<compile_context>
chip_gen: v6e
topology: v6e:2x2x1
jax: 0.10.0
libtpu: 0.0.40
codegen_flags: <defaults>
</compile_context>

<pallas_src>
import functools

import jax
import jax.numpy as jnp
from jax.experimental import pallas as pl
from jax.experimental.pallas import tpu as pltpu

EPS = 1e-5                      # nn.BatchNorm2d default
LANE = 128                      # lane width: pad Cout up to this (lane-dense stores)
DEFAULT_BLOCK_M = 512           # M-tile rows
VMEM_LIMIT = 32 * 1024 * 1024   # explicit scoped-VMEM limit (>= default on all chips)


def _round_up(x, m):
    return (x + m - 1) // m * m


# --------------------- Pallas kernel 1: matmul + BN stats --------------------
def _matmul_stats_kernel(lhs_ref, rhs_ref, y_ref, sum_ref, sq_ref,
                         acc_sum, acc_sq):
    # lhs: (TM, Kc) bf16 im2col tile ; rhs: (Kc, Cp) bf16 ; y: (TM, Cp) f32
    y = jnp.dot(lhs_ref[...], rhs_ref[...], preferred_element_type=jnp.float32)
    y_ref[...] = y

    @pl.when(pl.program_id(0) == 0)
    def _():
        acc_sum[...] = jnp.zeros_like(acc_sum)
        acc_sq[...] = jnp.zeros_like(acc_sq)

    acc_sum[...] += jnp.sum(y, axis=0, keepdims=True)
    acc_sq[...] += jnp.sum(y * y, axis=0, keepdims=True)

    @pl.when(pl.program_id(0) == pl.num_programs(0) - 1)
    def _():
        sum_ref[...] = acc_sum[...]
        sq_ref[...] = acc_sq[...]


# ------------------ Pallas kernel 2: folded BN affine + act ------------------
def _scale_shift_act_kernel(y_ref, scale_ref, shift_ref, o_ref, *, act):
    z = y_ref[...] * scale_ref[...] + shift_ref[...]
    if act == "relu":
        z = jnp.maximum(z, 0.0)
    elif act == "tanh":
        z = jnp.tanh(z)
    o_ref[...] = z.astype(o_ref.dtype)


# ------------------------------- JAX glue ------------------------------------
def _im2col(xp, K, stride):
    """xp: padded NHWC. Returns (M, K*K*C) patches (ky,kx,c order) and (Ho, Wo)."""
    N, Hp, Wp, C = xp.shape
    Ho = (Hp - K) // stride + 1
    Wo = (Wp - K) // stride + 1
    cols = []
    for ky in range(K):
        for kx in range(K):
            cols.append(xp[:, ky:ky + stride * (Ho - 1) + 1:stride,
                              kx:kx + stride * (Wo - 1) + 1:stride, :])
    p = jnp.stack(cols, axis=3)                       # (N, Ho, Wo, K*K, C)
    return p.reshape(N * Ho * Wo, K * K * C), (Ho, Wo)


def pallas_conv_block(x_nhwc, w_oihw, gamma, beta, *, stride, act, use_bn,
                      block_m=DEFAULT_BLOCK_M):
    """ReflectionPad(K//2) + Conv(bias=False) + [BN train] + activation, NHWC."""
    N, H, W, Cin = x_nhwc.shape
    Cout, cin_w, K, _ = w_oihw.shape
    assert cin_w == Cin
    pad = K // 2

    xp = jnp.pad(x_nhwc, ((0, 0), (pad, pad), (pad, pad), (0, 0)),
                 mode="reflect").astype(jnp.bfloat16)
    lhs, (Ho, Wo) = _im2col(xp, K, stride)            # (M, Kc) bf16
    M = N * Ho * Wo
    Kc = K * K * Cin

    Cp = _round_up(Cout, LANE)                        # lane-dense output
    TM = min(block_m, _round_up(M, 16))
    Mp = _round_up(M, TM)

    lhs = jnp.pad(lhs, ((0, Mp - M), (0, 0)))         # zero rows: no effect on sums
    rhs = jnp.transpose(w_oihw, (2, 3, 1, 0)).reshape(Kc, Cout)   # (ky,kx,cin,cout)
    rhs = jnp.pad(rhs.astype(jnp.bfloat16), ((0, 0), (0, Cp - Cout)))

    grid = (Mp // TM,)

    cost1 = pl.CostEstimate(
        flops=2 * Mp * Kc * Cp + 3 * Mp * Cp,
        transcendentals=0,
        bytes_accessed=Mp * Kc * 2 + Kc * Cp * 2 + Mp * Cp * 4 + 2 * Cp * 4)

    y, s, ss = pl.pallas_call(
        _matmul_stats_kernel,
        out_shape=(jax.ShapeDtypeStruct((Mp, Cp), jnp.float32),
                   jax.ShapeDtypeStruct((1, Cp), jnp.float32),
                   jax.ShapeDtypeStruct((1, Cp), jnp.float32)),
        grid_spec=pltpu.PrefetchScalarGridSpec(
            num_scalar_prefetch=0,
            grid=grid,
            in_specs=[pl.BlockSpec((TM, Kc), lambda i: (i, 0)),
                      pl.BlockSpec((Kc, Cp), lambda i: (0, 0))],
            out_specs=[pl.BlockSpec((TM, Cp), lambda i: (i, 0)),
                       pl.BlockSpec((1, Cp), lambda i: (0, 0)),
                       pl.BlockSpec((1, Cp), lambda i: (0, 0))],
            scratch_shapes=[pltpu.VMEM((1, Cp), jnp.float32),
                            pltpu.VMEM((1, Cp), jnp.float32)]),
        compiler_params=pltpu.CompilerParams(
            dimension_semantics=("arbitrary",),       # BN stats reduce over M tiles
            vmem_limit_bytes=VMEM_LIMIT),
        cost_estimate=cost1,
    )(lhs, rhs)

    # Fold BatchNorm (batch stats over all M rows, biased variance) into a
    # single per-channel scale/shift. Padded rows/channels are all-zero and do
    # not perturb the sums; divide by the true M.
    if use_bn:
        inv_m = 1.0 / float(M)
        mean = s * inv_m
        var = ss * inv_m - mean * mean
        g = jnp.pad(gamma.astype(jnp.float32), (0, Cp - Cout)).reshape(1, Cp)
        b = jnp.pad(beta.astype(jnp.float32), (0, Cp - Cout)).reshape(1, Cp)
        scale = g * jax.lax.rsqrt(var + EPS)
        shift = b - mean * scale
    else:
        scale = jnp.ones((1, Cp), jnp.float32)
        shift = jnp.zeros((1, Cp), jnp.float32)

    cost2 = pl.CostEstimate(
        flops=2 * Mp * Cp,
        transcendentals=Mp * Cp if act == "tanh" else 0,
        bytes_accessed=2 * Mp * Cp * 4 + 2 * Cp * 4)

    out = pl.pallas_call(
        functools.partial(_scale_shift_act_kernel, act=act),
        out_shape=jax.ShapeDtypeStruct((Mp, Cp), jnp.float32),
        grid_spec=pltpu.PrefetchScalarGridSpec(
            num_scalar_prefetch=0,
            grid=grid,
            in_specs=[pl.BlockSpec((TM, Cp), lambda i: (i, 0)),
                      pl.BlockSpec((1, Cp), lambda i: (0, 0)),
                      pl.BlockSpec((1, Cp), lambda i: (0, 0))],
            out_specs=pl.BlockSpec((TM, Cp), lambda i: (i, 0))),
        compiler_params=pltpu.CompilerParams(
            dimension_semantics=("parallel",),        # independent tiles (v7x: 2 TCs)
            vmem_limit_bytes=VMEM_LIMIT),
        cost_estimate=cost2,
    )(y, scale, shift)

    return out[:M, :Cout].reshape(N, Ho, Wo, Cout)


# ------------------------ reference conv block (lax) -------------------------
def reference_conv_block(x_nhwc, w_oihw, gamma, beta, *, stride, act, use_bn):
    pad = w_oihw.shape[-1] // 2
    xp = jnp.pad(x_nhwc, ((0, 0), (pad, pad), (pad, pad), (0, 0)),
                 mode="reflect").astype(jnp.bfloat16)
    w_hwio = jnp.transpose(w_oihw, (2, 3, 1, 0)).astype(jnp.bfloat16)
    y = jax.lax.conv_general_dilated(
        xp, w_hwio, (stride, stride), "VALID",
        dimension_numbers=("NHWC", "HWIO", "NHWC"),
        preferred_element_type=jnp.float32)
    if use_bn:
        mean = jnp.mean(y, axis=(0, 1, 2), keepdims=True)
        var = jnp.mean((y - mean) ** 2, axis=(0, 1, 2), keepdims=True)
        y = (y - mean) * jax.lax.rsqrt(var + EPS)
        y = y * gamma.reshape(1, 1, 1, -1) + beta.reshape(1, 1, 1, -1)
    if act == "relu":
        y = jnp.maximum(y, 0.0)
    elif act == "tanh":
        y = jnp.tanh(y)
    return y


# ----------------------- LocalEnhancer module graph --------------------------
def _bilinear_upsample_x2(x):
    """F.interpolate(scale_factor=2, mode='bilinear', align_corners=False), NHWC."""
    N, H, W, C = x.shape

    def idx(out_size, in_size):
        i = jnp.arange(out_size, dtype=jnp.float32)
        src = jnp.clip((i + 0.5) * 0.5 - 0.5, 0.0, in_size - 1.0)
        lo = jnp.floor(src).astype(jnp.int32)
        hi = jnp.minimum(lo + 1, in_size - 1)
        return lo, hi, src - lo.astype(jnp.float32)

    lo_h, hi_h, fh = idx(2 * H, H)
    lo_w, hi_w, fw = idx(2 * W, W)
    top = (x[:, lo_h, :, :] * (1.0 - fh)[None, :, None, None]
           + x[:, hi_h, :, :] * fh[None, :, None, None])
    out = (top[:, :, lo_w, :] * (1.0 - fw)[None, None, :, None]
           + top[:, :, hi_w, :] * fw[None, None, :, None])
    return out


def local_enhancer_forward(x, yx, y, a1, a2, params, *, conv_fn):
    """LocalEnhancer.forward (NCHW interface, like PyTorch). `yx` is unused,
    matching the original forward. Returns a tuple of one head output."""
    del yx
    to_nhwc = lambda t: jnp.transpose(t, (0, 2, 3, 1))
    x, y, a1, a2 = to_nhwc(x), to_nhwc(y), to_nhwc(a1), to_nhwc(a2)

    def cba(t, p, stride=1, act="relu", use_bn=True):
        return conv_fn(t, p["w"], p["gamma"], p["beta"],
                       stride=stride, act=act, use_bn=use_bn)

    def down(t, blk):                       # DownBlock
        t = cba(t, blk[0], stride=2)
        return cba(t, blk[1], stride=1)

    def resnet(t, blk):                     # ResnetBlock (expansion=1)
        h = cba(t, blk[0], act="relu")
        h = cba(h, blk[1], act="none")
        return jnp.maximum(t + h, 0.0)

    def flat(t, blocks):                    # FlatBlock (identity if no layers)
        for blk in blocks:
            t = resnet(t, blk)
        return t

    # extract_features
    x1 = x[..., 0:4]
    x2 = x[..., 4:8]
    x2_1 = x[..., 8:11]
    l = x[..., 11:]
    l1 = jnp.concatenate([x[..., 3:4], l], axis=-1)
    x1 = jnp.concatenate([x1, l], axis=-1)
    x2 = jnp.concatenate([x2, l], axis=-1)
    x2_1 = jnp.concatenate([x2_1, l1], axis=-1)

    x1 = cba(x1, params["in_conv1"])
    x2 = cba(x2, params["in_conv2"])
    x2_1 = cba(x2_1, params["in_conv2"])

    x1 = down(x1, params["down_block1"])
    x2 = down(x2, params["down_block2"])
    x2_1 = down(x2_1, params["down_block2"])

    x_a = jnp.concatenate([x2_1 * a1 + x2 * a2, x1], axis=-1)
    x_a = flat(x_a, params["flat_block2"])
    h = x_a + y
    h = flat(h, params["flat_block"])

    # UpBlock
    h = _bilinear_upsample_x2(h)
    h = cba(h, params["up_block"])

    # out_conv1: conv(K=7, no norm) + Tanh
    out = cba(h, params["out_conv1"], act="tanh", use_bn=False)
    return (jnp.transpose(out, (0, 3, 1, 2)),)


# --------------------------------- params ------------------------------------
def _init_conv(key, cin, cout, K):
    kw, kg, kb = jax.random.split(key, 3)
    std = (K * K * cin) ** -0.5
    return {"w": std * jax.random.normal(kw, (cout, cin, K, K), jnp.float32),
            "gamma": 1.0 + 0.1 * jax.random.normal(kg, (cout,), jnp.float32),
            "beta": 0.1 * jax.random.normal(kb, (cout,), jnp.float32)}


def init_params(key, ngf, sub_ngf, out_nc, flat_layers):
    keys = iter(jax.random.split(key, 64))
    nk = lambda: next(keys)
    p = {}
    p["in_conv1"] = _init_conv(nk(), 5, ngf // 2, 7)
    p["in_conv2"] = _init_conv(nk(), 5, ngf // 2, 7)
    p["down_block1"] = [_init_conv(nk(), ngf // 2, sub_ngf // 2, 3),
                        _init_conv(nk(), sub_ngf // 2, sub_ngf // 2, 3)]
    p["down_block2"] = [_init_conv(nk(), ngf // 2, sub_ngf // 2, 3),
                        _init_conv(nk(), sub_ngf // 2, sub_ngf // 2, 3)]
    p["flat_block2"] = [[_init_conv(nk(), sub_ngf, sub_ngf, 3),
                         _init_conv(nk(), sub_ngf, sub_ngf, 3)]
                        for _ in range(flat_layers)]
    p["flat_block"] = [[_init_conv(nk(), sub_ngf, sub_ngf, 3),
                        _init_conv(nk(), sub_ngf, sub_ngf, 3)]
                       for _ in range(flat_layers)]
    p["up_block"] = _init_conv(nk(), sub_ngf, ngf, 3)
    p["out_conv1"] = _init_conv(nk(), ngf, out_nc, 7)   # gamma/beta unused (no BN)
    return p


# ----------------------------------- main -------------------------------------
if __name__ == "__main__":
    N, H, W = 2, 32, 32
    ngf, sub_ngf, out_nc, flat_layers = 8, 16, 3, 1

    key = jax.random.PRNGKey(0)
    kp, kx, ky, ka1, ka2 = jax.random.split(key, 5)
    params = init_params(kp, ngf, sub_ngf, out_nc, flat_layers)

    x = jax.random.normal(kx, (N, 12, H, W), jnp.float32)                 # NCHW
    y = jax.random.normal(ky, (N, sub_ngf, H // 2, W // 2), jnp.float32)
    a1 = jax.random.uniform(ka1, (N, 1, H // 2, W // 2), jnp.float32)
    a2 = jax.random.uniform(ka2, (N, 1, H // 2, W // 2), jnp.float32)
    yx = jnp.zeros_like(y)                                                # unused

    fwd = jax.jit(functools.partial(local_enhancer_forward, conv_fn=pallas_conv_block))
    fref = jax.jit(functools.partial(local_enhancer_forward, conv_fn=reference_conv_block))

    out = jax.block_until_ready(fwd(x, yx, y, a1, a2, params))[0]
    ref = jax.block_until_ready(fref(x, yx, y, a1, a2, params))[0]

    assert out.shape == (N, out_nc, H, W), out.shape
    err = float(jnp.max(jnp.abs(out - ref)))
    assert err < 1e-2, err

    print("KERNEL_OK")
</pallas_src>

<mosaic_0001>
module attributes {stable_mosaic.version = 11 : i64} {
  func.func @_matmul_stats_kernel(%arg0: i32, %arg1: memref<512x245xbf16, #tpu.memory_space<vmem>>, %arg2: memref<245x128xbf16, #tpu.memory_space<vmem>>, %arg3: memref<512x128xf32, #tpu.memory_space<vmem>>, %arg4: memref<1x128xf32, #tpu.memory_space<vmem>>, %arg5: memref<1x128xf32, #tpu.memory_space<vmem>>, %arg6: memref<1x128xf32, #tpu.memory_space<vmem>>, %arg7: memref<1x128xf32, #tpu.memory_space<vmem>>) attributes {dimension_semantics = [#tpu.dimension_semantics<arbitrary>], iteration_bounds = array<i64: 4>, scalar_prefetch = 0 : i64, scratch_operands = 2 : i64, tpu.core_type = #tpu.core_type<tc>, window_params = [{transform_indices = @transform_0, window_bounds = array<i64: 512, 245>}, {pipeline_mode = #tpu.pipeline_mode<synchronous>, transform_indices = @transform_1, window_bounds = array<i64: 245, 128>}, {transform_indices = @transform_2, window_bounds = array<i64: 512, 128>}, {pipeline_mode = #tpu.pipeline_mode<synchronous>, transform_indices = @transform_3, window_bounds = array<i64: 1, 128>}, {pipeline_mode = #tpu.pipeline_mode<synchronous>, transform_indices = @transform_4, window_bounds = array<i64: 1, 128>}]} {
    %c0 = arith.constant 0 : index
    %c0_0 = arith.constant 0 : index
    %0 = vector.load %arg1[%c0, %c0_0] : memref<512x245xbf16, #tpu.memory_space<vmem>>, vector<512x245xbf16>
    %c0_1 = arith.constant 0 : index
    %c0_2 = arith.constant 0 : index
    %1 = vector.load %arg2[%c0_1, %c0_2] : memref<245x128xbf16, #tpu.memory_space<vmem>>, vector<245x128xbf16>
    %cst = arith.constant dense<0.000000e+00> : vector<512x128xf32>
    %2 = tpu.matmul %0, %1, %cst {dimension_numbers = #tpu.dot_dimension_numbers<[1], [0], [0], [1], [0, 0, 1, 1], [], []>} : vector<512x245xbf16>, vector<245x128xbf16>, vector<512x128xf32> -> vector<512x128xf32>
    %c0_3 = arith.constant 0 : index
    %c0_4 = arith.constant 0 : index
    %3 = vector.load %arg3[%c0_3, %c0_4] : memref<512x128xf32, #tpu.memory_space<vmem>>, vector<512x128xf32>
    tpu.vector_store %arg3[%c0_3, %c0_4], %2 {strides = array<i32>} : memref<512x128xf32, #tpu.memory_space<vmem>>, vector<512x128xf32>,
    %c0_i32 = arith.constant 0 : i32
    %4 = arith.cmpi eq, %arg0, %c0_i32 : i32
    %5 = arith.extui %4 : i1 to i32
    %c0_i32_5 = arith.constant 0 : i32
    %6 = arith.cmpi ne, %5, %c0_i32_5 : i32
    scf.if %6 {
      %cst_17 = arith.constant 0.000000e+00 : f32
      %21 = vector.broadcast %cst_17 : f32 to vector<1x128xf32>
      %c0_18 = arith.constant 0 : index
      %c0_19 = arith.constant 0 : index
      %22 = vector.load %arg6[%c0_18, %c0_19] : memref<1x128xf32, #tpu.memory_space<vmem>>, vector<1x128xf32>
      tpu.vector_store %arg6[%c0_18, %c0_19], %21 {strides = array<i32>} : memref<1x128xf32, #tpu.memory_space<vmem>>, vector<1x128xf32>,
      %cst_20 = arith.constant 0.000000e+00 : f32
      %23 = vector.broadcast %cst_20 : f32 to vector<1x128xf32>
      %c0_21 = arith.constant 0 : index
      %c0_22 = arith.constant 0 : index
      %24 = vector.load %arg7[%c0_21, %c0_22] : memref<1x128xf32, #tpu.memory_space<vmem>>, vector<1x128xf32>
      tpu.vector_store %arg7[%c0_21, %c0_22], %23 {strides = array<i32>} : memref<1x128xf32, #tpu.memory_space<vmem>>, vector<1x128xf32>,
    } else {
    }
    %c0_6 = arith.constant 0 : index
    %c0_7 = arith.constant 0 : index
    %7 = vector.load %arg6[%c0_6, %c0_7] : memref<1x128xf32, #tpu.memory_space<vmem>>, vector<1x128xf32>
    %cst_8 = arith.constant dense<0.000000e+00> : vector<128xf32>
    %8 = vector.multi_reduction <add>, %2, %cst_8 [0] : vector<512x128xf32> to vector<128xf32>
    %9 = vector.shape_cast %8 : vector<128xf32> to vector<1x128xf32>
    %10 = arith.addf %7, %9 : vector<1x128xf32>
    %c0_9 = arith.constant 0 : index
    %c0_10 = arith.constant 0 : index
    %11 = vector.load %arg6[%c0_9, %c0_10] : memref<1x128xf32, #tpu.memory_space<vmem>>, vector<1x128xf32>
    tpu.vector_store %arg6[%c0_9, %c0_10], %10 {strides = array<i32>} : memref<1x128xf32, #tpu.memory_space<vmem>>, vector<1x128xf32>,
    %c0_11 = arith.constant 0 : index
    %c0_12 = arith.constant 0 : index
    %12 = vector.load %arg7[%c0_11, %c0_12] : memref<1x128xf32, #tpu.memory_space<vmem>>, vector<1x128xf32>
    %13 = arith.mulf %2, %2 : vector<512x128xf32>
    %cst_13 = arith.constant dense<0.000000e+00> : vector<128xf32>
    %14 = vector.multi_reduction <add>, %13, %cst_13 [0] : vector<512x128xf32> to vector<128xf32>
    %15 = vector.shape_cast %14 : vector<128xf32> to vector<1x128xf32>
    %16 = arith.addf %12, %15 : vector<1x128xf32>
    %c0_14 = arith.constant 0 : index
    %c0_15 = arith.constant 0 : index
    %17 = vector.load %arg7[%c0_14, %c0_15] : memref<1x128xf32, #tpu.memory_space<vmem>>, vector<1x128xf32>
    tpu.vector_store %arg7[%c0_14, %c0_15], %16 {strides = array<i32>} : memref<1x128xf32, #tpu.memory_space<vmem>>, vector<1x128xf32>,
    %c3_i32 = arith.constant 3 : i32
    %18 = arith.cmpi eq, %arg0, %c3_i32 : i32
    %19 = arith.extui %18 : i1 to i32
    %c0_i32_16 = arith.constant 0 : i32
    %20 = arith.cmpi ne, %19, %c0_i32_16 : i32
    scf.if %20 {
      %c0_17 = arith.constant 0 : index
      %c0_18 = arith.constant 0 : index
      %21 = vector.load %arg6[%c0_17, %c0_18] : memref<1x128xf32, #tpu.memory_space<vmem>>, vector<1x128xf32>
      %c0_19 = arith.constant 0 : index
      %c0_20 = arith.constant 0 : index
      %22 = vector.load %arg4[%c0_19, %c0_20] : memref<1x128xf32, #tpu.memory_space<vmem>>, vector<1x128xf32>
      tpu.vector_store %arg4[%c0_19, %c0_20], %21 {strides = array<i32>} : memref<1x128xf32, #tpu.memory_space<vmem>>, vector<1x128xf32>,
      %c0_21 = arith.constant 0 : index
      %c0_22 = arith.constant 0 : index
      %23 = vector.load %arg7[%c0_21, %c0_22] : memref<1x128xf32, #tpu.memory_space<vmem>>, vector<1x128xf32>
      %c0_23 = arith.constant 0 : index
      %c0_24 = arith.constant 0 : index
      %24 = vector.load %arg5[%c0_23, %c0_24] : memref<1x128xf32, #tpu.memory_space<vmem>>, vector<1x128xf32>
      tpu.vector_store %arg5[%c0_23, %c0_24], %23 {strides = array<i32>} : memref<1x128xf32, #tpu.memory_space<vmem>>, vector<1x128xf32>,
    } else {
    }
    return
  }
  func.func @transform_0(%arg0: i32) -> (i32, i32) {
    %c0_i32 = arith.constant 0 : i32
    %c0_i32_0 = arith.constant 0 : i32
    return %arg0, %c0_i32 : i32, i32
  }
  func.func @transform_1(%arg0: i32) -> (i32, i32) {
    %c0_i32 = arith.constant 0 : i32
    %c0_i32_0 = arith.constant 0 : i32
    %c0_i32_1 = arith.constant 0 : i32
    return %c0_i32, %c0_i32_0 : i32, i32
  }
  func.func @transform_2(%arg0: i32) -> (i32, i32) {
    %c0_i32 = arith.constant 0 : i32
    %c0_i32_0 = arith.constant 0 : i32
    return %arg0, %c0_i32 : i32, i32
  }
  func.func @transform_3(%arg0: i32) -> (i32, i32) {
    %c0_i32 = arith.constant 0 : i32
    %c0_i32_0 = arith.constant 0 : i32
    %c0_i32_1 = arith.constant 0 : i32
    return %c0_i32, %c0_i32_0 : i32, i32
  }
  func.func @transform_4(%arg0: i32) -> (i32, i32) {
    %c0_i32 = arith.constant 0 : i32
    %c0_i32_0 = arith.constant 0 : i32
    %c0_i32_1 = arith.constant 0 : i32
    return %c0_i32, %c0_i32_0 : i32, i32
  }
}

module attributes {stable_mosaic.version = 11 : i64} {
  func.func @_scale_shift_act_kernel(%arg0: i32, %arg1: memref<512x128xf32, #tpu.memory_space<vmem>>, %arg2: memref<1x128xf32, #tpu.memory_space<vmem>>, %arg3: memref<1x128xf32, #tpu.memory_space<vmem>>, %arg4: memref<512x128xf32, #tpu.memory_space<vmem>>) attributes {dimension_semantics = [#tpu.dimension_semantics<parallel>], iteration_bounds = array<i64: 4>, scalar_prefetch = 0 : i64, scratch_operands = 0 : i64, tpu.core_type = #tpu.core_type<tc>, window_params = [{transform_indices = @transform_0, window_bounds = array<i64: 512, 128>}, {pipeline_mode = #tpu.pipeline_mode<synchronous>, transform_indices = @transform_1, window_bounds = array<i64: 1, 128>}, {pipeline_mode = #tpu.pipeline_mode<synchronous>, transform_indices = @transform_2, window_bounds = array<i64: 1, 128>}, {transform_indices = @transform_3, window_bounds = array<i64: 512, 128>}]} {
    %c0 = arith.constant 0 : index
    %c0_0 = arith.constant 0 : index
    %0 = vector.load %arg1[%c0, %c0_0] : memref<512x128xf32, #tpu.memory_space<vmem>>, vector<512x128xf32>
    %c0_1 = arith.constant 0 : index
    %c0_2 = arith.constant 0 : index
    %1 = vector.load %arg2[%c0_1, %c0_2] : memref<1x128xf32, #tpu.memory_space<vmem>>, vector<1x128xf32>
    %2 = vector.broadcast %1 : vector<1x128xf32> to vector<512x128xf32>
    %3 = arith.mulf %0, %2 : vector<512x128xf32>
    %c0_3 = arith.constant 0 : index
    %c0_4 = arith.constant 0 : index
    %4 = vector.load %arg3[%c0_3, %c0_4] : memref<1x128xf32, #tpu.memory_space<vmem>>, vector<1x128xf32>
    %5 = vector.broadcast %4 : vector<1x128xf32> to vector<512x128xf32>
    %6 = arith.addf %3, %5 : vector<512x128xf32>
    %cst = arith.constant 0.000000e+00 : f32
    %7 = vector.broadcast %cst : f32 to vector<512x128xf32>
    %8 = arith.maximumf %6, %7 : vector<512x128xf32>
    %c0_5 = arith.constant 0 : index
    %c0_6 = arith.constant 0 : index
    %9 = vector.load %arg4[%c0_5, %c0_6] : memref<512x128xf32, #tpu.memory_space<vmem>>, vector<512x128xf32>
    tpu.vector_store %arg4[%c0_5, %c0_6], %8 {strides = array<i32>} : memref<512x128xf32, #tpu.memory_space<vmem>>, vector<512x128xf32>,
    return
  }
  func.func @transform_0(%arg0: i32) -> (i32, i32) {
    %c0_i32 = arith.constant 0 : i32
    %c0_i32_0 = arith.constant 0 : i32
    return %arg0, %c0_i32 : i32, i32
  }
  func.func @transform_1(%arg0: i32) -> (i32, i32) {
    %c0_i32 = arith.constant 0 : i32
    %c0_i32_0 = arith.constant 0 : i32
    %c0_i32_1 = arith.constant 0 : i32
    return %c0_i32, %c0_i32_0 : i32, i32
  }
  func.func @transform_2(%arg0: i32) -> (i32, i32) {
    %c0_i32 = arith.constant 0 : i32
    %c0_i32_0 = arith.constant 0 : i32
    %c0_i32_1 = arith.constant 0 : i32
    return %c0_i32, %c0_i32_0 : i32, i32
  }
  func.func @transform_3(%arg0: i32) -> (i32, i32) {
    %c0_i32 = arith.constant 0 : i32
    %c0_i32_0 = arith.constant 0 : i32
    return %arg0, %c0_i32 : i32, i32
  }
}

module attributes {stable_mosaic.version = 11 : i64} {
  func.func @_scale_shift_act_kernel(%arg0: i32, %arg1: memref<512x128xf32, #tpu.memory_space<vmem>>, %arg2: memref<1x128xf32, #tpu.memory_space<vmem>>, %arg3: memref<1x128xf32, #tpu.memory_space<vmem>>, %arg4: memref<512x128xf32, #tpu.memory_space<vmem>>) attributes {dimension_semantics = [#tpu.dimension_semantics<parallel>], iteration_bounds = array<i64: 1>, scalar_prefetch = 0 : i64, scratch_operands = 0 : i64, tpu.core_type = #tpu.core_type<tc>, window_params = [{transform_indices = @transform_0, window_bounds = array<i64: 512, 128>}, {pipeline_mode = #tpu.pipeline_mode<synchronous>, transform_indices = @transform_1, window_bounds = array<i64: 1, 128>}, {pipeline_mode = #tpu.pipeline_mode<synchronous>, transform_indices = @transform_2, window_bounds = array<i64: 1, 128>}, {transform_indices = @transform_3, window_bounds = array<i64: 512, 128>}]} {
    %c0 = arith.constant 0 : index
    %c0_0 = arith.constant 0 : index
    %0 = vector.load %arg1[%c0, %c0_0] : memref<512x128xf32, #tpu.memory_space<vmem>>, vector<512x128xf32>
    %c0_1 = arith.constant 0 : index
    %c0_2 = arith.constant 0 : index
    %1 = vector.load %arg2[%c0_1, %c0_2] : memref<1x128xf32, #tpu.memory_space<vmem>>, vector<1x128xf32>
    %2 = vector.broadcast %1 : vector<1x128xf32> to vector<512x128xf32>
    %3 = arith.mulf %0, %2 : vector<512x128xf32>
    %c0_3 = arith.constant 0 : index
    %c0_4 = arith.constant 0 : index
    %4 = vector.load %arg3[%c0_3, %c0_4] : memref<1x128xf32, #tpu.memory_space<vmem>>, vector<1x128xf32>
    %5 = vector.broadcast %4 : vector<1x128xf32> to vector<512x128xf32>
    %6 = arith.addf %3, %5 : vector<512x128xf32>
    %cst = arith.constant 0.000000e+00 : f32
    %7 = vector.broadcast %cst : f32 to vector<512x128xf32>
    %8 = arith.maximumf %6, %7 : vector<512x128xf32>
    %c0_5 = arith.constant 0 : index
    %c0_6 = arith.constant 0 : index
    %9 = vector.load %arg4[%c0_5, %c0_6] : memref<512x128xf32, #tpu.memory_space<vmem>>, vector<512x128xf32>
    tpu.vector_store %arg4[%c0_5, %c0_6], %8 {strides = array<i32>} : memref<512x128xf32, #tpu.memory_space<vmem>>, vector<512x128xf32>,
    return
  }
  func.func @transform_0(%arg0: i32) -> (i32, i32) {
    %c0_i32 = arith.constant 0 : i32
    %c0_i32_0 = arith.constant 0 : i32
    return %arg0, %c0_i32 : i32, i32
  }
  func.func @transform_1(%arg0: i32) -> (i32, i32) {
    %c0_i32 = arith.constant 0 : i32
    %c0_i32_0 = arith.constant 0 : i32
    %c0_i32_1 = arith.constant 0 : i32
    return %c0_i32, %c0_i32_0 : i32, i32
  }
  func.func @transform_2(%arg0: i32) -> (i32, i32) {
    %c0_i32 = arith.constant 0 : i32
    %c0_i32_0 = arith.constant 0 : i32
    %c0_i32_1 = arith.constant 0 : i32
    return %c0_i32, %c0_i32_0 : i32, i32
  }
  func.func @transform_3(%arg0: i32) -> (i32, i32) {
    %c0_i32 = arith.constant 0 : i32
    %c0_i32_0 = arith.constant 0 : i32
    return %arg0, %c0_i32 : i32, i32
  }
}

module attributes {stable_mosaic.version = 11 : i64} {
  func.func @_matmul_stats_kernel(%arg0: i32, %arg1: memref<512x36xbf16, #tpu.memory_space<vmem>>, %arg2: memref<36x128xbf16, #tpu.memory_space<vmem>>, %arg3: memref<512x128xf32, #tpu.memory_space<vmem>>, %arg4: memref<1x128xf32, #tpu.memory_space<vmem>>, %arg5: memref<1x128xf32, #tpu.memory_space<vmem>>, %arg6: memref<1x128xf32, #tpu.memory_space<vmem>>, %arg7: memref<1x128xf32, #tpu.memory_space<vmem>>) attributes {dimension_semantics = [#tpu.dimension_semantics<arbitrary>], iteration_bounds = array<i64: 1>, scalar_prefetch = 0 : i64, scratch_operands = 2 : i64, tpu.core_type = #tpu.core_type<tc>, window_params = [{transform_indices = @transform_0, window_bounds = array<i64: 512, 36>}, {pipeline_mode = #tpu.pipeline_mode<synchronous>, transform_indices = @transform_1, window_bounds = array<i64: 36, 128>}, {transform_indices = @transform_2, window_bounds = array<i64: 512, 128>}, {pipeline_mode = #tpu.pipeline_mode<synchronous>, transform_indices = @transform_3, window_bounds = array<i64: 1, 128>}, {pipeline_mode = #tpu.pipeline_mode<synchronous>, transform_indices = @transform_4, window_bounds = array<i64: 1, 128>}]} {
    %c0 = arith.constant 0 : index
    %c0_0 = arith.constant 0 : index
    %0 = vector.load %arg1[%c0, %c0_0] : memref<512x36xbf16, #tpu.memory_space<vmem>>, vector<512x36xbf16>
    %c0_1 = arith.constant 0 : index
    %c0_2 = arith.constant 0 : index
    %1 = vector.load %arg2[%c0_1, %c0_2] : memref<36x128xbf16, #tpu.memory_space<vmem>>, vector<36x128xbf16>
    %cst = arith.constant dense<0.000000e+00> : vector<512x128xf32>
    %2 = tpu.matmul %0, %1, %cst {dimension_numbers = #tpu.dot_dimension_numbers<[1], [0], [0], [1], [0, 0, 1, 1], [], []>} : vector<512x36xbf16>, vector<36x128xbf16>, vector<512x128xf32> -> vector<512x128xf32>
    %c0_3 = arith.constant 0 : index
    %c0_4 = arith.constant 0 : index
    %3 = vector.load %arg3[%c0_3, %c0_4] : memref<512x128xf32, #tpu.memory_space<vmem>>, vector<512x128xf32>
    tpu.vector_store %arg3[%c0_3, %c0_4], %2 {strides = array<i32>} : memref<512x128xf32, #tpu.memory_space<vmem>>, vector<512x128xf32>,
    %c0_i32 = arith.constant 0 : i32
    %4 = arith.cmpi eq, %arg0, %c0_i32 : i32
    %5 = arith.extui %4 : i1 to i32
    %c0_i32_5 = arith.constant 0 : i32
    %6 = arith.cmpi ne, %5, %c0_i32_5 : i32
    scf.if %6 {
      %cst_18 = arith.constant 0.000000e+00 : f32
      %21 = vector.broadcast %cst_18 : f32 to vector<1x128xf32>
      %c0_19 = arith.constant 0 : index
      %c0_20 = arith.constant 0 : index
      %22 = vector.load %arg6[%c0_19, %c0_20] : memref<1x128xf32, #tpu.memory_space<vmem>>, vector<1x128xf32>
      tpu.vector_store %arg6[%c0_19, %c0_20], %21 {strides = array<i32>} : memref<1x128xf32, #tpu.memory_space<vmem>>, vector<1x128xf32>,
      %cst_21 = arith.constant 0.000000e+00 : f32
      %23 = vector.broadcast %cst_21 : f32 to vector<1x128xf32>
      %c0_22 = arith.constant 0 : index
      %c0_23 = arith.constant 0 : index
      %24 = vector.load %arg7[%c0_22, %c0_23] : memref<1x128xf32, #tpu.memory_space<vmem>>, vector<1x128xf32>
      tpu.vector_store %arg7[%c0_22, %c0_23], %23 {strides = array<i32>} : memref<1x128xf32, #tpu.memory_space<vmem>>, vector<1x128xf32>,
    } else {
    }
    %c0_6 = arith.constant 0 : index
    %c0_7 = arith.constant 0 : index
    %7 = vector.load %arg6[%c0_6, %c0_7] : memref<1x128xf32, #tpu.memory_space<vmem>>, vector<1x128xf32>
    %cst_8 = arith.constant dense<0.000000e+00> : vector<128xf32>
    %8 = vector.multi_reduction <add>, %2, %cst_8 [0] : vector<512x128xf32> to vector<128xf32>
    %9 = vector.shape_cast %8 : vector<128xf32> to vector<1x128xf32>
    %10 = arith.addf %7, %9 : vector<1x128xf32>
    %c0_9 = arith.constant 0 : index
    %c0_10 = arith.constant 0 : index
    %11 = vector.load %arg6[%c0_9, %c0_10] : memref<1x128xf32, #tpu.memory_space<vmem>>, vector<1x128xf32>
    tpu.vector_store %arg6[%c0_9, %c0_10], %10 {strides = array<i32>} : memref<1x128xf32, #tpu.memory_space<vmem>>, vector<1x128xf32>,
    %c0_11 = arith.constant 0 : index
    %c0_12 = arith.constant 0 : index
    %12 = vector.load %arg7[%c0_11, %c0_12] : memref<1x128xf32, #tpu.memory_space<vmem>>, vector<1x128xf32>
    %13 = arith.mulf %2, %2 : vector<512x128xf32>
    %cst_13 = arith.constant dense<0.000000e+00> : vector<128xf32>
    %14 = vector.multi_reduction <add>, %13, %cst_13 [0] : vector<512x128xf32> to vector<128xf32>
    %15 = vector.shape_cast %14 : vector<128xf32> to vector<1x128xf32>
    %16 = arith.addf %12, %15 : vector<1x128xf32>
    %c0_14 = arith.constant 0 : index
    %c0_15 = arith.constant 0 : index
    %17 = vector.load %arg7[%c0_14, %c0_15] : memref<1x128xf32, #tpu.memory_space<vmem>>, vector<1x128xf32>
    tpu.vector_store %arg7[%c0_14, %c0_15], %16 {strides = array<i32>} : memref<1x128xf32, #tpu.memory_space<vmem>>, vector<1x128xf32>,
    %c0_i32_16 = arith.constant 0 : i32
    %18 = arith.cmpi eq, %arg0, %c0_i32_16 : i32
    %19 = arith.extui %18 : i1 to i32
    %c0_i32_17 = arith.constant 0 : i32
    %20 = arith.cmpi ne, %19, %c0_i32_17 : i32
    scf.if %20 {
      %c0_18 = arith.constant 0 : index
      %c0_19 = arith.constant 0 : index
      %21 = vector.load %arg6[%c0_18, %c0_19] : memref<1x128xf32, #tpu.memory_space<vmem>>, vector<1x128xf32>
      %c0_20 = arith.constant 0 : index
      %c0_21 = arith.constant 0 : index
      %22 = vector.load %arg4[%c0_20, %c0_21] : memref<1x128xf32, #tpu.memory_space<vmem>>, vector<1x128xf32>
      tpu.vector_store %arg4[%c0_20, %c0_21], %21 {strides = array<i32>} : memref<1x128xf32, #tpu.memory_space<vmem>>, vector<1x128xf32>,
      %c0_22 = arith.constant 0 : index
      %c0_23 = arith.constant 0 : index
      %23 = vector.load %arg7[%c0_22, %c0_23] : memref<1x128xf32, #tpu.memory_space<vmem>>, vector<1x128xf32>
      %c0_24 = arith.constant 0 : index
      %c0_25 = arith.constant 0 : index
      %24 = vector.load %arg5[%c0_24, %c0_25] : memref<1x128xf32, #tpu.memory_space<vmem>>, vector<1x128xf32>
      tpu.vector_store %arg5[%c0_24, %c0_25], %23 {strides = array<i32>} : memref<1x128xf32, #tpu.memory_space<vmem>>, vector<1x128xf32>,
    } else {
    }
    return
  }
  func.func @transform_0(%arg0: i32) -> (i32, i32) {
    %c0_i32 = arith.constant 0 : i32
    %c0_i32_0 = arith.constant 0 : i32
    return %arg0, %c0_i32 : i32, i32
  }
  func.func @transform_1(%arg0: i32) -> (i32, i32) {
    %c0_i32 = arith.constant 0 : i32
    %c0_i32_0 = arith.constant 0 : i32
    %c0_i32_1 = arith.constant 0 : i32
    return %c0_i32, %c0_i32_0 : i32, i32
  }
  func.func @transform_2(%arg0: i32) -> (i32, i32) {
    %c0_i32 = arith.constant 0 : i32
    %c0_i32_0 = arith.constant 0 : i32
    return %arg0, %c0_i32 : i32, i32
  }
  func.func @transform_3(%arg0: i32) -> (i32, i32) {
    %c0_i32 = arith.constant 0 : i32
    %c0_i32_0 = arith.constant 0 : i32
    %c0_i32_1 = arith.constant 0 : i32
    return %c0_i32, %c0_i32_0 : i32, i32
  }
  func.func @transform_4(%arg0: i32) -> (i32, i32) {
    %c0_i32 = arith.constant 0 : i32
    %c0_i32_0 = arith.constant 0 : i32
    %c0_i32_1 = arith.constant 0 : i32
    return %c0_i32, %c0_i32_0 : i32, i32
  }
}

module attributes {stable_mosaic.version = 11 : i64} {
  func.func @_matmul_stats_kernel(%arg0: i32, %arg1: memref<512x72xbf16, #tpu.memory_space<vmem>>, %arg2: memref<72x128xbf16, #tpu.memory_space<vmem>>, %arg3: memref<512x128xf32, #tpu.memory_space<vmem>>, %arg4: memref<1x128xf32, #tpu.memory_space<vmem>>, %arg5: memref<1x128xf32, #tpu.memory_space<vmem>>, %arg6: memref<1x128xf32, #tpu.memory_space<vmem>>, %arg7: memref<1x128xf32, #tpu.memory_space<vmem>>) attributes {dimension_semantics = [#tpu.dimension_semantics<arbitrary>], iteration_bounds = array<i64: 1>, scalar_prefetch = 0 : i64, scratch_operands = 2 : i64, tpu.core_type = #tpu.core_type<tc>, window_params = [{transform_indices = @transform_0, window_bounds = array<i64: 512, 72>}, {pipeline_mode = #tpu.pipeline_mode<synchronous>, transform_indices = @transform_1, window_bounds = array<i64: 72, 128>}, {transform_indices = @transform_2, window_bounds = array<i64: 512, 128>}, {pipeline_mode = #tpu.pipeline_mode<synchronous>, transform_indices = @transform_3, window_bounds = array<i64: 1, 128>}, {pipeline_mode = #tpu.pipeline_mode<synchronous>, transform_indices = @transform_4, window_bounds = array<i64: 1, 128>}]} {
    %c0 = arith.constant 0 : index
    %c0_0 = arith.constant 0 : index
    %0 = vector.load %arg1[%c0, %c0_0] : memref<512x72xbf16, #tpu.memory_space<vmem>>, vector<512x72xbf16>
    %c0_1 = arith.constant 0 : index
    %c0_2 = arith.constant 0 : index
    %1 = vector.load %arg2[%c0_1, %c0_2] : memref<72x128xbf16, #tpu.memory_space<vmem>>, vector<72x128xbf16>
    %cst = arith.constant dense<0.000000e+00> : vector<512x128xf32>
    %2 = tpu.matmul %0, %1, %cst {dimension_numbers = #tpu.dot_dimension_numbers<[1], [0], [0], [1], [0, 0, 1, 1], [], []>} : vector<512x72xbf16>, vector<72x128xbf16>, vector<512x128xf32> -> vector<512x128xf32>
    %c0_3 = arith.constant 0 : index
    %c0_4 = arith.constant 0 : index
    %3 = vector.load %arg3[%c0_3, %c0_4] : memref<512x128xf32, #tpu.memory_space<vmem>>, vector<512x128xf32>
    tpu.vector_store %arg3[%c0_3, %c0_4], %2 {strides = array<i32>} : memref<512x128xf32, #tpu.memory_space<vmem>>, vector<512x128xf32>,
    %c0_i32 = arith.constant 0 : i32
    %4 = arith.cmpi eq, %arg0, %c0_i32 : i32
    %5 = arith.extui %4 : i1 to i32
    %c0_i32_5 = arith.constant 0 : i32
    %6 = arith.cmpi ne, %5, %c0_i32_5 : i32
    scf.if %6 {
      %cst_18 = arith.constant 0.000000e+00 : f32
      %21 = vector.broadcast %cst_18 : f32 to vector<1x128xf32>
      %c0_19 = arith.constant 0 : index
      %c0_20 = arith.constant 0 : index
      %22 = vector.load %arg6[%c0_19, %c0_20] : memref<1x128xf32, #tpu.memory_space<vmem>>, vector<1x128xf32>
      tpu.vector_store %arg6[%c0_19, %c0_20], %21 {strides = array<i32>} : memref<1x128xf32, #tpu.memory_space<vmem>>, vector<1x128xf32>,
      %cst_21 = arith.constant 0.000000e+00 : f32
      %23 = vector.broadcast %cst_21 : f32 to vector<1x128xf32>
      %c0_22 = arith.constant 0 : index
      %c0_23 = arith.constant 0 : index
      %24 = vector.load %arg7[%c0_22, %c0_23] : memref<1x128xf32, #tpu.memory_space<vmem>>, vector<1x128xf32>
      tpu.vector_store %arg7[%c0_22, %c0_23], %23 {strides = array<i32>} : memref<1x128xf32, #tpu.memory_space<vmem>>, vector<1x128xf32>,
    } else {
    }
    %c0_6 = arith.constant 0 : index
    %c0_7 = arith.constant 0 : index
    %7 = vector.load %arg6[%c0_6, %c0_7] : memref<1x128xf32, #tpu.memory_space<vmem>>, vector<1x128xf32>
    %cst_8 = arith.constant dense<0.000000e+00> : vector<128xf32>
    %8 = vector.multi_reduction <add>, %2, %cst_8 [0] : vector<512x128xf32> to vector<128xf32>
    %9 = vector.shape_cast %8 : vector<128xf32> to vector<1x128xf32>
    %10 = arith.addf %7, %9 : vector<1x128xf32>
    %c0_9 = arith.constant 0 : index
    %c0_10 = arith.constant 0 : index
    %11 = vector.load %arg6[%c0_9, %c0_10] : memref<1x128xf32, #tpu.memory_space<vmem>>, vector<1x128xf32>
    tpu.vector_store %arg6[%c0_9, %c0_10], %10 {strides = array<i32>} : memref<1x128xf32, #tpu.memory_space<vmem>>, vector<1x128xf32>,
    %c0_11 = arith.constant 0 : index
    %c0_12 = arith.constant 0 : index
    %12 = vector.load %arg7[%c0_11, %c0_12] : memref<1x128xf32, #tpu.memory_space<vmem>>, vector<1x128xf32>
    %13 = arith.mulf %2, %2 : vector<512x128xf32>
    %cst_13 = arith.constant dense<0.000000e+00> : vector<128xf32>
    %14 = vector.multi_reduction <add>, %13, %cst_13 [0] : vector<512x128xf32> to vector<128xf32>
    %15 = vector.shape_cast %14 : vector<128xf32> to vector<1x128xf32>
    %16 = arith.addf %12, %15 : vector<1x128xf32>
    %c0_14 = arith.constant 0 : index
    %c0_15 = arith.constant 0 : index
    %17 = vector.load %arg7[%c0_14, %c0_15] : memref<1x128xf32, #tpu.memory_space<vmem>>, vector<1x128xf32>
    tpu.vector_store %arg7[%c0_14, %c0_15], %16 {strides = array<i32>} : memref<1x128xf32, #tpu.memory_space<vmem>>, vector<1x128xf32>,
    %c0_i32_16 = arith.constant 0 : i32
    %18 = arith.cmpi eq, %arg0, %c0_i32_16 : i32
    %19 = arith.extui %18 : i1 to i32
    %c0_i32_17 = arith.constant 0 : i32
    %20 = arith.cmpi ne, %19, %c0_i32_17 : i32
    scf.if %20 {
      %c0_18 = arith.constant 0 : index
      %c0_19 = arith.constant 0 : index
      %21 = vector.load %arg6[%c0_18, %c0_19] : memref<1x128xf32, #tpu.memory_space<vmem>>, vector<1x128xf32>
      %c0_20 = arith.constant 0 : index
      %c0_21 = arith.constant 0 : index
      %22 = vector.load %arg4[%c0_20, %c0_21] : memref<1x128xf32, #tpu.memory_space<vmem>>, vector<1x128xf32>
      tpu.vector_store %arg4[%c0_20, %c0_21], %21 {strides = array<i32>} : memref<1x128xf32, #tpu.memory_space<vmem>>, vector<1x128xf32>,
      %c0_22 = arith.constant 0 : index
      %c0_23 = arith.constant 0 : index
      %23 = vector.load %arg7[%c0_22, %c0_23] : memref<1x128xf32, #tpu.memory_space<vmem>>, vector<1x128xf32>
      %c0_24 = arith.constant 0 : index
      %c0_25 = arith.constant 0 : index
      %24 = vector.load %arg5[%c0_24, %c0_25] : memref<1x128xf32, #tpu.memory_space<vmem>>, vector<1x128xf32>
      tpu.vector_store %arg5[%c0_24, %c0_25], %23 {strides = array<i32>} : memref<1x128xf32, #tpu.memory_space<vmem>>, vector<1x128xf32>,
    } else {
    }
    return
  }
  func.func @transform_0(%arg0: i32) -> (i32, i32) {
    %c0_i32 = arith.constant 0 : i32
    %c0_i32_0 = arith.constant 0 : i32
    return %arg0, %c0_i32 : i32, i32
  }
  func.func @transform_1(%arg0: i32) -> (i32, i32) {
    %c0_i32 = arith.constant 0 : i32
    %c0_i32_0 = arith.constant 0 : i32
    %c0_i32_1 = arith.constant 0 : i32
    return %c0_i32, %c0_i32_0 : i32, i32
  }
  func.func @transform_2(%arg0: i32) -> (i32, i32) {
    %c0_i32 = arith.constant 0 : i32
    %c0_i32_0 = arith.constant 0 : i32
    return %arg0, %c0_i32 : i32, i32
  }
  func.func @transform_3(%arg0: i32) -> (i32, i32) {
    %c0_i32 = arith.constant 0 : i32
    %c0_i32_0 = arith.constant 0 : i32
    %c0_i32_1 = arith.constant 0 : i32
    return %c0_i32, %c0_i32_0 : i32, i32
  }
  func.func @transform_4(%arg0: i32) -> (i32, i32) {
    %c0_i32 = arith.constant 0 : i32
    %c0_i32_0 = arith.constant 0 : i32
    %c0_i32_1 = arith.constant 0 : i32
    return %c0_i32, %c0_i32_0 : i32, i32
  }
}

module attributes {stable_mosaic.version = 11 : i64} {
  func.func @_matmul_stats_kernel(%arg0: i32, %arg1: memref<512x144xbf16, #tpu.memory_space<vmem>>, %arg2: memref<144x128xbf16, #tpu.memory_space<vmem>>, %arg3: memref<512x128xf32, #tpu.memory_space<vmem>>, %arg4: memref<1x128xf32, #tpu.memory_space<vmem>>, %arg5: memref<1x128xf32, #tpu.memory_space<vmem>>, %arg6: memref<1x128xf32, #tpu.memory_space<vmem>>, %arg7: memref<1x128xf32, #tpu.memory_space<vmem>>) attributes {dimension_semantics = [#tpu.dimension_semantics<arbitrary>], iteration_bounds = array<i64: 1>, scalar_prefetch = 0 : i64, scratch_operands = 2 : i64, tpu.core_type = #tpu.core_type<tc>, window_params = [{transform_indices = @transform_0, window_bounds = array<i64: 512, 144>}, {pipeline_mode = #tpu.pipeline_mode<synchronous>, transform_indices = @transform_1, window_bounds = array<i64: 144, 128>}, {transform_indices = @transform_2, window_bounds = array<i64: 512, 128>}, {pipeline_mode = #tpu.pipeline_mode<synchronous>, transform_indices = @transform_3, window_bounds = array<i64: 1, 128>}, {pipeline_mode = #tpu.pipeline_mode<synchronous>, transform_indices = @transform_4, window_bounds = array<i64: 1, 128>}]} {
    %c0 = arith.constant 0 : index
    %c0_0 = arith.constant 0 : index
    %0 = vector.load %arg1[%c0, %c0_0] : memref<512x144xbf16, #tpu.memory_space<vmem>>, vector<512x144xbf16>
    %c0_1 = arith.constant 0 : index
    %c0_2 = arith.constant 0 : index
    %1 = vector.load %arg2[%c0_1, %c0_2] : memref<144x128xbf16, #tpu.memory_space<vmem>>, vector<144x128xbf16>
    %cst = arith.constant dense<0.000000e+00> : vector<512x128xf32>
    %2 = tpu.matmul %0, %1, %cst {dimension_numbers = #tpu.dot_dimension_numbers<[1], [0], [0], [1], [0, 0, 1, 1], [], []>} : vector<512x144xbf16>, vector<144x128xbf16>, vector<512x128xf32> -> vector<512x128xf32>
    %c0_3 = arith.constant 0 : index
    %c0_4 = arith.constant 0 : index
    %3 = vector.load %arg3[%c0_3, %c0_4] : memref<512x128xf32, #tpu.memory_space<vmem>>, vector<512x128xf32>
    tpu.vector_store %arg3[%c0_3, %c0_4], %2 {strides = array<i32>} : memref<512x128xf32, #tpu.memory_space<vmem>>, vector<512x128xf32>,
    %c0_i32 = arith.constant 0 : i32
    %4 = arith.cmpi eq, %arg0, %c0_i32 : i32
    %5 = arith.extui %4 : i1 to i32
    %c0_i32_5 = arith.constant 0 : i32
    %6 = arith.cmpi ne, %5, %c0_i32_5 : i32
    scf.if %6 {
      %cst_18 = arith.constant 0.000000e+00 : f32
      %21 = vector.broadcast %cst_18 : f32 to vector<1x128xf32>
      %c0_19 = arith.constant 0 : index
      %c0_20 = arith.constant 0 : index
      %22 = vector.load %arg6[%c0_19, %c0_20] : memref<1x128xf32, #tpu.memory_space<vmem>>, vector<1x128xf32>
      tpu.vector_store %arg6[%c0_19, %c0_20], %21 {strides = array<i32>} : memref<1x128xf32, #tpu.memory_space<vmem>>, vector<1x128xf32>,
      %cst_21 = arith.constant 0.000000e+00 : f32
      %23 = vector.broadcast %cst_21 : f32 to vector<1x128xf32>
      %c0_22 = arith.constant 0 : index
      %c0_23 = arith.constant 0 : index
      %24 = vector.load %arg7[%c0_22, %c0_23] : memref<1x128xf32, #tpu.memory_space<vmem>>, vector<1x128xf32>
      tpu.vector_store %arg7[%c0_22, %c0_23], %23 {strides = array<i32>} : memref<1x128xf32, #tpu.memory_space<vmem>>, vector<1x128xf32>,
    } else {
    }
    %c0_6 = arith.constant 0 : index
    %c0_7 = arith.constant 0 : index
    %7 = vector.load %arg6[%c0_6, %c0_7] : memref<1x128xf32, #tpu.memory_space<vmem>>, vector<1x128xf32>
    %cst_8 = arith.constant dense<0.000000e+00> : vector<128xf32>
    %8 = vector.multi_reduction <add>, %2, %cst_8 [0] : vector<512x128xf32> to vector<128xf32>
    %9 = vector.shape_cast %8 : vector<128xf32> to vector<1x128xf32>
    %10 = arith.addf %7, %9 : vector<1x128xf32>
    %c0_9 = arith.constant 0 : index
    %c0_10 = arith.constant 0 : index
    %11 = vector.load %arg6[%c0_9, %c0_10] : memref<1x128xf32, #tpu.memory_space<vmem>>, vector<1x128xf32>
    tpu.vector_store %arg6[%c0_9, %c0_10], %10 {strides = array<i32>} : memref<1x128xf32, #tpu.memory_space<vmem>>, vector<1x128xf32>,
    %c0_11 = arith.constant 0 : index
    %c0_12 = arith.constant 0 : index
    %12 = vector.load %arg7[%c0_11, %c0_12] : memref<1x128xf32, #tpu.memory_space<vmem>>, vector<1x128xf32>
    %13 = arith.mulf %2, %2 : vector<512x128xf32>
    %cst_13 = arith.constant dense<0.000000e+00> : vector<128xf32>
    %14 = vector.multi_reduction <add>, %13, %cst_13 [0] : vector<512x128xf32> to vector<128xf32>
    %15 = vector.shape_cast %14 : vector<128xf32> to vector<1x128xf32>
    %16 = arith.addf %12, %15 : vector<1x128xf32>
    %c0_14 = arith.constant 0 : index
    %c0_15 = arith.constant 0 : index
    %17 = vector.load %arg7[%c0_14, %c0_15] : memref<1x128xf32, #tpu.memory_space<vmem>>, vector<1x128xf32>
    tpu.vector_store %arg7[%c0_14, %c0_15], %16 {strides = array<i32>} : memref<1x128xf32, #tpu.memory_space<vmem>>, vector<1x128xf32>,
    %c0_i32_16 = arith.constant 0 : i32
    %18 = arith.cmpi eq, %arg0, %c0_i32_16 : i32
    %19 = arith.extui %18 : i1 to i32
    %c0_i32_17 = arith.constant 0 : i32
    %20 = arith.cmpi ne, %19, %c0_i32_17 : i32
    scf.if %20 {
      %c0_18 = arith.constant 0 : index
      %c0_19 = arith.constant 0 : index
      %21 = vector.load %arg6[%c0_18, %c0_19] : memref<1x128xf32, #tpu.memory_space<vmem>>, vector<1x128xf32>
      %c0_20 = arith.constant 0 : index
      %c0_21 = arith.constant 0 : index
      %22 = vector.load %arg4[%c0_20, %c0_21] : memref<1x128xf32, #tpu.memory_space<vmem>>, vector<1x128xf32>
      tpu.vector_store %arg4[%c0_20, %c0_21], %21 {strides = array<i32>} : memref<1x128xf32, #tpu.memory_space<vmem>>, vector<1x128xf32>,
      %c0_22 = arith.constant 0 : index
      %c0_23 = arith.constant 0 : index
      %23 = vector.load %arg7[%c0_22, %c0_23] : memref<1x128xf32, #tpu.memory_space<vmem>>, vector<1x128xf32>
      %c0_24 = arith.constant 0 : index
      %c0_25 = arith.constant 0 : index
      %24 = vector.load %arg5[%c0_24, %c0_25] : memref<1x128xf32, #tpu.memory_space<vmem>>, vector<1x128xf32>
      tpu.vector_store %arg5[%c0_24, %c0_25], %23 {strides = array<i32>} : memref<1x128xf32, #tpu.memory_space<vmem>>, vector<1x128xf32>,
    } else {
    }
    return
  }
  func.func @transform_0(%arg0: i32) -> (i32, i32) {
    %c0_i32 = arith.constant 0 : i32
    %c0_i32_0 = arith.constant 0 : i32
    return %arg0, %c0_i32 : i32, i32
  }
  func.func @transform_1(%arg0: i32) -> (i32, i32) {
    %c0_i32 = arith.constant 0 : i32
    %c0_i32_0 = arith.constant 0 : i32
    %c0_i32_1 = arith.constant 0 : i32
    return %c0_i32, %c0_i32_0 : i32, i32
  }
  func.func @transform_2(%arg0: i32) -> (i32, i32) {
    %c0_i32 = arith.constant 0 : i32
    %c0_i32_0 = arith.constant 0 : i32
    return %arg0, %c0_i32 : i32, i32
  }
  func.func @transform_3(%arg0: i32) -> (i32, i32) {
    %c0_i32 = arith.constant 0 : i32
    %c0_i32_0 = arith.constant 0 : i32
    %c0_i32_1 = arith.constant 0 : i32
    return %c0_i32, %c0_i32_0 : i32, i32
  }
  func.func @transform_4(%arg0: i32) -> (i32, i32) {
    %c0_i32 = arith.constant 0 : i32
    %c0_i32_0 = arith.constant 0 : i32
    %c0_i32_1 = arith.constant 0 : i32
    return %c0_i32, %c0_i32_0 : i32, i32
  }
}

module attributes {stable_mosaic.version = 11 : i64} {
  func.func @_scale_shift_act_kernel(%arg0: i32, %arg1: memref<512x128xf32, #tpu.memory_space<vmem>>, %arg2: memref<1x128xf32, #tpu.memory_space<vmem>>, %arg3: memref<1x128xf32, #tpu.memory_space<vmem>>, %arg4: memref<512x128xf32, #tpu.memory_space<vmem>>) attributes {dimension_semantics = [#tpu.dimension_semantics<parallel>], iteration_bounds = array<i64: 1>, scalar_prefetch = 0 : i64, scratch_operands = 0 : i64, tpu.core_type = #tpu.core_type<tc>, window_params = [{transform_indices = @transform_0, window_bounds = array<i64: 512, 128>}, {pipeline_mode = #tpu.pipeline_mode<synchronous>, transform_indices = @transform_1, window_bounds = array<i64: 1, 128>}, {pipeline_mode = #tpu.pipeline_mode<synchronous>, transform_indices = @transform_2, window_bounds = array<i64: 1, 128>}, {transform_indices = @transform_3, window_bounds = array<i64: 512, 128>}]} {
    %c0 = arith.constant 0 : index
    %c0_0 = arith.constant 0 : index
    %0 = vector.load %arg1[%c0, %c0_0] : memref<512x128xf32, #tpu.memory_space<vmem>>, vector<512x128xf32>
    %c0_1 = arith.constant 0 : index
    %c0_2 = arith.constant 0 : index
    %1 = vector.load %arg2[%c0_1, %c0_2] : memref<1x128xf32, #tpu.memory_space<vmem>>, vector<1x128xf32>
    %2 = vector.broadcast %1 : vector<1x128xf32> to vector<512x128xf32>
    %3 = arith.mulf %0, %2 : vector<512x128xf32>
    %c0_3 = arith.constant 0 : index
    %c0_4 = arith.constant 0 : index
    %4 = vector.load %arg3[%c0_3, %c0_4] : memref<1x128xf32, #tpu.memory_space<vmem>>, vector<1x128xf32>
    %5 = vector.broadcast %4 : vector<1x128xf32> to vector<512x128xf32>
    %6 = arith.addf %3, %5 : vector<512x128xf32>
    %c0_5 = arith.constant 0 : index
    %c0_6 = arith.constant 0 : index
    %7 = vector.load %arg4[%c0_5, %c0_6] : memref<512x128xf32, #tpu.memory_space<vmem>>, vector<512x128xf32>
    tpu.vector_store %arg4[%c0_5, %c0_6], %6 {strides = array<i32>} : memref<512x128xf32, #tpu.memory_space<vmem>>, vector<512x128xf32>,
    return
  }
  func.func @transform_0(%arg0: i32) -> (i32, i32) {
    %c0_i32 = arith.constant 0 : i32
    %c0_i32_0 = arith.constant 0 : i32
    return %arg0, %c0_i32 : i32, i32
  }
  func.func @transform_1(%arg0: i32) -> (i32, i32) {
    %c0_i32 = arith.constant 0 : i32
    %c0_i32_0 = arith.constant 0 : i32
    %c0_i32_1 = arith.constant 0 : i32
    return %c0_i32, %c0_i32_0 : i32, i32
  }
  func.func @transform_2(%arg0: i32) -> (i32, i32) {
    %c0_i32 = arith.constant 0 : i32
    %c0_i32_0 = arith.constant 0 : i32
    %c0_i32_1 = arith.constant 0 : i32
    return %c0_i32, %c0_i32_0 : i32, i32
  }
  func.func @transform_3(%arg0: i32) -> (i32, i32) {
    %c0_i32 = arith.constant 0 : i32
    %c0_i32_0 = arith.constant 0 : i32
    return %arg0, %c0_i32 : i32, i32
  }
}

module attributes {stable_mosaic.version = 11 : i64} {
  func.func @_matmul_stats_kernel(%arg0: i32, %arg1: memref<512x144xbf16, #tpu.memory_space<vmem>>, %arg2: memref<144x128xbf16, #tpu.memory_space<vmem>>, %arg3: memref<512x128xf32, #tpu.memory_space<vmem>>, %arg4: memref<1x128xf32, #tpu.memory_space<vmem>>, %arg5: memref<1x128xf32, #tpu.memory_space<vmem>>, %arg6: memref<1x128xf32, #tpu.memory_space<vmem>>, %arg7: memref<1x128xf32, #tpu.memory_space<vmem>>) attributes {dimension_semantics = [#tpu.dimension_semantics<arbitrary>], iteration_bounds = array<i64: 4>, scalar_prefetch = 0 : i64, scratch_operands = 2 : i64, tpu.core_type = #tpu.core_type<tc>, window_params = [{transform_indices = @transform_0, window_bounds = array<i64: 512, 144>}, {pipeline_mode = #tpu.pipeline_mode<synchronous>, transform_indices = @transform_1, window_bounds = array<i64: 144, 128>}, {transform_indices = @transform_2, window_bounds = array<i64: 512, 128>}, {pipeline_mode = #tpu.pipeline_mode<synchronous>, transform_indices = @transform_3, window_bounds = array<i64: 1, 128>}, {pipeline_mode = #tpu.pipeline_mode<synchronous>, transform_indices = @transform_4, window_bounds = array<i64: 1, 128>}]} {
    %c0 = arith.constant 0 : index
    %c0_0 = arith.constant 0 : index
    %0 = vector.load %arg1[%c0, %c0_0] : memref<512x144xbf16, #tpu.memory_space<vmem>>, vector<512x144xbf16>
    %c0_1 = arith.constant 0 : index
    %c0_2 = arith.constant 0 : index
    %1 = vector.load %arg2[%c0_1, %c0_2] : memref<144x128xbf16, #tpu.memory_space<vmem>>, vector<144x128xbf16>
    %cst = arith.constant dense<0.000000e+00> : vector<512x128xf32>
    %2 = tpu.matmul %0, %1, %cst {dimension_numbers = #tpu.dot_dimension_numbers<[1], [0], [0], [1], [0, 0, 1, 1], [], []>} : vector<512x144xbf16>, vector<144x128xbf16>, vector<512x128xf32> -> vector<512x128xf32>
    %c0_3 = arith.constant 0 : index
    %c0_4 = arith.constant 0 : index
    %3 = vector.load %arg3[%c0_3, %c0_4] : memref<512x128xf32, #tpu.memory_space<vmem>>, vector<512x128xf32>
    tpu.vector_store %arg3[%c0_3, %c0_4], %2 {strides = array<i32>} : memref<512x128xf32, #tpu.memory_space<vmem>>, vector<512x128xf32>,
    %c0_i32 = arith.constant 0 : i32
    %4 = arith.cmpi eq, %arg0, %c0_i32 : i32
    %5 = arith.extui %4 : i1 to i32
    %c0_i32_5 = arith.constant 0 : i32
    %6 = arith.cmpi ne, %5, %c0_i32_5 : i32
    scf.if %6 {
      %cst_17 = arith.constant 0.000000e+00 : f32
      %21 = vector.broadcast %cst_17 : f32 to vector<1x128xf32>
      %c0_18 = arith.constant 0 : index
      %c0_19 = arith.constant 0 : index
      %22 = vector.load %arg6[%c0_18, %c0_19] : memref<1x128xf32, #tpu.memory_space<vmem>>, vector<1x128xf32>
      tpu.vector_store %arg6[%c0_18, %c0_19], %21 {strides = array<i32>} : memref<1x128xf32, #tpu.memory_space<vmem>>, vector<1x128xf32>,
      %cst_20 = arith.constant 0.000000e+00 : f32
      %23 = vector.broadcast %cst_20 : f32 to vector<1x128xf32>
      %c0_21 = arith.constant 0 : index
      %c0_22 = arith.constant 0 : index
      %24 = vector.load %arg7[%c0_21, %c0_22] : memref<1x128xf32, #tpu.memory_space<vmem>>, vector<1x128xf32>
      tpu.vector_store %arg7[%c0_21, %c0_22], %23 {strides = array<i32>} : memref<1x128xf32, #tpu.memory_space<vmem>>, vector<1x128xf32>,
    } else {
    }
    %c0_6 = arith.constant 0 : index
    %c0_7 = arith.constant 0 : index
    %7 = vector.load %arg6[%c0_6, %c0_7] : memref<1x128xf32, #tpu.memory_space<vmem>>, vector<1x128xf32>
    %cst_8 = arith.constant dense<0.000000e+00> : vector<128xf32>
    %8 = vector.multi_reduction <add>, %2, %cst_8 [0] : vector<512x128xf32> to vector<128xf32>
    %9 = vector.shape_cast %8 : vector<128xf32> to vector<1x128xf32>
    %10 = arith.addf %7, %9 : vector<1x128xf32>
    %c0_9 = arith.constant 0 : index
    %c0_10 = arith.constant 0 : index
    %11 = vector.load %arg6[%c0_9, %c0_10] : memref<1x128xf32, #tpu.memory_space<vmem>>, vector<1x128xf32>
    tpu.vector_store %arg6[%c0_9, %c0_10], %10 {strides = array<i32>} : memref<1x128xf32, #tpu.memory_space<vmem>>, vector<1x128xf32>,
    %c0_11 = arith.constant 0 : index
    %c0_12 = arith.constant 0 : index
    %12 = vector.load %arg7[%c0_11, %c0_12] : memref<1x128xf32, #tpu.memory_space<vmem>>, vector<1x128xf32>
    %13 = arith.mulf %2, %2 : vector<512x128xf32>
    %cst_13 = arith.constant dense<0.000000e+00> : vector<128xf32>
    %14 = vector.multi_reduction <add>, %13, %cst_13 [0] : vector<512x128xf32> to vector<128xf32>
    %15 = vector.shape_cast %14 : vector<128xf32> to vector<1x128xf32>
    %16 = arith.addf %12, %15 : vector<1x128xf32>
    %c0_14 = arith.constant 0 : index
    %c0_15 = arith.constant 0 : index
    %17 = vector.load %arg7[%c0_14, %c0_15] : memref<1x128xf32, #tpu.memory_space<vmem>>, vector<1x128xf32>
    tpu.vector_store %arg7[%c0_14, %c0_15], %16 {strides = array<i32>} : memref<1x128xf32, #tpu.memory_space<vmem>>, vector<1x128xf32>,
    %c3_i32 = arith.constant 3 : i32
    %18 = arith.cmpi eq, %arg0, %c3_i32 : i32
    %19 = arith.extui %18 : i1 to i32
    %c0_i32_16 = arith.constant 0 : i32
    %20 = arith.cmpi ne, %19, %c0_i32_16 : i32
    scf.if %20 {
      %c0_17 = arith.constant 0 : index
      %c0_18 = arith.constant 0 : index
      %21 = vector.load %arg6[%c0_17, %c0_18] : memref<1x128xf32, #tpu.memory_space<vmem>>, vector<1x128xf32>
      %c0_19 = arith.constant 0 : index
      %c0_20 = arith.constant 0 : index
      %22 = vector.load %arg4[%c0_19, %c0_20] : memref<1x128xf32, #tpu.memory_space<vmem>>, vector<1x128xf32>
      tpu.vector_store %arg4[%c0_19, %c0_20], %21 {strides = array<i32>} : memref<1x128xf32, #tpu.memory_space<vmem>>, vector<1x128xf32>,
      %c0_21 = arith.constant 0 : index
      %c0_22 = arith.constant 0 : index
      %23 = vector.load %arg7[%c0_21, %c0_22] : memref<1x128xf32, #tpu.memory_space<vmem>>, vector<1x128xf32>
      %c0_23 = arith.constant 0 : index
      %c0_24 = arith.constant 0 : index
      %24 = vector.load %arg5[%c0_23, %c0_24] : memref<1x128xf32, #tpu.memory_space<vmem>>, vector<1x128xf32>
      tpu.vector_store %arg5[%c0_23, %c0_24], %23 {strides = array<i32>} : memref<1x128xf32, #tpu.memory_space<vmem>>, vector<1x128xf32>,
    } else {
    }
    return
  }
  func.func @transform_0(%arg0: i32) -> (i32, i32) {
    %c0_i32 = arith.constant 0 : i32
    %c0_i32_0 = arith.constant 0 : i32
    return %arg0, %c0_i32 : i32, i32
  }
  func.func @transform_1(%arg0: i32) -> (i32, i32) {
    %c0_i32 = arith.constant 0 : i32
    %c0_i32_0 = arith.constant 0 : i32
    %c0_i32_1 = arith.constant 0 : i32
    return %c0_i32, %c0_i32_0 : i32, i32
  }
  func.func @transform_2(%arg0: i32) -> (i32, i32) {
    %c0_i32 = arith.constant 0 : i32
    %c0_i32_0 = arith.constant 0 : i32
    return %arg0, %c0_i32 : i32, i32
  }
  func.func @transform_3(%arg0: i32) -> (i32, i32) {
    %c0_i32 = arith.constant 0 : i32
    %c0_i32_0 = arith.constant 0 : i32
    %c0_i32_1 = arith.constant 0 : i32
    return %c0_i32, %c0_i32_0 : i32, i32
  }
  func.func @transform_4(%arg0: i32) -> (i32, i32) {
    %c0_i32 = arith.constant 0 : i32
    %c0_i32_0 = arith.constant 0 : i32
    %c0_i32_1 = arith.constant 0 : i32
    return %c0_i32, %c0_i32_0 : i32, i32
  }
}

module attributes {stable_mosaic.version = 11 : i64} {
  func.func @_matmul_stats_kernel(%arg0: i32, %arg1: memref<512x392xbf16, #tpu.memory_space<vmem>>, %arg2: memref<392x128xbf16, #tpu.memory_space<vmem>>, %arg3: memref<512x128xf32, #tpu.memory_space<vmem>>, %arg4: memref<1x128xf32, #tpu.memory_space<vmem>>, %arg5: memref<1x128xf32, #tpu.memory_space<vmem>>, %arg6: memref<1x128xf32, #tpu.memory_space<vmem>>, %arg7: memref<1x128xf32, #tpu.memory_space<vmem>>) attributes {dimension_semantics = [#tpu.dimension_semantics<arbitrary>], iteration_bounds = array<i64: 4>, scalar_prefetch = 0 : i64, scratch_operands = 2 : i64, tpu.core_type = #tpu.core_type<tc>, window_params = [{transform_indices = @transform_0, window_bounds = array<i64: 512, 392>}, {pipeline_mode = #tpu.pipeline_mode<synchronous>, transform_indices = @transform_1, window_bounds = array<i64: 392, 128>}, {transform_indices = @transform_2, window_bounds = array<i64: 512, 128>}, {pipeline_mode = #tpu.pipeline_mode<synchronous>, transform_indices = @transform_3, window_bounds = array<i64: 1, 128>}, {pipeline_mode = #tpu.pipeline_mode<synchronous>, transform_indices = @transform_4, window_bounds = array<i64: 1, 128>}]} {
    %c0 = arith.constant 0 : index
    %c0_0 = arith.constant 0 : index
    %0 = vector.load %arg1[%c0, %c0_0] : memref<512x392xbf16, #tpu.memory_space<vmem>>, vector<512x392xbf16>
    %c0_1 = arith.constant 0 : index
    %c0_2 = arith.constant 0 : index
    %1 = vector.load %arg2[%c0_1, %c0_2] : memref<392x128xbf16, #tpu.memory_space<vmem>>, vector<392x128xbf16>
    %cst = arith.constant dense<0.000000e+00> : vector<512x128xf32>
    %2 = tpu.matmul %0, %1, %cst {dimension_numbers = #tpu.dot_dimension_numbers<[1], [0], [0], [1], [0, 0, 1, 1], [], []>} : vector<512x392xbf16>, vector<392x128xbf16>, vector<512x128xf32> -> vector<512x128xf32>
    %c0_3 = arith.constant 0 : index
    %c0_4 = arith.constant 0 : index
    %3 = vector.load %arg3[%c0_3, %c0_4] : memref<512x128xf32, #tpu.memory_space<vmem>>, vector<512x128xf32>
    tpu.vector_store %arg3[%c0_3, %c0_4], %2 {strides = array<i32>} : memref<512x128xf32, #tpu.memory_space<vmem>>, vector<512x128xf32>,
    %c0_i32 = arith.constant 0 : i32
    %4 = arith.cmpi eq, %arg0, %c0_i32 : i32
    %5 = arith.extui %4 : i1 to i32
    %c0_i32_5 = arith.constant 0 : i32
    %6 = arith.cmpi ne, %5, %c0_i32_5 : i32
    scf.if %6 {
      %cst_17 = arith.constant 0.000000e+00 : f32
      %21 = vector.broadcast %cst_17 : f32 to vector<1x128xf32>
      %c0_18 = arith.constant 0 : index
      %c0_19 = arith.constant 0 : index
      %22 = vector.load %arg6[%c0_18, %c0_19] : memref<1x128xf32, #tpu.memory_space<vmem>>, vector<1x128xf32>
      tpu.vector_store %arg6[%c0_18, %c0_19], %21 {strides = array<i32>} : memref<1x128xf32, #tpu.memory_space<vmem>>, vector<1x128xf32>,
      %cst_20 = arith.constant 0.000000e+00 : f32
      %23 = vector.broadcast %cst_20 : f32 to vector<1x128xf32>
      %c0_21 = arith.constant 0 : index
      %c0_22 = arith.constant 0 : index
      %24 = vector.load %arg7[%c0_21, %c0_22] : memref<1x128xf32, #tpu.memory_space<vmem>>, vector<1x128xf32>
      tpu.vector_store %arg7[%c0_21, %c0_22], %23 {strides = array<i32>} : memref<1x128xf32, #tpu.memory_space<vmem>>, vector<1x128xf32>,
    } else {
    }
    %c0_6 = arith.constant 0 : index
    %c0_7 = arith.constant 0 : index
    %7 = vector.load %arg6[%c0_6, %c0_7] : memref<1x128xf32, #tpu.memory_space<vmem>>, vector<1x128xf32>
    %cst_8 = arith.constant dense<0.000000e+00> : vector<128xf32>
    %8 = vector.multi_reduction <add>, %2, %cst_8 [0] : vector<512x128xf32> to vector<128xf32>
    %9 = vector.shape_cast %8 : vector<128xf32> to vector<1x128xf32>
    %10 = arith.addf %7, %9 : vector<1x128xf32>
    %c0_9 = arith.constant 0 : index
    %c0_10 = arith.constant 0 : index
    %11 = vector.load %arg6[%c0_9, %c0_10] : memref<1x128xf32, #tpu.memory_space<vmem>>, vector<1x128xf32>
    tpu.vector_store %arg6[%c0_9, %c0_10], %10 {strides = array<i32>} : memref<1x128xf32, #tpu.memory_space<vmem>>, vector<1x128xf32>,
    %c0_11 = arith.constant 0 : index
    %c0_12 = arith.constant 0 : index
    %12 = vector.load %arg7[%c0_11, %c0_12] : memref<1x128xf32, #tpu.memory_space<vmem>>, vector<1x128xf32>
    %13 = arith.mulf %2, %2 : vector<512x128xf32>
    %cst_13 = arith.constant dense<0.000000e+00> : vector<128xf32>
    %14 = vector.multi_reduction <add>, %13, %cst_13 [0] : vector<512x128xf32> to vector<128xf32>
    %15 = vector.shape_cast %14 : vector<128xf32> to vector<1x128xf32>
    %16 = arith.addf %12, %15 : vector<1x128xf32>
    %c0_14 = arith.constant 0 : index
    %c0_15 = arith.constant 0 : index
    %17 = vector.load %arg7[%c0_14, %c0_15] : memref<1x128xf32, #tpu.memory_space<vmem>>, vector<1x128xf32>
    tpu.vector_store %arg7[%c0_14, %c0_15], %16 {strides = array<i32>} : memref<1x128xf32, #tpu.memory_space<vmem>>, vector<1x128xf32>,
    %c3_i32 = arith.constant 3 : i32
    %18 = arith.cmpi eq, %arg0, %c3_i32 : i32
    %19 = arith.extui %18 : i1 to i32
    %c0_i32_16 = arith.constant 0 : i32
    %20 = arith.cmpi ne, %19, %c0_i32_16 : i32
    scf.if %20 {
      %c0_17 = arith.constant 0 : index
      %c0_18 = arith.constant 0 : index
      %21 = vector.load %arg6[%c0_17, %c0_18] : memref<1x128xf32, #tpu.memory_space<vmem>>, vector<1x128xf32>
      %c0_19 = arith.constant 0 : index
      %c0_20 = arith.constant 0 : index
      %22 = vector.load %arg4[%c0_19, %c0_20] : memref<1x128xf32, #tpu.memory_space<vmem>>, vector<1x128xf32>
      tpu.vector_store %arg4[%c0_19, %c0_20], %21 {strides = array<i32>} : memref<1x128xf32, #tpu.memory_space<vmem>>, vector<1x128xf32>,
      %c0_21 = arith.constant 0 : index
      %c0_22 = arith.constant 0 : index
      %23 = vector.load %arg7[%c0_21, %c0_22] : memref<1x128xf32, #tpu.memory_space<vmem>>, vector<1x128xf32>
      %c0_23 = arith.constant 0 : index
      %c0_24 = arith.constant 0 : index
      %24 = vector.load %arg5[%c0_23, %c0_24] : memref<1x128xf32, #tpu.memory_space<vmem>>, vector<1x128xf32>
      tpu.vector_store %arg5[%c0_23, %c0_24], %23 {strides = array<i32>} : memref<1x128xf32, #tpu.memory_space<vmem>>, vector<1x128xf32>,
    } else {
    }
    return
  }
  func.func @transform_0(%arg0: i32) -> (i32, i32) {
    %c0_i32 = arith.constant 0 : i32
    %c0_i32_0 = arith.constant 0 : i32
    return %arg0, %c0_i32 : i32, i32
  }
  func.func @transform_1(%arg0: i32) -> (i32, i32) {
    %c0_i32 = arith.constant 0 : i32
    %c0_i32_0 = arith.constant 0 : i32
    %c0_i32_1 = arith.constant 0 : i32
    return %c0_i32, %c0_i32_0 : i32, i32
  }
  func.func @transform_2(%arg0: i32) -> (i32, i32) {
    %c0_i32 = arith.constant 0 : i32
    %c0_i32_0 = arith.constant 0 : i32
    return %arg0, %c0_i32 : i32, i32
  }
  func.func @transform_3(%arg0: i32) -> (i32, i32) {
    %c0_i32 = arith.constant 0 : i32
    %c0_i32_0 = arith.constant 0 : i32
    %c0_i32_1 = arith.constant 0 : i32
    return %c0_i32, %c0_i32_0 : i32, i32
  }
  func.func @transform_4(%arg0: i32) -> (i32, i32) {
    %c0_i32 = arith.constant 0 : i32
    %c0_i32_0 = arith.constant 0 : i32
    %c0_i32_1 = arith.constant 0 : i32
    return %c0_i32, %c0_i32_0 : i32, i32
  }
}

module attributes {stable_mosaic.version = 11 : i64} {
  func.func @_scale_shift_act_kernel(%arg0: i32, %arg1: memref<512x128xf32, #tpu.memory_space<vmem>>, %arg2: memref<1x128xf32, #tpu.memory_space<vmem>>, %arg3: memref<1x128xf32, #tpu.memory_space<vmem>>, %arg4: memref<512x128xf32, #tpu.memory_space<vmem>>) attributes {dimension_semantics = [#tpu.dimension_semantics<parallel>], iteration_bounds = array<i64: 4>, scalar_prefetch = 0 : i64, scratch_operands = 0 : i64, tpu.core_type = #tpu.core_type<tc>, window_params = [{transform_indices = @transform_0, window_bounds = array<i64: 512, 128>}, {pipeline_mode = #tpu.pipeline_mode<synchronous>, transform_indices = @transform_1, window_bounds = array<i64: 1, 128>}, {pipeline_mode = #tpu.pipeline_mode<synchronous>, transform_indices = @transform_2, window_bounds = array<i64: 1, 128>}, {transform_indices = @transform_3, window_bounds = array<i64: 512, 128>}]} {
    %c0 = arith.constant 0 : index
    %c0_0 = arith.constant 0 : index
    %0 = vector.load %arg1[%c0, %c0_0] : memref<512x128xf32, #tpu.memory_space<vmem>>, vector<512x128xf32>
    %c0_1 = arith.constant 0 : index
    %c0_2 = arith.constant 0 : index
    %1 = vector.load %arg2[%c0_1, %c0_2] : memref<1x128xf32, #tpu.memory_space<vmem>>, vector<1x128xf32>
    %2 = vector.broadcast %1 : vector<1x128xf32> to vector<512x128xf32>
    %3 = arith.mulf %0, %2 : vector<512x128xf32>
    %c0_3 = arith.constant 0 : index
    %c0_4 = arith.constant 0 : index
    %4 = vector.load %arg3[%c0_3, %c0_4] : memref<1x128xf32, #tpu.memory_space<vmem>>, vector<1x128xf32>
    %5 = vector.broadcast %4 : vector<1x128xf32> to vector<512x128xf32>
    %6 = arith.addf %3, %5 : vector<512x128xf32>
    %7 = math.tanh %6 : vector<512x128xf32>
    %c0_5 = arith.constant 0 : index
    %c0_6 = arith.constant 0 : index
    %8 = vector.load %arg4[%c0_5, %c0_6] : memref<512x128xf32, #tpu.memory_space<vmem>>, vector<512x128xf32>
    tpu.vector_store %arg4[%c0_5, %c0_6], %7 {strides = array<i32>} : memref<512x128xf32, #tpu.memory_space<vmem>>, vector<512x128xf32>,
    return
  }
  func.func @transform_0(%arg0: i32) -> (i32, i32) {
    %c0_i32 = arith.constant 0 : i32
    %c0_i32_0 = arith.constant 0 : i32
    return %arg0, %c0_i32 : i32, i32
  }
  func.func @transform_1(%arg0: i32) -> (i32, i32) {
    %c0_i32 = arith.constant 0 : i32
    %c0_i32_0 = arith.constant 0 : i32
    %c0_i32_1 = arith.constant 0 : i32
    return %c0_i32, %c0_i32_0 : i32, i32
  }
  func.func @transform_2(%arg0: i32) -> (i32, i32) {
    %c0_i32 = arith.constant 0 : i32
    %c0_i32_0 = arith.constant 0 : i32
    %c0_i32_1 = arith.constant 0 : i32
    return %c0_i32, %c0_i32_0 : i32, i32
  }
  func.func @transform_3(%arg0: i32) -> (i32, i32) {
    %c0_i32 = arith.constant 0 : i32
    %c0_i32_0 = arith.constant 0 : i32
    return %arg0, %c0_i32 : i32, i32
  }
}

</mosaic_0001>

<bundles_post_ra>
// kernel: local_enhancer_forward.31
= control target key start
LH: loop header
LB: loop body
LE: loop exit
PB: predicated region body
PF: predicated region fallthrough
CT: control target
= control target key end

     0   :  { %s613_s12 = smov 0   ;;  %s900_s0 = inlined_call_operand.vmem [shape: f32[2048,128], index: 0, kind: input, shape index: {}]   ;;  %s901_s1 = inlined_call_operand.vmem [shape: f32[1,128], index: 1, kind: input, shape index: {}]   ;;  %s902_s2 = inlined_call_operand.vmem [shape: f32[1,128], index: 2, kind: input, shape index: {}]   ;;  %s903_s3 = inlined_call_operand.vmem [shape: f32[2048,128], index: 3, kind: output, shape index: {}]  }
   0x1 LB: > { %s564_s13 = sadd.s32 4294967295, %s591_s12   ;;  %p568_p0 = scmp.ge.s32.totalorder %s591_s12, 1  ;;  %s591_s12 = sphi %s613_s12, %s13_s12  }
   0x2   : > { %p138_p1 = scmp.lt.s32.totalorder %s591_s12, 5 }
   0x4   : > { %p139_p2 = pnand %p568_p0, %p138_p1 }
   0x5   : > { %s569_s14 = sshll.u32 (!%p139_p2), %s564_s13, 6 }
   0x6   : > { %142 = sbr.rel (%p139_p2) target bundleno = 68 (0x44), region = 32  ;;  %p163_p3 = scmp.lt.s32.totalorder (!%p139_p2), %s569_s14, 255 }
   0xb   : > { %s905_s14 = smov (!%p163_p3, %s569_s14), 255  ;;  %v624_v0 = vld [vmem:[%s901_s1] ss:$0 sm:$0xff] }
   0xc   : > { %s570_s15 = sshll.u32 %s905_s14, 3  ;;  %v634_v1 = vld [vmem:[%s902_s2] ss:$0 sm:$0xff] }
   0xd   : > { %s629_s20 = scalar_lea.vmem %s900_s0, %s570_s15  ;;  %s657_s25 = scalar_lea.vmem %s903_s3, %s570_s15 }
   0xe   : > { %v174_v2 = vld [vmem:[%s629_s20] sm:$0xff]  ;;  %v175_v3 = vld [vmem:[%s629_s20 + $0x8] sm:$0xff]  ;;  %v176_v4 = vld [vmem:[%s629_s20 + $0x10] sm:$0xff] }
   0xf   : > { %v245_v5 = vmul.f32 %v624_v0, %v174_v2  ;;  %v246_v6 = vmul.f32 %v624_v0, %v175_v3  ;;  %v247_v7 = vmul.f32 %v624_v0, %v176_v4  ;;  %v177_v8 = vld [vmem:[%s629_s20 + $0x18] sm:$0xff]  ;;  %v178_v9 = vld [vmem:[%s629_s20 + $0x20] sm:$0xff]  ;;  %v179_v10 = vld [vmem:[%s629_s20 + $0x28] sm:$0xff] }
  0x10   : > { %v248_v11 = vmul.f32 %v624_v0, %v177_v8  ;;  %v249_v12 = vmul.f32 %v624_v0, %v178_v9  ;;  %v250_v13 = vmul.f32 %v624_v0, %v179_v10  ;;  %v180_v14 = vld [vmem:[%s629_s20 + $0x30] sm:$0xff]  ;;  %v181_v15 = vld [vmem:[%s629_s20 + $0x38] sm:$0xff]  ;;  %v182_v24 = vld [vmem:[%s629_s20 + $0x40] sm:$0xff] }
  0x11   : > { %v316_v16 = vadd.f32 %v634_v1, %v245_v5  ;;  %v317_v17 = vadd.f32 %v634_v1, %v246_v6  ;;  %v318_v18 = vadd.f32 %v634_v1, %v247_v7  ;;  %v251_v19 = vmul.f32 %v624_v0, %v180_v14  ;;  %v183_v25 = vld [vmem:[%s629_s20 + $0x48] sm:$0xff]  ;;  %v184_v26 = vld [vmem:[%s629_s20 + $0x50] sm:$0xff]  ;;  %v185_v31 = vld [vmem:[%s629_s20 + $0x58] sm:$0xff] }
  0x12   : > { %v319_v20 = vadd.f32 %v634_v1, %v248_v11  ;;  %v320_v21 = vadd.f32 %v634_v1, %v249_v12  ;;  %v321_v22 = vadd.f32 %v634_v1, %v250_v13  ;;  %v252_v23 = vmul.f32 %v624_v0, %v181_v15  ;;  %v186_v32 = vld [vmem:[%s629_s20 + $0x60] sm:$0xff]  ;;  %v187_v33 = vld [vmem:[%s629_s20 + $0x68] sm:$0xff]  ;;  %v188_v38 = vld [vmem:[%s629_s20 + $0x70] sm:$0xff] }
  0x13   : > { %v380_v27 = vmax.f32 %v316_v16, 0.0  ;;  %v381_v28 = vmax.f32 %v317_v17, 0.0  ;;  %v382_v29 = vmax.f32 %v318_v18, 0.0  ;;  %v322_v30 = vadd.f32 %v634_v1, %v251_v19  ;;  %v189_v43 = vld [vmem:[%s629_s20 + $0x78] sm:$0xff]  ;;  %v190_v56 = vld [vmem:[%s629_s20 + $0x80] sm:$0xff]  ;;  %v191_v57 = vld [vmem:[%s629_s20 + $0x88] sm:$0xff] }
  0x14   : > { %v383_v34 = vmax.f32 %v319_v20, 0.0  ;;  %v384_v35 = vmax.f32 %v320_v21, 0.0  ;;  %v385_v36 = vmax.f32 %v321_v22, 0.0  ;;  %v323_v37 = vadd.f32 %v634_v1, %v252_v23  ;;  %v192_v58 = vld [vmem:[%s629_s20 + $0x90] sm:$0xff]  ;;  %v193_v63 = vld [vmem:[%s629_s20 + $0x98] sm:$0xff]  ;;  %v194_v2 = vld [vmem:[%s629_s20 + $0xa0] sm:$0xff] }
  0x15   : > { %444 = vst [vmem:[%s657_s25] sm:$0xff] %v380_v27  ;;  %445 = vst [vmem:[%s657_s25 + $0x8] sm:$0xff] %v381_v28  ;;  %v386_v39 = vmax.f32 %v322_v30, 0.0  ;;  %v253_v40 = vmul.f32 %v624_v0, %v182_v24  ;;  %v254_v41 = vmul.f32 %v624_v0, %v183_v25  ;;  %v255_v42 = vmul.f32 %v624_v0, %v184_v26  ;;  %v195_v3 = vld [vmem:[%s629_s20 + $0xa8] sm:$0xff]  ;;  %v196_v8 = vld [vmem:[%s629_s20 + $0xb0] sm:$0xff] }
  0x16   : > { %446 = vst [vmem:[%s657_s25 + $0x10] sm:$0xff] %v382_v29  ;;  %447 = vst [vmem:[%s657_s25 + $0x18] sm:$0xff] %v383_v34  ;;  %v387_v44 = vmax.f32 %v323_v37, 0.0  ;;  %v256_v45 = vmul.f32 %v624_v0, %v185_v31  ;;  %v257_v46 = vmul.f32 %v624_v0, %v186_v32  ;;  %v258_v47 = vmul.f32 %v624_v0, %v187_v33  ;;  %v197_v13 = vld [vmem:[%s629_s20 + $0xb8] sm:$0xff]  ;;  %v198_v26 = vld [vmem:[%s629_s20 + $0xc0] sm:$0xff] }
  0x17   : > { %448 = vst [vmem:[%s657_s25 + $0x20] sm:$0xff] %v384_v35  ;;  %449 = vst [vmem:[%s657_s25 + $0x28] sm:$0xff] %v385_v36  ;;  %v324_v48 = vadd.f32 %v634_v1, %v253_v40  ;;  %v325_v49 = vadd.f32 %v634_v1, %v254_v41  ;;  %v326_v50 = vadd.f32 %v634_v1, %v255_v42  ;;  %v199_v27 = vld [vmem:[%s629_s20 + $0xc8] sm:$0xff]  ;;  %v200_v28 = vld [vmem:[%s629_s20 + $0xd0] sm:$0xff] }
  0x18   : > { %450 = vst [vmem:[%s657_s25 + $0x30] sm:$0xff] %v386_v39  ;;  %v259_v51 = vmul.f32 %v624_v0, %v188_v38  ;;  %451 = vst [vmem:[%s657_s25 + $0x38] sm:$0xff] %v387_v44  ;;  %v327_v52 = vadd.f32 %v634_v1, %v256_v45  ;;  %v328_v53 = vadd.f32 %v634_v1, %v257_v46  ;;  %v201_v33 = vld [vmem:[%s629_s20 + $0xd8] sm:$0xff]  ;;  %v202_v34 = vld [vmem:[%s629_s20 + $0xe0] sm:$0xff] }
  0x19   : > { %v329_v54 = vadd.f32 %v634_v1, %v258_v47  ;;  %v260_v55 = vmul.f32 %v624_v0, %v189_v43  ;;  %v388_v59 = vmax.f32 %v324_v48, 0.0  ;;  %v389_v60 = vmax.f32 %v325_v49, 0.0  ;;  %v203_v35 = vld [vmem:[%s629_s20 + $0xe8] sm:$0xff]  ;;  %v204_v40 = vld [vmem:[%s629_s20 + $0xf0] sm:$0xff]  ;;  %v205_v45 = vld [vmem:[%s629_s20 + $0xf8] sm:$0xff] }
  0x1a   : > { %v390_v61 = vmax.f32 %v326_v50, 0.0  ;;  %v330_v62 = vadd.f32 %v634_v1, %v259_v51  ;;  %v391_v4 = vmax.f32 %v327_v52, 0.0  ;;  %v392_v5 = vmax.f32 %v328_v53, 0.0 }
  0x1b   : > { %v393_v6 = vmax.f32 %v329_v54, 0.0  ;;  %v331_v7 = vadd.f32 %v634_v1, %v260_v55  ;;  %452 = vst [vmem:[%s657_s25 + $0x40] sm:$0xff] %v388_v59  ;;  %453 = vst [vmem:[%s657_s25 + $0x48] sm:$0xff] %v389_v60  ;;  %v261_v10 = vmul.f32 %v624_v0, %v190_v56  ;;  %v262_v11 = vmul.f32 %v624_v0, %v191_v57  ;;  %v207_v59 = vld [vmem:[%s629_s20 + $0x108] sm:$0xff]  ;;  %v208_v60 = vld [vmem:[%s629_s20 + $0x110] sm:$0xff] }
  0x1c   : > { %454 = vst [vmem:[%s657_s25 + $0x50] sm:$0xff] %v390_v61  ;;  %v394_v9 = vmax.f32 %v330_v62, 0.0  ;;  %v263_v12 = vmul.f32 %v624_v0, %v192_v58  ;;  %455 = vst [vmem:[%s657_s25 + $0x58] sm:$0xff] %v391_v4  ;;  %v264_v15 = vmul.f32 %v624_v0, %v193_v63  ;;  %v265_v16 = vmul.f32 %v624_v0, %v194_v2  ;;  %v206_v58 = vld [vmem:[%s629_s20 + $0x100] sm:$0xff] }
  0x1d   : > { %456 = vst [vmem:[%s657_s25 + $0x60] sm:$0xff] %v392_v5  ;;  %457 = vst [vmem:[%s657_s25 + $0x68] sm:$0xff] %v393_v6  ;;  %v395_v14 = vmax.f32 %v331_v7, 0.0  ;;  %v266_v17 = vmul.f32 %v624_v0, %v195_v3  ;;  %v332_v18 = vadd.f32 %v634_v1, %v261_v10  ;;  %v333_v19 = vadd.f32 %v634_v1, %v262_v11  ;;  %v209_v3 = vld [vmem:[%s629_s20 + $0x118] sm:$0xff]  ;;  %v210_v4 = vld [vmem:[%s629_s20 + $0x120] sm:$0xff] }
  0x1e   : > { %458 = vst [vmem:[%s657_s25 + $0x70] sm:$0xff] %v394_v9  ;;  %v334_v20 = vadd.f32 %v634_v1, %v263_v12  ;;  %v267_v21 = vmul.f32 %v624_v0, %v196_v8  ;;  %v335_v22 = vadd.f32 %v634_v1, %v264_v15  ;;  %v336_v23 = vadd.f32 %v634_v1, %v265_v16  ;;  %v211_v5 = vld [vmem:[%s629_s20 + $0x128] sm:$0xff]  ;;  %v212_v10 = vld [vmem:[%s629_s20 + $0x130] sm:$0xff]  ;;  %v213_v15 = vld [vmem:[%s629_s20 + $0x138] sm:$0xff] }
  0x1f   : > { %459 = vst [vmem:[%s657_s25 + $0x78] sm:$0xff] %v395_v14  ;;  %v337_v24 = vadd.f32 %v634_v1, %v266_v17  ;;  %v268_v25 = vmul.f32 %v624_v0, %v197_v13  ;;  %v396_v29 = vmax.f32 %v332_v18, 0.0  ;;  %v397_v30 = vmax.f32 %v333_v19, 0.0 }
  0x20   : > { %v398_v31 = vmax.f32 %v334_v20, 0.0  ;;  %v338_v32 = vadd.f32 %v634_v1, %v267_v21  ;;  %v399_v36 = vmax.f32 %v335_v22, 0.0  ;;  %v400_v37 = vmax.f32 %v336_v23, 0.0 }
  0x21   : > { %v401_v38 = vmax.f32 %v337_v24, 0.0  ;;  %v339_v39 = vadd.f32 %v634_v1, %v268_v25  ;;  %460 = vst [vmem:[%s657_s25 + $0x80] sm:$0xff] %v396_v29  ;;  %461 = vst [vmem:[%s657_s25 + $0x88] sm:$0xff] %v397_v30  ;;  %v269_v42 = vmul.f32 %v624_v0, %v198_v26  ;;  %v270_v43 = vmul.f32 %v624_v0, %v199_v27  ;;  %v215_v29 = vld [vmem:[%s629_s20 + $0x148] sm:$0xff]  ;;  %v216_v30 = vld [vmem:[%s629_s20 + $0x150] sm:$0xff] }
  0x22   : > { %462 = vst [vmem:[%s657_s25 + $0x90] sm:$0xff] %v398_v31  ;;  %v402_v41 = vmax.f32 %v338_v32, 0.0  ;;  %v271_v44 = vmul.f32 %v624_v0, %v200_v28  ;;  %463 = vst [vmem:[%s657_s25 + $0x98] sm:$0xff] %v399_v36  ;;  %v272_v47 = vmul.f32 %v624_v0, %v201_v33  ;;  %v273_v48 = vmul.f32 %v624_v0, %v202_v34  ;;  %v214_v28 = vld [vmem:[%s629_s20 + $0x140] sm:$0xff] }
  0x23   : > { %464 = vst [vmem:[%s657_s25 + $0xa0] sm:$0xff] %v400_v37  ;;  %465 = vst [vmem:[%s657_s25 + $0xa8] sm:$0xff] %v401_v38  ;;  %v403_v46 = vmax.f32 %v339_v39, 0.0  ;;  %v274_v49 = vmul.f32 %v624_v0, %v203_v35  ;;  %v340_v50 = vadd.f32 %v634_v1, %v269_v42  ;;  %v341_v51 = vadd.f32 %v634_v1, %v270_v43  ;;  %v217_v35 = vld [vmem:[%s629_s20 + $0x158] sm:$0xff]  ;;  %v218_v36 = vld [vmem:[%s629_s20 + $0x160] sm:$0xff] }
  0x24   : > { %466 = vst [vmem:[%s657_s25 + $0xb0] sm:$0xff] %v402_v41  ;;  %v342_v52 = vadd.f32 %v634_v1, %v271_v44  ;;  %v275_v53 = vmul.f32 %v624_v0, %v204_v40  ;;  %v343_v54 = vadd.f32 %v634_v1, %v272_v47  ;;  %v344_v55 = vadd.f32 %v634_v1, %v273_v48  ;;  %v219_v37 = vld [vmem:[%s629_s20 + $0x168] sm:$0xff]  ;;  %v220_v42 = vld [vmem:[%s629_s20 + $0x170] sm:$0xff]  ;;  %v221_v47 = vld [vmem:[%s629_s20 + $0x178] sm:$0xff] }
  0x25   : > { %467 = vst [vmem:[%s657_s25 + $0xb8] sm:$0xff] %v403_v46  ;;  %v345_v56 = vadd.f32 %v634_v1, %v274_v49  ;;  %v276_v57 = vmul.f32 %v624_v0, %v205_v45  ;;  %v404_v61 = vmax.f32 %v340_v50, 0.0  ;;  %v405_v62 = vmax.f32 %v341_v51, 0.0 }
  0x26   : > { %v406_v63 = vmax.f32 %v342_v52, 0.0  ;;  %v346_v2 = vadd.f32 %v634_v1, %v275_v53  ;;  %v407_v6 = vmax.f32 %v343_v54, 0.0  ;;  %v408_v7 = vmax.f32 %v344_v55, 0.0 }
  0x27   : > { %v409_v8 = vmax.f32 %v345_v56, 0.0  ;;  %v347_v9 = vadd.f32 %v634_v1, %v276_v57  ;;  %468 = vst [vmem:[%s657_s25 + $0xc0] sm:$0xff] %v404_v61  ;;  %469 = vst [vmem:[%s657_s25 + $0xc8] sm:$0xff] %v405_v62  ;;  %v277_v12 = vmul.f32 %v624_v0, %v206_v58  ;;  %v278_v13 = vmul.f32 %v624_v0, %v207_v59  ;;  %v223_v61 = vld [vmem:[%s629_s20 + $0x188] sm:$0xff]  ;;  %v224_v62 = vld [vmem:[%s629_s20 + $0x190] sm:$0xff] }
  0x28   : > { %470 = vst [vmem:[%s657_s25 + $0xd0] sm:$0xff] %v406_v63  ;;  %v410_v11 = vmax.f32 %v346_v2, 0.0  ;;  %v279_v14 = vmul.f32 %v624_v0, %v208_v60  ;;  %471 = vst [vmem:[%s657_s25 + $0xd8] sm:$0xff] %v407_v6  ;;  %v280_v17 = vmul.f32 %v624_v0, %v209_v3  ;;  %v281_v18 = vmul.f32 %v624_v0, %v210_v4  ;;  %v222_v60 = vld [vmem:[%s629_s20 + $0x180] sm:$0xff] }
  0x29   : > { %472 = vst [vmem:[%s657_s25 + $0xe0] sm:$0xff] %v408_v7  ;;  %473 = vst [vmem:[%s657_s25 + $0xe8] sm:$0xff] %v409_v8  ;;  %v411_v16 = vmax.f32 %v347_v9, 0.0  ;;  %v282_v19 = vmul.f32 %v624_v0, %v211_v5  ;;  %v348_v20 = vadd.f32 %v634_v1, %v277_v12  ;;  %v349_v21 = vadd.f32 %v634_v1, %v278_v13  ;;  %v225_v5 = vld [vmem:[%s629_s20 + $0x198] sm:$0xff]  ;;  %v226_v6 = vld [vmem:[%s629_s20 + $0x1a0] sm:$0xff] }
  0x2a   : > { %474 = vst [vmem:[%s657_s25 + $0xf0] sm:$0xff] %v410_v11  ;;  %v350_v22 = vadd.f32 %v634_v1, %v279_v14  ;;  %v283_v23 = vmul.f32 %v624_v0, %v212_v10  ;;  %v351_v24 = vadd.f32 %v634_v1, %v280_v17  ;;  %v352_v25 = vadd.f32 %v634_v1, %v281_v18  ;;  %v227_v7 = vld [vmem:[%s629_s20 + $0x1a8] sm:$0xff]  ;;  %v228_v12 = vld [vmem:[%s629_s20 + $0x1b0] sm:$0xff]  ;;  %v229_v17 = vld [vmem:[%s629_s20 + $0x1b8] sm:$0xff] }
  0x2b   : > { %475 = vst [vmem:[%s657_s25 + $0xf8] sm:$0xff] %v411_v16  ;;  %v353_v26 = vadd.f32 %v634_v1, %v282_v19  ;;  %v284_v27 = vmul.f32 %v624_v0, %v213_v15  ;;  %v412_v31 = vmax.f32 %v348_v20, 0.0  ;;  %v413_v32 = vmax.f32 %v349_v21, 0.0 }
  0x2c   : > { %v414_v33 = vmax.f32 %v350_v22, 0.0  ;;  %v354_v34 = vadd.f32 %v634_v1, %v283_v23  ;;  %v415_v38 = vmax.f32 %v351_v24, 0.0  ;;  %v416_v39 = vmax.f32 %v352_v25, 0.0 }
  0x2d   : > { %v417_v40 = vmax.f32 %v353_v26, 0.0  ;;  %v355_v41 = vadd.f32 %v634_v1, %v284_v27  ;;  %476 = vst [vmem:[%s657_s25 + $0x100] sm:$0xff] %v412_v31  ;;  %477 = vst [vmem:[%s657_s25 + $0x108] sm:$0xff] %v413_v32  ;;  %v285_v44 = vmul.f32 %v624_v0, %v214_v28  ;;  %v286_v45 = vmul.f32 %v624_v0, %v215_v29  ;;  %v231_v31 = vld [vmem:[%s629_s20 + $0x1c8] sm:$0xff]  ;;  %v232_v32 = vld [vmem:[%s629_s20 + $0x1d0] sm:$0xff] }
  0x2e   : > { %478 = vst [vmem:[%s657_s25 + $0x110] sm:$0xff] %v414_v33  ;;  %v418_v43 = vmax.f32 %v354_v34, 0.0  ;;  %v287_v46 = vmul.f32 %v624_v0, %v216_v30  ;;  %479 = vst [vmem:[%s657_s25 + $0x118] sm:$0xff] %v415_v38  ;;  %v288_v49 = vmul.f32 %v624_v0, %v217_v35  ;;  %v289_v50 = vmul.f32 %v624_v0, %v218_v36  ;;  %v230_v30 = vld [vmem:[%s629_s20 + $0x1c0] sm:$0xff] }
  0x2f   : > { %480 = vst [vmem:[%s657_s25 + $0x120] sm:$0xff] %v416_v39  ;;  %481 = vst [vmem:[%s657_s25 + $0x128] sm:$0xff] %v417_v40  ;;  %v419_v48 = vmax.f32 %v355_v41, 0.0  ;;  %v290_v51 = vmul.f32 %v624_v0, %v219_v37  ;;  %v356_v52 = vadd.f32 %v634_v1, %v285_v44  ;;  %v357_v53 = vadd.f32 %v634_v1, %v286_v45  ;;  %v233_v37 = vld [vmem:[%s629_s20 + $0x1d8] sm:$0xff]  ;;  %v234_v38 = vld [vmem:[%s629_s20 + $0x1e0] sm:$0xff] }
  0x30   : > { %482 = vst [vmem:[%s657_s25 + $0x130] sm:$0xff] %v418_v43  ;;  %v358_v54 = vadd.f32 %v634_v1, %v287_v46  ;;  %v291_v55 = vmul.f32 %v624_v0, %v220_v42  ;;  %v359_v56 = vadd.f32 %v634_v1, %v288_v49  ;;  %v360_v57 = vadd.f32 %v634_v1, %v289_v50  ;;  %v235_v39 = vld [vmem:[%s629_s20 + $0x1e8] sm:$0xff]  ;;  %v236_v44 = vld [vmem:[%s629_s20 + $0x1f0] sm:$0xff]  ;;  %v237_v49 = vld [vmem:[%s629_s20 + $0x1f8] sm:$0xff] }
  0x31   : > { %483 = vst [vmem:[%s657_s25 + $0x138] sm:$0xff] %v419_v48  ;;  %v361_v58 = vadd.f32 %v634_v1, %v290_v51  ;;  %v292_v59 = vmul.f32 %v624_v0, %v221_v47  ;;  %v420_v63 = vmax.f32 %v356_v52, 0.0  ;;  %v421_v2 = vmax.f32 %v357_v53, 0.0 }
  0x32   : > { %v422_v3 = vmax.f32 %v358_v54, 0.0  ;;  %v362_v4 = vadd.f32 %v634_v1, %v291_v55  ;;  %v423_v8 = vmax.f32 %v359_v56, 0.0  ;;  %v424_v9 = vmax.f32 %v360_v57, 0.0 }
  0x33   : > { %v425_v10 = vmax.f32 %v361_v58, 0.0  ;;  %v363_v11 = vadd.f32 %v634_v1, %v292_v59  ;;  %484 = vst [vmem:[%s657_s25 + $0x140] sm:$0xff] %v420_v63  ;;  %485 = vst [vmem:[%s657_s25 + $0x148] sm:$0xff] %v421_v2  ;;  %v293_v14 = vmul.f32 %v624_v0, %v222_v60  ;;  %v294_v15 = vmul.f32 %v624_v0, %v223_v61 }
  0x34   : > { %486 = vst [vmem:[%s657_s25 + $0x150] sm:$0xff] %v422_v3  ;;  %v426_v13 = vmax.f32 %v362_v4, 0.0  ;;  %v295_v16 = vmul.f32 %v624_v0, %v224_v62  ;;  %487 = vst [vmem:[%s657_s25 + $0x158] sm:$0xff] %v423_v8  ;;  %v296_v19 = vmul.f32 %v624_v0, %v225_v5  ;;  %v297_v20 = vmul.f32 %v624_v0, %v226_v6 }
  0x35   : > { %488 = vst [vmem:[%s657_s25 + $0x160] sm:$0xff] %v424_v9  ;;  %489 = vst [vmem:[%s657_s25 + $0x168] sm:$0xff] %v425_v10  ;;  %v427_v18 = vmax.f32 %v363_v11, 0.0  ;;  %v298_v21 = vmul.f32 %v624_v0, %v227_v7  ;;  %v364_v22 = vadd.f32 %v634_v1, %v293_v14  ;;  %v365_v23 = vadd.f32 %v634_v1, %v294_v15 }
  0x36   : > { %490 = vst [vmem:[%s657_s25 + $0x170] sm:$0xff] %v426_v13  ;;  %v366_v24 = vadd.f32 %v634_v1, %v295_v16  ;;  %v299_v25 = vmul.f32 %v624_v0, %v228_v12  ;;  %v367_v26 = vadd.f32 %v634_v1, %v296_v19  ;;  %v368_v27 = vadd.f32 %v634_v1, %v297_v20 }
  0x37   : > { %491 = vst [vmem:[%s657_s25 + $0x178] sm:$0xff] %v427_v18  ;;  %v369_v28 = vadd.f32 %v634_v1, %v298_v21  ;;  %v300_v29 = vmul.f32 %v624_v0, %v229_v17  ;;  %v428_v33 = vmax.f32 %v364_v22, 0.0  ;;  %v429_v34 = vmax.f32 %v365_v23, 0.0 }
  0x38   : > { %v430_v35 = vmax.f32 %v366_v24, 0.0  ;;  %v370_v36 = vadd.f32 %v634_v1, %v299_v25  ;;  %v431_v40 = vmax.f32 %v367_v26, 0.0  ;;  %v432_v41 = vmax.f32 %v368_v27, 0.0 }
  0x39   : > { %v433_v42 = vmax.f32 %v369_v28, 0.0  ;;  %v371_v43 = vadd.f32 %v634_v1, %v300_v29  ;;  %492 = vst [vmem:[%s657_s25 + $0x180] sm:$0xff] %v428_v33  ;;  %493 = vst [vmem:[%s657_s25 + $0x188] sm:$0xff] %v429_v34  ;;  %v301_v46 = vmul.f32 %v624_v0, %v230_v30  ;;  %v302_v47 = vmul.f32 %v624_v0, %v231_v31 }
  0x3a   : > { %494 = vst [vmem:[%s657_s25 + $0x190] sm:$0xff] %v430_v35  ;;  %v434_v45 = vmax.f32 %v370_v36, 0.0  ;;  %v303_v48 = vmul.f32 %v624_v0, %v232_v32  ;;  %495 = vst [vmem:[%s657_s25 + $0x198] sm:$0xff] %v431_v40  ;;  %v304_v51 = vmul.f32 %v624_v0, %v233_v37  ;;  %v305_v52 = vmul.f32 %v624_v0, %v234_v38 }
  0x3b   : > { %496 = vst [vmem:[%s657_s25 + $0x1a0] sm:$0xff] %v432_v41  ;;  %497 = vst [vmem:[%s657_s25 + $0x1a8] sm:$0xff] %v433_v42  ;;  %v435_v50 = vmax.f32 %v371_v43, 0.0  ;;  %v306_v53 = vmul.f32 %v624_v0, %v235_v39  ;;  %v372_v54 = vadd.f32 %v634_v1, %v301_v46  ;;  %v373_v55 = vadd.f32 %v634_v1, %v302_v47 }
  0x3c   : > { %498 = vst [vmem:[%s657_s25 + $0x1b0] sm:$0xff] %v434_v45  ;;  %v374_v56 = vadd.f32 %v634_v1, %v303_v48  ;;  %v307_v57 = vmul.f32 %v624_v0, %v236_v44  ;;  %v375_v58 = vadd.f32 %v634_v1, %v304_v51  ;;  %v376_v59 = vadd.f32 %v634_v1, %v305_v52 }
  0x3d   : > { %499 = vst [vmem:[%s657_s25 + $0x1b8] sm:$0xff] %v435_v50  ;;  %v377_v60 = vadd.f32 %v634_v1, %v306_v53  ;;  %v308_v61 = vmul.f32 %v624_v0, %v237_v49  ;;  %v436_v62 = vmax.f32 %v372_v54, 0.0  ;;  %v437_v63 = vmax.f32 %v373_v55, 0.0 }
  0x3e   : > { %v438_v2 = vmax.f32 %v374_v56, 0.0  ;;  %v378_v3 = vadd.f32 %v634_v1, %v307_v57  ;;  %v439_v4 = vmax.f32 %v375_v58, 0.0  ;;  %v440_v5 = vmax.f32 %v376_v59, 0.0 }
  0x3f   : > { %v441_v6 = vmax.f32 %v377_v60, 0.0  ;;  %v379_v7 = vadd.f32 %v634_v1, %v308_v61  ;;  %500 = vst [vmem:[%s657_s25 + $0x1c0] sm:$0xff] %v436_v62  ;;  %501 = vst [vmem:[%s657_s25 + $0x1c8] sm:$0xff] %v437_v63 }
  0x40   : > { %502 = vst [vmem:[%s657_s25 + $0x1d0] sm:$0xff] %v438_v2  ;;  %v442_v8 = vmax.f32 %v378_v3, 0.0  ;;  %503 = vst [vmem:[%s657_s25 + $0x1d8] sm:$0xff] %v439_v4 }
  0x41   : > { %504 = vst [vmem:[%s657_s25 + $0x1e0] sm:$0xff] %v440_v5  ;;  %505 = vst [vmem:[%s657_s25 + $0x1e8] sm:$0xff] %v441_v6  ;;  %v443_v0 = vmax.f32 %v379_v7, 0.0 }
  0x42   : > { %506 = vst [vmem:[%s657_s25 + $0x1f0] sm:$0xff] %v442_v8 }
  0x43   : > { %507 = vst [vmem:[%s657_s25 + $0x1f8] sm:$0xff] %v443_v0 }
  0x44 PF: > { %s13_s12 = sadd.s32 1, %s591_s12  }
  0x45   : > { %p10_p4 = scmp.ge.s32.totalorder %s13_s12, 6  }
  0x47   :  { %12 = sbr.rel (!%p10_p4) target bundleno = 1 (0x1), region = 62 }

// kernel: local_enhancer_forward.30
= control target key start
LH: loop header
LB: loop body
LE: loop exit
PB: predicated region body
PF: predicated region fallthrough
CT: control target
= control target key end

     0   :  { %s1741_s15 = smov 0   ;;  %s2404_s0 = inlined_call_operand.vmem [shape: bf16[2048,245], index: 0, kind: input, shape index: {}]   ;;  %s2405_s1 = inlined_call_operand.vmem [shape: bf16[245,128], index: 1, kind: input, shape index: {}]   ;;  %s2406_s2 = inlined_call_operand.vmem [shape: f32[2048,128], index: 2, kind: output, shape index: {0}]   ;;  %s2407_s3 = inlined_call_operand.vmem [shape: f32[1,128], index: 3, kind: output, shape index: {1}]   ;;  %s2408_s4 = inlined_call_operand.vmem [shape: f32[1,128], index: 4, kind: output, shape index: {2}]  }
   0x1 LB: > { %s1747_s16 = sadd.s32 4294967295, %s1711_s15   ;;  %p1427_p0 = scmp.ge.s32.totalorder %s1711_s15, 1  ;;  %s1711_s15 = sphi %s1741_s15, %s15_s15  }
   0x2   : > { %p159_p1 = scmp.lt.s32.totalorder %s1711_s15, 5 }
   0x4   : > { %p160_p2 = pnand %p1427_p0, %p159_p1 }
   0x6   : > { %163 = sbr.rel (%p160_p2) target bundleno = 558 (0x22e), region = 28 }
   0xb   : > { %v1593_v0 = vld [vmem:[%s2405_s1 + $0x38] sm:$0xff]   ;;  %v1713_v1 = vmov 0   ;;  %v1594_v2 = vld [vmem:[%s2405_s1 + $0x30] sm:$0xff]   ;;  %v1595_v3 = vld [vmem:[%s2405_s1 + $0x28] sm:$0xff]   ;;  %s1428_s23 = sshll.u32 %s1747_s16, 6  ;;  %vm676_vm0 = vcmask 957440  }
   0xc   : > { %780 = vmatprep.subr.bf16.mxu0 %v1713_v1  ;;  %1550 = vmatprep.subr.bf16.mxu1 %v1713_v1  ;;  %p187_p3 = scmp.lt.s32.totalorder %s1428_s23, 255  ;;  %v1596_v4 = vld [vmem:[%s2405_s1 + $0x20] sm:$0xff]   ;;  %v1597_v5 = vld [vmem:[%s2405_s1 + $0x18] sm:$0xff]   ;;  %v1598_v7 = vld [vmem:[%s2405_s1 + $0x10] sm:$0xff]   ;;  %vm773_vm1 = vcmask 1041408   ;;  %vm774_vm2 = vcmask 1042432  }
   0xd   : > { %781 = vmatpush1.bf16.msra.mxu0 %v1593_v0  ;;  %1566 = vmatpush1.bf16.msra.mxu1 %v1593_v0  ;;  %v1599_v9 = vld [vmem:[%s2405_s1 + $0x8] sm:$0xff]   ;;  %v1714_v10 = vmov 65535   ;;  %v1600_v12 = vld [vmem:[%s2405_s1] sm:$0xff]   ;;  %v1601_v13 = vld [vmem:[%s2405_s1 + $0x78] ss:$0 sps:$4 sm:$0x77]  }
   0xe   : > { %782 = vmatprep.subr.bf16.mxu0 %v1713_v1  ;;  %1551 = vmatprep.subr.bf16.mxu1 %v1713_v1  ;;  %s2458_s23 = smov (!%p187_p3, %s1428_s23), 255  ;;  %v775_v11 = vsel %vm773_vm1, 4294967295, %v1714_v10  ;;  %v1602_v16 = vld [vmem:[%s2405_s1 + $0x70] sm:$0xff]   ;;  %v1603_v17 = vld [vmem:[%s2405_s1 + $0x68] sm:$0xff]   ;;  %v1604_v18 = vld [vmem:[%s2405_s1 + $0x60] sm:$0xff]   ;;  %p1545_p4 = scmp.ne.s32.totalorder %s1747_s16, 0 }
   0xf   : > { %s1549_s26 = sshll.u32 %s2458_s23, 3  ;;  %v776_v14 = vsel %vm774_vm2, %v775_v11, 0  ;;  %v1605_v19 = vld [vmem:[%s2405_s1 + $0x58] sm:$0xff]   ;;  %v1606_v20 = vld [vmem:[%s2405_s1 + $0x50] sm:$0xff]   ;;  %v1607_v21 = vld [vmem:[%s2405_s1 + $0x48] sm:$0xff]  }
  0x10   : > { %s1780_s29 = scalar_lea.vmem %s2404_s0, %s1549_s26  ;;  %v778_v15 = vand.u32 %v1601_v13, %v776_v14  ;;  %v1608_v22 = vld [vmem:[%s2405_s1 + $0x40] sm:$0xff]   ;;  %s1943_s9 = scalar_lea.vmem %s2406_s2, %s1549_s26 }
  0x11   : > { %783 = vmatpush1.bf16.msra.mxu0 %v1594_v2  ;;  %1567 = vmatpush1.bf16.msra.mxu1 %v1594_v2  ;;  %v1611_v6 = vld [vmem:[%s1780_s29 + $0x4] ss:$8 sps:$4 sm:$0xff]   ;;  %v1609_v23 = vld [vmem:[%s1780_s29] ss:$8 sps:$4 sm:$0xff]   ;;  %v1615_v25 = vld [vmem:[%s1780_s29 + $0x14] ss:$8 sps:$4 sm:$0xff]  }
  0x12   : > { %784 = vmatprep.subr.bf16.mxu0 %v1713_v1  ;;  %1552 = vmatprep.subr.bf16.mxu1 %v1713_v1  ;;  %v1614_v8 = vld [vmem:[%s1780_s29 + $0x104] ss:$8 sps:$4 sm:$0xff]   ;;  %v1612_v24 = vld [vmem:[%s1780_s29 + $0x100] ss:$8 sps:$4 sm:$0xff]   ;;  %v1617_v26 = vld [vmem:[%s1780_s29 + $0x114] ss:$8 sps:$4 sm:$0xff]  }
  0x13   : > { %1513 = vmatprep.mubr.msk.bf16.mxu0 %vm676_vm0, %v1611_v6  ;;  %1529 = vmatprep.mubr.msk.bf16.mxu1 %vm676_vm0, %v1614_v8  ;;  %v1619_v27 = vld [vmem:[%s1780_s29 + $0x10] ss:$8 sps:$4 sm:$0xff]   ;;  %v1621_v29 = vld [vmem:[%s1780_s29 + $0x24] ss:$8 sps:$4 sm:$0xff]   ;;  %v1625_v31 = vld [vmem:[%s1780_s29 + $0x20] ss:$8 sps:$4 sm:$0xff]  }
  0x14   : > { %v1620_v28 = vld [vmem:[%s1780_s29 + $0x110] ss:$8 sps:$4 sm:$0xff]   ;;  %v1623_v30 = vld [vmem:[%s1780_s29 + $0x124] ss:$8 sps:$4 sm:$0xff]   ;;  %v1626_v32 = vld [vmem:[%s1780_s29 + $0x120] ss:$8 sps:$4 sm:$0xff]  }
  0x15   : > { %785 = vmatpush1.bf16.msra.mxu0 %v1595_v3  ;;  %1568 = vmatpush1.bf16.msra.mxu1 %v1595_v3  ;;  %v1627_v33 = vld [vmem:[%s1780_s29 + $0x34] ss:$8 sps:$4 sm:$0xff]   ;;  %v1631_v35 = vld [vmem:[%s1780_s29 + $0x30] ss:$8 sps:$4 sm:$0xff]   ;;  %v1633_v37 = vld [vmem:[%s1780_s29 + $0x44] ss:$8 sps:$4 sm:$0xff]  }
  0x16   : > { %786 = vmatprep.subr.bf16.mxu0 %v1713_v1  ;;  %1553 = vmatprep.subr.bf16.mxu1 %v1713_v1  ;;  %v1629_v34 = vld [vmem:[%s1780_s29 + $0x134] ss:$8 sps:$4 sm:$0xff]   ;;  %v1632_v36 = vld [vmem:[%s1780_s29 + $0x130] ss:$8 sps:$4 sm:$0xff]   ;;  %v1635_v38 = vld [vmem:[%s1780_s29 + $0x144] ss:$8 sps:$4 sm:$0xff]  }
  0x17   : > { %v1637_v39 = vld [vmem:[%s1780_s29 + $0x40] ss:$8 sps:$4 sm:$0xff]   ;;  %v1639_v41 = vld [vmem:[%s1780_s29 + $0x54] ss:$8 sps:$4 sm:$0xff]   ;;  %v1643_v43 = vld [vmem:[%s1780_s29 + $0x50] ss:$8 sps:$4 sm:$0xff]  }
  0x18   : > { %v1638_v40 = vld [vmem:[%s1780_s29 + $0x140] ss:$8 sps:$4 sm:$0xff]   ;;  %v1641_v42 = vld [vmem:[%s1780_s29 + $0x154] ss:$8 sps:$4 sm:$0xff]   ;;  %v1644_v44 = vld [vmem:[%s1780_s29 + $0x150] ss:$8 sps:$4 sm:$0xff]  }
  0x19   : > { %787 = vmatpush1.bf16.msra.mxu0 %v1596_v4  ;;  %1569 = vmatpush1.bf16.msra.mxu1 %v1596_v4  ;;  %v1645_v45 = vld [vmem:[%s1780_s29 + $0x64] ss:$8 sps:$4 sm:$0xff]   ;;  %v1649_v47 = vld [vmem:[%s1780_s29 + $0x60] ss:$8 sps:$4 sm:$0xff]   ;;  %v1651_v49 = vld [vmem:[%s1780_s29 + $0x74] ss:$8 sps:$4 sm:$0xff]  }
  0x1a   : > { %788 = vmatprep.subr.bf16.mxu0 %v1713_v1  ;;  %1554 = vmatprep.subr.bf16.mxu1 %v1713_v1  ;;  %v1647_v46 = vld [vmem:[%s1780_s29 + $0x164] ss:$8 sps:$4 sm:$0xff]   ;;  %v1650_v48 = vld [vmem:[%s1780_s29 + $0x160] ss:$8 sps:$4 sm:$0xff]   ;;  %v1653_v50 = vld [vmem:[%s1780_s29 + $0x174] ss:$8 sps:$4 sm:$0xff]  }
  0x1b   : > { %v1655_v51 = vld [vmem:[%s1780_s29 + $0x70] ss:$8 sps:$4 sm:$0xff]   ;;  %v1657_v53 = vld [vmem:[%s1780_s29 + $0x84] ss:$8 sps:$4 sm:$0xff]   ;;  %v1661_v55 = vld [vmem:[%s1780_s29 + $0x80] ss:$8 sps:$4 sm:$0xff]  }
  0x1c   : > { %v1656_v52 = vld [vmem:[%s1780_s29 + $0x170] ss:$8 sps:$4 sm:$0xff]   ;;  %v1659_v54 = vld [vmem:[%s1780_s29 + $0x184] ss:$8 sps:$4 sm:$0xff]   ;;  %v1662_v56 = vld [vmem:[%s1780_s29 + $0x180] ss:$8 sps:$4 sm:$0xff]  }
  0x1d   : > { %789 = vmatpush1.bf16.msra.mxu0 %v1597_v5  ;;  %1570 = vmatpush1.bf16.msra.mxu1 %v1597_v5  ;;  %v1663_v57 = vld [vmem:[%s1780_s29 + $0x94] ss:$8 sps:$4 sm:$0xff]   ;;  %v1667_v59 = vld [vmem:[%s1780_s29 + $0x90] ss:$8 sps:$4 sm:$0xff]   ;;  %v1669_v61 = vld [vmem:[%s1780_s29 + $0xa4] ss:$8 sps:$4 sm:$0xff]  }
  0x1e   : > { %790 = vmatprep.subr.bf16.mxu0 %v1713_v1  ;;  %1555 = vmatprep.subr.bf16.mxu1 %v1713_v1  ;;  %v1665_v58 = vld [vmem:[%s1780_s29 + $0x194] ss:$8 sps:$4 sm:$0xff]   ;;  %v1668_v60 = vld [vmem:[%s1780_s29 + $0x190] ss:$8 sps:$4 sm:$0xff]   ;;  %v1671_v62 = vld [vmem:[%s1780_s29 + $0x1a4] ss:$8 sps:$4 sm:$0xff]  }
  0x1f   : > { %v1673_v63 = vld [vmem:[%s1780_s29 + $0xa0] ss:$8 sps:$4 sm:$0xff]   ;;  %v1677_v2 = vld [vmem:[%s1780_s29 + $0x1b4] ss:$8 sps:$4 sm:$0xff]   ;;  %v1679_v3 = vld [vmem:[%s1780_s29 + $0xb0] ss:$8 sps:$4 sm:$0xff]  }
  0x20   : > { %v1674_v0 = vld [vmem:[%s1780_s29 + $0x1a0] ss:$8 sps:$4 sm:$0xff]   ;;  %v1680_v4 = vld [vmem:[%s1780_s29 + $0x1b0] ss:$8 sps:$4 sm:$0xff]   ;;  %v1681_v5 = vld [vmem:[%s1780_s29 + $0xc4] ss:$8 sps:$4 sm:$0xff]  }
  0x21   : > { %791 = vmatpush1.bf16.msra.mxu0 %v1598_v7  ;;  %1571 = vmatpush1.bf16.msra.mxu1 %v1598_v7  ;;  %v1683_v6 = vld [vmem:[%s1780_s29 + $0x1c4] ss:$8 sps:$4 sm:$0xff]   ;;  %v1685_v7 = vld [vmem:[%s1780_s29 + $0xc0] ss:$8 sps:$4 sm:$0xff]   ;;  %v1689_v10 = vld [vmem:[%s1780_s29 + $0x1d4] ss:$8 sps:$4 sm:$0xff]  }
  0x22   : > { %792 = vmatprep.subr.bf16.mxu0 %v1713_v1  ;;  %1556 = vmatprep.subr.bf16.mxu1 %v1713_v1  ;;  %v1686_v8 = vld [vmem:[%s1780_s29 + $0x1c0] ss:$8 sps:$4 sm:$0xff]   ;;  %v1691_v11 = vld [vmem:[%s1780_s29 + $0xd0] ss:$8 sps:$4 sm:$0xff]   ;;  %v1693_v13 = vld [vmem:[%s1780_s29 + $0xe4] ss:$8 sps:$4 sm:$0xff]  }
  0x23   : > { %v1695_v14 = vld [vmem:[%s1780_s29 + $0x1e4] ss:$8 sps:$4 sm:$0xff]  }
  0x25   : > { %793 = vmatpush1.bf16.msra.mxu0 %v1599_v9  ;;  %1572 = vmatpush1.bf16.msra.mxu1 %v1599_v9  ;;  %v1687_v9 = vld [vmem:[%s1780_s29 + $0xd4] ss:$8 sps:$4 sm:$0xff]  }
  0x26   : > { %794 = vmatprep.subr.bf16.mxu0 %v1713_v1  ;;  %1557 = vmatprep.subr.bf16.mxu1 %v1713_v1 }
  0x29   : > { %795 = vmatpush1.bf16.msra.mxu0 %v1600_v12  ;;  %1573 = vmatpush1.bf16.msra.mxu1 %v1600_v12  ;;  %v1692_v12 = vld [vmem:[%s1780_s29 + $0x1d0] ss:$8 sps:$4 sm:$0xff]  }
  0x2a   : > { %796 = vmatprep.subr.bf16.mxu0 %v1713_v1  ;;  %1558 = vmatprep.subr.bf16.mxu1 %v1713_v1 }
  0x2d   : > { %797 = vmatpush2.bf16.msra.mxu0 %v778_v15  ;;  %1574 = vmatpush2.bf16.msra.mxu1 %v778_v15  ;;  %v1697_v15 = vld [vmem:[%s1780_s29 + $0xe0] ss:$8 sps:$4 sm:$0xff]  }
  0x2e   : > { %798 = vmatprep.subr.bf16.mxu0 %v1713_v1  ;;  %1559 = vmatprep.subr.bf16.mxu1 %v1713_v1 }
  0x31   : > { %799 = vmatpush2.bf16.msra.mxu0 %v1602_v16  ;;  %1575 = vmatpush2.bf16.msra.mxu1 %v1602_v16  ;;  %v1698_v16 = vld [vmem:[%s1780_s29 + $0x1e0] ss:$8 sps:$4 sm:$0xff]  }
  0x32   : > { %800 = vmatprep.subr.bf16.mxu0 %v1713_v1  ;;  %1560 = vmatprep.subr.bf16.mxu1 %v1713_v1 }
  0x35   : > { %801 = vmatpush2.bf16.msra.mxu0 %v1603_v17  ;;  %1576 = vmatpush2.bf16.msra.mxu1 %v1603_v17  ;;  %v1699_v17 = vld [vmem:[%s1780_s29 + $0xf4] ss:$8 sps:$4 sm:$0xff]  }
  0x36   : > { %802 = vmatprep.subr.bf16.mxu0 %v1713_v1  ;;  %1561 = vmatprep.subr.bf16.mxu1 %v1713_v1 }
  0x39   : > { %803 = vmatpush2.bf16.msra.mxu0 %v1604_v18  ;;  %1577 = vmatpush2.bf16.msra.mxu1 %v1604_v18  ;;  %v1701_v18 = vld [vmem:[%s1780_s29 + $0x1f4] ss:$8 sps:$4 sm:$0xff]  }
  0x3a   : > { %804 = vmatprep.subr.bf16.mxu0 %v1713_v1  ;;  %1562 = vmatprep.subr.bf16.mxu1 %v1713_v1 }
  0x3d   : > { %805 = vmatpush2.bf16.msra.mxu0 %v1605_v19  ;;  %1578 = vmatpush2.bf16.msra.mxu1 %v1605_v19  ;;  %v1703_v19 = vld [vmem:[%s1780_s29 + $0xf0] ss:$8 sps:$4 sm:$0xff]  }
  0x3e   : > { %806 = vmatprep.subr.bf16.mxu0 %v1713_v1  ;;  %1563 = vmatprep.subr.bf16.mxu1 %v1713_v1 }
  0x41   : > { %807 = vmatpush2.bf16.msra.mxu0 %v1606_v20  ;;  %1579 = vmatpush2.bf16.msra.mxu1 %v1606_v20  ;;  %v1704_v20 = vld [vmem:[%s1780_s29 + $0x1f0] ss:$8 sps:$4 sm:$0xff]  }
  0x42   : > { %808 = vmatprep.subr.bf16.mxu0 %v1713_v1  ;;  %1564 = vmatprep.subr.bf16.mxu1 %v1713_v1 }
  0x45   : > { %809 = vmatpush2.bf16.msra.mxu0 %v1607_v21  ;;  %1580 = vmatpush2.bf16.msra.mxu1 %v1607_v21 }
  0x46   : > { %810 = vmatprep.subr.bf16.mxu0 %v1713_v1  ;;  %1565 = vmatprep.subr.bf16.mxu1 %v1713_v1  ;;  %v1675_v1 = vld [vmem:[%s1780_s29 + $0xb4] ss:$8 sps:$4 sm:$0xff]  }
  0x49   : > { %811 = vmatpush2.bf16.msra.mxu0 %v1608_v22  ;;  %1581 = vmatpush2.bf16.msra.mxu1 %v1608_v22 }
  0x4c   : > { %813 = vmatmul.mubr.bf16.vlgmr.msra.gmra.mxu0 %v1609_v23  ;;  %941 = vmatmul.mubr.bf16.vlgmr.msra.gmra.mxu1 %v1612_v24 }
  0x4d   : > { %1514 = vmatprep.mubr.msk.bf16.mxu0 %vm676_vm0, %v1615_v25  ;;  %1530 = vmatprep.mubr.msk.bf16.mxu1 %vm676_vm0, %v1617_v26 }
  0x54   : > { %821 = vmatmul.mubr.bf16.gmra.mxu0 %v1619_v27  ;;  %949 = vmatmul.mubr.bf16.gmra.mxu1 %v1620_v28 }
  0x55   : > { %1515 = vmatprep.mubr.msk.bf16.mxu0 %vm676_vm0, %v1621_v29  ;;  %1531 = vmatprep.mubr.msk.bf16.mxu1 %vm676_vm0, %v1623_v30 }
  0x5c   : > { %829 = vmatmul.mubr.bf16.gmra.mxu0 %v1625_v31  ;;  %957 = vmatmul.mubr.bf16.gmra.mxu1 %v1626_v32 }
  0x5d   : > { %1516 = vmatprep.mubr.msk.bf16.mxu0 %vm676_vm0, %v1627_v33  ;;  %1532 = vmatprep.mubr.msk.bf16.mxu1 %vm676_vm0, %v1629_v34 }
  0x64   : > { %837 = vmatmul.mubr.bf16.gmra.mxu0 %v1631_v35  ;;  %965 = vmatmul.mubr.bf16.gmra.mxu1 %v1632_v36 }
  0x65   : > { %1517 = vmatprep.mubr.msk.bf16.mxu0 %vm676_vm0, %v1633_v37  ;;  %1533 = vmatprep.mubr.msk.bf16.mxu1 %vm676_vm0, %v1635_v38 }
  0x6c   : > { %845 = vmatmul.mubr.bf16.gmra.mxu0 %v1637_v39  ;;  %973 = vmatmul.mubr.bf16.gmra.mxu1 %v1638_v40 }
  0x6d   : > { %1518 = vmatprep.mubr.msk.bf16.mxu0 %vm676_vm0, %v1639_v41  ;;  %1534 = vmatprep.mubr.msk.bf16.mxu1 %vm676_vm0, %v1641_v42 }
  0x74   : > { %853 = vmatmul.mubr.bf16.gmra.mxu0 %v1643_v43  ;;  %981 = vmatmul.mubr.bf16.gmra.mxu1 %v1644_v44 }
  0x75   : > { %1519 = vmatprep.mubr.msk.bf16.mxu0 %vm676_vm0, %v1645_v45  ;;  %1535 = vmatprep.mubr.msk.bf16.mxu1 %vm676_vm0, %v1647_v46 }
  0x7c   : > { %861 = vmatmul.mubr.bf16.gmra.mxu0 %v1649_v47  ;;  %989 = vmatmul.mubr.bf16.gmra.mxu1 %v1650_v48 }
  0x7d   : > { %1520 = vmatprep.mubr.msk.bf16.mxu0 %vm676_vm0, %v1651_v49  ;;  %1536 = vmatprep.mubr.msk.bf16.mxu1 %vm676_vm0, %v1653_v50 }
  0x84   : > { %869 = vmatmul.mubr.bf16.gmra.mxu0 %v1655_v51  ;;  %997 = vmatmul.mubr.bf16.gmra.mxu1 %v1656_v52 }
  0x85   : > { %1521 = vmatprep.mubr.msk.bf16.mxu0 %vm676_vm0, %v1657_v53  ;;  %1537 = vmatprep.mubr.msk.bf16.mxu1 %vm676_vm0, %v1659_v54 }
  0x8c   : > { %877 = vmatmul.mubr.bf16.gmra.mxu0 %v1661_v55  ;;  %1005 = vmatmul.mubr.bf16.gmra.mxu1 %v1662_v56 }
  0x8d   : > { %1522 = vmatprep.mubr.msk.bf16.mxu0 %vm676_vm0, %v1663_v57  ;;  %1538 = vmatprep.mubr.msk.bf16.mxu1 %vm676_vm0, %v1665_v58 }
  0x94   : > { %885 = vmatmul.mubr.bf16.gmra.mxu0 %v1667_v59  ;;  %1013 = vmatmul.mubr.bf16.gmra.mxu1 %v1668_v60 }
  0x95   : > { %1523 = vmatprep.mubr.msk.bf16.mxu0 %vm676_vm0, %v1669_v61  ;;  %1539 = vmatprep.mubr.msk.bf16.mxu1 %vm676_vm0, %v1671_v62 }
  0x9c   : > { %893 = vmatmul.mubr.bf16.gmra.mxu0 %v1673_v63  ;;  %1021 = vmatmul.mubr.bf16.gmra.mxu1 %v1674_v0 }
  0x9d   : > { %1524 = vmatprep.mubr.msk.bf16.mxu0 %vm676_vm0, %v1675_v1  ;;  %1540 = vmatprep.mubr.msk.bf16.mxu1 %vm676_vm0, %v1677_v2 }
  0xa4   : > { %901 = vmatmul.mubr.bf16.gmra.mxu0 %v1679_v3  ;;  %1029 = vmatmul.mubr.bf16.gmra.mxu1 %v1680_v4 }
  0xa5   : > { %1525 = vmatprep.mubr.msk.bf16.mxu0 %vm676_vm0, %v1681_v5  ;;  %1541 = vmatprep.mubr.msk.bf16.mxu1 %vm676_vm0, %v1683_v6 }
  0xac   : > { %909 = vmatmul.mubr.bf16.gmra.mxu0 %v1685_v7  ;;  %1037 = vmatmul.mubr.bf16.gmra.mxu1 %v1686_v8 }
  0xad   : > { %1526 = vmatprep.mubr.msk.bf16.mxu0 %vm676_vm0, %v1687_v9  ;;  %1542 = vmatprep.mubr.msk.bf16.mxu1 %vm676_vm0, %v1689_v10 }
  0xb4   : > { %917 = vmatmul.mubr.bf16.gmra.mxu0 %v1691_v11  ;;  %1045 = vmatmul.mubr.bf16.gmra.mxu1 %v1692_v12 }
  0xb5   : > { %1527 = vmatprep.mubr.msk.bf16.mxu0 %vm676_vm0, %v1693_v13  ;;  %1543 = vmatprep.mubr.msk.bf16.mxu1 %vm676_vm0, %v1695_v14 }
  0xbc   : > { %925 = vmatmul.mubr.bf16.gmra.mxu0 %v1697_v15  ;;  %1053 = vmatmul.mubr.bf16.gmra.mxu1 %v1698_v16 }
  0xbd   : > { %1528 = vmatprep.mubr.msk.bf16.mxu0 %vm676_vm0, %v1699_v17  ;;  %1544 = vmatprep.mubr.msk.bf16.mxu1 %vm676_vm0, %v1701_v18 }
  0xc4   : > { %933 = vmatmul.mubr.bf16.gmra.mxu0 %v1703_v19  ;;  %1061 = vmatmul.mubr.bf16.gmra.mxu1 %v1704_v20 }
 0x10c   : > { %v1945_v21 = vpop.f32.mrf.mxu0  ;;  %v1947_v22 = vpop.f32.mrf.mxu1 }
 0x10d   : > { %1069 = vst [vmem:[%s1943_s9] sm:$0xff] %v1945_v21  ;;  %1101 = vst [vmem:[%s1943_s9 + $0x100] sm:$0xff] %v1947_v22 }
 0x10e   : > { %v816_v23 = vpop.f32.mrf.mxu0  ;;  %v944_v24 = vpop.f32.mrf.mxu1 }
 0x110   : > { %v1953_v25 = vpop.f32.mrf.mxu0  ;;  %v1955_v26 = vpop.f32.mrf.mxu1 }
 0x111   : > { %1070 = vst [vmem:[%s1943_s9 + $0x8] sm:$0xff] %v1953_v25  ;;  %1102 = vst [vmem:[%s1943_s9 + $0x108] sm:$0xff] %v1955_v26 }
 0x112   : > { %v819_v27 = vpop.f32.mrf.mxu0  ;;  %v947_v28 = vpop.f32.mrf.mxu1 }
 0x114   : > { %v1961_v29 = vpop.f32.mrf.mxu0  ;;  %v1963_v30 = vpop.f32.mrf.mxu1 }
 0x115   : > { %1071 = vst [vmem:[%s1943_s9 + $0x10] sm:$0xff] %v1961_v29  ;;  %1103 = vst [vmem:[%s1943_s9 + $0x110] sm:$0xff] %v1963_v30 }
 0x116   : > { %v824_v31 = vpop.f32.mrf.mxu0  ;;  %v952_v32 = vpop.f32.mrf.mxu1 }
 0x118   : > { %v1969_v33 = vpop.f32.mrf.mxu0  ;;  %v1971_v34 = vpop.f32.mrf.mxu1 }
 0x119   : > { %1072 = vst [vmem:[%s1943_s9 + $0x18] sm:$0xff] %v1969_v33  ;;  %1104 = vst [vmem:[%s1943_s9 + $0x118] sm:$0xff] %v1971_v34 }
 0x11a   : > { %v827_v35 = vpop.f32.mrf.mxu0  ;;  %v955_v36 = vpop.f32.mrf.mxu1 }
 0x11c   : > { %v1977_v37 = vpop.f32.mrf.mxu0  ;;  %v1979_v38 = vpop.f32.mrf.mxu1 }
 0x11d   : > { %1073 = vst [vmem:[%s1943_s9 + $0x20] sm:$0xff] %v1977_v37  ;;  %1105 = vst [vmem:[%s1943_s9 + $0x120] sm:$0xff] %v1979_v38 }
 0x11e   : > { %v832_v39 = vpop.f32.mrf.mxu0  ;;  %v960_v40 = vpop.f32.mrf.mxu1 }
 0x120   : > { %v1985_v41 = vpop.f32.mrf.mxu0  ;;  %v1987_v42 = vpop.f32.mrf.mxu1 }
 0x121   : > { %1074 = vst [vmem:[%s1943_s9 + $0x28] sm:$0xff] %v1985_v41  ;;  %1106 = vst [vmem:[%s1943_s9 + $0x128] sm:$0xff] %v1987_v42 }
 0x122   : > { %v835_v43 = vpop.f32.mrf.mxu0  ;;  %v963_v44 = vpop.f32.mrf.mxu1 }
 0x124   : > { %v1993_v45 = vpop.f32.mrf.mxu0  ;;  %v1995_v46 = vpop.f32.mrf.mxu1 }
 0x125   : > { %1075 = vst [vmem:[%s1943_s9 + $0x30] sm:$0xff] %v1993_v45  ;;  %1107 = vst [vmem:[%s1943_s9 + $0x130] sm:$0xff] %v1995_v46 }
 0x126   : > { %v840_v47 = vpop.f32.mrf.mxu0  ;;  %v968_v48 = vpop.f32.mrf.mxu1 }
 0x128   : > { %v2001_v49 = vpop.f32.mrf.mxu0  ;;  %v2003_v50 = vpop.f32.mrf.mxu1 }
 0x129   : > { %1076 = vst [vmem:[%s1943_s9 + $0x38] sm:$0xff] %v2001_v49  ;;  %1108 = vst [vmem:[%s1943_s9 + $0x138] sm:$0xff] %v2003_v50 }
 0x12a   : > { %v843_v51 = vpop.f32.mrf.mxu0  ;;  %v971_v52 = vpop.f32.mrf.mxu1 }
 0x12c   : > { %v2009_v53 = vpop.f32.mrf.mxu0  ;;  %v2011_v54 = vpop.f32.mrf.mxu1 }
 0x12d   : > { %1077 = vst [vmem:[%s1943_s9 + $0x40] sm:$0xff] %v2009_v53  ;;  %1109 = vst [vmem:[%s1943_s9 + $0x140] sm:$0xff] %v2011_v54 }
 0x12e   : > { %v848_v55 = vpop.f32.mrf.mxu0  ;;  %v976_v56 = vpop.f32.mrf.mxu1 }
 0x130   : > { %v2017_v57 = vpop.f32.mrf.mxu0  ;;  %v2019_v58 = vpop.f32.mrf.mxu1 }
 0x131   : > { %1078 = vst [vmem:[%s1943_s9 + $0x48] sm:$0xff] %v2017_v57  ;;  %1110 = vst [vmem:[%s1943_s9 + $0x148] sm:$0xff] %v2019_v58 }
 0x132   : > { %v851_v59 = vpop.f32.mrf.mxu0  ;;  %v979_v60 = vpop.f32.mrf.mxu1 }
 0x134   : > { %v2025_v61 = vpop.f32.mrf.mxu0  ;;  %v2027_v62 = vpop.f32.mrf.mxu1 }
 0x135   : > { %1079 = vst [vmem:[%s1943_s9 + $0x50] sm:$0xff] %v2025_v61  ;;  %1111 = vst [vmem:[%s1943_s9 + $0x150] sm:$0xff] %v2027_v62 }
 0x136   : > { %v856_v63 = vpop.f32.mrf.mxu0  ;;  %v984_v0 = vpop.f32.mrf.mxu1 }
 0x138   : > { %v2033_v1 = vpop.f32.mrf.mxu0  ;;  %v2035_v2 = vpop.f32.mrf.mxu1 }
 0x139   : > { %1080 = vst [vmem:[%s1943_s9 + $0x58] sm:$0xff] %v2033_v1  ;;  %1112 = vst [vmem:[%s1943_s9 + $0x158] sm:$0xff] %v2035_v2 }
 0x13a   : > { %v859_v3 = vpop.f32.mrf.mxu0  ;;  %v987_v4 = vpop.f32.mrf.mxu1 }
 0x13c   : > { %v2041_v5 = vpop.f32.mrf.mxu0  ;;  %v2043_v6 = vpop.f32.mrf.mxu1 }
 0x13d   : > { %1081 = vst [vmem:[%s1943_s9 + $0x60] sm:$0xff] %v2041_v5  ;;  %1113 = vst [vmem:[%s1943_s9 + $0x160] sm:$0xff] %v2043_v6 }
 0x13e   : > { %v864_v7 = vpop.f32.mrf.mxu0  ;;  %v992_v8 = vpop.f32.mrf.mxu1 }
 0x140   : > { %v2049_v9 = vpop.f32.mrf.mxu0  ;;  %v2051_v10 = vpop.f32.mrf.mxu1 }
 0x141   : > { %1082 = vst [vmem:[%s1943_s9 + $0x68] sm:$0xff] %v2049_v9  ;;  %1114 = vst [vmem:[%s1943_s9 + $0x168] sm:$0xff] %v2051_v10 }
 0x142   : > { %v867_v11 = vpop.f32.mrf.mxu0  ;;  %v995_v12 = vpop.f32.mrf.mxu1 }
 0x144   : > { %v2057_v13 = vpop.f32.mrf.mxu0  ;;  %v2059_v14 = vpop.f32.mrf.mxu1 }
 0x145   : > { %1083 = vst [vmem:[%s1943_s9 + $0x70] sm:$0xff] %v2057_v13  ;;  %1115 = vst [vmem:[%s1943_s9 + $0x170] sm:$0xff] %v2059_v14 }
 0x146   : > { %v872_v15 = vpop.f32.mrf.mxu0  ;;  %v1000_v16 = vpop.f32.mrf.mxu1 }
 0x148   : > { %v2065_v17 = vpop.f32.mrf.mxu0  ;;  %v2067_v18 = vpop.f32.mrf.mxu1 }
 0x149   : > { %1084 = vst [vmem:[%s1943_s9 + $0x78] sm:$0xff] %v2065_v17  ;;  %1116 = vst [vmem:[%s1943_s9 + $0x178] sm:$0xff] %v2067_v18 }
 0x14a   : > { %v875_v19 = vpop.f32.mrf.mxu0  ;;  %v1003_v20 = vpop.f32.mrf.mxu1 }
 0x14c   : > { %v2073_v23 = vpop.f32.mrf.mxu0  ;;  %v2075_v24 = vpop.f32.mrf.mxu1 }
 0x14d   : > { %1085 = vst [vmem:[%s1943_s9 + $0x80] sm:$0xff] %v2073_v23  ;;  %1117 = vst [vmem:[%s1943_s9 + $0x180] sm:$0xff] %v2075_v24 }
 0x14e   : > { %v880_v27 = vpop.f32.mrf.mxu0  ;;  %v1008_v28 = vpop.f32.mrf.mxu1 }
 0x150   : > { %v2081_v31 = vpop.f32.mrf.mxu0  ;;  %v2083_v32 = vpop.f32.mrf.mxu1 }
 0x151   : > { %1086 = vst [vmem:[%s1943_s9 + $0x88] sm:$0xff] %v2081_v31  ;;  %1118 = vst [vmem:[%s1943_s9 + $0x188] sm:$0xff] %v2083_v32 }
 0x152   : > { %v883_v35 = vpop.f32.mrf.mxu0  ;;  %v1011_v36 = vpop.f32.mrf.mxu1 }
 0x154   : > { %v2089_v39 = vpop.f32.mrf.mxu0  ;;  %v2091_v40 = vpop.f32.mrf.mxu1 }
 0x155   : > { %1087 = vst [vmem:[%s1943_s9 + $0x90] sm:$0xff] %v2089_v39  ;;  %1119 = vst [vmem:[%s1943_s9 + $0x190] sm:$0xff] %v2091_v40 }
 0x156   : > { %v888_v43 = vpop.f32.mrf.mxu0  ;;  %v1016_v44 = vpop.f32.mrf.mxu1 }
 0x158   : > { %v2097_v47 = vpop.f32.mrf.mxu0  ;;  %v2099_v48 = vpop.f32.mrf.mxu1 }
 0x159   : > { %1088 = vst [vmem:[%s1943_s9 + $0x98] sm:$0xff] %v2097_v47  ;;  %1120 = vst [vmem:[%s1943_s9 + $0x198] sm:$0xff] %v2099_v48 }
 0x15a   : > { %v891_v51 = vpop.f32.mrf.mxu0  ;;  %v1019_v52 = vpop.f32.mrf.mxu1 }
 0x15c   : > { %v2105_v55 = vpop.f32.mrf.mxu0  ;;  %v2107_v56 = vpop.f32.mrf.mxu1 }
 0x15d   : > { %2433 = vst [vmem:[#allocation4_spill] sm:$0xff] %v2107_v56  ;;  %1089 = vst [vmem:[%s1943_s9 + $0xa0] sm:$0xff] %v2105_v55 }
 0x15e   : > { %1121 = vst [vmem:[%s1943_s9 + $0x1a0] sm:$0xff] %v2107_v56  ;;  %v896_v59 = vpop.f32.mrf.mxu0  ;;  %v1024_v60 = vpop.f32.mrf.mxu1 }
 0x160   : > { %v2113_v63 = vpop.f32.mrf.mxu0  ;;  %v2115_v0 = vpop.f32.mrf.mxu1 }
 0x161   : > { %2434 = vst [vmem:[#allocation5_spill] sm:$0xff] %v2115_v0  ;;  %1090 = vst [vmem:[%s1943_s9 + $0xa8] sm:$0xff] %v2113_v63 }
 0x162   : > { %1122 = vst [vmem:[%s1943_s9 + $0x1a8] sm:$0xff] %v2115_v0  ;;  %v899_v3 = vpop.f32.mrf.mxu0  ;;  %v1027_v4 = vpop.f32.mrf.mxu1 }
 0x164   : > { %v2121_v7 = vpop.f32.mrf.mxu0  ;;  %v2123_v8 = vpop.f32.mrf.mxu1 }
 0x165   : > { %2435 = vst [vmem:[#allocation6_spill] sm:$0xff] %v2123_v8  ;;  %1091 = vst [vmem:[%s1943_s9 + $0xb0] sm:$0xff] %v2121_v7 }
 0x166   : > { %1123 = vst [vmem:[%s1943_s9 + $0x1b0] sm:$0xff] %v2123_v8  ;;  %v904_v11 = vpop.f32.mrf.mxu0  ;;  %v1032_v12 = vpop.f32.mrf.mxu1 }
 0x168   : > { %v2129_v15 = vpop.f32.mrf.mxu0  ;;  %v2131_v16 = vpop.f32.mrf.mxu1 }
 0x169   : > { %2436 = vst [vmem:[#allocation7_spill] sm:$0xff] %v2131_v16  ;;  %1092 = vst [vmem:[%s1943_s9 + $0xb8] sm:$0xff] %v2129_v15 }
 0x16a   : > { %1124 = vst [vmem:[%s1943_s9 + $0x1b8] sm:$0xff] %v2131_v16  ;;  %v907_v19 = vpop.f32.mrf.mxu0  ;;  %v1035_v20 = vpop.f32.mrf.mxu1 }
 0x16c   : > { %v2137_v27 = vpop.f32.mrf.mxu0  ;;  %v2139_v28 = vpop.f32.mrf.mxu1 }
 0x16d   : > { %2437 = vst [vmem:[#allocation8_spill] sm:$0xff] %v2139_v28  ;;  %1093 = vst [vmem:[%s1943_s9 + $0xc0] sm:$0xff] %v2137_v27 }
 0x16e   : > { %1125 = vst [vmem:[%s1943_s9 + $0x1c0] sm:$0xff] %v2139_v28  ;;  %v912_v35 = vpop.f32.mrf.mxu0  ;;  %v1040_v36 = vpop.f32.mrf.mxu1 }
 0x170   : > { %v2145_v43 = vpop.f32.mrf.mxu0  ;;  %v2147_v44 = vpop.f32.mrf.mxu1 }
 0x171   : > { %2438 = vst [vmem:[#allocation9_spill] sm:$0xff] %v2147_v44  ;;  %1094 = vst [vmem:[%s1943_s9 + $0xc8] sm:$0xff] %v2145_v43 }
 0x172   : > { %1126 = vst [vmem:[%s1943_s9 + $0x1c8] sm:$0xff] %v2147_v44  ;;  %v915_v51 = vpop.f32.mrf.mxu0  ;;  %v1043_v52 = vpop.f32.mrf.mxu1 }
 0x174   : > { %v2153_v59 = vpop.f32.mrf.mxu0  ;;  %v2155_v60 = vpop.f32.mrf.mxu1 }
 0x175   : > { %2439 = vst [vmem:[#allocation10_spill] sm:$0xff] %v2155_v60  ;;  %1095 = vst [vmem:[%s1943_s9 + $0xd0] sm:$0xff] %v2153_v59 }
 0x176   : > { %1127 = vst [vmem:[%s1943_s9 + $0x1d0] sm:$0xff] %v2155_v60  ;;  %v920_v3 = vpop.f32.mrf.mxu0  ;;  %v1048_v4 = vpop.f32.mrf.mxu1 }
 0x178   : > { %v2161_v11 = vpop.f32.mrf.mxu0  ;;  %v2163_v12 = vpop.f32.mrf.mxu1 }
 0x179   : > { %2440 = vst [vmem:[#allocation11_spill] sm:$0xff] %v2163_v12  ;;  %1096 = vst [vmem:[%s1943_s9 + $0xd8] sm:$0xff] %v2161_v11 }
 0x17a   : > { %1128 = vst [vmem:[%s1943_s9 + $0x1d8] sm:$0xff] %v2163_v12  ;;  %v923_v19 = vpop.f32.mrf.mxu0  ;;  %v1051_v20 = vpop.f32.mrf.mxu1 }
 0x17c   : > { %v2169_v35 = vpop.f32.mrf.mxu0  ;;  %v2171_v36 = vpop.f32.mrf.mxu1 }
 0x17d   : > { %2441 = vst [vmem:[#allocation12_spill] sm:$0xff] %v2171_v36  ;;  %1097 = vst [vmem:[%s1943_s9 + $0xe0] sm:$0xff] %v2169_v35 }
 0x17e   : > { %1129 = vst [vmem:[%s1943_s9 + $0x1e0] sm:$0xff] %v2171_v36  ;;  %v928_v51 = vpop.f32.mrf.mxu0  ;;  %v1056_v52 = vpop.f32.mrf.mxu1 }
 0x180   : > { %v2177_v3 = vpop.f32.mrf.mxu0  ;;  %v2179_v4 = vpop.f32.mrf.mxu1 }
 0x181   : > { %2442 = vst [vmem:[#allocation13_spill] sm:$0xff] %v2179_v4  ;;  %1098 = vst [vmem:[%s1943_s9 + $0xe8] sm:$0xff] %v2177_v3 }
 0x182   : > { %1130 = vst [vmem:[%s1943_s9 + $0x1e8] sm:$0xff] %v2179_v4  ;;  %v931_v19 = vpop.f32.mrf.mxu0  ;;  %v1059_v20 = vpop.f32.mrf.mxu1 }
 0x184   : > { %v2185_v12 = vpop.f32.mrf.mxu0  ;;  %v2187_v60 = vpop.f32.mrf.mxu1 }
 0x185   : > { %2443 = vst [vmem:[#allocation14_spill] sm:$0xff] %v2187_v60  ;;  %1099 = vst [vmem:[%s1943_s9 + $0xf0] sm:$0xff] %v2185_v12 }
 0x186   : > { %1131 = vst [vmem:[%s1943_s9 + $0x1f0] sm:$0xff] %v2187_v60  ;;  %v936_v51 = vpop.f32.mrf.mxu0  ;;  %v1064_v52 = vpop.f32.mrf.mxu1  ;;  %1136 = sbr.rel (%p1545_p4) target bundleno = 397 (0x18d), region = 32 }
 0x188   : > { %v2193_v36 = vpop.f32.mrf.mxu0  ;;  %v2195_v44 = vpop.f32.mrf.mxu1 }
 0x189   : > { %2444 = vst [vmem:[#allocation15_spill] sm:$0xff] %v2195_v44  ;;  %1100 = vst [vmem:[%s1943_s9 + $0xf8] sm:$0xff] %v2193_v36 }
 0x18a   : > { %1132 = vst [vmem:[%s1943_s9 + $0x1f8] sm:$0xff] %v2195_v44  ;;  %v939_v19 = vpop.f32.mrf.mxu0  ;;  %v1067_v20 = vpop.f32.mrf.mxu1 }
 0x18b   : > { %v1715_v4 = vmov 0.0  }
 0x18c   : > { %1137 = vst [vmem:[#allocation2] sm:$0x1] %v1715_v4  ;;  %1138 = vst [vmem:[#allocation3] sm:$0x1] %v1715_v4 }
 0x18d PF: > { %v1140_v51 = vadd.f32 %v1953_v25, %v1945_v21  ;;  %v1212_v4 = vmul.f32 %v1945_v21, %v1945_v21  ;;  %v1213_v8 = vmul.f32 %v1953_v25, %v1953_v25  ;;  %v1217_v25 = vmul.f32 %v1985_v41, %v1985_v41  ;;  %p1546_p5 = scmp.ne.s32.totalorder %s1747_s16, 3 }
 0x18f   : > { %v1141_v52 = vadd.f32 %v1140_v51, %v1961_v29 }
 0x191   : > { %v1142_v60 = vadd.f32 %v1141_v52, %v1969_v33  ;;  %v1214_v52 = vmul.f32 %v1961_v29, %v1961_v29 }
 0x193   : > { %v1143_v28 = vadd.f32 %v1142_v60, %v1977_v37 }
 0x195   : > { %v1144_v44 = vadd.f32 %v1143_v28, %v1985_v41  ;;  %v1215_v28 = vmul.f32 %v1969_v33, %v1969_v33 }
 0x197   : > { %v1145_v19 = vadd.f32 %v1144_v44, %v1993_v45  ;;  %v1276_v44 = vadd.f32 %v1213_v8, %v1212_v4  ;;  %v1219_v8 = vmul.f32 %v2001_v49, %v2001_v49 }
 0x199   : > { %v1146_v20 = vadd.f32 %v1145_v19, %v2001_v49  ;;  %v1277_v21 = vadd.f32 %v1276_v44, %v1214_v52  ;;  %v1220_v52 = vmul.f32 %v2009_v53, %v2009_v53  ;;  %v1222_v44 = vmul.f32 %v2025_v61, %v2025_v61 }
 0x19b   : > { %v1147_v16 = vadd.f32 %v1146_v20, %v2009_v53  ;;  %v1216_v20 = vmul.f32 %v1977_v37, %v1977_v37 }
 0x19d   : > { %v1148_v51 = vadd.f32 %v1147_v16, %v2017_v57  ;;  %v1278_v16 = vadd.f32 %v1277_v21, %v1215_v28  ;;  %v1224_v21 = vmul.f32 %v2041_v5, %v2041_v5 }
 0x19f   : > { %v1149_v60 = vadd.f32 %v1148_v51, %v2025_v61  ;;  %v1218_v51 = vmul.f32 %v1993_v45, %v1993_v45  ;;  %v1279_v56 = vadd.f32 %v1278_v16, %v1216_v20  ;;  %v1225_v16 = vmul.f32 %v2049_v9, %v2049_v9 }
 0x1a1   : > { %v1150_v19 = vadd.f32 %v1149_v60, %v2033_v1  ;;  %v1280_v4 = vadd.f32 %v1279_v56, %v1217_v25  ;;  %v1223_v56 = vmul.f32 %v2033_v1, %v2033_v1 }
 0x1a3   : > { %v1151_v0 = vadd.f32 %v1150_v19, %v2041_v5  ;;  %v1281_v60 = vadd.f32 %v1280_v4, %v1218_v51  ;;  %v1226_v51 = vmul.f32 %v2057_v13, %v2057_v13 }
 0x1a5   : > { %v1152_v29 = vadd.f32 %v1151_v0, %v2049_v9  ;;  %v1221_v0 = vmul.f32 %v2017_v57, %v2017_v57  ;;  %v1282_v28 = vadd.f32 %v1281_v60, %v1219_v8  ;;  %v1227_v8 = vmul.f32 %v2065_v17, %v2065_v17 }
 0x1a6   : > { %v1229_v60 = vmul.f32 %v2081_v31, %v2081_v31 }
 0x1a7   : > { %v1153_v33 = vadd.f32 %v1152_v29, %v2057_v13  ;;  %v1283_v19 = vadd.f32 %v1282_v28, %v1220_v52 }
 0x1a9   : > { %v1154_v37 = vadd.f32 %v1153_v33, %v2065_v17  ;;  %v1284_v20 = vadd.f32 %v1283_v19, %v1221_v0  ;;  %v1230_v0 = vmul.f32 %v2089_v39, %v2089_v39  ;;  %v1232_v19 = vmul.f32 %v2105_v55, %v2105_v55 }
 0x1ab   : > { %v1155_v41 = vadd.f32 %v1154_v37, %v2073_v23  ;;  %v1285_v25 = vadd.f32 %v1284_v20, %v1222_v44  ;;  %v1228_v37 = vmul.f32 %v2073_v23, %v2073_v23 }
 0x1ad   : > { %v1156_v45 = vadd.f32 %v1155_v41, %v2081_v31  ;;  %v1286_v29 = vadd.f32 %v1285_v25, %v1223_v56  ;;  %v1233_v56 = vmul.f32 %v2113_v63, %v2113_v63  ;;  %v1235_v25 = vmul.f32 %v2129_v15, %v2129_v15 }
 0x1af   : > { %v1157_v49 = vadd.f32 %v1156_v45, %v2089_v39  ;;  %v1287_v33 = vadd.f32 %v1286_v29, %v1224_v21  ;;  %v1231_v45 = vmul.f32 %v2097_v47, %v2097_v47 }
 0x1b1   : > { %v1158_v53 = vadd.f32 %v1157_v49, %v2097_v47  ;;  %v1288_v4 = vadd.f32 %v1287_v33, %v1225_v16  ;;  %v1236_v16 = vmul.f32 %v2137_v27, %v2137_v27  ;;  %v1238_v33 = vmul.f32 %v2153_v59, %v2153_v59 }
 0x1b3   : > { %v1159_v57 = vadd.f32 %v1158_v53, %v2105_v55  ;;  %v1289_v52 = vadd.f32 %v1288_v4, %v1226_v51  ;;  %v1234_v53 = vmul.f32 %v2121_v7, %v2121_v7 }
 0x1b5   : > { %v1160_v61 = vadd.f32 %v1159_v57, %v2113_v63  ;;  %v1290_v41 = vadd.f32 %v1289_v52, %v1227_v8  ;;  %v1239_v8 = vmul.f32 %v2161_v11, %v2161_v11  ;;  %v1241_v52 = vmul.f32 %v2177_v3, %v2177_v3 }
 0x1b7   : > { %v1161_v1 = vadd.f32 %v1160_v61, %v2121_v7  ;;  %v1291_v28 = vadd.f32 %v1290_v41, %v1228_v37  ;;  %v1237_v61 = vmul.f32 %v2145_v43, %v2145_v43 }
 0x1b9   : > { %v1162_v5 = vadd.f32 %v1161_v1, %v2129_v15  ;;  %v1292_v44 = vadd.f32 %v1291_v28, %v1229_v60  ;;  %v1242_v60 = vmul.f32 %v2185_v12, %v2185_v12  ;;  %v1244_v28 = vmul.f32 %v1947_v22, %v1947_v22 }
 0x1bb   : > { %v1163_v9 = vadd.f32 %v1162_v5, %v2137_v27  ;;  %v1293_v49 = vadd.f32 %v1292_v44, %v1230_v0  ;;  %v1240_v5 = vmul.f32 %v2169_v35, %v2169_v35 }
 0x1bd   : > { %v1164_v13 = vadd.f32 %v1163_v9, %v2145_v43  ;;  %v1294_v20 = vadd.f32 %v1293_v49, %v1231_v45  ;;  %v1245_v45 = vmul.f32 %v1955_v26, %v1955_v26  ;;  %v1247_v49 = vmul.f32 %v1971_v34, %v1971_v34 }
 0x1bf   : > { %v1165_v17 = vadd.f32 %v1164_v13, %v2153_v59  ;;  %v1295_v21 = vadd.f32 %v1294_v20, %v1232_v19  ;;  %v1243_v13 = vmul.f32 %v2193_v36, %v2193_v36 }
 0x1c1   : > { %v1166_v23 = vadd.f32 %v1165_v17, %v2161_v11  ;;  %v1296_v57 = vadd.f32 %v1295_v21, %v1233_v56  ;;  %v1248_v56 = vmul.f32 %v1979_v38, %v1979_v38  ;;  %v1250_v21 = vmul.f32 %v1995_v46, %v1995_v46 }
 0x1c3   : > { %v1167_v31 = vadd.f32 %v1166_v23, %v2169_v35  ;;  %v1297_v29 = vadd.f32 %v1296_v57, %v1234_v53  ;;  %v1246_v23 = vmul.f32 %v1963_v30, %v1963_v30 }
 0x1c5   : > { %v1168_v39 = vadd.f32 %v1167_v31, %v2177_v3  ;;  %v1298_v51 = vadd.f32 %v1297_v29, %v1235_v25  ;;  %v1251_v25 = vmul.f32 %v2003_v50, %v2003_v50  ;;  %v1253_v29 = vmul.f32 %v2019_v58, %v2019_v58 }
 0x1c7   : > { %v1169_v47 = vadd.f32 %v1168_v39, %v2185_v12  ;;  %v1299_v1 = vadd.f32 %v1298_v51, %v1236_v16  ;;  %v1249_v39 = vmul.f32 %v1987_v42, %v1987_v42 }
 0x1c9   : > { %v1170_v55 = vadd.f32 %v1169_v47, %v2193_v36  ;;  %v1300_v4 = vadd.f32 %v1299_v1, %v1237_v61  ;;  %v1254_v61 = vmul.f32 %v2027_v62, %v2027_v62  ;;  %v1256_v1 = vmul.f32 %v2043_v6, %v2043_v6 }
 0x1cb   : > { %v1171_v63 = vadd.f32 %v1170_v55, %v1947_v22  ;;  %v1301_v37 = vadd.f32 %v1300_v4, %v1238_v33  ;;  %v1252_v55 = vmul.f32 %v2011_v54, %v2011_v54  ;;  %v1257_v4 = vmul.f32 %v2051_v10, %v2051_v10 }
 0x1cd   : > { %v1172_v7 = vadd.f32 %v1171_v63, %v1955_v26  ;;  %v1302_v9 = vadd.f32 %v1301_v37, %v1239_v8  ;;  %v1258_v37 = vmul.f32 %v2059_v14, %v2059_v14 }
 0x1cf   : > { %v1173_v15 = vadd.f32 %v1172_v7, %v1963_v30  ;;  %v1303_v41 = vadd.f32 %v1302_v9, %v1240_v5  ;;  %v1255_v7 = vmul.f32 %v2035_v2, %v2035_v2  ;;  %v1259_v9 = vmul.f32 %v2067_v18, %v2067_v18 }
 0x1d1   : > { %v1174_v27 = vadd.f32 %v1173_v15, %v1971_v34  ;;  %v1304_v0 = vadd.f32 %v1303_v41, %v1241_v52  ;;  %v1260_v41 = vmul.f32 %v2075_v24, %v2075_v24 }
 0x1d3   : > { %v1175_v43 = vadd.f32 %v1174_v27, %v1979_v38  ;;  %v1305_v17 = vadd.f32 %v1304_v0, %v1242_v60  ;;  %v1261_v0 = vmul.f32 %v2083_v32, %v2083_v32 }
 0x1d5   : > { %v1176_v59 = vadd.f32 %v1175_v43, %v1987_v42  ;;  %v1306_v44 = vadd.f32 %v1305_v17, %v1243_v13  ;;  %v1262_v17 = vmul.f32 %v2091_v40, %v2091_v40 }
 0x1d7   : > { %v1177_v11 = vadd.f32 %v1176_v59, %v1995_v46  ;;  %v1307_v19 = vadd.f32 %v1306_v44, %v1244_v28  ;;  %v1263_v44 = vmul.f32 %v2099_v48, %v2099_v48 }
 0x1d9   : > { %v1178_v35 = vadd.f32 %v1177_v11, %v2003_v50  ;;  %v1308_v31 = vadd.f32 %v1307_v19, %v1245_v45 }
 0x1db   : > { %v1179_v3 = vadd.f32 %v1178_v35, %v2011_v54  ;;  %v1309_v20 = vadd.f32 %v1308_v31, %v1246_v23 }
 0x1dd   : > { %v1180_v12 = vadd.f32 %v1179_v3, %v2019_v58  ;;  %v1310_v53 = vadd.f32 %v1309_v20, %v1247_v49  ;;  %v2445_v58 = vld [vmem:[#allocation4_spill] sm:$0xff] }
 0x1de   : > { %v1264_v19 = vmul.f32 %v2445_v58, %v2445_v58 }
 0x1df   : > { %v1181_v36 = vadd.f32 %v1180_v12, %v2027_v62  ;;  %v1311_v47 = vadd.f32 %v1310_v53, %v1248_v56  ;;  %v2446_v62 = vld [vmem:[#allocation5_spill] sm:$0xff] }
 0x1e0   : > { %v1265_v31 = vmul.f32 %v2446_v62, %v2446_v62 }
 0x1e1   : > { %v1182_v22 = vadd.f32 %v1181_v36, %v2035_v2  ;;  %v1312_v57 = vadd.f32 %v1311_v47, %v1249_v39  ;;  %v2447_v2 = vld [vmem:[#allocation6_spill] sm:$0xff] }
 0x1e2   : > { %v1266_v20 = vmul.f32 %v2447_v2, %v2447_v2 }
 0x1e3   : > { %v1183_v26 = vadd.f32 %v1182_v22, %v2043_v6  ;;  %v1313_v16 = vadd.f32 %v1312_v57, %v1250_v21  ;;  %v2448_v6 = vld [vmem:[#allocation7_spill] sm:$0xff] }
 0x1e4   : > { %v1267_v53 = vmul.f32 %v2448_v6, %v2448_v6  ;;  %v2456_v21 = vld [vmem:[#allocation15_spill] sm:$0xff] }
 0x1e5   : > { %v1184_v30 = vadd.f32 %v1183_v26, %v2051_v10  ;;  %v1314_v63 = vadd.f32 %v1313_v16, %v1251_v25  ;;  %v2449_v10 = vld [vmem:[#allocation8_spill] sm:$0xff] }
 0x1e7   : > { %v1185_v34 = vadd.f32 %v1184_v30, %v2059_v14  ;;  %v1315_v51 = vadd.f32 %v1314_v63, %v1252_v55  ;;  %v2450_v14 = vld [vmem:[#allocation9_spill] sm:$0xff] }
 0x1e9   : > { %v1186_v38 = vadd.f32 %v1185_v34, %v2067_v18  ;;  %v1316_v33 = vadd.f32 %v1315_v51, %v1253_v29  ;;  %v2451_v18 = vld [vmem:[#allocation10_spill] sm:$0xff]  ;;  %v1268_v34 = vmul.f32 %v2449_v10, %v2449_v10 }
 0x1eb   : > { %v1187_v42 = vadd.f32 %v1186_v38, %v2075_v24  ;;  %v1317_v15 = vadd.f32 %v1316_v33, %v1254_v61  ;;  %v2452_v24 = vld [vmem:[#allocation11_spill] sm:$0xff]  ;;  %v1269_v38 = vmul.f32 %v2450_v14, %v2450_v14 }
 0x1ed   : > { %v1188_v46 = vadd.f32 %v1187_v42, %v2083_v32  ;;  %v1318_v27 = vadd.f32 %v1317_v15, %v1255_v7  ;;  %v2453_v32 = vld [vmem:[#allocation12_spill] sm:$0xff]  ;;  %v1270_v42 = vmul.f32 %v2451_v18, %v2451_v18  ;;  %v1139_v15 = vld [vmem:[#allocation2] sm:$0x1] }
 0x1ef   : > { %v1189_v50 = vadd.f32 %v1188_v46, %v2091_v40  ;;  %v1319_v43 = vadd.f32 %v1318_v27, %v1256_v1  ;;  %v2454_v40 = vld [vmem:[#allocation13_spill] sm:$0xff]  ;;  %v1271_v46 = vmul.f32 %v2452_v24, %v2452_v24 }
 0x1f1   : > { %v1190_v54 = vadd.f32 %v1189_v50, %v2099_v48  ;;  %v1320_v59 = vadd.f32 %v1319_v43, %v1257_v4  ;;  %v2455_v48 = vld [vmem:[#allocation14_spill] sm:$0xff]  ;;  %v1272_v50 = vmul.f32 %v2453_v32, %v2453_v32 }
 0x1f3   : > { %v1191_v8 = vadd.f32 %v1190_v54, %v2445_v58  ;;  %v1321_v11 = vadd.f32 %v1320_v59, %v1258_v37  ;;  %v1273_v54 = vmul.f32 %v2454_v40, %v2454_v40 }
 0x1f5   : > { %v1192_v5 = vadd.f32 %v1191_v8, %v2446_v62  ;;  %v1322_v35 = vadd.f32 %v1321_v11, %v1259_v9  ;;  %v1274_v8 = vmul.f32 %v2455_v48, %v2455_v48  ;;  %v1275_v62 = vmul.f32 %v2456_v21, %v2456_v21 }
 0x1f7   : > { %v1193_v52 = vadd.f32 %v1192_v5, %v2447_v2  ;;  %v1323_v3 = vadd.f32 %v1322_v35, %v1260_v41 }
 0x1f9   : > { %v1194_v60 = vadd.f32 %v1193_v52, %v2448_v6  ;;  %v1324_v12 = vadd.f32 %v1323_v3, %v1261_v0 }
 0x1fb   : > { %v1195_v13 = vadd.f32 %v1194_v60, %v2449_v10  ;;  %v1325_v36 = vadd.f32 %v1324_v12, %v1262_v17  ;;  %v1211_v60 = vld [vmem:[#allocation3] sm:$0x1] }
 0x1fd   : > { %v1196_v28 = vadd.f32 %v1195_v13, %v2450_v14  ;;  %v1326_v22 = vadd.f32 %v1325_v36, %v1263_v44 }
 0x1ff   : > { %v1197_v45 = vadd.f32 %v1196_v28, %v2451_v18  ;;  %v1327_v26 = vadd.f32 %v1326_v22, %v1264_v19 }
 0x201   : > { %v1198_v23 = vadd.f32 %v1197_v45, %v2452_v24  ;;  %v1328_v30 = vadd.f32 %v1327_v26, %v1265_v31 }
 0x203   : > { %v1199_v49 = vadd.f32 %v1198_v23, %v2453_v32  ;;  %v1329_v25 = vadd.f32 %v1328_v30, %v1266_v20 }
 0x205   : > { %v1200_v56 = vadd.f32 %v1199_v49, %v2454_v40  ;;  %v1330_v55 = vadd.f32 %v1329_v25, %v1267_v53 }
 0x207   : > { %v1201_v39 = vadd.f32 %v1200_v56, %v2455_v48  ;;  %v1331_v29 = vadd.f32 %v1330_v55, %v1268_v34 }
 0x209   : > { %v1202_v47 = vadd.f32 %v1201_v39, %v2456_v21  ;;  %v1332_v61 = vadd.f32 %v1331_v29, %v1269_v38 }
 0x20b   : > { %v1203_v57 = vrot.slane %v1202_v47, 4  ;;  %v1333_v7 = vadd.f32 %v1332_v61, %v1270_v42 }
 0x20d   : > { %v1204_v16 = vadd.f32 %v1203_v57, %v1202_v47  ;;  %v1334_v1 = vadd.f32 %v1333_v7, %v1271_v46 }
 0x20f   : > { %v1205_v63 = vrot.slane %v1204_v16, 2  ;;  %v1335_v4 = vadd.f32 %v1334_v1, %v1272_v50 }
 0x211   : > { %v1206_v51 = vadd.f32 %v1205_v63, %v1204_v16  ;;  %v1336_v5 = vadd.f32 %v1335_v4, %v1273_v54 }
 0x213   : > { %v1207_v33 = vrot.slane %v1206_v51, 1  ;;  %v1337_v37 = vadd.f32 %v1336_v5, %v1274_v8 }
 0x215   : > { %v1208_v58 = vadd.f32 %v1207_v33, %v1206_v51  ;;  %v1338_v43 = vadd.f32 %v1337_v37, %v1275_v62 }
 0x217   : > { %v1209_v27 = vadd.f32 %v1208_v58, %v1139_v15  ;;  %v1339_v2 = vrot.slane %v1338_v43, 4 }
 0x219   : > { %1210 = vst [vmem:[#allocation2] sm:$0x1] %v1209_v27  ;;  %v1340_v52 = vadd.f32 %v1339_v2, %v1338_v43 }
 0x21b   : > { %v1341_v9 = vrot.slane %v1340_v52, 2 }
 0x21d   : > { %v1342_v59 = vadd.f32 %v1341_v9, %v1340_v52 }
 0x21f   : > { %v1343_v6 = vrot.slane %v1342_v59, 1 }
 0x221   : > { %v1344_v41 = vadd.f32 %v1343_v6, %v1342_v59  ;;  %1350 = sbr.rel (%p1546_p5) target bundleno = 558 (0x22e), region = 36 }
 0x223   : > { %v1345_v11 = vadd.f32 %v1344_v41, %v1211_v60 }
 0x225   : > { %1346 = vst [vmem:[#allocation3] sm:$0x1] %v1345_v11 }
 0x226   : > { %v1351_v10 = vld [vmem:[#allocation2] sm:$0x1] }
 0x227   : > { %1352 = vst [vmem:[%s2407_s3] sm:$0x1] %v1351_v10 }
 0x22c   : > { %v1353_v13 = vld [vmem:[#allocation3] sm:$0x1] }
 0x22d   : > { %1354 = vst [vmem:[%s2408_s4] sm:$0x1] %v1353_v13 }
 0x22e PF: > { %s15_s15 = sadd.s32 1, %s1711_s15  }
 0x22f   : > { %p12_p6 = scmp.ge.s32.totalorder %s15_s15, 6  }
 0x231   :  { %14 = sbr.rel (!%p12_p6) target bundleno = 1 (0x1), region = 82 }

// kernel: local_enhancer_forward.37
= control target key start
LH: loop header
LB: loop body
LE: loop exit
PB: predicated region body
PF: predicated region fallthrough
CT: control target
= control target key end

     0   :  { %s896_s0 = inlined_call_operand.vmem [shape: f32[512,128], index: 0, kind: input, shape index: {}]   ;;  %s897_s1 = inlined_call_operand.vmem [shape: f32[1,128], index: 1, kind: input, shape index: {}]   ;;  %s898_s2 = inlined_call_operand.vmem [shape: f32[1,128], index: 2, kind: input, shape index: {}]   ;;  %s899_s3 = inlined_call_operand.vmem [shape: f32[512,128], index: 3, kind: output, shape index: {}]  }
   0x1   :  { %v14_v0 = vld [vmem:[%s896_s0] sm:$0xff]  ;;  %v15_v4 = vld [vmem:[%s896_s0 + $0x8] sm:$0xff]  ;;  %v16_v5 = vld [vmem:[%s896_s0 + $0x10] sm:$0xff] }
   0x2   :  { %v380_v1 = vld [vmem:[%s897_s1] ss:$0 sm:$0xff]  ;;  %v17_v6 = vld [vmem:[%s896_s0 + $0x18] sm:$0xff]  ;;  %v19_v11 = vld [vmem:[%s896_s0 + $0x28] sm:$0xff] }
   0x3   :  { %v385_v2 = vld [vmem:[%s898_s2] ss:$0 sm:$0xff]  ;;  %v85_v3 = vmul.f32 %v380_v1, %v14_v0  ;;  %v86_v7 = vmul.f32 %v380_v1, %v15_v4  ;;  %v87_v8 = vmul.f32 %v380_v1, %v16_v5  ;;  %v88_v9 = vmul.f32 %v380_v1, %v17_v6  ;;  %v20_v12 = vld [vmem:[%s896_s0 + $0x30] sm:$0xff]  ;;  %v21_v17 = vld [vmem:[%s896_s0 + $0x38] sm:$0xff] }
   0x4   :  { %v18_v10 = vld [vmem:[%s896_s0 + $0x20] sm:$0xff]  ;;  %v90_v15 = vmul.f32 %v380_v1, %v19_v11  ;;  %v91_v16 = vmul.f32 %v380_v1, %v20_v12  ;;  %v92_v21 = vmul.f32 %v380_v1, %v21_v17  ;;  %v23_v27 = vld [vmem:[%s896_s0 + $0x48] sm:$0xff]  ;;  %v24_v28 = vld [vmem:[%s896_s0 + $0x50] sm:$0xff] }
   0x5   :  { %v156_v13 = vadd.f32 %v385_v2, %v85_v3  ;;  %v89_v14 = vmul.f32 %v380_v1, %v18_v10  ;;  %v157_v18 = vadd.f32 %v385_v2, %v86_v7  ;;  %v158_v19 = vadd.f32 %v385_v2, %v87_v8  ;;  %v22_v22 = vld [vmem:[%s896_s0 + $0x40] sm:$0xff]  ;;  %v25_v29 = vld [vmem:[%s896_s0 + $0x58] sm:$0xff]  ;;  %v27_v35 = vld [vmem:[%s896_s0 + $0x68] sm:$0xff] }
   0x6   :  { %v159_v20 = vadd.f32 %v385_v2, %v88_v9  ;;  %v161_v25 = vadd.f32 %v385_v2, %v90_v15  ;;  %v162_v26 = vadd.f32 %v385_v2, %v91_v16  ;;  %v163_v33 = vadd.f32 %v385_v2, %v92_v21  ;;  %v26_v34 = vld [vmem:[%s896_s0 + $0x60] sm:$0xff]  ;;  %v28_v36 = vld [vmem:[%s896_s0 + $0x70] sm:$0xff]  ;;  %v29_v41 = vld [vmem:[%s896_s0 + $0x78] sm:$0xff] }
   0x7   :  { %v220_v23 = vmax.f32 %v156_v13, 0.0  ;;  %v160_v24 = vadd.f32 %v385_v2, %v89_v14  ;;  %v221_v30 = vmax.f32 %v157_v18, 0.0  ;;  %v222_v31 = vmax.f32 %v158_v19, 0.0  ;;  %v30_v54 = vld [vmem:[%s896_s0 + $0x80] sm:$0xff]  ;;  %v31_v59 = vld [vmem:[%s896_s0 + $0x88] sm:$0xff]  ;;  %v32_v60 = vld [vmem:[%s896_s0 + $0x90] sm:$0xff] }
   0x8   :  { %v223_v32 = vmax.f32 %v159_v20, 0.0  ;;  %v225_v38 = vmax.f32 %v161_v25, 0.0  ;;  %v226_v39 = vmax.f32 %v162_v26, 0.0  ;;  %v93_v40 = vmul.f32 %v380_v1, %v22_v22  ;;  %v33_v61 = vld [vmem:[%s896_s0 + $0x98] sm:$0xff]  ;;  %v34_v4 = vld [vmem:[%s896_s0 + $0xa0] sm:$0xff]  ;;  %v35_v5 = vld [vmem:[%s896_s0 + $0xa8] sm:$0xff] }
   0x9   :  { %284 = vst [vmem:[%s899_s3] sm:$0xff] %v220_v23  ;;  %v224_v37 = vmax.f32 %v160_v24, 0.0  ;;  %285 = vst [vmem:[%s899_s3 + $0x8] sm:$0xff] %v221_v30  ;;  %v227_v42 = vmax.f32 %v163_v33, 0.0  ;;  %v94_v43 = vmul.f32 %v380_v1, %v23_v27  ;;  %v95_v44 = vmul.f32 %v380_v1, %v24_v28  ;;  %v36_v6 = vld [vmem:[%s896_s0 + $0xb0] sm:$0xff]  ;;  %v37_v11 = vld [vmem:[%s896_s0 + $0xb8] sm:$0xff] }
   0xa   :  { %286 = vst [vmem:[%s899_s3 + $0x10] sm:$0xff] %v222_v31  ;;  %287 = vst [vmem:[%s899_s3 + $0x18] sm:$0xff] %v223_v32  ;;  %v96_v45 = vmul.f32 %v380_v1, %v25_v29  ;;  %v164_v46 = vadd.f32 %v385_v2, %v93_v40  ;;  %v97_v47 = vmul.f32 %v380_v1, %v26_v34  ;;  %v38_v24 = vld [vmem:[%s896_s0 + $0xc0] sm:$0xff]  ;;  %v39_v29 = vld [vmem:[%s896_s0 + $0xc8] sm:$0xff] }
   0xb   :  { %288 = vst [vmem:[%s899_s3 + $0x20] sm:$0xff] %v224_v37  ;;  %289 = vst [vmem:[%s899_s3 + $0x28] sm:$0xff] %v225_v38  ;;  %v98_v48 = vmul.f32 %v380_v1, %v27_v35  ;;  %v99_v49 = vmul.f32 %v380_v1, %v28_v36  ;;  %v165_v50 = vadd.f32 %v385_v2, %v94_v43  ;;  %v40_v30 = vld [vmem:[%s896_s0 + $0xd0] sm:$0xff]  ;;  %v41_v31 = vld [vmem:[%s896_s0 + $0xd8] sm:$0xff] }
   0xc   :  { %290 = vst [vmem:[%s899_s3 + $0x30] sm:$0xff] %v226_v39  ;;  %291 = vst [vmem:[%s899_s3 + $0x38] sm:$0xff] %v227_v42  ;;  %v166_v51 = vadd.f32 %v385_v2, %v95_v44  ;;  %v167_v52 = vadd.f32 %v385_v2, %v96_v45  ;;  %v100_v53 = vmul.f32 %v380_v1, %v29_v41  ;;  %v228_v55 = vmax.f32 %v164_v46, 0.0  ;;  %v42_v36 = vld [vmem:[%s896_s0 + $0xe0] sm:$0xff]  ;;  %v43_v37 = vld [vmem:[%s896_s0 + $0xe8] sm:$0xff] }
   0xd   :  { %v168_v56 = vadd.f32 %v385_v2, %v97_v47  ;;  %v169_v57 = vadd.f32 %v385_v2, %v98_v48  ;;  %v170_v58 = vadd.f32 %v385_v2, %v99_v49  ;;  %v229_v62 = vmax.f32 %v165_v50, 0.0  ;;  %v44_v38 = vld [vmem:[%s896_s0 + $0xf0] sm:$0xff]  ;;  %v45_v43 = vld [vmem:[%s896_s0 + $0xf8] sm:$0xff] }
   0xe   :  { %v230_v63 = vmax.f32 %v166_v51, 0.0  ;;  %v231_v0 = vmax.f32 %v167_v52, 0.0  ;;  %v171_v3 = vadd.f32 %v385_v2, %v100_v53  ;;  %292 = vst [vmem:[%s899_s3 + $0x40] sm:$0xff] %v228_v55  ;;  %v101_v10 = vmul.f32 %v380_v1, %v30_v54 }
   0xf   :  { %v232_v7 = vmax.f32 %v168_v56, 0.0  ;;  %v233_v8 = vmax.f32 %v169_v57, 0.0  ;;  %v234_v9 = vmax.f32 %v170_v58, 0.0  ;;  %293 = vst [vmem:[%s899_s3 + $0x48] sm:$0xff] %v229_v62  ;;  %v102_v13 = vmul.f32 %v380_v1, %v31_v59  ;;  %v46_v56 = vld [vmem:[%s896_s0 + $0x100] sm:$0xff]  ;;  %v48_v62 = vld [vmem:[%s896_s0 + $0x110] sm:$0xff] }
  0x10   :  { %294 = vst [vmem:[%s899_s3 + $0x50] sm:$0xff] %v230_v63  ;;  %295 = vst [vmem:[%s899_s3 + $0x58] sm:$0xff] %v231_v0  ;;  %v235_v12 = vmax.f32 %v171_v3, 0.0  ;;  %v103_v14 = vmul.f32 %v380_v1, %v32_v60  ;;  %v104_v15 = vmul.f32 %v380_v1, %v33_v61  ;;  %v172_v16 = vadd.f32 %v385_v2, %v101_v10  ;;  %v47_v61 = vld [vmem:[%s896_s0 + $0x108] sm:$0xff]  ;;  %v49_v63 = vld [vmem:[%s896_s0 + $0x118] sm:$0xff] }
  0x11   :  { %296 = vst [vmem:[%s899_s3 + $0x60] sm:$0xff] %v232_v7  ;;  %297 = vst [vmem:[%s899_s3 + $0x68] sm:$0xff] %v233_v8  ;;  %v105_v17 = vmul.f32 %v380_v1, %v34_v4  ;;  %v106_v18 = vmul.f32 %v380_v1, %v35_v5  ;;  %v107_v19 = vmul.f32 %v380_v1, %v36_v6  ;;  %v50_v6 = vld [vmem:[%s896_s0 + $0x120] sm:$0xff]  ;;  %v51_v7 = vld [vmem:[%s896_s0 + $0x128] sm:$0xff] }
  0x12   :  { %298 = vst [vmem:[%s899_s3 + $0x70] sm:$0xff] %v234_v9  ;;  %299 = vst [vmem:[%s899_s3 + $0x78] sm:$0xff] %v235_v12  ;;  %v173_v20 = vadd.f32 %v385_v2, %v102_v13  ;;  %v174_v21 = vadd.f32 %v385_v2, %v103_v14  ;;  %v175_v22 = vadd.f32 %v385_v2, %v104_v15  ;;  %v236_v25 = vmax.f32 %v172_v16, 0.0  ;;  %v52_v8 = vld [vmem:[%s896_s0 + $0x130] sm:$0xff]  ;;  %v53_v13 = vld [vmem:[%s896_s0 + $0x138] sm:$0xff] }
  0x13   :  { %v108_v23 = vmul.f32 %v380_v1, %v37_v11  ;;  %v176_v26 = vadd.f32 %v385_v2, %v105_v17  ;;  %v177_v27 = vadd.f32 %v385_v2, %v106_v18  ;;  %v178_v28 = vadd.f32 %v385_v2, %v107_v19 }
  0x14   :  { %v237_v32 = vmax.f32 %v173_v20, 0.0  ;;  %v238_v33 = vmax.f32 %v174_v21, 0.0  ;;  %v239_v34 = vmax.f32 %v175_v22, 0.0  ;;  %300 = vst [vmem:[%s899_s3 + $0x80] sm:$0xff] %v236_v25  ;;  %v109_v42 = vmul.f32 %v380_v1, %v38_v24 }
  0x15   :  { %v179_v35 = vadd.f32 %v385_v2, %v108_v23  ;;  %v240_v39 = vmax.f32 %v176_v26, 0.0  ;;  %v241_v40 = vmax.f32 %v177_v27, 0.0  ;;  %v242_v41 = vmax.f32 %v178_v28, 0.0  ;;  %v54_v26 = vld [vmem:[%s896_s0 + $0x140] sm:$0xff] }
  0x16   :  { %301 = vst [vmem:[%s899_s3 + $0x88] sm:$0xff] %v237_v32  ;;  %302 = vst [vmem:[%s899_s3 + $0x90] sm:$0xff] %v238_v33  ;;  %v110_v45 = vmul.f32 %v380_v1, %v39_v29  ;;  %v111_v46 = vmul.f32 %v380_v1, %v40_v30  ;;  %v112_v47 = vmul.f32 %v380_v1, %v41_v31  ;;  %v55_v31 = vld [vmem:[%s896_s0 + $0x148] sm:$0xff]  ;;  %v56_v32 = vld [vmem:[%s896_s0 + $0x150] sm:$0xff] }
  0x17   :  { %303 = vst [vmem:[%s899_s3 + $0x98] sm:$0xff] %v239_v34  ;;  %v243_v44 = vmax.f32 %v179_v35, 0.0  ;;  %304 = vst [vmem:[%s899_s3 + $0xa0] sm:$0xff] %v240_v39  ;;  %v180_v48 = vadd.f32 %v385_v2, %v109_v42  ;;  %v113_v49 = vmul.f32 %v380_v1, %v42_v36  ;;  %v114_v50 = vmul.f32 %v380_v1, %v43_v37  ;;  %v57_v33 = vld [vmem:[%s896_s0 + $0x158] sm:$0xff]  ;;  %v59_v39 = vld [vmem:[%s896_s0 + $0x168] sm:$0xff] }
  0x18   :  { %305 = vst [vmem:[%s899_s3 + $0xa8] sm:$0xff] %v241_v40  ;;  %306 = vst [vmem:[%s899_s3 + $0xb0] sm:$0xff] %v242_v41  ;;  %v115_v51 = vmul.f32 %v380_v1, %v44_v38  ;;  %v181_v52 = vadd.f32 %v385_v2, %v110_v45  ;;  %v182_v53 = vadd.f32 %v385_v2, %v111_v46  ;;  %v58_v38 = vld [vmem:[%s896_s0 + $0x160] sm:$0xff]  ;;  %v60_v40 = vld [vmem:[%s896_s0 + $0x170] sm:$0xff] }
  0x19   :  { %307 = vst [vmem:[%s899_s3 + $0xb8] sm:$0xff] %v243_v44  ;;  %v183_v54 = vadd.f32 %v385_v2, %v112_v47  ;;  %v116_v55 = vmul.f32 %v380_v1, %v45_v43  ;;  %v244_v57 = vmax.f32 %v180_v48, 0.0  ;;  %v184_v58 = vadd.f32 %v385_v2, %v113_v49  ;;  %v61_v45 = vld [vmem:[%s896_s0 + $0x178] sm:$0xff] }
  0x1a   :  { %v185_v59 = vadd.f32 %v385_v2, %v114_v50  ;;  %v186_v60 = vadd.f32 %v385_v2, %v115_v51  ;;  %v245_v0 = vmax.f32 %v181_v52, 0.0  ;;  %v246_v3 = vmax.f32 %v182_v53, 0.0 }
  0x1b   :  { %v247_v4 = vmax.f32 %v183_v54, 0.0  ;;  %v187_v5 = vadd.f32 %v385_v2, %v116_v55  ;;  %308 = vst [vmem:[%s899_s3 + $0xc0] sm:$0xff] %v244_v57  ;;  %v248_v9 = vmax.f32 %v184_v58, 0.0  ;;  %v117_v12 = vmul.f32 %v380_v1, %v46_v56  ;;  %v62_v58 = vld [vmem:[%s896_s0 + $0x180] sm:$0xff] }
  0x1c   :  { %v249_v10 = vmax.f32 %v185_v59, 0.0  ;;  %v250_v11 = vmax.f32 %v186_v60, 0.0  ;;  %309 = vst [vmem:[%s899_s3 + $0xc8] sm:$0xff] %v245_v0  ;;  %310 = vst [vmem:[%s899_s3 + $0xd0] sm:$0xff] %v246_v3  ;;  %v118_v15 = vmul.f32 %v380_v1, %v47_v61  ;;  %v119_v16 = vmul.f32 %v380_v1, %v48_v62  ;;  %v64_v0 = vld [vmem:[%s896_s0 + $0x190] sm:$0xff]  ;;  %v65_v3 = vld [vmem:[%s896_s0 + $0x198] sm:$0xff] }
  0x1d   :  { %311 = vst [vmem:[%s899_s3 + $0xd8] sm:$0xff] %v247_v4  ;;  %v251_v14 = vmax.f32 %v187_v5, 0.0  ;;  %v120_v17 = vmul.f32 %v380_v1, %v49_v63  ;;  %312 = vst [vmem:[%s899_s3 + $0xe0] sm:$0xff] %v248_v9  ;;  %v188_v18 = vadd.f32 %v385_v2, %v117_v12  ;;  %v121_v19 = vmul.f32 %v380_v1, %v50_v6  ;;  %v63_v63 = vld [vmem:[%s896_s0 + $0x188] sm:$0xff] }
  0x1e   :  { %313 = vst [vmem:[%s899_s3 + $0xe8] sm:$0xff] %v249_v10  ;;  %314 = vst [vmem:[%s899_s3 + $0xf0] sm:$0xff] %v250_v11  ;;  %v122_v20 = vmul.f32 %v380_v1, %v51_v7  ;;  %v123_v21 = vmul.f32 %v380_v1, %v52_v8  ;;  %v189_v22 = vadd.f32 %v385_v2, %v118_v15  ;;  %v66_v8 = vld [vmem:[%s896_s0 + $0x1a0] sm:$0xff]  ;;  %v67_v9 = vld [vmem:[%s896_s0 + $0x1a8] sm:$0xff] }
  0x1f   :  { %315 = vst [vmem:[%s899_s3 + $0xf8] sm:$0xff] %v251_v14  ;;  %v190_v23 = vadd.f32 %v385_v2, %v119_v16  ;;  %v191_v24 = vadd.f32 %v385_v2, %v120_v17  ;;  %v124_v25 = vmul.f32 %v380_v1, %v53_v13  ;;  %v252_v27 = vmax.f32 %v188_v18, 0.0  ;;  %v68_v10 = vld [vmem:[%s896_s0 + $0x1b0] sm:$0xff]  ;;  %v69_v15 = vld [vmem:[%s896_s0 + $0x1b8] sm:$0xff] }
  0x20   :  { %v192_v28 = vadd.f32 %v385_v2, %v121_v19  ;;  %v193_v29 = vadd.f32 %v385_v2, %v122_v20  ;;  %v194_v30 = vadd.f32 %v385_v2, %v123_v21  ;;  %v253_v34 = vmax.f32 %v189_v22, 0.0 }
  0x21   :  { %v254_v35 = vmax.f32 %v190_v23, 0.0  ;;  %v255_v36 = vmax.f32 %v191_v24, 0.0  ;;  %v195_v37 = vadd.f32 %v385_v2, %v124_v25  ;;  %316 = vst [vmem:[%s899_s3 + $0x100] sm:$0xff] %v252_v27  ;;  %v125_v44 = vmul.f32 %v380_v1, %v54_v26 }
  0x22   :  { %v256_v41 = vmax.f32 %v192_v28, 0.0  ;;  %v257_v42 = vmax.f32 %v193_v29, 0.0  ;;  %v258_v43 = vmax.f32 %v194_v30, 0.0  ;;  %317 = vst [vmem:[%s899_s3 + $0x108] sm:$0xff] %v253_v34  ;;  %v126_v47 = vmul.f32 %v380_v1, %v55_v31  ;;  %v70_v28 = vld [vmem:[%s896_s0 + $0x1c0] sm:$0xff]  ;;  %v72_v34 = vld [vmem:[%s896_s0 + $0x1d0] sm:$0xff] }
  0x23   :  { %318 = vst [vmem:[%s899_s3 + $0x110] sm:$0xff] %v254_v35  ;;  %319 = vst [vmem:[%s899_s3 + $0x118] sm:$0xff] %v255_v36  ;;  %v259_v46 = vmax.f32 %v195_v37, 0.0  ;;  %v127_v48 = vmul.f32 %v380_v1, %v56_v32  ;;  %v128_v49 = vmul.f32 %v380_v1, %v57_v33  ;;  %v196_v50 = vadd.f32 %v385_v2, %v125_v44  ;;  %v71_v33 = vld [vmem:[%s896_s0 + $0x1c8] sm:$0xff]  ;;  %v73_v35 = vld [vmem:[%s896_s0 + $0x1d8] sm:$0xff] }
  0x24   :  { %320 = vst [vmem:[%s899_s3 + $0x120] sm:$0xff] %v256_v41  ;;  %321 = vst [vmem:[%s899_s3 + $0x128] sm:$0xff] %v257_v42  ;;  %v129_v51 = vmul.f32 %v380_v1, %v58_v38  ;;  %v130_v52 = vmul.f32 %v380_v1, %v59_v39  ;;  %v131_v53 = vmul.f32 %v380_v1, %v60_v40  ;;  %v74_v40 = vld [vmem:[%s896_s0 + $0x1e0] sm:$0xff]  ;;  %v75_v41 = vld [vmem:[%s896_s0 + $0x1e8] sm:$0xff] }
  0x25   :  { %322 = vst [vmem:[%s899_s3 + $0x130] sm:$0xff] %v258_v43  ;;  %323 = vst [vmem:[%s899_s3 + $0x138] sm:$0xff] %v259_v46  ;;  %v197_v54 = vadd.f32 %v385_v2, %v126_v47  ;;  %v198_v55 = vadd.f32 %v385_v2, %v127_v48  ;;  %v199_v56 = vadd.f32 %v385_v2, %v128_v49  ;;  %v260_v59 = vmax.f32 %v196_v50, 0.0  ;;  %v76_v42 = vld [vmem:[%s896_s0 + $0x1f0] sm:$0xff]  ;;  %v77_v47 = vld [vmem:[%s896_s0 + $0x1f8] sm:$0xff] }
  0x26   :  { %v132_v57 = vmul.f32 %v380_v1, %v61_v45  ;;  %v200_v60 = vadd.f32 %v385_v2, %v129_v51  ;;  %v201_v61 = vadd.f32 %v385_v2, %v130_v52  ;;  %v202_v62 = vadd.f32 %v385_v2, %v131_v53 }
  0x27   :  { %v261_v4 = vmax.f32 %v197_v54, 0.0  ;;  %v262_v5 = vmax.f32 %v198_v55, 0.0  ;;  %v263_v6 = vmax.f32 %v199_v56, 0.0  ;;  %324 = vst [vmem:[%s899_s3 + $0x140] sm:$0xff] %v260_v59  ;;  %v133_v14 = vmul.f32 %v380_v1, %v62_v58 }
  0x28   :  { %v203_v7 = vadd.f32 %v385_v2, %v132_v57  ;;  %v264_v11 = vmax.f32 %v200_v60, 0.0  ;;  %v265_v12 = vmax.f32 %v201_v61, 0.0  ;;  %v266_v13 = vmax.f32 %v202_v62, 0.0 }
  0x29   :  { %325 = vst [vmem:[%s899_s3 + $0x148] sm:$0xff] %v261_v4  ;;  %326 = vst [vmem:[%s899_s3 + $0x150] sm:$0xff] %v262_v5  ;;  %v134_v17 = vmul.f32 %v380_v1, %v63_v63  ;;  %v135_v18 = vmul.f32 %v380_v1, %v64_v0  ;;  %v136_v19 = vmul.f32 %v380_v1, %v65_v3 }
  0x2a   :  { %327 = vst [vmem:[%s899_s3 + $0x158] sm:$0xff] %v263_v6  ;;  %v267_v16 = vmax.f32 %v203_v7, 0.0  ;;  %328 = vst [vmem:[%s899_s3 + $0x160] sm:$0xff] %v264_v11  ;;  %v204_v20 = vadd.f32 %v385_v2, %v133_v14  ;;  %v137_v21 = vmul.f32 %v380_v1, %v66_v8  ;;  %v138_v22 = vmul.f32 %v380_v1, %v67_v9 }
  0x2b   :  { %329 = vst [vmem:[%s899_s3 + $0x168] sm:$0xff] %v265_v12  ;;  %330 = vst [vmem:[%s899_s3 + $0x170] sm:$0xff] %v266_v13  ;;  %v139_v23 = vmul.f32 %v380_v1, %v68_v10  ;;  %v205_v24 = vadd.f32 %v385_v2, %v134_v17  ;;  %v206_v25 = vadd.f32 %v385_v2, %v135_v18 }
  0x2c   :  { %331 = vst [vmem:[%s899_s3 + $0x178] sm:$0xff] %v267_v16  ;;  %v207_v26 = vadd.f32 %v385_v2, %v136_v19  ;;  %v140_v27 = vmul.f32 %v380_v1, %v69_v15  ;;  %v268_v29 = vmax.f32 %v204_v20, 0.0  ;;  %v208_v30 = vadd.f32 %v385_v2, %v137_v21 }
  0x2d   :  { %v209_v31 = vadd.f32 %v385_v2, %v138_v22  ;;  %v210_v32 = vadd.f32 %v385_v2, %v139_v23  ;;  %v269_v36 = vmax.f32 %v205_v24, 0.0  ;;  %v270_v37 = vmax.f32 %v206_v25, 0.0 }
  0x2e   :  { %v271_v38 = vmax.f32 %v207_v26, 0.0  ;;  %v211_v39 = vadd.f32 %v385_v2, %v140_v27  ;;  %332 = vst [vmem:[%s899_s3 + $0x180] sm:$0xff] %v268_v29  ;;  %v272_v43 = vmax.f32 %v208_v30, 0.0  ;;  %v141_v46 = vmul.f32 %v380_v1, %v70_v28 }
  0x2f   :  { %v273_v44 = vmax.f32 %v209_v31, 0.0  ;;  %v274_v45 = vmax.f32 %v210_v32, 0.0  ;;  %333 = vst [vmem:[%s899_s3 + $0x188] sm:$0xff] %v269_v36  ;;  %334 = vst [vmem:[%s899_s3 + $0x190] sm:$0xff] %v270_v37  ;;  %v142_v49 = vmul.f32 %v380_v1, %v71_v33  ;;  %v143_v50 = vmul.f32 %v380_v1, %v72_v34 }
  0x30   :  { %335 = vst [vmem:[%s899_s3 + $0x198] sm:$0xff] %v271_v38  ;;  %v275_v48 = vmax.f32 %v211_v39, 0.0  ;;  %v144_v51 = vmul.f32 %v380_v1, %v73_v35  ;;  %336 = vst [vmem:[%s899_s3 + $0x1a0] sm:$0xff] %v272_v43  ;;  %v212_v52 = vadd.f32 %v385_v2, %v141_v46  ;;  %v145_v53 = vmul.f32 %v380_v1, %v74_v40 }
  0x31   :  { %337 = vst [vmem:[%s899_s3 + $0x1a8] sm:$0xff] %v273_v44  ;;  %338 = vst [vmem:[%s899_s3 + $0x1b0] sm:$0xff] %v274_v45  ;;  %v146_v54 = vmul.f32 %v380_v1, %v75_v41  ;;  %v147_v55 = vmul.f32 %v380_v1, %v76_v42  ;;  %v213_v56 = vadd.f32 %v385_v2, %v142_v49 }
  0x32   :  { %339 = vst [vmem:[%s899_s3 + $0x1b8] sm:$0xff] %v275_v48  ;;  %v214_v57 = vadd.f32 %v385_v2, %v143_v50  ;;  %v215_v58 = vadd.f32 %v385_v2, %v144_v51  ;;  %v148_v59 = vmul.f32 %v380_v1, %v77_v47  ;;  %v276_v60 = vmax.f32 %v212_v52, 0.0 }
  0x33   :  { %v216_v61 = vadd.f32 %v385_v2, %v145_v53  ;;  %v217_v62 = vadd.f32 %v385_v2, %v146_v54  ;;  %v218_v63 = vadd.f32 %v385_v2, %v147_v55  ;;  %v277_v0 = vmax.f32 %v213_v56, 0.0 }
  0x34   :  { %v278_v3 = vmax.f32 %v214_v57, 0.0  ;;  %v279_v4 = vmax.f32 %v215_v58, 0.0  ;;  %v219_v5 = vadd.f32 %v385_v2, %v148_v59  ;;  %340 = vst [vmem:[%s899_s3 + $0x1c0] sm:$0xff] %v276_v60 }
  0x35   :  { %v280_v6 = vmax.f32 %v216_v61, 0.0  ;;  %v281_v7 = vmax.f32 %v217_v62, 0.0  ;;  %v282_v8 = vmax.f32 %v218_v63, 0.0  ;;  %341 = vst [vmem:[%s899_s3 + $0x1c8] sm:$0xff] %v277_v0 }
  0x36   :  { %342 = vst [vmem:[%s899_s3 + $0x1d0] sm:$0xff] %v278_v3  ;;  %343 = vst [vmem:[%s899_s3 + $0x1d8] sm:$0xff] %v279_v4  ;;  %v283_v1 = vmax.f32 %v219_v5, 0.0 }
  0x37   :  { %344 = vst [vmem:[%s899_s3 + $0x1e0] sm:$0xff] %v280_v6  ;;  %345 = vst [vmem:[%s899_s3 + $0x1e8] sm:$0xff] %v281_v7 }
  0x38   :  { %346 = vst [vmem:[%s899_s3 + $0x1f0] sm:$0xff] %v282_v8  ;;  %347 = vst [vmem:[%s899_s3 + $0x1f8] sm:$0xff] %v283_v1 }

// kernel: local_enhancer_forward.36
= control target key start
LH: loop header
LB: loop body
LE: loop exit
PB: predicated region body
PF: predicated region fallthrough
CT: control target
= control target key end

     0   :  { %vm356_vm0 = vcmask 1041408   ;;  %vm259_vm1 = vcmask 293888   ;;  %v1162_v37 = vmov 0.0   ;;  %s1715_s1 = inlined_call_operand.vmem [shape: bf16[36,128], index: 1, kind: input, shape index: {}]   ;;  %s1716_s0 = inlined_call_operand.vmem [shape: bf16[512,36], index: 0, kind: input, shape index: {}]   ;;  %s1717_s2 = inlined_call_operand.vmem [shape: f32[512,128], index: 2, kind: output, shape index: {0}]   ;;  %s1718_s3 = inlined_call_operand.vmem [shape: f32[1,128], index: 3, kind: output, shape index: {1}]   ;;  %s1719_s4 = inlined_call_operand.vmem [shape: f32[1,128], index: 4, kind: output, shape index: {2}]  }
   0x1   :  { %v1127_v0 = vld [vmem:[%s1715_s1 + $0x10] ss:$0 sps:$4 sm:$0x33]   ;;  %v1128_v1 = vld [vmem:[%s1715_s1 + $0x8] sm:$0xff]   ;;  %v1130_v3 = vld [vmem:[%s1716_s0] sm:$0xff]  }
   0x2   :  { %1124 = vmatprep.subr.msk.bf16.mxu0 %vm356_vm0, %v1127_v0  ;;  %v358_v2 = vsel %vm356_vm0, %v1127_v0, 0  ;;  %1125 = vmatprep.subr.msk.bf16.mxu1 %vm356_vm0, %v1127_v0  ;;  %v1129_v4 = vld [vmem:[%s1715_s1] sm:$0xff]   ;;  %v1131_v5 = vld [vmem:[%s1716_s0 + $0x8] sm:$0xff]   ;;  %v1132_v6 = vld [vmem:[%s1716_s0 + $0x10] sm:$0xff]   ;;  %717 = vst [vmem:[#allocation2] sm:$0x1] %v1162_v37 }
   0x3   :  { %1049 = vmatpush3.bf16.msra.mxu0 %v358_v2  ;;  %1121 = vmatpush3.bf16.msra.mxu1 %v358_v2  ;;  %v1133_v7 = vld [vmem:[%s1716_s0 + $0x18] sm:$0xff]   ;;  %v1134_v8 = vld [vmem:[%s1716_s0 + $0x20] sm:$0xff]   ;;  %v1147_v10 = vld [vmem:[%s1716_s0 + $0x88] sm:$0xff]   ;;  %718 = vst [vmem:[#allocation3] sm:$0x1] %v1162_v37 }
   0x4   :  { %1050 = vmatprep.subr.bf16.mxu0 %v1128_v1  ;;  %1119 = vmatprep.subr.bf16.mxu1 %v1128_v1  ;;  %v1146_v9 = vld [vmem:[%s1716_s0 + $0x80] sm:$0xff]   ;;  %v1148_v11 = vld [vmem:[%s1716_s0 + $0x90] sm:$0xff]   ;;  %v1135_v12 = vld [vmem:[%s1716_s0 + $0x28] sm:$0xff]  }
   0x5   :  { %1054 = vmatprep.mubr.msk.bf16.mxu0 %vm259_vm1, %v1130_v3  ;;  %1086 = vmatprep.mubr.msk.bf16.mxu1 %vm259_vm1, %v1146_v9  ;;  %v1136_v13 = vld [vmem:[%s1716_s0 + $0x30] sm:$0xff]   ;;  %v1149_v14 = vld [vmem:[%s1716_s0 + $0x98] sm:$0xff]   ;;  %v1150_v15 = vld [vmem:[%s1716_s0 + $0xa0] sm:$0xff]  }
   0x6   :  { %v1137_v16 = vld [vmem:[%s1716_s0 + $0x38] sm:$0xff]   ;;  %v1151_v17 = vld [vmem:[%s1716_s0 + $0xa8] sm:$0xff]   ;;  %v1138_v18 = vld [vmem:[%s1716_s0 + $0x40] sm:$0xff]  }
   0x7   :  { %1051 = vmatpush3.bf16.msra.mxu0 %v1128_v1  ;;  %1122 = vmatpush3.bf16.msra.mxu1 %v1128_v1  ;;  %v1152_v19 = vld [vmem:[%s1716_s0 + $0xb0] sm:$0xff]   ;;  %v1139_v20 = vld [vmem:[%s1716_s0 + $0x48] sm:$0xff]   ;;  %v1153_v21 = vld [vmem:[%s1716_s0 + $0xb8] sm:$0xff]  }
   0x8   :  { %1052 = vmatprep.subr.bf16.mxu0 %v1129_v4  ;;  %1120 = vmatprep.subr.bf16.mxu1 %v1129_v4  ;;  %v1140_v22 = vld [vmem:[%s1716_s0 + $0x50] sm:$0xff]   ;;  %v1154_v23 = vld [vmem:[%s1716_s0 + $0xc0] sm:$0xff]   ;;  %v1141_v24 = vld [vmem:[%s1716_s0 + $0x58] sm:$0xff]  }
   0x9   :  { %v1155_v25 = vld [vmem:[%s1716_s0 + $0xc8] sm:$0xff]   ;;  %v1142_v26 = vld [vmem:[%s1716_s0 + $0x60] sm:$0xff]   ;;  %v1156_v27 = vld [vmem:[%s1716_s0 + $0xd0] sm:$0xff]  }
   0xa   :  { %v1143_v28 = vld [vmem:[%s1716_s0 + $0x68] sm:$0xff]   ;;  %v1157_v29 = vld [vmem:[%s1716_s0 + $0xd8] sm:$0xff]   ;;  %v1144_v30 = vld [vmem:[%s1716_s0 + $0x70] sm:$0xff]  }
   0xb   :  { %1053 = vmatpush3.bf16.msra.mxu0 %v1129_v4  ;;  %1123 = vmatpush3.bf16.msra.mxu1 %v1129_v4  ;;  %v1158_v31 = vld [vmem:[%s1716_s0 + $0xe0] sm:$0xff]   ;;  %v1145_v32 = vld [vmem:[%s1716_s0 + $0x78] sm:$0xff]   ;;  %v1159_v33 = vld [vmem:[%s1716_s0 + $0xe8] sm:$0xff]  }
   0xc   :  { %v1160_v34 = vld [vmem:[%s1716_s0 + $0xf0] sm:$0xff]   ;;  %v1161_v35 = vld [vmem:[%s1716_s0 + $0xf8] sm:$0xff]  }
   0xe   :  { %1055 = vmatmul.mubr.msk.bf16.vlgmr.msra.gmra.mxu0 %vm259_vm1, %v1131_v5  ;;  %1087 = vmatmul.mubr.msk.bf16.vlgmr.msra.gmra.mxu1 %vm259_vm1, %v1147_v10 }
   0xf   :  { %1058 = vmatprep.mubr.msk.bf16.mxu0 %vm259_vm1, %v1132_v6  ;;  %1090 = vmatprep.mubr.msk.bf16.mxu1 %vm259_vm1, %v1148_v11 }
  0x16   :  { %1059 = vmatmul.mubr.msk.bf16.gmra.mxu0 %vm259_vm1, %v1133_v7  ;;  %1091 = vmatmul.mubr.msk.bf16.gmra.mxu1 %vm259_vm1, %v1149_v14 }
  0x17   :  { %1062 = vmatprep.mubr.msk.bf16.mxu0 %vm259_vm1, %v1134_v8  ;;  %1094 = vmatprep.mubr.msk.bf16.mxu1 %vm259_vm1, %v1150_v15 }
  0x1e   :  { %1063 = vmatmul.mubr.msk.bf16.gmra.mxu0 %vm259_vm1, %v1135_v12  ;;  %1095 = vmatmul.mubr.msk.bf16.gmra.mxu1 %vm259_vm1, %v1151_v17 }
  0x1f   :  { %1066 = vmatprep.mubr.msk.bf16.mxu0 %vm259_vm1, %v1136_v13  ;;  %1098 = vmatprep.mubr.msk.bf16.mxu1 %vm259_vm1, %v1152_v19 }
  0x26   :  { %1067 = vmatmul.mubr.msk.bf16.gmra.mxu0 %vm259_vm1, %v1137_v16  ;;  %1099 = vmatmul.mubr.msk.bf16.gmra.mxu1 %vm259_vm1, %v1153_v21 }
  0x27   :  { %1070 = vmatprep.mubr.msk.bf16.mxu0 %vm259_vm1, %v1138_v18  ;;  %1102 = vmatprep.mubr.msk.bf16.mxu1 %vm259_vm1, %v1154_v23 }
  0x2e   :  { %1071 = vmatmul.mubr.msk.bf16.gmra.mxu0 %vm259_vm1, %v1139_v20  ;;  %1103 = vmatmul.mubr.msk.bf16.gmra.mxu1 %vm259_vm1, %v1155_v25 }
  0x2f   :  { %1074 = vmatprep.mubr.msk.bf16.mxu0 %vm259_vm1, %v1140_v22  ;;  %1106 = vmatprep.mubr.msk.bf16.mxu1 %vm259_vm1, %v1156_v27 }
  0x36   :  { %1075 = vmatmul.mubr.msk.bf16.gmra.mxu0 %vm259_vm1, %v1141_v24  ;;  %1107 = vmatmul.mubr.msk.bf16.gmra.mxu1 %vm259_vm1, %v1157_v29 }
  0x37   :  { %1078 = vmatprep.mubr.msk.bf16.mxu0 %vm259_vm1, %v1142_v26  ;;  %1110 = vmatprep.mubr.msk.bf16.mxu1 %vm259_vm1, %v1158_v31 }
  0x3e   :  { %1079 = vmatmul.mubr.msk.bf16.gmra.mxu0 %vm259_vm1, %v1143_v28  ;;  %1111 = vmatmul.mubr.msk.bf16.gmra.mxu1 %vm259_vm1, %v1159_v33 }
  0x3f   :  { %1082 = vmatprep.mubr.msk.bf16.mxu0 %vm259_vm1, %v1144_v30  ;;  %1114 = vmatprep.mubr.msk.bf16.mxu1 %vm259_vm1, %v1160_v34 }
  0x46   :  { %1083 = vmatmul.mubr.msk.bf16.gmra.mxu0 %vm259_vm1, %v1145_v32  ;;  %1115 = vmatmul.mubr.msk.bf16.gmra.mxu1 %vm259_vm1, %v1161_v35 }
  0xce   :  { %v1056_v36 = vpop.f32.mrf.mxu0  ;;  %v1337_v45 = vpop.f32.mrf.mxu1 }
  0xcf   :  { %651 = vst [vmem:[%s1717_s2 + $0x10] sm:$0xff] %v1056_v36  ;;  %v794_v46 = vmul.f32 %v1056_v36, %v1056_v36  ;;  %683 = vst [vmem:[%s1717_s2 + $0x110] sm:$0xff] %v1337_v45 }
  0xd0   :  { %v394_v38 = vpop.f32.mrf.mxu0  ;;  %v1346_v50 = vpop.f32.mrf.mxu1 }
  0xd1   :  { %649 = vst [vmem:[%s1717_s2] sm:$0xff] %v394_v38  ;;  %v792_v41 = vmul.f32 %v394_v38, %v394_v38  ;;  %681 = vst [vmem:[%s1717_s2 + $0x100] sm:$0xff] %v1346_v50 }
  0xd2   :  { %v1057_v39 = vpop.f32.mrf.mxu0  ;;  %v1355_v55 = vpop.f32.mrf.mxu1 }
  0xd3   :  { %652 = vst [vmem:[%s1717_s2 + $0x18] sm:$0xff] %v1057_v39  ;;  %v795_v51 = vmul.f32 %v1057_v39, %v1057_v39  ;;  %684 = vst [vmem:[%s1717_s2 + $0x118] sm:$0xff] %v1355_v55 }
  0xd4   :  { %v397_v40 = vpop.f32.mrf.mxu0  ;;  %v1364_v60 = vpop.f32.mrf.mxu1 }
  0xd5   :  { %650 = vst [vmem:[%s1717_s2 + $0x8] sm:$0xff] %v397_v40  ;;  %v720_v42 = vadd.f32 %v397_v40, %v394_v38  ;;  %v793_v43 = vmul.f32 %v397_v40, %v397_v40  ;;  %682 = vst [vmem:[%s1717_s2 + $0x108] sm:$0xff] %v1364_v60 }
  0xd6   :  { %v1060_v44 = vpop.f32.mrf.mxu0  ;;  %v1373_v1 = vpop.f32.mrf.mxu1 }
  0xd7   :  { %v721_v47 = vadd.f32 %v1056_v36, %v720_v42  ;;  %v856_v48 = vadd.f32 %v793_v43, %v792_v41  ;;  %655 = vst [vmem:[%s1717_s2 + $0x30] sm:$0xff] %v1060_v44  ;;  %v798_v2 = vmul.f32 %v1060_v44, %v1060_v44  ;;  %687 = vst [vmem:[%s1717_s2 + $0x130] sm:$0xff] %v1373_v1 }
  0xd8   :  { %v410_v49 = vpop.f32.mrf.mxu0  ;;  %v1382_v6 = vpop.f32.mrf.mxu1 }
  0xd9   :  { %v857_v52 = vadd.f32 %v856_v48, %v794_v46  ;;  %653 = vst [vmem:[%s1717_s2 + $0x20] sm:$0xff] %v410_v49  ;;  %v722_v53 = vadd.f32 %v1057_v39, %v721_v47  ;;  %v796_v57 = vmul.f32 %v410_v49, %v410_v49  ;;  %685 = vst [vmem:[%s1717_s2 + $0x120] sm:$0xff] %v1382_v6 }
  0xda   :  { %v1061_v54 = vpop.f32.mrf.mxu0  ;;  %v1391_v11 = vpop.f32.mrf.mxu1 }
  0xdb   :  { %v723_v56 = vadd.f32 %v722_v53, %v410_v49  ;;  %v858_v58 = vadd.f32 %v857_v52, %v795_v51  ;;  %656 = vst [vmem:[%s1717_s2 + $0x38] sm:$0xff] %v1061_v54  ;;  %v799_v7 = vmul.f32 %v1061_v54, %v1061_v54  ;;  %688 = vst [vmem:[%s1717_s2 + $0x138] sm:$0xff] %v1391_v11 }
  0xdc   :  { %v413_v59 = vpop.f32.mrf.mxu0  ;;  %v1400_v16 = vpop.f32.mrf.mxu1 }
  0xdd   :  { %v859_v61 = vadd.f32 %v858_v58, %v796_v57  ;;  %654 = vst [vmem:[%s1717_s2 + $0x28] sm:$0xff] %v413_v59  ;;  %v724_v62 = vadd.f32 %v723_v56, %v413_v59  ;;  %v797_v63 = vmul.f32 %v413_v59, %v413_v59  ;;  %686 = vst [vmem:[%s1717_s2 + $0x128] sm:$0xff] %v1400_v16 }
  0xde   :  { %v1064_v0 = vpop.f32.mrf.mxu0  ;;  %v1409_v21 = vpop.f32.mrf.mxu1 }
  0xdf   :  { %v725_v3 = vadd.f32 %v1060_v44, %v724_v62  ;;  %v860_v4 = vadd.f32 %v859_v61, %v797_v63  ;;  %659 = vst [vmem:[%s1717_s2 + $0x50] sm:$0xff] %v1064_v0  ;;  %v802_v22 = vmul.f32 %v1064_v0, %v1064_v0  ;;  %691 = vst [vmem:[%s1717_s2 + $0x150] sm:$0xff] %v1409_v21 }
  0xe0   :  { %v426_v5 = vpop.f32.mrf.mxu0  ;;  %v1418_v26 = vpop.f32.mrf.mxu1 }
  0xe1   :  { %v861_v8 = vadd.f32 %v860_v4, %v798_v2  ;;  %657 = vst [vmem:[%s1717_s2 + $0x40] sm:$0xff] %v426_v5  ;;  %v726_v9 = vadd.f32 %v1061_v54, %v725_v3  ;;  %v800_v13 = vmul.f32 %v426_v5, %v426_v5  ;;  %689 = vst [vmem:[%s1717_s2 + $0x140] sm:$0xff] %v1418_v26 }
  0xe2   :  { %v1065_v10 = vpop.f32.mrf.mxu0  ;;  %v1427_v31 = vpop.f32.mrf.mxu1 }
  0xe3   :  { %v727_v12 = vadd.f32 %v726_v9, %v426_v5  ;;  %v862_v14 = vadd.f32 %v861_v8, %v799_v7  ;;  %660 = vst [vmem:[%s1717_s2 + $0x58] sm:$0xff] %v1065_v10  ;;  %v803_v27 = vmul.f32 %v1065_v10, %v1065_v10  ;;  %692 = vst [vmem:[%s1717_s2 + $0x158] sm:$0xff] %v1427_v31 }
  0xe4   :  { %v429_v15 = vpop.f32.mrf.mxu0  ;;  %v1436_v36 = vpop.f32.mrf.mxu1 }
  0xe5   :  { %v863_v17 = vadd.f32 %v862_v14, %v800_v13  ;;  %658 = vst [vmem:[%s1717_s2 + $0x48] sm:$0xff] %v429_v15  ;;  %v728_v18 = vadd.f32 %v727_v12, %v429_v15  ;;  %v801_v19 = vmul.f32 %v429_v15, %v429_v15  ;;  %690 = vst [vmem:[%s1717_s2 + $0x148] sm:$0xff] %v1436_v36 }
  0xe6   :  { %v1068_v20 = vpop.f32.mrf.mxu0  ;;  %v1445_v41 = vpop.f32.mrf.mxu1 }
  0xe7   :  { %v729_v23 = vadd.f32 %v1064_v0, %v728_v18  ;;  %v864_v24 = vadd.f32 %v863_v17, %v801_v19  ;;  %663 = vst [vmem:[%s1717_s2 + $0x70] sm:$0xff] %v1068_v20  ;;  %v806_v42 = vmul.f32 %v1068_v20, %v1068_v20  ;;  %695 = vst [vmem:[%s1717_s2 + $0x170] sm:$0xff] %v1445_v41 }
  0xe8   :  { %v442_v25 = vpop.f32.mrf.mxu0  ;;  %v1454_v47 = vpop.f32.mrf.mxu1 }
  0xe9   :  { %v865_v28 = vadd.f32 %v864_v24, %v802_v22  ;;  %661 = vst [vmem:[%s1717_s2 + $0x60] sm:$0xff] %v442_v25  ;;  %v730_v29 = vadd.f32 %v1065_v10, %v729_v23  ;;  %v804_v33 = vmul.f32 %v442_v25, %v442_v25  ;;  %693 = vst [vmem:[%s1717_s2 + $0x160] sm:$0xff] %v1454_v47 }
  0xea   :  { %v1069_v30 = vpop.f32.mrf.mxu0  ;;  %v1463_v53 = vpop.f32.mrf.mxu1 }
  0xeb   :  { %v731_v32 = vadd.f32 %v730_v29, %v442_v25  ;;  %v866_v34 = vadd.f32 %v865_v28, %v803_v27  ;;  %664 = vst [vmem:[%s1717_s2 + $0x78] sm:$0xff] %v1069_v30  ;;  %v807_v48 = vmul.f32 %v1069_v30, %v1069_v30  ;;  %696 = vst [vmem:[%s1717_s2 + $0x178] sm:$0xff] %v1463_v53 }
  0xec   :  { %v445_v35 = vpop.f32.mrf.mxu0  ;;  %v1472_v59 = vpop.f32.mrf.mxu1 }
  0xed   :  { %v867_v37 = vadd.f32 %v866_v34, %v804_v33  ;;  %662 = vst [vmem:[%s1717_s2 + $0x68] sm:$0xff] %v445_v35  ;;  %v732_v38 = vadd.f32 %v731_v32, %v445_v35  ;;  %v805_v39 = vmul.f32 %v445_v35, %v445_v35  ;;  %694 = vst [vmem:[%s1717_s2 + $0x168] sm:$0xff] %v1472_v59 }
  0xee   :  { %v1072_v40 = vpop.f32.mrf.mxu0  ;;  %v1481_v2 = vpop.f32.mrf.mxu1 }
  0xef   :  { %v733_v43 = vadd.f32 %v1068_v20, %v732_v38  ;;  %v868_v44 = vadd.f32 %v867_v37, %v805_v39  ;;  %667 = vst [vmem:[%s1717_s2 + $0x90] sm:$0xff] %v1072_v40  ;;  %v810_v3 = vmul.f32 %v1072_v40, %v1072_v40  ;;  %699 = vst [vmem:[%s1717_s2 + $0x190] sm:$0xff] %v1481_v2 }
  0xf0   :  { %v458_v46 = vpop.f32.mrf.mxu0  ;;  %v1490_v8 = vpop.f32.mrf.mxu1 }
  0xf1   :  { %v869_v49 = vadd.f32 %v868_v44, %v806_v42  ;;  %665 = vst [vmem:[%s1717_s2 + $0x80] sm:$0xff] %v458_v46  ;;  %v734_v51 = vadd.f32 %v1069_v30, %v733_v43  ;;  %v808_v56 = vmul.f32 %v458_v46, %v458_v46  ;;  %697 = vst [vmem:[%s1717_s2 + $0x180] sm:$0xff] %v1490_v8 }
  0xf2   :  { %v1073_v52 = vpop.f32.mrf.mxu0  ;;  %v1499_v14 = vpop.f32.mrf.mxu1 }
  0xf3   :  { %v735_v54 = vadd.f32 %v734_v51, %v458_v46  ;;  %v870_v57 = vadd.f32 %v869_v49, %v807_v48  ;;  %668 = vst [vmem:[%s1717_s2 + $0x98] sm:$0xff] %v1073_v52  ;;  %v811_v9 = vmul.f32 %v1073_v52, %v1073_v52  ;;  %700 = vst [vmem:[%s1717_s2 + $0x198] sm:$0xff] %v1499_v14 }
  0xf4   :  { %v461_v58 = vpop.f32.mrf.mxu0  ;;  %v1508_v20 = vpop.f32.mrf.mxu1 }
  0xf5   :  { %v871_v61 = vadd.f32 %v870_v57, %v808_v56  ;;  %666 = vst [vmem:[%s1717_s2 + $0x88] sm:$0xff] %v461_v58  ;;  %v736_v62 = vadd.f32 %v735_v54, %v461_v58  ;;  %v809_v63 = vmul.f32 %v461_v58, %v461_v58  ;;  %698 = vst [vmem:[%s1717_s2 + $0x188] sm:$0xff] %v1508_v20 }
  0xf6   :  { %v1076_v0 = vpop.f32.mrf.mxu0  ;;  %v1517_v27 = vpop.f32.mrf.mxu1 }
  0xf7   :  { %v737_v4 = vadd.f32 %v1072_v40, %v736_v62  ;;  %v872_v5 = vadd.f32 %v871_v61, %v809_v63  ;;  %671 = vst [vmem:[%s1717_s2 + $0xb0] sm:$0xff] %v1076_v0  ;;  %v814_v28 = vmul.f32 %v1076_v0, %v1076_v0  ;;  %703 = vst [vmem:[%s1717_s2 + $0x1b0] sm:$0xff] %v1517_v27 }
  0xf8   :  { %v474_v7 = vpop.f32.mrf.mxu0  ;;  %v1526_v33 = vpop.f32.mrf.mxu1 }
  0xf9   :  { %v873_v10 = vadd.f32 %v872_v5, %v810_v3  ;;  %669 = vst [vmem:[%s1717_s2 + $0xa0] sm:$0xff] %v474_v7  ;;  %v738_v12 = vadd.f32 %v1073_v52, %v737_v4  ;;  %v812_v17 = vmul.f32 %v474_v7, %v474_v7  ;;  %701 = vst [vmem:[%s1717_s2 + $0x1a0] sm:$0xff] %v1526_v33 }
  0xfa   :  { %v1077_v13 = vpop.f32.mrf.mxu0  ;;  %v1535_v39 = vpop.f32.mrf.mxu1 }
  0xfb   :  { %v739_v15 = vadd.f32 %v738_v12, %v474_v7  ;;  %v874_v18 = vadd.f32 %v873_v10, %v811_v9  ;;  %672 = vst [vmem:[%s1717_s2 + $0xb8] sm:$0xff] %v1077_v13  ;;  %v815_v34 = vmul.f32 %v1077_v13, %v1077_v13  ;;  %704 = vst [vmem:[%s1717_s2 + $0x1b8] sm:$0xff] %v1535_v39 }
  0xfc   :  { %v477_v19 = vpop.f32.mrf.mxu0  ;;  %v1544_v46 = vpop.f32.mrf.mxu1 }
  0xfd   :  { %v875_v22 = vadd.f32 %v874_v18, %v812_v17  ;;  %670 = vst [vmem:[%s1717_s2 + $0xa8] sm:$0xff] %v477_v19  ;;  %v740_v23 = vadd.f32 %v739_v15, %v477_v19  ;;  %v813_v24 = vmul.f32 %v477_v19, %v477_v19  ;;  %702 = vst [vmem:[%s1717_s2 + $0x1a8] sm:$0xff] %v1544_v46 }
  0xfe   :  { %v1080_v25 = vpop.f32.mrf.mxu0  ;;  %v1553_v54 = vpop.f32.mrf.mxu1 }
  0xff   :  { %v741_v29 = vadd.f32 %v1076_v0, %v740_v23  ;;  %v876_v30 = vadd.f32 %v875_v22, %v813_v24  ;;  %675 = vst [vmem:[%s1717_s2 + $0xd0] sm:$0xff] %v1080_v25  ;;  %v818_v56 = vmul.f32 %v1080_v25, %v1080_v25  ;;  %707 = vst [vmem:[%s1717_s2 + $0x1d0] sm:$0xff] %v1553_v54 }
 0x100   :  { %v490_v32 = vpop.f32.mrf.mxu0  ;;  %v1562_v62 = vpop.f32.mrf.mxu1 }
 0x101   :  { %v877_v35 = vadd.f32 %v876_v30, %v814_v28  ;;  %673 = vst [vmem:[%s1717_s2 + $0xc0] sm:$0xff] %v490_v32  ;;  %v742_v37 = vadd.f32 %v1077_v13, %v741_v29  ;;  %v816_v42 = vmul.f32 %v490_v32, %v490_v32  ;;  %705 = vst [vmem:[%s1717_s2 + $0x1c0] sm:$0xff] %v1562_v62 }
 0x102   :  { %v1081_v38 = vpop.f32.mrf.mxu0  ;;  %v1571_v5 = vpop.f32.mrf.mxu1 }
 0x103   :  { %v743_v40 = vadd.f32 %v742_v37, %v490_v32  ;;  %v878_v43 = vadd.f32 %v877_v35, %v815_v34  ;;  %676 = vst [vmem:[%s1717_s2 + $0xd8] sm:$0xff] %v1081_v38  ;;  %v819_v63 = vmul.f32 %v1081_v38, %v1081_v38  ;;  %708 = vst [vmem:[%s1717_s2 + $0x1d8] sm:$0xff] %v1571_v5 }
 0x104   :  { %v493_v44 = vpop.f32.mrf.mxu0  ;;  %v1580_v13 = vpop.f32.mrf.mxu1  ;;  %v824_v34 = vmul.f32 %v1346_v50, %v1346_v50 }
 0x105   :  { %v879_v48 = vadd.f32 %v878_v43, %v816_v42  ;;  %674 = vst [vmem:[%s1717_s2 + $0xc8] sm:$0xff] %v493_v44  ;;  %v744_v49 = vadd.f32 %v743_v40, %v493_v44  ;;  %v817_v51 = vmul.f32 %v493_v44, %v493_v44  ;;  %706 = vst [vmem:[%s1717_s2 + $0x1c8] sm:$0xff] %v1580_v13 }
 0x106   :  { %v1084_v52 = vpop.f32.mrf.mxu0  ;;  %v1589_v19 = vpop.f32.mrf.mxu1  ;;  %v825_v42 = vmul.f32 %v1364_v60, %v1364_v60 }
 0x107   :  { %v745_v57 = vadd.f32 %v1080_v25, %v744_v49  ;;  %v880_v58 = vadd.f32 %v879_v48, %v817_v51  ;;  %679 = vst [vmem:[%s1717_s2 + $0xf0] sm:$0xff] %v1084_v52  ;;  %v822_v22 = vmul.f32 %v1084_v52, %v1084_v52  ;;  %711 = vst [vmem:[%s1717_s2 + $0x1f0] sm:$0xff] %v1589_v19 }
 0x108   :  { %v506_v61 = vpop.f32.mrf.mxu0  ;;  %v1595_v25 = vpop.f32.mrf.mxu1  ;;  %v827_v49 = vmul.f32 %v1355_v55, %v1355_v55 }
 0x109   :  { %v881_v0 = vadd.f32 %v880_v58, %v818_v56  ;;  %677 = vst [vmem:[%s1717_s2 + $0xe0] sm:$0xff] %v506_v61  ;;  %v746_v3 = vadd.f32 %v1081_v38, %v745_v57  ;;  %v820_v9 = vmul.f32 %v506_v61, %v506_v61  ;;  %709 = vst [vmem:[%s1717_s2 + $0x1e0] sm:$0xff] %v1595_v25 }
 0x10a   :  { %v1085_v4 = vpop.f32.mrf.mxu0  ;;  %v1601_v32 = vpop.f32.mrf.mxu1  ;;  %v828_v56 = vmul.f32 %v1382_v6, %v1382_v6 }
 0x10b   :  { %v747_v7 = vadd.f32 %v746_v3, %v506_v61  ;;  %v882_v10 = vadd.f32 %v881_v0, %v819_v63  ;;  %680 = vst [vmem:[%s1717_s2 + $0xf8] sm:$0xff] %v1085_v4  ;;  %v823_v28 = vmul.f32 %v1085_v4, %v1085_v4  ;;  %712 = vst [vmem:[%s1717_s2 + $0x1f8] sm:$0xff] %v1601_v32 }
 0x10c   :  { %v509_v12 = vpop.f32.mrf.mxu0  ;;  %v1610_v38 = vpop.f32.mrf.mxu1  ;;  %v829_v63 = vmul.f32 %v1400_v16, %v1400_v16 }
 0x10d   :  { %v883_v15 = vadd.f32 %v882_v10, %v820_v9  ;;  %678 = vst [vmem:[%s1717_s2 + $0xe8] sm:$0xff] %v509_v12  ;;  %v748_v17 = vadd.f32 %v747_v7, %v509_v12  ;;  %v821_v18 = vmul.f32 %v509_v12, %v509_v12  ;;  %710 = vst [vmem:[%s1717_s2 + $0x1e8] sm:$0xff] %v1610_v38 }
 0x10e   :  { %v832_v9 = vmul.f32 %v1418_v26, %v1418_v26 }
 0x10f   :  { %v749_v23 = vadd.f32 %v1084_v52, %v748_v17  ;;  %v884_v24 = vadd.f32 %v883_v15, %v821_v18  ;;  %v833_v15 = vmul.f32 %v1436_v36, %v1436_v36 }
 0x111   :  { %v750_v29 = vadd.f32 %v1085_v4, %v749_v23  ;;  %v885_v30 = vadd.f32 %v884_v24, %v822_v22  ;;  %v836_v24 = vmul.f32 %v1454_v47, %v1454_v47 }
 0x113   :  { %v886_v35 = vadd.f32 %v885_v30, %v823_v28  ;;  %v751_v37 = vadd.f32 %v750_v29, %v1346_v50  ;;  %v826_v50 = vmul.f32 %v1337_v45, %v1337_v45  ;;  %v837_v30 = vmul.f32 %v1472_v59, %v1472_v59 }
 0x115   :  { %v752_v40 = vadd.f32 %v751_v37, %v1364_v60  ;;  %v887_v43 = vadd.f32 %v886_v35, %v824_v34 }
 0x117   :  { %v753_v44 = vadd.f32 %v1337_v45, %v752_v40  ;;  %v888_v48 = vadd.f32 %v887_v43, %v825_v42  ;;  %v830_v45 = vmul.f32 %v1373_v1, %v1373_v1  ;;  %v840_v42 = vmul.f32 %v1490_v8, %v1490_v8 }
 0x119   :  { %v889_v51 = vadd.f32 %v888_v48, %v826_v50  ;;  %v754_v52 = vadd.f32 %v1355_v55, %v753_v44  ;;  %v831_v55 = vmul.f32 %v1391_v11, %v1391_v11  ;;  %v841_v44 = vmul.f32 %v1508_v20, %v1508_v20 }
 0x11b   :  { %v755_v60 = vadd.f32 %v754_v52, %v1382_v6  ;;  %v890_v57 = vadd.f32 %v889_v51, %v827_v49 }
 0x11d   :  { %v891_v58 = vadd.f32 %v890_v57, %v828_v56  ;;  %v756_v61 = vadd.f32 %v755_v60, %v1400_v16  ;;  %v844_v60 = vmul.f32 %v1526_v33, %v1526_v33 }
 0x11f   :  { %v757_v0 = vadd.f32 %v1373_v1, %v756_v61  ;;  %v892_v3 = vadd.f32 %v891_v58, %v829_v63  ;;  %v834_v1 = vmul.f32 %v1409_v21, %v1409_v21  ;;  %v845_v58 = vmul.f32 %v1544_v46, %v1544_v46 }
 0x121   :  { %v893_v4 = vadd.f32 %v892_v3, %v830_v45  ;;  %v758_v7 = vadd.f32 %v1391_v11, %v757_v0  ;;  %v835_v11 = vmul.f32 %v1427_v31, %v1427_v31  ;;  %v848_v3 = vmul.f32 %v1562_v62, %v1562_v62 }
 0x123   :  { %v759_v6 = vadd.f32 %v758_v7, %v1418_v26  ;;  %v894_v10 = vadd.f32 %v893_v4, %v831_v55  ;;  %v849_v7 = vmul.f32 %v1580_v13, %v1580_v13 }
 0x125   :  { %v895_v12 = vadd.f32 %v894_v10, %v832_v9  ;;  %v760_v16 = vadd.f32 %v759_v6, %v1436_v36 }
 0x127   :  { %v761_v17 = vadd.f32 %v1409_v21, %v760_v16  ;;  %v896_v18 = vadd.f32 %v895_v12, %v833_v15  ;;  %v838_v21 = vmul.f32 %v1445_v41, %v1445_v41  ;;  %v852_v16 = vmul.f32 %v1595_v25, %v1595_v25 }
 0x129   :  { %v897_v22 = vadd.f32 %v896_v18, %v834_v1  ;;  %v762_v23 = vadd.f32 %v1427_v31, %v761_v17  ;;  %v839_v31 = vmul.f32 %v1463_v53, %v1463_v53  ;;  %v853_v17 = vmul.f32 %v1610_v38, %v1610_v38 }
 0x12b   :  { %v763_v26 = vadd.f32 %v762_v23, %v1454_v47  ;;  %v898_v28 = vadd.f32 %v897_v22, %v835_v11 }
 0x12d   :  { %v899_v29 = vadd.f32 %v898_v28, %v836_v24  ;;  %v764_v36 = vadd.f32 %v763_v26, %v1472_v59 }
 0x12f   :  { %v765_v34 = vadd.f32 %v1445_v41, %v764_v36  ;;  %v900_v35 = vadd.f32 %v899_v29, %v837_v30  ;;  %v842_v41 = vmul.f32 %v1481_v2, %v1481_v2 }
 0x131   :  { %v901_v37 = vadd.f32 %v900_v35, %v838_v21  ;;  %v766_v40 = vadd.f32 %v1463_v53, %v765_v34  ;;  %v843_v53 = vmul.f32 %v1499_v14, %v1499_v14  ;;  %v719_v35 = vld [vmem:[#allocation2] sm:$0x1] }
 0x133   :  { %v767_v47 = vadd.f32 %v766_v40, %v1490_v8  ;;  %v902_v43 = vadd.f32 %v901_v37, %v839_v31  ;;  %v791_v37 = vld [vmem:[#allocation3] sm:$0x1] }
 0x135   :  { %v903_v50 = vadd.f32 %v902_v43, %v840_v42  ;;  %v768_v59 = vadd.f32 %v767_v47, %v1508_v20 }
 0x137   :  { %v769_v48 = vadd.f32 %v1481_v2, %v768_v59  ;;  %v904_v49 = vadd.f32 %v903_v50, %v841_v44  ;;  %v846_v2 = vmul.f32 %v1517_v27, %v1517_v27 }
 0x139   :  { %v905_v51 = vadd.f32 %v904_v49, %v842_v41  ;;  %v770_v52 = vadd.f32 %v1499_v14, %v769_v48  ;;  %v847_v14 = vmul.f32 %v1535_v39, %v1535_v39 }
 0x13b   :  { %v771_v8 = vadd.f32 %v770_v52, %v1526_v33  ;;  %v906_v56 = vadd.f32 %v905_v51, %v843_v53 }
 0x13d   :  { %v907_v57 = vadd.f32 %v906_v56, %v844_v60  ;;  %v772_v20 = vadd.f32 %v771_v8, %v1544_v46 }
 0x13f   :  { %v773_v61 = vadd.f32 %v1517_v27, %v772_v20  ;;  %v908_v63 = vadd.f32 %v907_v57, %v845_v58  ;;  %v850_v27 = vmul.f32 %v1553_v54, %v1553_v54 }
 0x141   :  { %v909_v45 = vadd.f32 %v908_v63, %v846_v2  ;;  %v774_v0 = vadd.f32 %v1535_v39, %v773_v61  ;;  %v851_v39 = vmul.f32 %v1571_v5, %v1571_v5 }
 0x143   :  { %v775_v33 = vadd.f32 %v774_v0, %v1562_v62  ;;  %v910_v55 = vadd.f32 %v909_v45, %v847_v14 }
 0x145   :  { %v911_v4 = vadd.f32 %v910_v55, %v848_v3  ;;  %v776_v46 = vadd.f32 %v775_v33, %v1580_v13 }
 0x147   :  { %v777_v6 = vadd.f32 %v1553_v54, %v776_v46  ;;  %v912_v9 = vadd.f32 %v911_v4, %v849_v7  ;;  %v854_v54 = vmul.f32 %v1589_v19, %v1589_v19 }
 0x149   :  { %v913_v10 = vadd.f32 %v912_v9, %v850_v27  ;;  %v778_v12 = vadd.f32 %v1571_v5, %v777_v6  ;;  %v855_v5 = vmul.f32 %v1601_v32, %v1601_v32 }
 0x14b   :  { %v779_v62 = vadd.f32 %v778_v12, %v1595_v25  ;;  %v914_v15 = vadd.f32 %v913_v10, %v851_v39 }
 0x14d   :  { %v915_v1 = vadd.f32 %v914_v15, %v852_v16  ;;  %v780_v13 = vadd.f32 %v779_v62, %v1610_v38 }
 0x14f   :  { %v781_v18 = vadd.f32 %v1589_v19, %v780_v13  ;;  %v916_v11 = vadd.f32 %v915_v1, %v853_v17 }
 0x151   :  { %v782_v22 = vadd.f32 %v1601_v32, %v781_v18  ;;  %v917_v23 = vadd.f32 %v916_v11, %v854_v54 }
 0x153   :  { %v783_v25 = vrot.slane %v782_v22, 4  ;;  %v918_v26 = vadd.f32 %v917_v23, %v855_v5 }
 0x155   :  { %v784_v24 = vadd.f32 %v783_v25, %v782_v22  ;;  %v919_v28 = vrot.slane %v918_v26, 4 }
 0x157   :  { %v785_v29 = vrot.slane %v784_v24, 2  ;;  %v920_v36 = vadd.f32 %v919_v28, %v918_v26 }
 0x159   :  { %v786_v30 = vadd.f32 %v785_v29, %v784_v24  ;;  %v921_v38 = vrot.slane %v920_v36, 2 }
 0x15b   :  { %v787_v21 = vrot.slane %v786_v30, 1  ;;  %v922_v34 = vadd.f32 %v921_v38, %v920_v36 }
 0x15d   :  { %v788_v31 = vadd.f32 %v787_v21, %v786_v30  ;;  %v923_v19 = vrot.slane %v922_v34, 1 }
 0x15f   :  { %v789_v40 = vadd.f32 %v788_v31, %v719_v35  ;;  %v924_v47 = vadd.f32 %v923_v19, %v922_v34 }
 0x161   :  { %790 = vst [vmem:[#allocation2] sm:$0x1] %v789_v40  ;;  %v925_v42 = vadd.f32 %v924_v47, %v791_v37 }
 0x163   :  { %926 = vst [vmem:[#allocation3] sm:$0x1] %v925_v42 }
 0x168   :  { %v930_v32 = vld [vmem:[#allocation2] sm:$0x1] }
 0x169   :  { %931 = vst [vmem:[%s1718_s3] sm:$0x1] %v930_v32 }
 0x16a   :  { %v932_v43 = vld [vmem:[#allocation3] sm:$0x1] }
 0x16b   :  { %933 = vst [vmem:[%s1719_s4] sm:$0x1] %v932_v43 }

// kernel: local_enhancer_forward.38
= control target key start
LH: loop header
LB: loop body
LE: loop exit
PB: predicated region body
PF: predicated region fallthrough
CT: control target
= control target key end

     0   :  { %vm372_vm0 = vcmask 1043456   ;;  %vm275_vm1 = vcmask 588800   ;;  %v1192_v39 = vmov 0.0   ;;  %s1751_s1 = inlined_call_operand.vmem [shape: bf16[72,128], index: 1, kind: input, shape index: {}]   ;;  %s1752_s0 = inlined_call_operand.vmem [shape: bf16[512,72], index: 0, kind: input, shape index: {}]   ;;  %s1753_s2 = inlined_call_operand.vmem [shape: f32[512,128], index: 2, kind: output, shape index: {0}]   ;;  %s1754_s3 = inlined_call_operand.vmem [shape: f32[1,128], index: 3, kind: output, shape index: {1}]   ;;  %s1755_s4 = inlined_call_operand.vmem [shape: f32[1,128], index: 4, kind: output, shape index: {2}]  }
   0x1   :  { %v1155_v0 = vld [vmem:[%s1751_s1 + $0x20] ss:$0 sps:$4 sm:$0xff]   ;;  %v1156_v1 = vld [vmem:[%s1751_s1 + $0x18] sm:$0xff]   ;;  %v1157_v3 = vld [vmem:[%s1751_s1 + $0x10] sm:$0xff]   ;;  %733 = vst [vmem:[#allocation2] sm:$0x1] %v1192_v39 }
   0x2   :  { %1152 = vmatprep.subr.msk.bf16.mxu0 %vm372_vm0, %v1155_v0  ;;  %v374_v2 = vsel %vm372_vm0, %v1155_v0, 0  ;;  %1153 = vmatprep.subr.msk.bf16.mxu1 %vm372_vm0, %v1155_v0  ;;  %v1160_v4 = vld [vmem:[%s1752_s0] sm:$0xff]   ;;  %v1158_v5 = vld [vmem:[%s1751_s1 + $0x8] sm:$0xff]   ;;  %v1162_v8 = vld [vmem:[%s1752_s0 + $0x10] sm:$0xff]   ;;  %734 = vst [vmem:[#allocation3] sm:$0x1] %v1192_v39 }
   0x3   :  { %1069 = vmatpush3.bf16.msra.mxu0 %v374_v2  ;;  %1147 = vmatpush3.bf16.msra.mxu1 %v374_v2  ;;  %v1159_v6 = vld [vmem:[%s1751_s1] sm:$0xff]   ;;  %v1161_v7 = vld [vmem:[%s1752_s0 + $0x8] sm:$0xff]   ;;  %v1178_v11 = vld [vmem:[%s1752_s0 + $0x90] sm:$0xff]  }
   0x4   :  { %1070 = vmatprep.subr.bf16.mxu0 %v1156_v1  ;;  %1143 = vmatprep.subr.bf16.mxu1 %v1156_v1  ;;  %v1176_v9 = vld [vmem:[%s1752_s0 + $0x80] sm:$0xff]   ;;  %v1177_v10 = vld [vmem:[%s1752_s0 + $0x88] sm:$0xff]   ;;  %v1163_v12 = vld [vmem:[%s1752_s0 + $0x18] sm:$0xff]  }
   0x5   :  { %1078 = vmatprep.mubr.msk.bf16.mxu0 %vm275_vm1, %v1160_v4  ;;  %1110 = vmatprep.mubr.msk.bf16.mxu1 %vm275_vm1, %v1176_v9  ;;  %v1164_v13 = vld [vmem:[%s1752_s0 + $0x20] sm:$0xff]   ;;  %v1179_v14 = vld [vmem:[%s1752_s0 + $0x98] sm:$0xff]   ;;  %v1165_v16 = vld [vmem:[%s1752_s0 + $0x28] sm:$0xff]  }
   0x6   :  { %v1180_v15 = vld [vmem:[%s1752_s0 + $0xa0] sm:$0xff]   ;;  %v1166_v17 = vld [vmem:[%s1752_s0 + $0x30] sm:$0xff]   ;;  %v1181_v18 = vld [vmem:[%s1752_s0 + $0xa8] sm:$0xff]  }
   0x7   :  { %1071 = vmatpush3.bf16.msra.mxu0 %v1156_v1  ;;  %1148 = vmatpush3.bf16.msra.mxu1 %v1156_v1  ;;  %v1182_v19 = vld [vmem:[%s1752_s0 + $0xb0] sm:$0xff]   ;;  %v1167_v20 = vld [vmem:[%s1752_s0 + $0x38] sm:$0xff]   ;;  %v1168_v21 = vld [vmem:[%s1752_s0 + $0x40] sm:$0xff]  }
   0x8   :  { %1072 = vmatprep.subr.bf16.mxu0 %v1157_v3  ;;  %1144 = vmatprep.subr.bf16.mxu1 %v1157_v3  ;;  %v1183_v22 = vld [vmem:[%s1752_s0 + $0xb8] sm:$0xff]   ;;  %v1184_v23 = vld [vmem:[%s1752_s0 + $0xc0] sm:$0xff]   ;;  %v1169_v24 = vld [vmem:[%s1752_s0 + $0x48] sm:$0xff]  }
   0x9   :  { %v1170_v25 = vld [vmem:[%s1752_s0 + $0x50] sm:$0xff]   ;;  %v1185_v26 = vld [vmem:[%s1752_s0 + $0xc8] sm:$0xff]   ;;  %v1171_v28 = vld [vmem:[%s1752_s0 + $0x58] sm:$0xff]  }
   0xa   :  { %v1186_v27 = vld [vmem:[%s1752_s0 + $0xd0] sm:$0xff]   ;;  %v1172_v29 = vld [vmem:[%s1752_s0 + $0x60] sm:$0xff]   ;;  %v1187_v30 = vld [vmem:[%s1752_s0 + $0xd8] sm:$0xff]  }
   0xb   :  { %1073 = vmatpush3.bf16.msra.mxu0 %v1157_v3  ;;  %1149 = vmatpush3.bf16.msra.mxu1 %v1157_v3  ;;  %v1188_v31 = vld [vmem:[%s1752_s0 + $0xe0] sm:$0xff]   ;;  %v1173_v32 = vld [vmem:[%s1752_s0 + $0x68] sm:$0xff]   ;;  %v1174_v33 = vld [vmem:[%s1752_s0 + $0x70] sm:$0xff]  }
   0xc   :  { %1074 = vmatprep.subr.bf16.mxu0 %v1158_v5  ;;  %1145 = vmatprep.subr.bf16.mxu1 %v1158_v5  ;;  %v1189_v34 = vld [vmem:[%s1752_s0 + $0xe8] sm:$0xff]   ;;  %v1190_v35 = vld [vmem:[%s1752_s0 + $0xf0] sm:$0xff]   ;;  %v1175_v36 = vld [vmem:[%s1752_s0 + $0x78] sm:$0xff]  }
   0xd   :  { %v1191_v37 = vld [vmem:[%s1752_s0 + $0xf8] sm:$0xff]  }
   0xf   :  { %1075 = vmatpush3.bf16.msra.mxu0 %v1158_v5  ;;  %1150 = vmatpush3.bf16.msra.mxu1 %v1158_v5 }
  0x10   :  { %1076 = vmatprep.subr.bf16.mxu0 %v1159_v6  ;;  %1146 = vmatprep.subr.bf16.mxu1 %v1159_v6 }
  0x13   :  { %1077 = vmatpush3.bf16.msra.mxu0 %v1159_v6  ;;  %1151 = vmatpush3.bf16.msra.mxu1 %v1159_v6 }
  0x16   :  { %1079 = vmatmul.mubr.msk.bf16.vlgmr.msra.gmra.mxu0 %vm275_vm1, %v1161_v7  ;;  %1111 = vmatmul.mubr.msk.bf16.vlgmr.msra.gmra.mxu1 %vm275_vm1, %v1177_v10 }
  0x17   :  { %1082 = vmatprep.mubr.msk.bf16.mxu0 %vm275_vm1, %v1162_v8  ;;  %1114 = vmatprep.mubr.msk.bf16.mxu1 %vm275_vm1, %v1178_v11 }
  0x1e   :  { %1083 = vmatmul.mubr.msk.bf16.gmra.mxu0 %vm275_vm1, %v1163_v12  ;;  %1115 = vmatmul.mubr.msk.bf16.gmra.mxu1 %vm275_vm1, %v1179_v14 }
  0x1f   :  { %1086 = vmatprep.mubr.msk.bf16.mxu0 %vm275_vm1, %v1164_v13  ;;  %1118 = vmatprep.mubr.msk.bf16.mxu1 %vm275_vm1, %v1180_v15 }
  0x26   :  { %1087 = vmatmul.mubr.msk.bf16.gmra.mxu0 %vm275_vm1, %v1165_v16  ;;  %1119 = vmatmul.mubr.msk.bf16.gmra.mxu1 %vm275_vm1, %v1181_v18 }
  0x27   :  { %1090 = vmatprep.mubr.msk.bf16.mxu0 %vm275_vm1, %v1166_v17  ;;  %1122 = vmatprep.mubr.msk.bf16.mxu1 %vm275_vm1, %v1182_v19 }
  0x2e   :  { %1091 = vmatmul.mubr.msk.bf16.gmra.mxu0 %vm275_vm1, %v1167_v20  ;;  %1123 = vmatmul.mubr.msk.bf16.gmra.mxu1 %vm275_vm1, %v1183_v22 }
  0x2f   :  { %1094 = vmatprep.mubr.msk.bf16.mxu0 %vm275_vm1, %v1168_v21  ;;  %1126 = vmatprep.mubr.msk.bf16.mxu1 %vm275_vm1, %v1184_v23 }
  0x36   :  { %1095 = vmatmul.mubr.msk.bf16.gmra.mxu0 %vm275_vm1, %v1169_v24  ;;  %1127 = vmatmul.mubr.msk.bf16.gmra.mxu1 %vm275_vm1, %v1185_v26 }
  0x37   :  { %1098 = vmatprep.mubr.msk.bf16.mxu0 %vm275_vm1, %v1170_v25  ;;  %1130 = vmatprep.mubr.msk.bf16.mxu1 %vm275_vm1, %v1186_v27 }
  0x3e   :  { %1099 = vmatmul.mubr.msk.bf16.gmra.mxu0 %vm275_vm1, %v1171_v28  ;;  %1131 = vmatmul.mubr.msk.bf16.gmra.mxu1 %vm275_vm1, %v1187_v30 }
  0x3f   :  { %1102 = vmatprep.mubr.msk.bf16.mxu0 %vm275_vm1, %v1172_v29  ;;  %1134 = vmatprep.mubr.msk.bf16.mxu1 %vm275_vm1, %v1188_v31 }
  0x46   :  { %1103 = vmatmul.mubr.msk.bf16.gmra.mxu0 %vm275_vm1, %v1173_v32  ;;  %1135 = vmatmul.mubr.msk.bf16.gmra.mxu1 %vm275_vm1, %v1189_v34 }
  0x47   :  { %1106 = vmatprep.mubr.msk.bf16.mxu0 %vm275_vm1, %v1174_v33  ;;  %1138 = vmatprep.mubr.msk.bf16.mxu1 %vm275_vm1, %v1190_v35 }
  0x4e   :  { %1107 = vmatmul.mubr.msk.bf16.gmra.mxu0 %vm275_vm1, %v1175_v36  ;;  %1139 = vmatmul.mubr.msk.bf16.gmra.mxu1 %vm275_vm1, %v1191_v37 }
  0xd6   :  { %v1080_v38 = vpop.f32.mrf.mxu0  ;;  %v1364_v41 = vpop.f32.mrf.mxu1 }
  0xd7   :  { %667 = vst [vmem:[%s1753_s2 + $0x10] sm:$0xff] %v1080_v38  ;;  %699 = vst [vmem:[%s1753_s2 + $0x110] sm:$0xff] %v1364_v41  ;;  %v810_v51 = vmul.f32 %v1080_v38, %v1080_v38 }
  0xd8   :  { %v410_v40 = vpop.f32.mrf.mxu0  ;;  %v1373_v43 = vpop.f32.mrf.mxu1 }
  0xd9   :  { %665 = vst [vmem:[%s1753_s2] sm:$0xff] %v410_v40  ;;  %697 = vst [vmem:[%s1753_s2 + $0x100] sm:$0xff] %v1373_v43  ;;  %v808_v46 = vmul.f32 %v410_v40, %v410_v40 }
  0xda   :  { %v1081_v42 = vpop.f32.mrf.mxu0  ;;  %v1382_v45 = vpop.f32.mrf.mxu1 }
  0xdb   :  { %668 = vst [vmem:[%s1753_s2 + $0x18] sm:$0xff] %v1081_v42  ;;  %700 = vst [vmem:[%s1753_s2 + $0x118] sm:$0xff] %v1382_v45  ;;  %v811_v56 = vmul.f32 %v1081_v42, %v1081_v42 }
  0xdc   :  { %v413_v44 = vpop.f32.mrf.mxu0  ;;  %v1391_v50 = vpop.f32.mrf.mxu1 }
  0xdd   :  { %666 = vst [vmem:[%s1753_s2 + $0x8] sm:$0xff] %v413_v44  ;;  %v736_v47 = vadd.f32 %v413_v44, %v410_v40  ;;  %v809_v48 = vmul.f32 %v413_v44, %v413_v44  ;;  %698 = vst [vmem:[%s1753_s2 + $0x108] sm:$0xff] %v1391_v50 }
  0xde   :  { %v1084_v49 = vpop.f32.mrf.mxu0  ;;  %v1400_v55 = vpop.f32.mrf.mxu1 }
  0xdf   :  { %v737_v52 = vadd.f32 %v1080_v38, %v736_v47  ;;  %v872_v53 = vadd.f32 %v809_v48, %v808_v46  ;;  %671 = vst [vmem:[%s1753_s2 + $0x30] sm:$0xff] %v1084_v49  ;;  %703 = vst [vmem:[%s1753_s2 + $0x130] sm:$0xff] %v1400_v55  ;;  %v814_v7 = vmul.f32 %v1084_v49, %v1084_v49 }
  0xe0   :  { %v426_v54 = vpop.f32.mrf.mxu0  ;;  %v1409_v60 = vpop.f32.mrf.mxu1 }
  0xe1   :  { %v873_v57 = vadd.f32 %v872_v53, %v810_v51  ;;  %669 = vst [vmem:[%s1753_s2 + $0x20] sm:$0xff] %v426_v54  ;;  %v738_v58 = vadd.f32 %v1081_v42, %v737_v52  ;;  %v812_v62 = vmul.f32 %v426_v54, %v426_v54  ;;  %701 = vst [vmem:[%s1753_s2 + $0x120] sm:$0xff] %v1409_v60 }
  0xe2   :  { %v1085_v59 = vpop.f32.mrf.mxu0  ;;  %v1418_v1 = vpop.f32.mrf.mxu1 }
  0xe3   :  { %v739_v61 = vadd.f32 %v738_v58, %v426_v54  ;;  %v874_v63 = vadd.f32 %v873_v57, %v811_v56  ;;  %672 = vst [vmem:[%s1753_s2 + $0x38] sm:$0xff] %v1085_v59  ;;  %704 = vst [vmem:[%s1753_s2 + $0x138] sm:$0xff] %v1418_v1  ;;  %v815_v12 = vmul.f32 %v1085_v59, %v1085_v59 }
  0xe4   :  { %v429_v0 = vpop.f32.mrf.mxu0  ;;  %v1427_v6 = vpop.f32.mrf.mxu1 }
  0xe5   :  { %v875_v2 = vadd.f32 %v874_v63, %v812_v62  ;;  %670 = vst [vmem:[%s1753_s2 + $0x28] sm:$0xff] %v429_v0  ;;  %v740_v3 = vadd.f32 %v739_v61, %v429_v0  ;;  %v813_v4 = vmul.f32 %v429_v0, %v429_v0  ;;  %702 = vst [vmem:[%s1753_s2 + $0x128] sm:$0xff] %v1427_v6 }
  0xe6   :  { %v1088_v5 = vpop.f32.mrf.mxu0  ;;  %v1436_v11 = vpop.f32.mrf.mxu1 }
  0xe7   :  { %v741_v8 = vadd.f32 %v1084_v49, %v740_v3  ;;  %v876_v9 = vadd.f32 %v875_v2, %v813_v4  ;;  %675 = vst [vmem:[%s1753_s2 + $0x50] sm:$0xff] %v1088_v5  ;;  %707 = vst [vmem:[%s1753_s2 + $0x150] sm:$0xff] %v1436_v11  ;;  %v818_v27 = vmul.f32 %v1088_v5, %v1088_v5 }
  0xe8   :  { %v442_v10 = vpop.f32.mrf.mxu0  ;;  %v1445_v16 = vpop.f32.mrf.mxu1 }
  0xe9   :  { %v877_v13 = vadd.f32 %v876_v9, %v814_v7  ;;  %673 = vst [vmem:[%s1753_s2 + $0x40] sm:$0xff] %v442_v10  ;;  %v742_v14 = vadd.f32 %v1085_v59, %v741_v8  ;;  %v816_v18 = vmul.f32 %v442_v10, %v442_v10  ;;  %705 = vst [vmem:[%s1753_s2 + $0x140] sm:$0xff] %v1445_v16 }
  0xea   :  { %v1089_v15 = vpop.f32.mrf.mxu0  ;;  %v1454_v21 = vpop.f32.mrf.mxu1 }
  0xeb   :  { %v743_v17 = vadd.f32 %v742_v14, %v442_v10  ;;  %v878_v19 = vadd.f32 %v877_v13, %v815_v12  ;;  %676 = vst [vmem:[%s1753_s2 + $0x58] sm:$0xff] %v1089_v15  ;;  %708 = vst [vmem:[%s1753_s2 + $0x158] sm:$0xff] %v1454_v21  ;;  %v819_v32 = vmul.f32 %v1089_v15, %v1089_v15 }
  0xec   :  { %v445_v20 = vpop.f32.mrf.mxu0  ;;  %v1463_v26 = vpop.f32.mrf.mxu1 }
  0xed   :  { %v879_v22 = vadd.f32 %v878_v19, %v816_v18  ;;  %674 = vst [vmem:[%s1753_s2 + $0x48] sm:$0xff] %v445_v20  ;;  %v744_v23 = vadd.f32 %v743_v17, %v445_v20  ;;  %v817_v24 = vmul.f32 %v445_v20, %v445_v20  ;;  %706 = vst [vmem:[%s1753_s2 + $0x148] sm:$0xff] %v1463_v26 }
  0xee   :  { %v1092_v25 = vpop.f32.mrf.mxu0  ;;  %v1472_v31 = vpop.f32.mrf.mxu1 }
  0xef   :  { %v745_v28 = vadd.f32 %v1088_v5, %v744_v23  ;;  %v880_v29 = vadd.f32 %v879_v22, %v817_v24  ;;  %679 = vst [vmem:[%s1753_s2 + $0x70] sm:$0xff] %v1092_v25  ;;  %711 = vst [vmem:[%s1753_s2 + $0x170] sm:$0xff] %v1472_v31  ;;  %v822_v51 = vmul.f32 %v1092_v25, %v1092_v25 }
  0xf0   :  { %v458_v30 = vpop.f32.mrf.mxu0  ;;  %v1481_v36 = vpop.f32.mrf.mxu1 }
  0xf1   :  { %v881_v33 = vadd.f32 %v880_v29, %v818_v27  ;;  %677 = vst [vmem:[%s1753_s2 + $0x60] sm:$0xff] %v458_v30  ;;  %v746_v34 = vadd.f32 %v1089_v15, %v745_v28  ;;  %v820_v38 = vmul.f32 %v458_v30, %v458_v30  ;;  %709 = vst [vmem:[%s1753_s2 + $0x160] sm:$0xff] %v1481_v36 }
  0xf2   :  { %v1093_v35 = vpop.f32.mrf.mxu0  ;;  %v1490_v42 = vpop.f32.mrf.mxu1 }
  0xf3   :  { %v747_v37 = vadd.f32 %v746_v34, %v458_v30  ;;  %v882_v39 = vadd.f32 %v881_v33, %v819_v32  ;;  %680 = vst [vmem:[%s1753_s2 + $0x78] sm:$0xff] %v1093_v35  ;;  %712 = vst [vmem:[%s1753_s2 + $0x178] sm:$0xff] %v1490_v42  ;;  %v823_v57 = vmul.f32 %v1093_v35, %v1093_v35 }
  0xf4   :  { %v461_v40 = vpop.f32.mrf.mxu0  ;;  %v1499_v49 = vpop.f32.mrf.mxu1 }
  0xf5   :  { %v883_v44 = vadd.f32 %v882_v39, %v820_v38  ;;  %678 = vst [vmem:[%s1753_s2 + $0x68] sm:$0xff] %v461_v40  ;;  %v748_v46 = vadd.f32 %v747_v37, %v461_v40  ;;  %v821_v47 = vmul.f32 %v461_v40, %v461_v40  ;;  %710 = vst [vmem:[%s1753_s2 + $0x168] sm:$0xff] %v1499_v49 }
  0xf6   :  { %v1096_v48 = vpop.f32.mrf.mxu0  ;;  %v1508_v56 = vpop.f32.mrf.mxu1 }
  0xf7   :  { %v749_v52 = vadd.f32 %v1092_v25, %v748_v46  ;;  %v884_v53 = vadd.f32 %v883_v44, %v821_v47  ;;  %683 = vst [vmem:[%s1753_s2 + $0x90] sm:$0xff] %v1096_v48  ;;  %715 = vst [vmem:[%s1753_s2 + $0x190] sm:$0xff] %v1508_v56  ;;  %v826_v12 = vmul.f32 %v1096_v48, %v1096_v48 }
  0xf8   :  { %v474_v54 = vpop.f32.mrf.mxu0  ;;  %v1517_v62 = vpop.f32.mrf.mxu1 }
  0xf9   :  { %v885_v58 = vadd.f32 %v884_v53, %v822_v51  ;;  %681 = vst [vmem:[%s1753_s2 + $0x80] sm:$0xff] %v474_v54  ;;  %v750_v59 = vadd.f32 %v1093_v35, %v749_v52  ;;  %v824_v0 = vmul.f32 %v474_v54, %v474_v54  ;;  %713 = vst [vmem:[%s1753_s2 + $0x180] sm:$0xff] %v1517_v62 }
  0xfa   :  { %v1097_v61 = vpop.f32.mrf.mxu0  ;;  %v1526_v4 = vpop.f32.mrf.mxu1 }
  0xfb   :  { %v751_v63 = vadd.f32 %v750_v59, %v474_v54  ;;  %v886_v2 = vadd.f32 %v885_v58, %v823_v57  ;;  %684 = vst [vmem:[%s1753_s2 + $0x98] sm:$0xff] %v1097_v61  ;;  %716 = vst [vmem:[%s1753_s2 + $0x198] sm:$0xff] %v1526_v4  ;;  %v827_v18 = vmul.f32 %v1097_v61, %v1097_v61 }
  0xfc   :  { %v477_v3 = vpop.f32.mrf.mxu0  ;;  %v1535_v10 = vpop.f32.mrf.mxu1 }
  0xfd   :  { %v887_v5 = vadd.f32 %v886_v2, %v824_v0  ;;  %682 = vst [vmem:[%s1753_s2 + $0x88] sm:$0xff] %v477_v3  ;;  %v752_v7 = vadd.f32 %v751_v63, %v477_v3  ;;  %v825_v8 = vmul.f32 %v477_v3, %v477_v3  ;;  %714 = vst [vmem:[%s1753_s2 + $0x188] sm:$0xff] %v1535_v10 }
  0xfe   :  { %v1100_v9 = vpop.f32.mrf.mxu0  ;;  %v1544_v17 = vpop.f32.mrf.mxu1 }
  0xff   :  { %v753_v13 = vadd.f32 %v1096_v48, %v752_v7  ;;  %v888_v14 = vadd.f32 %v887_v5, %v825_v8  ;;  %687 = vst [vmem:[%s1753_s2 + $0xb0] sm:$0xff] %v1100_v9  ;;  %719 = vst [vmem:[%s1753_s2 + $0x1b0] sm:$0xff] %v1544_v17  ;;  %v830_v37 = vmul.f32 %v1100_v9, %v1100_v9 }
 0x100   :  { %v490_v15 = vpop.f32.mrf.mxu0  ;;  %v1553_v23 = vpop.f32.mrf.mxu1 }
 0x101   :  { %v889_v19 = vadd.f32 %v888_v14, %v826_v12  ;;  %685 = vst [vmem:[%s1753_s2 + $0xa0] sm:$0xff] %v490_v15  ;;  %v754_v20 = vadd.f32 %v1097_v61, %v753_v13  ;;  %v828_v25 = vmul.f32 %v490_v15, %v490_v15  ;;  %717 = vst [vmem:[%s1753_s2 + $0x1a0] sm:$0xff] %v1553_v23 }
 0x102   :  { %v1101_v22 = vpop.f32.mrf.mxu0  ;;  %v1562_v29 = vpop.f32.mrf.mxu1 }
 0x103   :  { %v755_v24 = vadd.f32 %v754_v20, %v490_v15  ;;  %v890_v27 = vadd.f32 %v889_v19, %v827_v18  ;;  %688 = vst [vmem:[%s1753_s2 + $0xb8] sm:$0xff] %v1101_v22  ;;  %720 = vst [vmem:[%s1753_s2 + $0x1b8] sm:$0xff] %v1562_v29  ;;  %v831_v46 = vmul.f32 %v1101_v22, %v1101_v22 }
 0x104   :  { %v493_v28 = vpop.f32.mrf.mxu0  ;;  %v1571_v35 = vpop.f32.mrf.mxu1 }
 0x105   :  { %v891_v30 = vadd.f32 %v890_v27, %v828_v25  ;;  %686 = vst [vmem:[%s1753_s2 + $0xa8] sm:$0xff] %v493_v28  ;;  %v756_v32 = vadd.f32 %v755_v24, %v493_v28  ;;  %v829_v33 = vmul.f32 %v493_v28, %v493_v28  ;;  %718 = vst [vmem:[%s1753_s2 + $0x1a8] sm:$0xff] %v1571_v35 }
 0x106   :  { %v1104_v34 = vpop.f32.mrf.mxu0  ;;  %v1580_v44 = vpop.f32.mrf.mxu1 }
 0x107   :  { %v757_v38 = vadd.f32 %v1100_v9, %v756_v32  ;;  %v892_v39 = vadd.f32 %v891_v30, %v829_v33  ;;  %691 = vst [vmem:[%s1753_s2 + $0xd0] sm:$0xff] %v1104_v34  ;;  %723 = vst [vmem:[%s1753_s2 + $0x1d0] sm:$0xff] %v1580_v44  ;;  %v834_v5 = vmul.f32 %v1104_v34, %v1104_v34 }
 0x108   :  { %v506_v40 = vpop.f32.mrf.mxu0  ;;  %v1589_v52 = vpop.f32.mrf.mxu1 }
 0x109   :  { %v893_v47 = vadd.f32 %v892_v39, %v830_v37  ;;  %689 = vst [vmem:[%s1753_s2 + $0xc0] sm:$0xff] %v506_v40  ;;  %v758_v48 = vadd.f32 %v1101_v22, %v757_v38  ;;  %v832_v54 = vmul.f32 %v506_v40, %v506_v40  ;;  %721 = vst [vmem:[%s1753_s2 + $0x1c0] sm:$0xff] %v1589_v52 }
 0x10a   :  { %v1105_v51 = vpop.f32.mrf.mxu0  ;;  %v1598_v59 = vpop.f32.mrf.mxu1 }
 0x10b   :  { %v759_v53 = vadd.f32 %v758_v48, %v506_v40  ;;  %v894_v57 = vadd.f32 %v893_v47, %v831_v46  ;;  %692 = vst [vmem:[%s1753_s2 + $0xd8] sm:$0xff] %v1105_v51  ;;  %724 = vst [vmem:[%s1753_s2 + $0x1d8] sm:$0xff] %v1598_v59  ;;  %v835_v13 = vmul.f32 %v1105_v51, %v1105_v51 }
 0x10c   :  { %v509_v58 = vpop.f32.mrf.mxu0  ;;  %v1607_v3 = vpop.f32.mrf.mxu1  ;;  %v840_v47 = vmul.f32 %v1373_v43, %v1373_v43 }
 0x10d   :  { %v895_v61 = vadd.f32 %v894_v57, %v832_v54  ;;  %690 = vst [vmem:[%s1753_s2 + $0xc8] sm:$0xff] %v509_v58  ;;  %v760_v63 = vadd.f32 %v759_v53, %v509_v58  ;;  %v833_v0 = vmul.f32 %v509_v58, %v509_v58  ;;  %722 = vst [vmem:[%s1753_s2 + $0x1c8] sm:$0xff] %v1607_v3 }
 0x10e   :  { %v1108_v2 = vpop.f32.mrf.mxu0  ;;  %v1616_v12 = vpop.f32.mrf.mxu1  ;;  %v841_v54 = vmul.f32 %v1391_v50, %v1391_v50  ;;  %v842_v58 = vmul.f32 %v1364_v41, %v1364_v41 }
 0x10f   :  { %v761_v7 = vadd.f32 %v1104_v34, %v760_v63  ;;  %v896_v8 = vadd.f32 %v895_v61, %v833_v0  ;;  %695 = vst [vmem:[%s1753_s2 + $0xf0] sm:$0xff] %v1108_v2  ;;  %727 = vst [vmem:[%s1753_s2 + $0x1f0] sm:$0xff] %v1616_v12  ;;  %v838_v34 = vmul.f32 %v1108_v2, %v1108_v2 }
 0x110   :  { %v522_v9 = vpop.f32.mrf.mxu0  ;;  %v1625_v19 = vpop.f32.mrf.mxu1  ;;  %v843_v0 = vmul.f32 %v1382_v45, %v1382_v45 }
 0x111   :  { %v897_v14 = vadd.f32 %v896_v8, %v834_v5  ;;  %693 = vst [vmem:[%s1753_s2 + $0xe0] sm:$0xff] %v522_v9  ;;  %v762_v15 = vadd.f32 %v1105_v51, %v761_v7  ;;  %v836_v22 = vmul.f32 %v522_v9, %v522_v9  ;;  %725 = vst [vmem:[%s1753_s2 + $0x1e0] sm:$0xff] %v1625_v19 }
 0x112   :  { %v1109_v18 = vpop.f32.mrf.mxu0  ;;  %v1634_v27 = vpop.f32.mrf.mxu1  ;;  %v844_v7 = vmul.f32 %v1409_v60, %v1409_v60 }
 0x113   :  { %v763_v20 = vadd.f32 %v762_v15, %v522_v9  ;;  %v898_v24 = vadd.f32 %v897_v14, %v835_v13  ;;  %696 = vst [vmem:[%s1753_s2 + $0xf8] sm:$0xff] %v1109_v18  ;;  %728 = vst [vmem:[%s1753_s2 + $0x1f8] sm:$0xff] %v1634_v27  ;;  %v839_v39 = vmul.f32 %v1109_v18, %v1109_v18 }
 0x114   :  { %v525_v25 = vpop.f32.mrf.mxu0  ;;  %v1643_v33 = vpop.f32.mrf.mxu1  ;;  %v845_v13 = vmul.f32 %v1427_v6, %v1427_v6 }
 0x115   :  { %v899_v28 = vadd.f32 %v898_v24, %v836_v22  ;;  %694 = vst [vmem:[%s1753_s2 + $0xe8] sm:$0xff] %v525_v25  ;;  %v764_v30 = vadd.f32 %v763_v20, %v525_v25  ;;  %v837_v32 = vmul.f32 %v525_v25, %v525_v25  ;;  %726 = vst [vmem:[%s1753_s2 + $0x1e8] sm:$0xff] %v1643_v33 }
 0x116   :  { %v848_v22 = vmul.f32 %v1445_v16, %v1445_v16 }
 0x117   :  { %v765_v37 = vadd.f32 %v1108_v2, %v764_v30  ;;  %v900_v38 = vadd.f32 %v899_v28, %v837_v32  ;;  %v849_v28 = vmul.f32 %v1463_v26, %v1463_v26 }
 0x119   :  { %v766_v40 = vadd.f32 %v1109_v18, %v765_v37  ;;  %v901_v46 = vadd.f32 %v900_v38, %v838_v34  ;;  %v852_v38 = vmul.f32 %v1481_v36, %v1481_v36 }
 0x11b   :  { %v902_v48 = vadd.f32 %v901_v46, %v839_v39  ;;  %v767_v51 = vadd.f32 %v766_v40, %v1373_v43  ;;  %v853_v46 = vmul.f32 %v1499_v49, %v1499_v49 }
 0x11d   :  { %v768_v53 = vadd.f32 %v767_v51, %v1391_v50  ;;  %v903_v57 = vadd.f32 %v902_v48, %v840_v47 }
 0x11f   :  { %v769_v61 = vadd.f32 %v1364_v41, %v768_v53  ;;  %v904_v63 = vadd.f32 %v903_v57, %v841_v54  ;;  %v846_v41 = vmul.f32 %v1400_v55, %v1400_v55  ;;  %v856_v54 = vmul.f32 %v1517_v62, %v1517_v62 }
 0x121   :  { %v905_v2 = vadd.f32 %v904_v63, %v842_v58  ;;  %v770_v5 = vadd.f32 %v1382_v45, %v769_v61  ;;  %v847_v45 = vmul.f32 %v1418_v1, %v1418_v1  ;;  %v857_v61 = vmul.f32 %v1535_v10, %v1535_v10 }
 0x123   :  { %v771_v43 = vadd.f32 %v770_v5, %v1409_v60  ;;  %v906_v8 = vadd.f32 %v905_v2, %v843_v0 }
 0x125   :  { %v907_v50 = vadd.f32 %v906_v8, %v844_v7  ;;  %v772_v9 = vadd.f32 %v771_v43, %v1427_v6  ;;  %v860_v43 = vmul.f32 %v1553_v23, %v1553_v23 }
 0x127   :  { %v773_v14 = vadd.f32 %v1400_v55, %v772_v9  ;;  %v908_v15 = vadd.f32 %v907_v50, %v845_v13  ;;  %v850_v55 = vmul.f32 %v1436_v11, %v1436_v11  ;;  %v861_v50 = vmul.f32 %v1571_v35, %v1571_v35 }
 0x129   :  { %v909_v18 = vadd.f32 %v908_v15, %v846_v41  ;;  %v774_v20 = vadd.f32 %v1418_v1, %v773_v14  ;;  %v851_v1 = vmul.f32 %v1454_v21, %v1454_v21  ;;  %v864_v15 = vmul.f32 %v1589_v52, %v1589_v52 }
 0x12b   :  { %v775_v60 = vadd.f32 %v774_v20, %v1445_v16  ;;  %v910_v24 = vadd.f32 %v909_v18, %v847_v45  ;;  %v865_v20 = vmul.f32 %v1607_v3, %v1607_v3 }
 0x12d   :  { %v911_v25 = vadd.f32 %v910_v24, %v848_v22  ;;  %v776_v6 = vadd.f32 %v775_v60, %v1463_v26 }
 0x12f   :  { %v777_v30 = vadd.f32 %v1436_v11, %v776_v6  ;;  %v912_v32 = vadd.f32 %v911_v25, %v849_v28  ;;  %v854_v11 = vmul.f32 %v1472_v31, %v1472_v31  ;;  %v868_v6 = vmul.f32 %v1625_v19, %v1625_v19 }
 0x131   :  { %v913_v34 = vadd.f32 %v912_v32, %v850_v55  ;;  %v778_v37 = vadd.f32 %v1454_v21, %v777_v30  ;;  %v855_v21 = vmul.f32 %v1490_v42, %v1490_v42  ;;  %v869_v30 = vmul.f32 %v1643_v33, %v1643_v33 }
 0x133   :  { %v779_v16 = vadd.f32 %v778_v37, %v1481_v36  ;;  %v914_v39 = vadd.f32 %v913_v34, %v851_v1 }
 0x135   :  { %v915_v40 = vadd.f32 %v914_v39, %v852_v38  ;;  %v780_v26 = vadd.f32 %v779_v16, %v1499_v49 }
 0x137   :  { %v781_v47 = vadd.f32 %v1472_v31, %v780_v26  ;;  %v916_v48 = vadd.f32 %v915_v40, %v853_v46  ;;  %v858_v31 = vmul.f32 %v1508_v56, %v1508_v56 }
 0x139   :  { %v917_v51 = vadd.f32 %v916_v48, %v854_v11  ;;  %v782_v53 = vadd.f32 %v1490_v42, %v781_v47  ;;  %v859_v42 = vmul.f32 %v1526_v4, %v1526_v4  ;;  %v735_v48 = vld [vmem:[#allocation2] sm:$0x1] }
 0x13b   :  { %v783_v36 = vadd.f32 %v782_v53, %v1517_v62  ;;  %v918_v57 = vadd.f32 %v917_v51, %v855_v21  ;;  %v807_v51 = vld [vmem:[#allocation3] sm:$0x1] }
 0x13d   :  { %v919_v58 = vadd.f32 %v918_v57, %v856_v54  ;;  %v784_v49 = vadd.f32 %v783_v36, %v1535_v10 }
 0x13f   :  { %v785_v63 = vadd.f32 %v1508_v56, %v784_v49  ;;  %v920_v0 = vadd.f32 %v919_v58, %v857_v61  ;;  %v862_v56 = vmul.f32 %v1544_v17, %v1544_v17 }
 0x141   :  { %v921_v2 = vadd.f32 %v920_v0, %v858_v31  ;;  %v786_v5 = vadd.f32 %v1526_v4, %v785_v63  ;;  %v863_v4 = vmul.f32 %v1562_v29, %v1562_v29 }
 0x143   :  { %v787_v62 = vadd.f32 %v786_v5, %v1553_v23  ;;  %v922_v7 = vadd.f32 %v921_v2, %v859_v42 }
 0x145   :  { %v923_v8 = vadd.f32 %v922_v7, %v860_v43  ;;  %v788_v10 = vadd.f32 %v787_v62, %v1571_v35 }
 0x147   :  { %v789_v9 = vadd.f32 %v1544_v17, %v788_v10  ;;  %v924_v13 = vadd.f32 %v923_v8, %v861_v50  ;;  %v866_v17 = vmul.f32 %v1580_v44, %v1580_v44 }
 0x149   :  { %v925_v41 = vadd.f32 %v924_v13, %v862_v56  ;;  %v790_v14 = vadd.f32 %v1562_v29, %v789_v9  ;;  %v867_v29 = vmul.f32 %v1598_v59, %v1598_v59 }
 0x14b   :  { %v791_v23 = vadd.f32 %v790_v14, %v1589_v52  ;;  %v926_v45 = vadd.f32 %v925_v41, %v863_v4 }
 0x14d   :  { %v927_v18 = vadd.f32 %v926_v45, %v864_v15  ;;  %v792_v35 = vadd.f32 %v791_v23, %v1607_v3 }
 0x14f   :  { %v793_v60 = vadd.f32 %v1580_v44, %v792_v35  ;;  %v928_v22 = vadd.f32 %v927_v18, %v865_v20  ;;  %v870_v44 = vmul.f32 %v1616_v12, %v1616_v12 }
 0x151   :  { %v929_v24 = vadd.f32 %v928_v22, %v866_v17  ;;  %v794_v25 = vadd.f32 %v1598_v59, %v793_v60  ;;  %v871_v59 = vmul.f32 %v1634_v27, %v1634_v27 }
 0x153   :  { %v795_v52 = vadd.f32 %v794_v25, %v1625_v19  ;;  %v930_v28 = vadd.f32 %v929_v24, %v867_v29 }
 0x155   :  { %v931_v55 = vadd.f32 %v930_v28, %v868_v6  ;;  %v796_v3 = vadd.f32 %v795_v52, %v1643_v33 }
 0x157   :  { %v797_v32 = vadd.f32 %v1616_v12, %v796_v3  ;;  %v932_v1 = vadd.f32 %v931_v55, %v869_v30 }
 0x159   :  { %v798_v34 = vadd.f32 %v1634_v27, %v797_v32  ;;  %v933_v37 = vadd.f32 %v932_v1, %v870_v44 }
 0x15b   :  { %v799_v19 = vrot.slane %v798_v34, 4  ;;  %v934_v16 = vadd.f32 %v933_v37, %v871_v59 }
 0x15d   :  { %v800_v38 = vadd.f32 %v799_v19, %v798_v34  ;;  %v935_v39 = vrot.slane %v934_v16, 4 }
 0x15f   :  { %v801_v40 = vrot.slane %v800_v38, 2  ;;  %v936_v26 = vadd.f32 %v935_v39, %v934_v16 }
 0x161   :  { %v802_v46 = vadd.f32 %v801_v40, %v800_v38  ;;  %v937_v33 = vrot.slane %v936_v26, 2 }
 0x163   :  { %v803_v11 = vrot.slane %v802_v46, 1  ;;  %v938_v47 = vadd.f32 %v937_v33, %v936_v26 }
 0x165   :  { %v804_v21 = vadd.f32 %v803_v11, %v802_v46  ;;  %v939_v12 = vrot.slane %v938_v47, 1 }
 0x167   :  { %v805_v53 = vadd.f32 %v804_v21, %v735_v48  ;;  %v940_v36 = vadd.f32 %v939_v12, %v938_v47 }
 0x169   :  { %806 = vst [vmem:[#allocation2] sm:$0x1] %v805_v53  ;;  %v941_v54 = vadd.f32 %v940_v36, %v807_v51 }
 0x16b   :  { %942 = vst [vmem:[#allocation3] sm:$0x1] %v941_v54 }
 0x170   :  { %v946_v27 = vld [vmem:[#allocation2] sm:$0x1] }
 0x171   :  { %947 = vst [vmem:[%s1754_s3] sm:$0x1] %v946_v27 }
 0x172   :  { %v948_v57 = vld [vmem:[#allocation3] sm:$0x1] }
 0x173   :  { %949 = vst [vmem:[%s1755_s4] sm:$0x1] %v948_v57 }

// kernel: local_enhancer_forward.48
= control target key start
LH: loop header
LB: loop body
LE: loop exit
PB: predicated region body
PF: predicated region fallthrough
CT: control target
= control target key end

     0   :  { %v1352_v0 = vmov 0   ;;  %vm439_vm0 = vcmask 130048   ;;  %s2152_s1 = inlined_call_operand.vmem [shape: bf16[144,128], index: 1, kind: input, shape index: {}]   ;;  %s2153_s0 = inlined_call_operand.vmem [shape: bf16[512,144], index: 0, kind: input, shape index: {}]   ;;  %s2154_s2 = inlined_call_operand.vmem [shape: f32[512,128], index: 2, kind: output, shape index: {0}]   ;;  %s2155_s3 = inlined_call_operand.vmem [shape: f32[1,128], index: 3, kind: output, shape index: {1}]   ;;  %s2156_s4 = inlined_call_operand.vmem [shape: f32[1,128], index: 4, kind: output, shape index: {2}]  }
   0x1   :  { %536 = vmatprep.subr.bf16.mxu0 %v1352_v0  ;;  %v1247_v1 = vld [vmem:[%s2152_s1 + $0x38] sm:$0xff]   ;;  %1227 = vmatprep.subr.bf16.mxu1 %v1352_v0  ;;  %v1248_v2 = vld [vmem:[%s2152_s1 + $0x30] sm:$0xff]   ;;  %v1249_v3 = vld [vmem:[%s2152_s1 + $0x28] sm:$0xff]  }
   0x2   :  { %537 = vmatpush1.bf16.msra.mxu0 %v1247_v1  ;;  %1236 = vmatpush1.bf16.msra.mxu1 %v1247_v1  ;;  %v1250_v4 = vld [vmem:[%s2152_s1 + $0x20] sm:$0xff]   ;;  %v1251_v6 = vld [vmem:[%s2152_s1 + $0x18] sm:$0xff]   ;;  %v1252_v7 = vld [vmem:[%s2152_s1 + $0x10] sm:$0xff]  }
   0x3   :  { %538 = vmatprep.subr.bf16.mxu0 %v1352_v0  ;;  %1228 = vmatprep.subr.bf16.mxu1 %v1352_v0  ;;  %v1258_v5 = vld [vmem:[%s2153_s0 + $0x4] ss:$8 sps:$4 sm:$0xff]   ;;  %v1256_v12 = vld [vmem:[%s2153_s0] ss:$8 sps:$4 sm:$0xff]   ;;  %v1259_v13 = vld [vmem:[%s2153_s0 + $0x14] ss:$8 sps:$4 sm:$0xff]  }
   0x4   :  { %1195 = vmatprep.mubr.msk.bf16.mxu0 %vm439_vm0, %v1258_v5  ;;  %v1282_v8 = vld [vmem:[%s2153_s0 + $0x104] ss:$8 sps:$4 sm:$0xff]   ;;  %v1280_v14 = vld [vmem:[%s2153_s0 + $0x100] ss:$8 sps:$4 sm:$0xff]   ;;  %v1286_v15 = vld [vmem:[%s2153_s0 + $0x114] ss:$8 sps:$4 sm:$0xff]  }
   0x5   :  { %v1253_v9 = vld [vmem:[%s2152_s1 + $0x8] sm:$0xff]   ;;  %1211 = vmatprep.mubr.msk.bf16.mxu1 %vm439_vm0, %v1282_v8  ;;  %v1254_v10 = vld [vmem:[%s2152_s1] sm:$0xff]   ;;  %v1261_v16 = vld [vmem:[%s2153_s0 + $0x10] ss:$8 sps:$4 sm:$0xff]  }
   0x6   :  { %539 = vmatpush1.bf16.msra.mxu0 %v1248_v2  ;;  %1237 = vmatpush1.bf16.msra.mxu1 %v1248_v2  ;;  %v1255_v11 = vld [vmem:[%s2152_s1 + $0x40] sm:$0xff]   ;;  %v1288_v18 = vld [vmem:[%s2153_s0 + $0x110] ss:$8 sps:$4 sm:$0xff]   ;;  %v1265_v21 = vld [vmem:[%s2153_s0 + $0x34] ss:$8 sps:$4 sm:$0xff]  }
   0x7   :  { %540 = vmatprep.subr.bf16.mxu0 %v1352_v0  ;;  %1229 = vmatprep.subr.bf16.mxu1 %v1352_v0  ;;  %v1262_v17 = vld [vmem:[%s2153_s0 + $0x24] ss:$8 sps:$4 sm:$0xff]   ;;  %v1264_v20 = vld [vmem:[%s2153_s0 + $0x20] ss:$8 sps:$4 sm:$0xff]   ;;  %v1298_v23 = vld [vmem:[%s2153_s0 + $0x134] ss:$8 sps:$4 sm:$0xff]  }
   0x8   :  { %v1292_v19 = vld [vmem:[%s2153_s0 + $0x124] ss:$8 sps:$4 sm:$0xff]   ;;  %v1294_v22 = vld [vmem:[%s2153_s0 + $0x120] ss:$8 sps:$4 sm:$0xff]   ;;  %v1267_v24 = vld [vmem:[%s2153_s0 + $0x30] ss:$8 sps:$4 sm:$0xff]  }
   0x9   :  { %v1300_v25 = vld [vmem:[%s2153_s0 + $0x130] ss:$8 sps:$4 sm:$0xff]   ;;  %v1268_v26 = vld [vmem:[%s2153_s0 + $0x44] ss:$8 sps:$4 sm:$0xff]   ;;  %v1270_v28 = vld [vmem:[%s2153_s0 + $0x40] ss:$8 sps:$4 sm:$0xff]  }
   0xa   :  { %541 = vmatpush1.bf16.msra.mxu0 %v1249_v3  ;;  %1238 = vmatpush1.bf16.msra.mxu1 %v1249_v3  ;;  %v1304_v27 = vld [vmem:[%s2153_s0 + $0x144] ss:$8 sps:$4 sm:$0xff]   ;;  %v1306_v29 = vld [vmem:[%s2153_s0 + $0x140] ss:$8 sps:$4 sm:$0xff]   ;;  %v1271_v30 = vld [vmem:[%s2153_s0 + $0x54] ss:$8 sps:$4 sm:$0xff]  }
   0xb   :  { %542 = vmatprep.subr.bf16.mxu0 %v1352_v0  ;;  %1230 = vmatprep.subr.bf16.mxu1 %v1352_v0  ;;  %v1310_v31 = vld [vmem:[%s2153_s0 + $0x154] ss:$8 sps:$4 sm:$0xff]   ;;  %v1273_v32 = vld [vmem:[%s2153_s0 + $0x50] ss:$8 sps:$4 sm:$0xff]   ;;  %v1274_v34 = vld [vmem:[%s2153_s0 + $0x64] ss:$8 sps:$4 sm:$0xff]  }
   0xc   :  { %v1312_v33 = vld [vmem:[%s2153_s0 + $0x150] ss:$8 sps:$4 sm:$0xff]   ;;  %v1316_v35 = vld [vmem:[%s2153_s0 + $0x164] ss:$8 sps:$4 sm:$0xff]   ;;  %v1276_v36 = vld [vmem:[%s2153_s0 + $0x60] ss:$8 sps:$4 sm:$0xff]  }
   0xd   :  { %v1318_v37 = vld [vmem:[%s2153_s0 + $0x160] ss:$8 sps:$4 sm:$0xff]   ;;  %v1277_v38 = vld [vmem:[%s2153_s0 + $0x74] ss:$8 sps:$4 sm:$0xff]   ;;  %v1279_v40 = vld [vmem:[%s2153_s0 + $0x70] ss:$8 sps:$4 sm:$0xff]  }
   0xe   :  { %543 = vmatpush1.bf16.msra.mxu0 %v1250_v4  ;;  %1239 = vmatpush1.bf16.msra.mxu1 %v1250_v4  ;;  %v1322_v39 = vld [vmem:[%s2153_s0 + $0x174] ss:$8 sps:$4 sm:$0xff]   ;;  %v1324_v41 = vld [vmem:[%s2153_s0 + $0x170] ss:$8 sps:$4 sm:$0xff]   ;;  %v1283_v42 = vld [vmem:[%s2153_s0 + $0x84] ss:$8 sps:$4 sm:$0xff]  }
   0xf   :  { %544 = vmatprep.subr.bf16.mxu0 %v1352_v0  ;;  %1231 = vmatprep.subr.bf16.mxu1 %v1352_v0  ;;  %v1328_v43 = vld [vmem:[%s2153_s0 + $0x184] ss:$8 sps:$4 sm:$0xff]   ;;  %v1285_v44 = vld [vmem:[%s2153_s0 + $0x80] ss:$8 sps:$4 sm:$0xff]   ;;  %v1289_v46 = vld [vmem:[%s2153_s0 + $0x94] ss:$8 sps:$4 sm:$0xff]  }
  0x10   :  { %v1330_v45 = vld [vmem:[%s2153_s0 + $0x180] ss:$8 sps:$4 sm:$0xff]   ;;  %v1331_v47 = vld [vmem:[%s2153_s0 + $0x194] ss:$8 sps:$4 sm:$0xff]   ;;  %v1291_v48 = vld [vmem:[%s2153_s0 + $0x90] ss:$8 sps:$4 sm:$0xff]  }
  0x11   :  { %v1333_v49 = vld [vmem:[%s2153_s0 + $0x190] ss:$8 sps:$4 sm:$0xff]   ;;  %v1295_v50 = vld [vmem:[%s2153_s0 + $0xa4] ss:$8 sps:$4 sm:$0xff]   ;;  %v1297_v52 = vld [vmem:[%s2153_s0 + $0xa0] ss:$8 sps:$4 sm:$0xff]  }
  0x12   :  { %545 = vmatpush1.bf16.msra.mxu0 %v1251_v6  ;;  %1240 = vmatpush1.bf16.msra.mxu1 %v1251_v6  ;;  %v1334_v51 = vld [vmem:[%s2153_s0 + $0x1a4] ss:$8 sps:$4 sm:$0xff]   ;;  %v1336_v53 = vld [vmem:[%s2153_s0 + $0x1a0] ss:$8 sps:$4 sm:$0xff]   ;;  %v1301_v54 = vld [vmem:[%s2153_s0 + $0xb4] ss:$8 sps:$4 sm:$0xff]  }
  0x13   :  { %546 = vmatprep.subr.bf16.mxu0 %v1352_v0  ;;  %1232 = vmatprep.subr.bf16.mxu1 %v1352_v0  ;;  %v1337_v55 = vld [vmem:[%s2153_s0 + $0x1b4] ss:$8 sps:$4 sm:$0xff]   ;;  %v1303_v56 = vld [vmem:[%s2153_s0 + $0xb0] ss:$8 sps:$4 sm:$0xff]   ;;  %v1307_v58 = vld [vmem:[%s2153_s0 + $0xc4] ss:$8 sps:$4 sm:$0xff]  }
  0x14   :  { %v1339_v57 = vld [vmem:[%s2153_s0 + $0x1b0] ss:$8 sps:$4 sm:$0xff]   ;;  %v1340_v59 = vld [vmem:[%s2153_s0 + $0x1c4] ss:$8 sps:$4 sm:$0xff]   ;;  %v1309_v60 = vld [vmem:[%s2153_s0 + $0xc0] ss:$8 sps:$4 sm:$0xff]  }
  0x15   :  { %v1342_v61 = vld [vmem:[%s2153_s0 + $0x1c0] ss:$8 sps:$4 sm:$0xff]   ;;  %v1313_v62 = vld [vmem:[%s2153_s0 + $0xd4] ss:$8 sps:$4 sm:$0xff]   ;;  %v1345_v1 = vld [vmem:[%s2153_s0 + $0x1d0] ss:$8 sps:$4 sm:$0xff]  }
  0x16   :  { %547 = vmatpush1.bf16.msra.mxu0 %v1252_v7  ;;  %1241 = vmatpush1.bf16.msra.mxu1 %v1252_v7  ;;  %v1343_v63 = vld [vmem:[%s2153_s0 + $0x1d4] ss:$8 sps:$4 sm:$0xff]   ;;  %v1319_v2 = vld [vmem:[%s2153_s0 + $0xe4] ss:$8 sps:$4 sm:$0xff]   ;;  %v1321_v4 = vld [vmem:[%s2153_s0 + $0xe0] ss:$8 sps:$4 sm:$0xff]  }
  0x17   :  { %548 = vmatprep.subr.bf16.mxu0 %v1352_v0  ;;  %1233 = vmatprep.subr.bf16.mxu1 %v1352_v0  ;;  %v1346_v3 = vld [vmem:[%s2153_s0 + $0x1e4] ss:$8 sps:$4 sm:$0xff]   ;;  %v1348_v5 = vld [vmem:[%s2153_s0 + $0x1e0] ss:$8 sps:$4 sm:$0xff]   ;;  %v1325_v6 = vld [vmem:[%s2153_s0 + $0xf4] ss:$8 sps:$4 sm:$0xff]  }
  0x18   :  { %v1349_v7 = vld [vmem:[%s2153_s0 + $0x1f4] ss:$8 sps:$4 sm:$0xff]   ;;  %v1327_v8 = vld [vmem:[%s2153_s0 + $0xf0] ss:$8 sps:$4 sm:$0xff]  }
  0x1a   :  { %549 = vmatpush1.bf16.msra.mxu0 %v1253_v9  ;;  %1242 = vmatpush1.bf16.msra.mxu1 %v1253_v9  ;;  %v1351_v9 = vld [vmem:[%s2153_s0 + $0x1f0] ss:$8 sps:$4 sm:$0xff]  }
  0x1b   :  { %550 = vmatprep.subr.bf16.mxu0 %v1352_v0  ;;  %1234 = vmatprep.subr.bf16.mxu1 %v1352_v0 }
  0x1e   :  { %551 = vmatpush1.bf16.msra.mxu0 %v1254_v10  ;;  %1243 = vmatpush1.bf16.msra.mxu1 %v1254_v10 }
  0x1f   :  { %566 = vmatprep.subr.bf16.mxu0 %v1352_v0  ;;  %1235 = vmatprep.subr.bf16.mxu1 %v1352_v0  ;;  %v1315_v0 = vld [vmem:[%s2153_s0 + $0xd0] ss:$8 sps:$4 sm:$0xff]  }
  0x22   :  { %567 = vmatpush2.bf16.msra.mxu0 %v1255_v11  ;;  %1244 = vmatpush2.bf16.msra.mxu1 %v1255_v11 }
  0x25   :  { %569 = vmatmul.mubr.bf16.vlgmr.msra.gmra.mxu0 %v1256_v12  ;;  %697 = vmatmul.mubr.bf16.vlgmr.msra.gmra.mxu1 %v1280_v14 }
  0x26   :  { %1196 = vmatprep.mubr.msk.bf16.mxu0 %vm439_vm0, %v1259_v13  ;;  %1212 = vmatprep.mubr.msk.bf16.mxu1 %vm439_vm0, %v1286_v15 }
  0x2d   :  { %577 = vmatmul.mubr.bf16.gmra.mxu0 %v1261_v16  ;;  %705 = vmatmul.mubr.bf16.gmra.mxu1 %v1288_v18 }
  0x2e   :  { %1197 = vmatprep.mubr.msk.bf16.mxu0 %vm439_vm0, %v1262_v17  ;;  %1213 = vmatprep.mubr.msk.bf16.mxu1 %vm439_vm0, %v1292_v19 }
  0x35   :  { %585 = vmatmul.mubr.bf16.gmra.mxu0 %v1264_v20  ;;  %713 = vmatmul.mubr.bf16.gmra.mxu1 %v1294_v22 }
  0x36   :  { %1198 = vmatprep.mubr.msk.bf16.mxu0 %vm439_vm0, %v1265_v21  ;;  %1214 = vmatprep.mubr.msk.bf16.mxu1 %vm439_vm0, %v1298_v23 }
  0x3d   :  { %593 = vmatmul.mubr.bf16.gmra.mxu0 %v1267_v24  ;;  %721 = vmatmul.mubr.bf16.gmra.mxu1 %v1300_v25 }
  0x3e   :  { %1199 = vmatprep.mubr.msk.bf16.mxu0 %vm439_vm0, %v1268_v26  ;;  %1215 = vmatprep.mubr.msk.bf16.mxu1 %vm439_vm0, %v1304_v27 }
  0x45   :  { %601 = vmatmul.mubr.bf16.gmra.mxu0 %v1270_v28  ;;  %729 = vmatmul.mubr.bf16.gmra.mxu1 %v1306_v29 }
  0x46   :  { %1200 = vmatprep.mubr.msk.bf16.mxu0 %vm439_vm0, %v1271_v30  ;;  %1216 = vmatprep.mubr.msk.bf16.mxu1 %vm439_vm0, %v1310_v31 }
  0x4d   :  { %609 = vmatmul.mubr.bf16.gmra.mxu0 %v1273_v32  ;;  %737 = vmatmul.mubr.bf16.gmra.mxu1 %v1312_v33 }
  0x4e   :  { %1201 = vmatprep.mubr.msk.bf16.mxu0 %vm439_vm0, %v1274_v34  ;;  %1217 = vmatprep.mubr.msk.bf16.mxu1 %vm439_vm0, %v1316_v35 }
  0x55   :  { %617 = vmatmul.mubr.bf16.gmra.mxu0 %v1276_v36  ;;  %745 = vmatmul.mubr.bf16.gmra.mxu1 %v1318_v37 }
  0x56   :  { %1202 = vmatprep.mubr.msk.bf16.mxu0 %vm439_vm0, %v1277_v38  ;;  %1218 = vmatprep.mubr.msk.bf16.mxu1 %vm439_vm0, %v1322_v39 }
  0x5d   :  { %625 = vmatmul.mubr.bf16.gmra.mxu0 %v1279_v40  ;;  %753 = vmatmul.mubr.bf16.gmra.mxu1 %v1324_v41 }
  0x5e   :  { %1203 = vmatprep.mubr.msk.bf16.mxu0 %vm439_vm0, %v1283_v42  ;;  %1219 = vmatprep.mubr.msk.bf16.mxu1 %vm439_vm0, %v1328_v43 }
  0x65   :  { %633 = vmatmul.mubr.bf16.gmra.mxu0 %v1285_v44  ;;  %761 = vmatmul.mubr.bf16.gmra.mxu1 %v1330_v45 }
  0x66   :  { %1204 = vmatprep.mubr.msk.bf16.mxu0 %vm439_vm0, %v1289_v46  ;;  %1220 = vmatprep.mubr.msk.bf16.mxu1 %vm439_vm0, %v1331_v47 }
  0x6d   :  { %641 = vmatmul.mubr.bf16.gmra.mxu0 %v1291_v48  ;;  %769 = vmatmul.mubr.bf16.gmra.mxu1 %v1333_v49 }
  0x6e   :  { %1205 = vmatprep.mubr.msk.bf16.mxu0 %vm439_vm0, %v1295_v50  ;;  %1221 = vmatprep.mubr.msk.bf16.mxu1 %vm439_vm0, %v1334_v51 }
  0x75   :  { %649 = vmatmul.mubr.bf16.gmra.mxu0 %v1297_v52  ;;  %777 = vmatmul.mubr.bf16.gmra.mxu1 %v1336_v53 }
  0x76   :  { %1206 = vmatprep.mubr.msk.bf16.mxu0 %vm439_vm0, %v1301_v54  ;;  %1222 = vmatprep.mubr.msk.bf16.mxu1 %vm439_vm0, %v1337_v55 }
  0x7d   :  { %657 = vmatmul.mubr.bf16.gmra.mxu0 %v1303_v56  ;;  %785 = vmatmul.mubr.bf16.gmra.mxu1 %v1339_v57 }
  0x7e   :  { %1207 = vmatprep.mubr.msk.bf16.mxu0 %vm439_vm0, %v1307_v58  ;;  %1223 = vmatprep.mubr.msk.bf16.mxu1 %vm439_vm0, %v1340_v59 }
  0x85   :  { %665 = vmatmul.mubr.bf16.gmra.mxu0 %v1309_v60  ;;  %793 = vmatmul.mubr.bf16.gmra.mxu1 %v1342_v61 }
  0x86   :  { %1208 = vmatprep.mubr.msk.bf16.mxu0 %vm439_vm0, %v1313_v62  ;;  %1224 = vmatprep.mubr.msk.bf16.mxu1 %vm439_vm0, %v1343_v63 }
  0x8d   :  { %673 = vmatmul.mubr.bf16.gmra.mxu0 %v1315_v0  ;;  %801 = vmatmul.mubr.bf16.gmra.mxu1 %v1345_v1 }
  0x8e   :  { %1209 = vmatprep.mubr.msk.bf16.mxu0 %vm439_vm0, %v1319_v2  ;;  %1225 = vmatprep.mubr.msk.bf16.mxu1 %vm439_vm0, %v1346_v3 }
  0x95   :  { %681 = vmatmul.mubr.bf16.gmra.mxu0 %v1321_v4  ;;  %809 = vmatmul.mubr.bf16.gmra.mxu1 %v1348_v5 }
  0x96   :  { %1210 = vmatprep.mubr.msk.bf16.mxu0 %vm439_vm0, %v1325_v6  ;;  %1226 = vmatprep.mubr.msk.bf16.mxu1 %vm439_vm0, %v1349_v7 }
  0x9d   :  { %689 = vmatmul.mubr.bf16.gmra.mxu0 %v1327_v8  ;;  %817 = vmatmul.mubr.bf16.gmra.mxu1 %v1351_v9 }
  0xe5   :  { %v1630_v10 = vpop.f32.mrf.mxu0  ;;  %v1632_v11 = vpop.f32.mrf.mxu1 }
  0xe6   :  { %825 = vst [vmem:[%s2154_s2] sm:$0xff] %v1630_v10  ;;  %857 = vst [vmem:[%s2154_s2 + $0x100] sm:$0xff] %v1632_v11 }
  0xe7   :  { %v572_v12 = vpop.f32.mrf.mxu0  ;;  %v700_v13 = vpop.f32.mrf.mxu1 }
  0xe8   :  { %v1353_v12 = vmov 0.0  }
  0xe9   :  { %v1642_v14 = vpop.f32.mrf.mxu0  ;;  %v1644_v15 = vpop.f32.mrf.mxu1  ;;  %893 = vst [vmem:[#allocation2] sm:$0x1] %v1353_v12  ;;  %894 = vst [vmem:[#allocation3] sm:$0x1] %v1353_v12 }
  0xea   :  { %826 = vst [vmem:[%s2154_s2 + $0x8] sm:$0xff] %v1642_v14  ;;  %858 = vst [vmem:[%s2154_s2 + $0x108] sm:$0xff] %v1644_v15  ;;  %v969_v13 = vmul.f32 %v1642_v14, %v1642_v14 }
  0xeb   :  { %v575_v16 = vpop.f32.mrf.mxu0  ;;  %v703_v17 = vpop.f32.mrf.mxu1 }
  0xed   :  { %v1654_v18 = vpop.f32.mrf.mxu0  ;;  %v1656_v19 = vpop.f32.mrf.mxu1 }
  0xee   :  { %827 = vst [vmem:[%s2154_s2 + $0x10] sm:$0xff] %v1654_v18  ;;  %859 = vst [vmem:[%s2154_s2 + $0x110] sm:$0xff] %v1656_v19 }
  0xef   :  { %v580_v20 = vpop.f32.mrf.mxu0  ;;  %v708_v21 = vpop.f32.mrf.mxu1 }
  0xf0   :  { %v968_v20 = vmul.f32 %v1630_v10, %v1630_v10  ;;  %v896_v21 = vadd.f32 %v1642_v14, %v1630_v10 }
  0xf1   :  { %v1666_v22 = vpop.f32.mrf.mxu0  ;;  %v1668_v23 = vpop.f32.mrf.mxu1 }
  0xf2   :  { %828 = vst [vmem:[%s2154_s2 + $0x18] sm:$0xff] %v1666_v22  ;;  %860 = vst [vmem:[%s2154_s2 + $0x118] sm:$0xff] %v1668_v23  ;;  %v971_v10 = vmul.f32 %v1666_v22, %v1666_v22 }
  0xf3   :  { %v583_v24 = vpop.f32.mrf.mxu0  ;;  %v711_v25 = vpop.f32.mrf.mxu1 }
  0xf4   :  { %v970_v24 = vmul.f32 %v1654_v18, %v1654_v18 }
  0xf5   :  { %v1678_v26 = vpop.f32.mrf.mxu0  ;;  %v1680_v27 = vpop.f32.mrf.mxu1 }
  0xf6   :  { %829 = vst [vmem:[%s2154_s2 + $0x20] sm:$0xff] %v1678_v26  ;;  %861 = vst [vmem:[%s2154_s2 + $0x120] sm:$0xff] %v1680_v27 }
  0xf7   :  { %v588_v28 = vpop.f32.mrf.mxu0  ;;  %v716_v29 = vpop.f32.mrf.mxu1 }
  0xf8   :  { %v1032_v29 = vadd.f32 %v969_v13, %v968_v20 }
  0xf9   :  { %v1690_v30 = vpop.f32.mrf.mxu0  ;;  %v1692_v31 = vpop.f32.mrf.mxu1 }
  0xfa   :  { %830 = vst [vmem:[%s2154_s2 + $0x28] sm:$0xff] %v1690_v30  ;;  %862 = vst [vmem:[%s2154_s2 + $0x128] sm:$0xff] %v1692_v31 }
  0xfb   :  { %v591_v32 = vpop.f32.mrf.mxu0  ;;  %v719_v33 = vpop.f32.mrf.mxu1 }
  0xfc   :  { %v897_v32 = vadd.f32 %v896_v21, %v1654_v18 }
  0xfd   :  { %v1702_v34 = vpop.f32.mrf.mxu0  ;;  %v1704_v35 = vpop.f32.mrf.mxu1 }
  0xfe   :  { %831 = vst [vmem:[%s2154_s2 + $0x30] sm:$0xff] %v1702_v34  ;;  %863 = vst [vmem:[%s2154_s2 + $0x130] sm:$0xff] %v1704_v35 }
  0xff   :  { %v596_v36 = vpop.f32.mrf.mxu0  ;;  %v724_v37 = vpop.f32.mrf.mxu1 }
 0x100   :  { %v1033_v36 = vadd.f32 %v1032_v29, %v970_v24  ;;  %v898_v37 = vadd.f32 %v897_v32, %v1666_v22  ;;  %v973_v22 = vmul.f32 %v1690_v30, %v1690_v30 }
 0x101   :  { %v1714_v38 = vpop.f32.mrf.mxu0  ;;  %v1716_v39 = vpop.f32.mrf.mxu1 }
 0x102   :  { %832 = vst [vmem:[%s2154_s2 + $0x38] sm:$0xff] %v1714_v38  ;;  %864 = vst [vmem:[%s2154_s2 + $0x138] sm:$0xff] %v1716_v39 }
 0x103   :  { %v599_v40 = vpop.f32.mrf.mxu0  ;;  %v727_v41 = vpop.f32.mrf.mxu1 }
 0x104   :  { %v972_v40 = vmul.f32 %v1678_v26, %v1678_v26 }
 0x105   :  { %v1726_v42 = vpop.f32.mrf.mxu0  ;;  %v1728_v43 = vpop.f32.mrf.mxu1 }
 0x106   :  { %833 = vst [vmem:[%s2154_s2 + $0x40] sm:$0xff] %v1726_v42  ;;  %865 = vst [vmem:[%s2154_s2 + $0x140] sm:$0xff] %v1728_v43 }
 0x107   :  { %v604_v44 = vpop.f32.mrf.mxu0  ;;  %v732_v45 = vpop.f32.mrf.mxu1 }
 0x108   :  { %v1034_v44 = vadd.f32 %v1033_v36, %v971_v10  ;;  %v899_v45 = vadd.f32 %v898_v37, %v1678_v26 }
 0x109   :  { %v1738_v46 = vpop.f32.mrf.mxu0  ;;  %v1740_v47 = vpop.f32.mrf.mxu1 }
 0x10a   :  { %834 = vst [vmem:[%s2154_s2 + $0x48] sm:$0xff] %v1738_v46  ;;  %866 = vst [vmem:[%s2154_s2 + $0x148] sm:$0xff] %v1740_v47 }
 0x10b   :  { %v607_v48 = vpop.f32.mrf.mxu0  ;;  %v735_v49 = vpop.f32.mrf.mxu1 }
 0x10d   :  { %v1750_v50 = vpop.f32.mrf.mxu0  ;;  %v1752_v51 = vpop.f32.mrf.mxu1 }
 0x10e   :  { %835 = vst [vmem:[%s2154_s2 + $0x50] sm:$0xff] %v1750_v50  ;;  %867 = vst [vmem:[%s2154_s2 + $0x150] sm:$0xff] %v1752_v51 }
 0x10f   :  { %v612_v52 = vpop.f32.mrf.mxu0  ;;  %v740_v53 = vpop.f32.mrf.mxu1 }
 0x110   :  { %v1035_v52 = vadd.f32 %v1034_v44, %v972_v40  ;;  %v900_v53 = vadd.f32 %v899_v45, %v1690_v30  ;;  %v975_v30 = vmul.f32 %v1714_v38, %v1714_v38 }
 0x111   :  { %v1762_v54 = vpop.f32.mrf.mxu0  ;;  %v1764_v55 = vpop.f32.mrf.mxu1 }
 0x112   :  { %836 = vst [vmem:[%s2154_s2 + $0x58] sm:$0xff] %v1762_v54  ;;  %868 = vst [vmem:[%s2154_s2 + $0x158] sm:$0xff] %v1764_v55 }
 0x113   :  { %v615_v56 = vpop.f32.mrf.mxu0  ;;  %v743_v57 = vpop.f32.mrf.mxu1 }
 0x114   :  { %v974_v56 = vmul.f32 %v1702_v34, %v1702_v34 }
 0x115   :  { %v1774_v58 = vpop.f32.mrf.mxu0  ;;  %v1776_v59 = vpop.f32.mrf.mxu1 }
 0x116   :  { %837 = vst [vmem:[%s2154_s2 + $0x60] sm:$0xff] %v1774_v58  ;;  %869 = vst [vmem:[%s2154_s2 + $0x160] sm:$0xff] %v1776_v59 }
 0x117   :  { %v620_v60 = vpop.f32.mrf.mxu0  ;;  %v748_v61 = vpop.f32.mrf.mxu1 }
 0x118   :  { %v1036_v60 = vadd.f32 %v1035_v52, %v973_v22  ;;  %v901_v61 = vadd.f32 %v900_v53, %v1702_v34 }
 0x119   :  { %v1786_v62 = vpop.f32.mrf.mxu0  ;;  %v1788_v63 = vpop.f32.mrf.mxu1 }
 0x11a   :  { %838 = vst [vmem:[%s2154_s2 + $0x68] sm:$0xff] %v1786_v62  ;;  %870 = vst [vmem:[%s2154_s2 + $0x168] sm:$0xff] %v1788_v63 }
 0x11b   :  { %v623_v0 = vpop.f32.mrf.mxu0  ;;  %v751_v1 = vpop.f32.mrf.mxu1 }
 0x11d   :  { %v1798_v2 = vpop.f32.mrf.mxu0  ;;  %v1800_v3 = vpop.f32.mrf.mxu1 }
 0x11e   :  { %839 = vst [vmem:[%s2154_s2 + $0x70] sm:$0xff] %v1798_v2  ;;  %871 = vst [vmem:[%s2154_s2 + $0x170] sm:$0xff] %v1800_v3 }
 0x11f   :  { %v628_v4 = vpop.f32.mrf.mxu0  ;;  %v756_v5 = vpop.f32.mrf.mxu1 }
 0x120   :  { %v1037_v4 = vadd.f32 %v1036_v60, %v974_v56  ;;  %v902_v5 = vadd.f32 %v901_v61, %v1714_v38  ;;  %v977_v38 = vmul.f32 %v1738_v46, %v1738_v46 }
 0x121   :  { %v1810_v6 = vpop.f32.mrf.mxu0  ;;  %v1812_v7 = vpop.f32.mrf.mxu1 }
 0x122   :  { %840 = vst [vmem:[%s2154_s2 + $0x78] sm:$0xff] %v1810_v6  ;;  %872 = vst [vmem:[%s2154_s2 + $0x178] sm:$0xff] %v1812_v7  ;;  %v1038_v12 = vadd.f32 %v1037_v4, %v975_v30  ;;  %v903_v13 = vadd.f32 %v902_v5, %v1726_v42 }
 0x123   :  { %v631_v8 = vpop.f32.mrf.mxu0  ;;  %v759_v9 = vpop.f32.mrf.mxu1 }
 0x124   :  { %v976_v8 = vmul.f32 %v1726_v42, %v1726_v42 }
 0x125   :  { %v1824_v16 = vpop.f32.mrf.mxu0  ;;  %v1826_v17 = vpop.f32.mrf.mxu1 }
 0x126   :  { %841 = vst [vmem:[%s2154_s2 + $0x80] sm:$0xff] %v1824_v16  ;;  %873 = vst [vmem:[%s2154_s2 + $0x180] sm:$0xff] %v1826_v17  ;;  %v1039_v24 = vadd.f32 %v1038_v12, %v976_v8 }
 0x127   :  { %v636_v25 = vpop.f32.mrf.mxu0  ;;  %v764_v28 = vpop.f32.mrf.mxu1 }
 0x128   :  { %v904_v25 = vadd.f32 %v903_v13, %v1738_v46  ;;  %v978_v28 = vmul.f32 %v1750_v50, %v1750_v50  ;;  %v1040_v32 = vadd.f32 %v1039_v24, %v977_v38  ;;  %v979_v46 = vmul.f32 %v1762_v54, %v1762_v54 }
 0x129   :  { %v1845_v14 = vpop.f32.mrf.mxu0  ;;  %v1847_v33 = vpop.f32.mrf.mxu1 }
 0x12a   :  { %842 = vst [vmem:[%s2154_s2 + $0x88] sm:$0xff] %v1845_v14  ;;  %874 = vst [vmem:[%s2154_s2 + $0x188] sm:$0xff] %v1847_v33  ;;  %v905_v10 = vadd.f32 %v904_v25, %v1750_v50  ;;  %v1041_v40 = vadd.f32 %v1040_v32, %v978_v28 }
 0x12b   :  { %v639_v18 = vpop.f32.mrf.mxu0  ;;  %v767_v41 = vpop.f32.mrf.mxu1 }
 0x12c   :  { %v906_v18 = vadd.f32 %v905_v10, %v1762_v54  ;;  %v980_v41 = vmul.f32 %v1774_v58, %v1774_v58  ;;  %v1042_v45 = vadd.f32 %v1041_v40, %v979_v46  ;;  %v981_v54 = vmul.f32 %v1786_v62, %v1786_v62 }
 0x12d   :  { %v1863_v48 = vpop.f32.mrf.mxu0  ;;  %v1865_v49 = vpop.f32.mrf.mxu1 }
 0x12e   :  { %843 = vst [vmem:[%s2154_s2 + $0x90] sm:$0xff] %v1863_v48  ;;  %875 = vst [vmem:[%s2154_s2 + $0x190] sm:$0xff] %v1865_v49  ;;  %v907_v22 = vadd.f32 %v906_v18, %v1774_v58  ;;  %v1043_v56 = vadd.f32 %v1042_v45, %v980_v41 }
 0x12f   :  { %v644_v26 = vpop.f32.mrf.mxu0  ;;  %v772_v57 = vpop.f32.mrf.mxu1 }
 0x130   :  { %v908_v26 = vadd.f32 %v907_v22, %v1786_v62  ;;  %v982_v57 = vmul.f32 %v1798_v2, %v1798_v2  ;;  %v1044_v61 = vadd.f32 %v1043_v56, %v981_v54  ;;  %v983_v62 = vmul.f32 %v1810_v6, %v1810_v6 }
 0x131   :  { %v1881_v0 = vpop.f32.mrf.mxu0  ;;  %v1883_v1 = vpop.f32.mrf.mxu1 }
 0x132   :  { %844 = vst [vmem:[%s2154_s2 + $0x98] sm:$0xff] %v1881_v0  ;;  %876 = vst [vmem:[%s2154_s2 + $0x198] sm:$0xff] %v1883_v1  ;;  %v909_v30 = vadd.f32 %v908_v26, %v1798_v2  ;;  %v1045_v8 = vadd.f32 %v1044_v61, %v982_v57 }
 0x133   :  { %v647_v34 = vpop.f32.mrf.mxu0  ;;  %v775_v9 = vpop.f32.mrf.mxu1 }
 0x134   :  { %v910_v34 = vadd.f32 %v909_v30, %v1810_v6  ;;  %v984_v9 = vmul.f32 %v1824_v16, %v1824_v16  ;;  %v1046_v13 = vadd.f32 %v1045_v8, %v983_v62  ;;  %v985_v6 = vmul.f32 %v1845_v14, %v1845_v14 }
 0x135   :  { %v1899_v20 = vpop.f32.mrf.mxu0  ;;  %v1901_v21 = vpop.f32.mrf.mxu1 }
 0x136   :  { %845 = vst [vmem:[%s2154_s2 + $0xa0] sm:$0xff] %v1899_v20  ;;  %877 = vst [vmem:[%s2154_s2 + $0x1a0] sm:$0xff] %v1901_v21  ;;  %v911_v38 = vadd.f32 %v910_v34, %v1824_v16  ;;  %v1047_v28 = vadd.f32 %v1046_v13, %v984_v9 }
 0x137   :  { %v652_v42 = vpop.f32.mrf.mxu0  ;;  %v780_v29 = vpop.f32.mrf.mxu1 }
 0x138   :  { %v912_v42 = vadd.f32 %v911_v38, %v1845_v14  ;;  %v986_v29 = vmul.f32 %v1863_v48, %v1863_v48  ;;  %v1048_v10 = vadd.f32 %v1047_v28, %v985_v6  ;;  %v987_v14 = vmul.f32 %v1881_v0, %v1881_v0 }
 0x139   :  { %v1917_v36 = vpop.f32.mrf.mxu0  ;;  %v1919_v37 = vpop.f32.mrf.mxu1 }
 0x13a   :  { %846 = vst [vmem:[%s2154_s2 + $0xa8] sm:$0xff] %v1917_v36  ;;  %878 = vst [vmem:[%s2154_s2 + $0x1a8] sm:$0xff] %v1919_v37  ;;  %v913_v46 = vadd.f32 %v912_v42, %v1863_v48  ;;  %v1049_v41 = vadd.f32 %v1048_v10, %v986_v29 }
 0x13b   :  { %v655_v50 = vpop.f32.mrf.mxu0  ;;  %v783_v44 = vpop.f32.mrf.mxu1 }
 0x13c   :  { %v914_v50 = vadd.f32 %v913_v46, %v1881_v0  ;;  %v988_v44 = vmul.f32 %v1899_v20, %v1899_v20  ;;  %v1050_v22 = vadd.f32 %v1049_v41, %v987_v14  ;;  %v989_v0 = vmul.f32 %v1917_v36, %v1917_v36 }
 0x13d   :  { %v658_v52 = vpop.f32.mrf.mxu0  ;;  %v1935_v53 = vpop.f32.mrf.mxu1 }
 0x13e   :  { %847 = vst [vmem:[%s2154_s2 + $0xb0] sm:$0xff] %v658_v52  ;;  %879 = vst [vmem:[%s2154_s2 + $0x1b0] sm:$0xff] %v1935_v53  ;;  %v915_v54 = vadd.f32 %v914_v50, %v1899_v20  ;;  %v1051_v57 = vadd.f32 %v1050_v22, %v988_v44 }
 0x13f   :  { %v660_v58 = vpop.f32.mrf.mxu0  ;;  %v788_v60 = vpop.f32.mrf.mxu1 }
 0x140   :  { %v916_v58 = vadd.f32 %v915_v54, %v1917_v36  ;;  %v990_v60 = vmul.f32 %v658_v52, %v658_v52  ;;  %v1052_v30 = vadd.f32 %v1051_v57, %v989_v0 }
 0x141   :  { %v661_v4 = vpop.f32.mrf.mxu0  ;;  %v1950_v5 = vpop.f32.mrf.mxu1 }
 0x142   :  { %848 = vst [vmem:[%s2154_s2 + $0xb8] sm:$0xff] %v661_v4  ;;  %880 = vst [vmem:[%s2154_s2 + $0x1b8] sm:$0xff] %v1950_v5  ;;  %v917_v62 = vadd.f32 %v916_v58, %v658_v52  ;;  %v991_v8 = vmul.f32 %v661_v4, %v661_v4 }
 0x143   :  { %v663_v2 = vpop.f32.mrf.mxu0  ;;  %v791_v12 = vpop.f32.mrf.mxu1 }
 0x144   :  { %v1053_v2 = vadd.f32 %v1052_v30, %v990_v60  ;;  %v918_v36 = vadd.f32 %v917_v62, %v661_v4 }
 0x145   :  { %v666_v24 = vpop.f32.mrf.mxu0  ;;  %v1965_v25 = vpop.f32.mrf.mxu1 }
 0x146   :  { %849 = vst [vmem:[%s2154_s2 + $0xc0] sm:$0xff] %v666_v24  ;;  %881 = vst [vmem:[%s2154_s2 + $0x1c0] sm:$0xff] %v1965_v25  ;;  %v992_v12 = vmul.f32 %v666_v24, %v666_v24  ;;  %v1054_v6 = vadd.f32 %v1053_v2, %v991_v8  ;;  %v919_v52 = vadd.f32 %v918_v36, %v666_v24 }
 0x147   :  { %v668_v16 = vpop.f32.mrf.mxu0  ;;  %v796_v32 = vpop.f32.mrf.mxu1 }
 0x148   :  { %v1055_v16 = vadd.f32 %v1054_v6, %v992_v12 }
 0x149   :  { %v669_v40 = vpop.f32.mrf.mxu0  ;;  %v1980_v18 = vpop.f32.mrf.mxu1 }
 0x14a   :  { %850 = vst [vmem:[%s2154_s2 + $0xc8] sm:$0xff] %v669_v40  ;;  %882 = vst [vmem:[%s2154_s2 + $0x1c8] sm:$0xff] %v1980_v18  ;;  %v993_v28 = vmul.f32 %v669_v40, %v669_v40  ;;  %v920_v4 = vadd.f32 %v919_v52, %v669_v40 }
 0x14b   :  { %v671_v48 = vpop.f32.mrf.mxu0  ;;  %v799_v45 = vpop.f32.mrf.mxu1 }
 0x14c   :  { %v1056_v14 = vadd.f32 %v1055_v16, %v993_v28 }
 0x14d   :  { %v674_v56 = vpop.f32.mrf.mxu0  ;;  %v1995_v26 = vpop.f32.mrf.mxu1 }
 0x14e   :  { %851 = vst [vmem:[%s2154_s2 + $0xd0] sm:$0xff] %v674_v56  ;;  %883 = vst [vmem:[%s2154_s2 + $0x1d0] sm:$0xff] %v1995_v26  ;;  %v994_v32 = vmul.f32 %v674_v56, %v674_v56  ;;  %v921_v24 = vadd.f32 %v920_v4, %v674_v56 }
 0x14f   :  { %v676_v20 = vpop.f32.mrf.mxu0  ;;  %v804_v61 = vpop.f32.mrf.mxu1 }
 0x150   :  { %v1057_v48 = vadd.f32 %v1056_v14, %v994_v32  ;;  %v1001_v32 = vmul.f32 %v1644_v15, %v1644_v15  ;;  %v1002_v14 = vmul.f32 %v1656_v19, %v1656_v19 }
 0x151   :  { %v677_v34 = vpop.f32.mrf.mxu0  ;;  %v2005_v9 = vpop.f32.mrf.mxu1 }
 0x152   :  { %852 = vst [vmem:[%s2154_s2 + $0xd8] sm:$0xff] %v677_v34  ;;  %884 = vst [vmem:[%s2154_s2 + $0x1d8] sm:$0xff] %v2005_v9  ;;  %v995_v41 = vmul.f32 %v677_v34, %v677_v34  ;;  %v922_v40 = vadd.f32 %v921_v24, %v677_v34 }
 0x153   :  { %v679_v13 = vpop.f32.mrf.mxu0  ;;  %v807_v38 = vpop.f32.mrf.mxu1 }
 0x154   :  { %v1058_v0 = vadd.f32 %v1057_v48, %v995_v41 }
 0x155   :  { %v682_v42 = vpop.f32.mrf.mxu0  ;;  %v2014_v29 = vpop.f32.mrf.mxu1 }
 0x156   :  { %853 = vst [vmem:[%s2154_s2 + $0xe0] sm:$0xff] %v682_v42  ;;  %885 = vst [vmem:[%s2154_s2 + $0x1e0] sm:$0xff] %v2014_v29  ;;  %v996_v45 = vmul.f32 %v682_v42, %v682_v42  ;;  %v923_v56 = vadd.f32 %v922_v40, %v682_v42  ;;  %v1000_v42 = vmul.f32 %v1632_v11, %v1632_v11 }
 0x157   :  { %v684_v10 = vpop.f32.mrf.mxu0  ;;  %v812_v46 = vpop.f32.mrf.mxu1 }
 0x158   :  { %v1059_v20 = vadd.f32 %v1058_v0, %v996_v45 }
 0x159   :  { %v685_v50 = vpop.f32.mrf.mxu0  ;;  %v2023_v44 = vpop.f32.mrf.mxu1 }
 0x15a   :  { %854 = vst [vmem:[%s2154_s2 + $0xe8] sm:$0xff] %v685_v50  ;;  %886 = vst [vmem:[%s2154_s2 + $0x1e8] sm:$0xff] %v2023_v44  ;;  %v997_v57 = vmul.f32 %v685_v50, %v685_v50  ;;  %v924_v61 = vadd.f32 %v923_v56, %v685_v50  ;;  %v1003_v50 = vmul.f32 %v1668_v23, %v1668_v23 }
 0x15b   :  { %v687_v22 = vpop.f32.mrf.mxu0  ;;  %v815_v54 = vpop.f32.mrf.mxu1 }
 0x15c   :  { %v1060_v34 = vadd.f32 %v1059_v20, %v997_v57 }
 0x15d   :  { %v690_v58 = vpop.f32.mrf.mxu0  ;;  %v2032_v60 = vpop.f32.mrf.mxu1 }
 0x15e   :  { %855 = vst [vmem:[%s2154_s2 + $0xf0] sm:$0xff] %v690_v58  ;;  %v998_v30 = vmul.f32 %v690_v58, %v690_v58  ;;  %887 = vst [vmem:[%s2154_s2 + $0x1f0] sm:$0xff] %v2032_v60  ;;  %v925_v2 = vadd.f32 %v924_v61, %v690_v58 }
 0x15f   :  { %v692_v62 = vpop.f32.mrf.mxu0  ;;  %v820_v8 = vpop.f32.mrf.mxu1 }
 0x160   :  { %v1061_v13 = vadd.f32 %v1060_v34, %v998_v30 }
 0x161   :  { %v693_v36 = vpop.f32.mrf.mxu0  ;;  %v2041_v12 = vpop.f32.mrf.mxu1 }
 0x162   :  { %856 = vst [vmem:[%s2154_s2 + $0xf8] sm:$0xff] %v693_v36  ;;  %v926_v38 = vadd.f32 %v925_v2, %v693_v36  ;;  %v999_v6 = vmul.f32 %v693_v36, %v693_v36  ;;  %888 = vst [vmem:[%s2154_s2 + $0x1f8] sm:$0xff] %v2041_v12 }
 0x163   :  { %v695_v52 = vpop.f32.mrf.mxu0  ;;  %v823_v28 = vpop.f32.mrf.mxu1 }
 0x164   :  { %v927_v16 = vadd.f32 %v926_v38, %v1632_v11  ;;  %v1062_v4 = vadd.f32 %v1061_v13, %v999_v6  ;;  %v1004_v11 = vmul.f32 %v1680_v27, %v1680_v27 }
 0x166   :  { %v928_v10 = vadd.f32 %v927_v16, %v1644_v15  ;;  %v1063_v46 = vadd.f32 %v1062_v4, %v1000_v42  ;;  %v1005_v15 = vmul.f32 %v1692_v31, %v1692_v31 }
 0x168   :  { %v929_v24 = vadd.f32 %v928_v10, %v1656_v19  ;;  %v1064_v41 = vadd.f32 %v1063_v46, %v1001_v32  ;;  %v1006_v19 = vmul.f32 %v1704_v35, %v1704_v35 }
 0x16a   :  { %v930_v48 = vadd.f32 %v929_v24, %v1668_v23  ;;  %v1065_v40 = vadd.f32 %v1064_v41, %v1002_v14  ;;  %v1007_v23 = vmul.f32 %v1716_v39, %v1716_v39  ;;  %v1017_v14 = vmul.f32 %v1847_v33, %v1847_v33 }
 0x16c   :  { %v931_v45 = vadd.f32 %v930_v48, %v1680_v27  ;;  %v1066_v22 = vadd.f32 %v1065_v40, %v1003_v50  ;;  %v1008_v27 = vmul.f32 %v1728_v43, %v1728_v43  ;;  %v1018_v50 = vmul.f32 %v1865_v49, %v1865_v49 }
 0x16d   :  { %v1019_v40 = vmul.f32 %v1883_v1, %v1883_v1 }
 0x16e   :  { %v932_v54 = vadd.f32 %v931_v45, %v1692_v31  ;;  %v1067_v0 = vadd.f32 %v1066_v22, %v1004_v11  ;;  %v1009_v31 = vmul.f32 %v1740_v47, %v1740_v47  ;;  %v1020_v45 = vmul.f32 %v1901_v21, %v1901_v21 }
 0x170   :  { %v933_v56 = vadd.f32 %v932_v54, %v1704_v35  ;;  %v1068_v57 = vadd.f32 %v1067_v0, %v1005_v15  ;;  %v1010_v35 = vmul.f32 %v1752_v51, %v1752_v51  ;;  %v1021_v15 = vmul.f32 %v1919_v37, %v1919_v37 }
 0x171   :  { %v1022_v0 = vmul.f32 %v1935_v53, %v1935_v53 }
 0x172   :  { %v934_v58 = vadd.f32 %v933_v56, %v1716_v39  ;;  %v1069_v20 = vadd.f32 %v1068_v57, %v1006_v19  ;;  %v1011_v39 = vmul.f32 %v1764_v55, %v1764_v55  ;;  %v1023_v56 = vmul.f32 %v1950_v5, %v1950_v5 }
 0x174   :  { %v1070_v61 = vadd.f32 %v1069_v20, %v1007_v23  ;;  %v935_v30 = vadd.f32 %v934_v58, %v1728_v43  ;;  %v1012_v43 = vmul.f32 %v1776_v59, %v1776_v59  ;;  %v1024_v23 = vmul.f32 %v1965_v25, %v1965_v25 }
 0x175   :  { %v1025_v20 = vmul.f32 %v1980_v18, %v1980_v18 }
 0x176   :  { %v936_v62 = vadd.f32 %v935_v30, %v1740_v47  ;;  %v1071_v8 = vadd.f32 %v1070_v61, %v1008_v27  ;;  %v1013_v47 = vmul.f32 %v1788_v63, %v1788_v63  ;;  %v1026_v61 = vmul.f32 %v1995_v26, %v1995_v26 }
 0x178   :  { %v937_v34 = vadd.f32 %v936_v62, %v1752_v51  ;;  %v1072_v2 = vadd.f32 %v1071_v8, %v1009_v31  ;;  %v1014_v51 = vmul.f32 %v1800_v3, %v1800_v3  ;;  %v1027_v31 = vmul.f32 %v2005_v9, %v2005_v9 }
 0x179   :  { %v1028_v8 = vmul.f32 %v2014_v29, %v2014_v29 }
 0x17a   :  { %v938_v36 = vadd.f32 %v937_v34, %v1764_v55  ;;  %v1073_v13 = vadd.f32 %v1072_v2, %v1010_v35  ;;  %v1015_v55 = vmul.f32 %v1812_v7, %v1812_v7  ;;  %v1029_v34 = vmul.f32 %v2023_v44, %v2023_v44 }
 0x17c   :  { %v939_v38 = vadd.f32 %v938_v36, %v1776_v59  ;;  %v1074_v6 = vadd.f32 %v1073_v13, %v1011_v39  ;;  %v1016_v59 = vmul.f32 %v1826_v17, %v1826_v17  ;;  %v1030_v39 = vmul.f32 %v2032_v60, %v2032_v60 }
 0x17d   :  { %v1031_v13 = vmul.f32 %v2041_v12, %v2041_v12 }
 0x17e   :  { %v940_v52 = vadd.f32 %v939_v38, %v1788_v63  ;;  %v1075_v28 = vadd.f32 %v1074_v6, %v1012_v43 }
 0x180   :  { %v941_v42 = vadd.f32 %v940_v52, %v1800_v3  ;;  %v1076_v16 = vadd.f32 %v1075_v28, %v1013_v47 }
 0x182   :  { %v942_v4 = vadd.f32 %v941_v42, %v1812_v7  ;;  %v1077_v32 = vadd.f32 %v1076_v16, %v1014_v51  ;;  %v895_v16 = vld [vmem:[#allocation2] sm:$0x1] }
 0x184   :  { %v943_v10 = vadd.f32 %v942_v4, %v1826_v17  ;;  %v1078_v46 = vadd.f32 %v1077_v32, %v1015_v55 }
 0x186   :  { %v944_v63 = vadd.f32 %v943_v10, %v1847_v33  ;;  %v1079_v24 = vadd.f32 %v1078_v46, %v1016_v59 }
 0x188   :  { %v1080_v3 = vadd.f32 %v1079_v24, %v1017_v14  ;;  %v945_v41 = vadd.f32 %v944_v63, %v1865_v49 }
 0x18a   :  { %v1081_v7 = vadd.f32 %v1080_v3, %v1018_v50  ;;  %v946_v48 = vadd.f32 %v945_v41, %v1883_v1 }
 0x18c   :  { %v1082_v17 = vadd.f32 %v1081_v7, %v1019_v40  ;;  %v947_v11 = vadd.f32 %v946_v48, %v1901_v21 }
 0x18e   :  { %v1083_v33 = vadd.f32 %v1082_v17, %v1020_v45  ;;  %v948_v22 = vadd.f32 %v947_v11, %v1919_v37 }
 0x190   :  { %v1084_v54 = vadd.f32 %v1083_v33, %v1021_v15  ;;  %v949_v49 = vadd.f32 %v948_v22, %v1935_v53 }
 0x192   :  { %v1085_v19 = vadd.f32 %v1084_v54, %v1022_v0  ;;  %v950_v1 = vadd.f32 %v949_v49, %v1950_v5 }
 0x194   :  { %v1086_v57 = vadd.f32 %v1085_v19, %v1023_v56  ;;  %v951_v21 = vadd.f32 %v950_v1, %v1965_v25 }
 0x196   :  { %v1087_v58 = vadd.f32 %v1086_v57, %v1024_v23  ;;  %v952_v37 = vadd.f32 %v951_v21, %v1980_v18 }
 0x198   :  { %v1088_v27 = vadd.f32 %v1087_v58, %v1025_v20  ;;  %v953_v53 = vadd.f32 %v952_v37, %v1995_v26 }
 0x19a   :  { %v1089_v30 = vadd.f32 %v1088_v27, %v1026_v61  ;;  %v954_v5 = vadd.f32 %v953_v53, %v2005_v9 }
 0x19c   :  { %v1090_v62 = vadd.f32 %v1089_v30, %v1027_v31  ;;  %v955_v25 = vadd.f32 %v954_v5, %v2014_v29 }
 0x19e   :  { %v1091_v35 = vadd.f32 %v1090_v62, %v1028_v8  ;;  %v956_v18 = vadd.f32 %v955_v25, %v2023_v44 }
 0x1a0   :  { %v1092_v2 = vadd.f32 %v1091_v35, %v1029_v34  ;;  %v957_v26 = vadd.f32 %v956_v18, %v2032_v60  ;;  %v967_v60 = vld [vmem:[#allocation3] sm:$0x1] }
 0x1a2   :  { %v1093_v36 = vadd.f32 %v1092_v2, %v1030_v39  ;;  %v958_v9 = vadd.f32 %v957_v26, %v2041_v12 }
 0x1a4   :  { %v959_v43 = vrot.slane %v958_v9, 4  ;;  %v1094_v29 = vadd.f32 %v1093_v36, %v1031_v13 }
 0x1a6   :  { %v960_v38 = vadd.f32 %v959_v43, %v958_v9  ;;  %v1095_v6 = vrot.slane %v1094_v29, 4 }
 0x1a8   :  { %v961_v47 = vrot.slane %v960_v38, 2  ;;  %v1096_v52 = vadd.f32 %v1095_v6, %v1094_v29 }
 0x1aa   :  { %v962_v28 = vadd.f32 %v961_v47, %v960_v38  ;;  %v1097_v44 = vrot.slane %v1096_v52, 2 }
 0x1ac   :  { %v963_v51 = vrot.slane %v962_v28, 1  ;;  %v1098_v42 = vadd.f32 %v1097_v44, %v1096_v52 }
 0x1ae   :  { %v964_v55 = vadd.f32 %v963_v51, %v962_v28  ;;  %v1099_v4 = vrot.slane %v1098_v42, 1 }
 0x1b0   :  { %v965_v32 = vadd.f32 %v964_v55, %v895_v16  ;;  %v1100_v59 = vadd.f32 %v1099_v4, %v1098_v42 }
 0x1b2   :  { %966 = vst [vmem:[#allocation2] sm:$0x1] %v965_v32  ;;  %v1101_v10 = vadd.f32 %v1100_v59, %v967_v60 }
 0x1b4   :  { %1102 = vst [vmem:[#allocation3] sm:$0x1] %v1101_v10 }
 0x1b9   :  { %v1106_v12 = vld [vmem:[#allocation2] sm:$0x1] }
 0x1ba   :  { %1107 = vst [vmem:[%s2155_s3] sm:$0x1] %v1106_v12 }
 0x1bb   :  { %v1108_v46 = vld [vmem:[#allocation3] sm:$0x1] }
 0x1bc   :  { %1109 = vst [vmem:[%s2156_s4] sm:$0x1] %v1108_v46 }

// kernel: local_enhancer_forward.51
= control target key start
LH: loop header
LB: loop body
LE: loop exit
PB: predicated region body
PF: predicated region fallthrough
CT: control target
= control target key end

     0   :  { %s832_s0 = inlined_call_operand.vmem [shape: f32[512,128], index: 0, kind: input, shape index: {}]   ;;  %s833_s1 = inlined_call_operand.vmem [shape: f32[1,128], index: 1, kind: input, shape index: {}]   ;;  %s834_s2 = inlined_call_operand.vmem [shape: f32[1,128], index: 2, kind: input, shape index: {}]   ;;  %s835_s3 = inlined_call_operand.vmem [shape: f32[512,128], index: 3, kind: output, shape index: {}]  }
   0x1   :  { %v14_v0 = vld [vmem:[%s832_s0] sm:$0xff]  ;;  %v15_v4 = vld [vmem:[%s832_s0 + $0x8] sm:$0xff]  ;;  %v16_v5 = vld [vmem:[%s832_s0 + $0x10] sm:$0xff] }
   0x2   :  { %v316_v1 = vld [vmem:[%s833_s1] ss:$0 sm:$0xff]  ;;  %v17_v6 = vld [vmem:[%s832_s0 + $0x18] sm:$0xff]  ;;  %v19_v11 = vld [vmem:[%s832_s0 + $0x28] sm:$0xff] }
   0x3   :  { %v321_v2 = vld [vmem:[%s834_s2] ss:$0 sm:$0xff]  ;;  %v85_v3 = vmul.f32 %v316_v1, %v14_v0  ;;  %v86_v7 = vmul.f32 %v316_v1, %v15_v4  ;;  %v87_v8 = vmul.f32 %v316_v1, %v16_v5  ;;  %v88_v9 = vmul.f32 %v316_v1, %v17_v6  ;;  %v20_v12 = vld [vmem:[%s832_s0 + $0x30] sm:$0xff]  ;;  %v21_v17 = vld [vmem:[%s832_s0 + $0x38] sm:$0xff] }
   0x4   :  { %v18_v10 = vld [vmem:[%s832_s0 + $0x20] sm:$0xff]  ;;  %v90_v15 = vmul.f32 %v316_v1, %v19_v11  ;;  %v91_v16 = vmul.f32 %v316_v1, %v20_v12  ;;  %v23_v19 = vld [vmem:[%s832_s0 + $0x48] sm:$0xff]  ;;  %v92_v23 = vmul.f32 %v316_v1, %v21_v17  ;;  %v24_v24 = vld [vmem:[%s832_s0 + $0x50] sm:$0xff] }
   0x5   :  { %v156_v13 = vadd.f32 %v321_v2, %v85_v3  ;;  %v89_v14 = vmul.f32 %v316_v1, %v18_v10  ;;  %v22_v18 = vld [vmem:[%s832_s0 + $0x40] sm:$0xff]  ;;  %v157_v20 = vadd.f32 %v321_v2, %v86_v7  ;;  %v158_v21 = vadd.f32 %v321_v2, %v87_v8  ;;  %v25_v25 = vld [vmem:[%s832_s0 + $0x58] sm:$0xff]  ;;  %v27_v31 = vld [vmem:[%s832_s0 + $0x68] sm:$0xff] }
   0x6   :  { %v159_v22 = vadd.f32 %v321_v2, %v88_v9  ;;  %v26_v26 = vld [vmem:[%s832_s0 + $0x60] sm:$0xff]  ;;  %v161_v28 = vadd.f32 %v321_v2, %v90_v15  ;;  %v162_v29 = vadd.f32 %v321_v2, %v91_v16  ;;  %v93_v30 = vmul.f32 %v316_v1, %v22_v18  ;;  %v28_v32 = vld [vmem:[%s832_s0 + $0x70] sm:$0xff]  ;;  %v29_v33 = vld [vmem:[%s832_s0 + $0x78] sm:$0xff] }
   0x7   :  { %220 = vst [vmem:[%s835_s3] sm:$0xff] %v156_v13  ;;  %v160_v27 = vadd.f32 %v321_v2, %v89_v14  ;;  %221 = vst [vmem:[%s835_s3 + $0x8] sm:$0xff] %v157_v20  ;;  %v163_v34 = vadd.f32 %v321_v2, %v92_v23  ;;  %v94_v35 = vmul.f32 %v316_v1, %v23_v19  ;;  %v30_v38 = vld [vmem:[%s832_s0 + $0x80] sm:$0xff]  ;;  %v31_v43 = vld [vmem:[%s832_s0 + $0x88] sm:$0xff] }
   0x8   :  { %222 = vst [vmem:[%s835_s3 + $0x10] sm:$0xff] %v158_v21  ;;  %223 = vst [vmem:[%s835_s3 + $0x18] sm:$0xff] %v159_v22  ;;  %v95_v36 = vmul.f32 %v316_v1, %v24_v24  ;;  %v96_v37 = vmul.f32 %v316_v1, %v25_v25  ;;  %v164_v39 = vadd.f32 %v321_v2, %v93_v30  ;;  %v32_v44 = vld [vmem:[%s832_s0 + $0x90] sm:$0xff]  ;;  %v33_v45 = vld [vmem:[%s832_s0 + $0x98] sm:$0xff] }
   0x9   :  { %224 = vst [vmem:[%s835_s3 + $0x20] sm:$0xff] %v160_v27  ;;  %225 = vst [vmem:[%s835_s3 + $0x28] sm:$0xff] %v161_v28  ;;  %v97_v40 = vmul.f32 %v316_v1, %v26_v26  ;;  %v98_v41 = vmul.f32 %v316_v1, %v27_v31  ;;  %v99_v42 = vmul.f32 %v316_v1, %v28_v32  ;;  %v34_v50 = vld [vmem:[%s832_s0 + $0xa0] sm:$0xff]  ;;  %v35_v51 = vld [vmem:[%s832_s0 + $0xa8] sm:$0xff] }
   0xa   :  { %226 = vst [vmem:[%s835_s3 + $0x30] sm:$0xff] %v162_v29  ;;  %227 = vst [vmem:[%s835_s3 + $0x38] sm:$0xff] %v163_v34  ;;  %v165_v46 = vadd.f32 %v321_v2, %v94_v35  ;;  %v166_v47 = vadd.f32 %v321_v2, %v95_v36  ;;  %v167_v48 = vadd.f32 %v321_v2, %v96_v37  ;;  %v36_v52 = vld [vmem:[%s832_s0 + $0xb0] sm:$0xff]  ;;  %v37_v57 = vld [vmem:[%s832_s0 + $0xb8] sm:$0xff] }
   0xb   :  { %v100_v49 = vmul.f32 %v316_v1, %v29_v33  ;;  %228 = vst [vmem:[%s835_s3 + $0x40] sm:$0xff] %v164_v39  ;;  %v168_v53 = vadd.f32 %v321_v2, %v97_v40  ;;  %v169_v54 = vadd.f32 %v321_v2, %v98_v41  ;;  %v170_v55 = vadd.f32 %v321_v2, %v99_v42  ;;  %v38_v62 = vld [vmem:[%s832_s0 + $0xc0] sm:$0xff]  ;;  %v39_v5 = vld [vmem:[%s832_s0 + $0xc8] sm:$0xff]  ;;  %v40_v6 = vld [vmem:[%s832_s0 + $0xd0] sm:$0xff] }
   0xc   :  { %v101_v56 = vmul.f32 %v316_v1, %v30_v38  ;;  %229 = vst [vmem:[%s835_s3 + $0x48] sm:$0xff] %v165_v46  ;;  %230 = vst [vmem:[%s835_s3 + $0x50] sm:$0xff] %v166_v47  ;;  %v102_v59 = vmul.f32 %v316_v1, %v31_v43  ;;  %v103_v60 = vmul.f32 %v316_v1, %v32_v44  ;;  %v41_v7 = vld [vmem:[%s832_s0 + $0xd8] sm:$0xff]  ;;  %v42_v12 = vld [vmem:[%s832_s0 + $0xe0] sm:$0xff] }
   0xd   :  { %231 = vst [vmem:[%s835_s3 + $0x58] sm:$0xff] %v167_v48  ;;  %v171_v58 = vadd.f32 %v321_v2, %v100_v49  ;;  %v104_v61 = vmul.f32 %v316_v1, %v33_v45  ;;  %232 = vst [vmem:[%s835_s3 + $0x60] sm:$0xff] %v168_v53  ;;  %v105_v0 = vmul.f32 %v316_v1, %v34_v50  ;;  %v43_v13 = vld [vmem:[%s832_s0 + $0xe8] sm:$0xff]  ;;  %v44_v14 = vld [vmem:[%s832_s0 + $0xf0] sm:$0xff] }
   0xe   :  { %233 = vst [vmem:[%s835_s3 + $0x68] sm:$0xff] %v169_v54  ;;  %234 = vst [vmem:[%s835_s3 + $0x70] sm:$0xff] %v170_v55  ;;  %v172_v63 = vadd.f32 %v321_v2, %v101_v56  ;;  %v106_v3 = vmul.f32 %v316_v1, %v35_v51  ;;  %v107_v4 = vmul.f32 %v316_v1, %v36_v52  ;;  %v45_v19 = vld [vmem:[%s832_s0 + $0xf8] sm:$0xff]  ;;  %v46_v24 = vld [vmem:[%s832_s0 + $0x100] sm:$0xff] }
   0xf   :  { %235 = vst [vmem:[%s835_s3 + $0x78] sm:$0xff] %v171_v58  ;;  %v173_v8 = vadd.f32 %v321_v2, %v102_v59  ;;  %v174_v9 = vadd.f32 %v321_v2, %v103_v60  ;;  %v175_v10 = vadd.f32 %v321_v2, %v104_v61  ;;  %v108_v11 = vmul.f32 %v316_v1, %v37_v57  ;;  %v47_v29 = vld [vmem:[%s832_s0 + $0x108] sm:$0xff]  ;;  %v48_v30 = vld [vmem:[%s832_s0 + $0x110] sm:$0xff]  ;;  %v49_v31 = vld [vmem:[%s832_s0 + $0x118] sm:$0xff] }
  0x10   :  { %236 = vst [vmem:[%s835_s3 + $0x80] sm:$0xff] %v172_v63  ;;  %v176_v15 = vadd.f32 %v321_v2, %v105_v0  ;;  %v177_v16 = vadd.f32 %v321_v2, %v106_v3  ;;  %v178_v17 = vadd.f32 %v321_v2, %v107_v4  ;;  %v109_v18 = vmul.f32 %v316_v1, %v38_v62  ;;  %v50_v36 = vld [vmem:[%s832_s0 + $0x120] sm:$0xff]  ;;  %v51_v37 = vld [vmem:[%s832_s0 + $0x128] sm:$0xff]  ;;  %v52_v38 = vld [vmem:[%s832_s0 + $0x130] sm:$0xff] }
  0x11   :  { %237 = vst [vmem:[%s835_s3 + $0x88] sm:$0xff] %v173_v8  ;;  %238 = vst [vmem:[%s835_s3 + $0x90] sm:$0xff] %v174_v9  ;;  %v179_v20 = vadd.f32 %v321_v2, %v108_v11  ;;  %v110_v21 = vmul.f32 %v316_v1, %v39_v5  ;;  %v111_v22 = vmul.f32 %v316_v1, %v40_v6  ;;  %v53_v43 = vld [vmem:[%s832_s0 + $0x138] sm:$0xff]  ;;  %v54_v48 = vld [vmem:[%s832_s0 + $0x140] sm:$0xff] }
  0x12   :  { %239 = vst [vmem:[%s835_s3 + $0x98] sm:$0xff] %v175_v10  ;;  %v112_v23 = vmul.f32 %v316_v1, %v41_v7  ;;  %240 = vst [vmem:[%s835_s3 + $0xa0] sm:$0xff] %v176_v15  ;;  %v180_v25 = vadd.f32 %v321_v2, %v109_v18  ;;  %v113_v26 = vmul.f32 %v316_v1, %v42_v12  ;;  %v55_v53 = vld [vmem:[%s832_s0 + $0x148] sm:$0xff]  ;;  %v56_v54 = vld [vmem:[%s832_s0 + $0x150] sm:$0xff] }
  0x13   :  { %241 = vst [vmem:[%s835_s3 + $0xa8] sm:$0xff] %v177_v16  ;;  %242 = vst [vmem:[%s835_s3 + $0xb0] sm:$0xff] %v178_v17  ;;  %v114_v27 = vmul.f32 %v316_v1, %v43_v13  ;;  %v115_v28 = vmul.f32 %v316_v1, %v44_v14  ;;  %v181_v32 = vadd.f32 %v321_v2, %v110_v21  ;;  %v57_v55 = vld [vmem:[%s832_s0 + $0x158] sm:$0xff]  ;;  %v58_v60 = vld [vmem:[%s832_s0 + $0x160] sm:$0xff] }
  0x14   :  { %243 = vst [vmem:[%s835_s3 + $0xb8] sm:$0xff] %v179_v20  ;;  %v182_v33 = vadd.f32 %v321_v2, %v111_v22  ;;  %v183_v34 = vadd.f32 %v321_v2, %v112_v23  ;;  %v116_v35 = vmul.f32 %v316_v1, %v45_v19  ;;  %244 = vst [vmem:[%s835_s3 + $0xc0] sm:$0xff] %v180_v25  ;;  %v59_v61 = vld [vmem:[%s832_s0 + $0x168] sm:$0xff]  ;;  %v60_v62 = vld [vmem:[%s832_s0 + $0x170] sm:$0xff] }
  0x15   :  { %v184_v39 = vadd.f32 %v321_v2, %v113_v26  ;;  %v185_v40 = vadd.f32 %v321_v2, %v114_v27  ;;  %v186_v41 = vadd.f32 %v321_v2, %v115_v28  ;;  %v117_v42 = vmul.f32 %v316_v1, %v46_v24  ;;  %245 = vst [vmem:[%s835_s3 + $0xc8] sm:$0xff] %v181_v32  ;;  %v61_v5 = vld [vmem:[%s832_s0 + $0x178] sm:$0xff]  ;;  %v62_v10 = vld [vmem:[%s832_s0 + $0x180] sm:$0xff]  ;;  %v63_v15 = vld [vmem:[%s832_s0 + $0x188] sm:$0xff] }
  0x16   :  { %246 = vst [vmem:[%s835_s3 + $0xd0] sm:$0xff] %v182_v33  ;;  %247 = vst [vmem:[%s835_s3 + $0xd8] sm:$0xff] %v183_v34  ;;  %v187_v44 = vadd.f32 %v321_v2, %v116_v35  ;;  %v118_v45 = vmul.f32 %v316_v1, %v47_v29  ;;  %v119_v46 = vmul.f32 %v316_v1, %v48_v30  ;;  %v64_v16 = vld [vmem:[%s832_s0 + $0x190] sm:$0xff]  ;;  %v65_v17 = vld [vmem:[%s832_s0 + $0x198] sm:$0xff] }
  0x17   :  { %v120_v47 = vmul.f32 %v316_v1, %v49_v31  ;;  %248 = vst [vmem:[%s835_s3 + $0xe0] sm:$0xff] %v184_v39  ;;  %249 = vst [vmem:[%s835_s3 + $0xe8] sm:$0xff] %v185_v40  ;;  %v188_v49 = vadd.f32 %v321_v2, %v117_v42  ;;  %v121_v50 = vmul.f32 %v316_v1, %v50_v36  ;;  %v66_v22 = vld [vmem:[%s832_s0 + $0x1a0] sm:$0xff]  ;;  %v67_v23 = vld [vmem:[%s832_s0 + $0x1a8] sm:$0xff] }
  0x18   :  { %250 = vst [vmem:[%s835_s3 + $0xf0] sm:$0xff] %v186_v41  ;;  %v122_v51 = vmul.f32 %v316_v1, %v51_v37  ;;  %v123_v52 = vmul.f32 %v316_v1, %v52_v38  ;;  %251 = vst [vmem:[%s835_s3 + $0xf8] sm:$0xff] %v187_v44  ;;  %v189_v56 = vadd.f32 %v321_v2, %v118_v45  ;;  %v68_v24 = vld [vmem:[%s832_s0 + $0x1b0] sm:$0xff]  ;;  %v69_v29 = vld [vmem:[%s832_s0 + $0x1b8] sm:$0xff] }
  0x19   :  { %v190_v57 = vadd.f32 %v321_v2, %v119_v46  ;;  %v191_v58 = vadd.f32 %v321_v2, %v120_v47  ;;  %v124_v59 = vmul.f32 %v316_v1, %v53_v43  ;;  %252 = vst [vmem:[%s835_s3 + $0x100] sm:$0xff] %v188_v49  ;;  %v192_v63 = vadd.f32 %v321_v2, %v121_v50  ;;  %v70_v34 = vld [vmem:[%s832_s0 + $0x1c0] sm:$0xff]  ;;  %v71_v39 = vld [vmem:[%s832_s0 + $0x1c8] sm:$0xff]  ;;  %v72_v40 = vld [vmem:[%s832_s0 + $0x1d0] sm:$0xff] }
  0x1a   :  { %v193_v0 = vadd.f32 %v321_v2, %v122_v51  ;;  %v194_v3 = vadd.f32 %v321_v2, %v123_v52  ;;  %v125_v4 = vmul.f32 %v316_v1, %v54_v48  ;;  %253 = vst [vmem:[%s835_s3 + $0x108] sm:$0xff] %v189_v56  ;;  %v126_v7 = vmul.f32 %v316_v1, %v55_v53  ;;  %v73_v41 = vld [vmem:[%s832_s0 + $0x1d8] sm:$0xff]  ;;  %v74_v46 = vld [vmem:[%s832_s0 + $0x1e0] sm:$0xff]  ;;  %v75_v47 = vld [vmem:[%s832_s0 + $0x1e8] sm:$0xff] }
  0x1b   :  { %254 = vst [vmem:[%s835_s3 + $0x110] sm:$0xff] %v190_v57  ;;  %255 = vst [vmem:[%s835_s3 + $0x118] sm:$0xff] %v191_v58  ;;  %v195_v6 = vadd.f32 %v321_v2, %v124_v59  ;;  %v127_v8 = vmul.f32 %v316_v1, %v56_v54  ;;  %v128_v9 = vmul.f32 %v316_v1, %v57_v55  ;;  %v76_v48 = vld [vmem:[%s832_s0 + $0x1f0] sm:$0xff]  ;;  %v77_v53 = vld [vmem:[%s832_s0 + $0x1f8] sm:$0xff] }
  0x1c   :  { %256 = vst [vmem:[%s835_s3 + $0x120] sm:$0xff] %v192_v63  ;;  %257 = vst [vmem:[%s835_s3 + $0x128] sm:$0xff] %v193_v0  ;;  %v196_v11 = vadd.f32 %v321_v2, %v125_v4  ;;  %v129_v12 = vmul.f32 %v316_v1, %v58_v60  ;;  %v130_v13 = vmul.f32 %v316_v1, %v59_v61 }
  0x1d   :  { %258 = vst [vmem:[%s835_s3 + $0x130] sm:$0xff] %v194_v3  ;;  %v131_v14 = vmul.f32 %v316_v1, %v60_v62  ;;  %259 = vst [vmem:[%s835_s3 + $0x138] sm:$0xff] %v195_v6  ;;  %v197_v18 = vadd.f32 %v321_v2, %v126_v7  ;;  %v198_v19 = vadd.f32 %v321_v2, %v127_v8 }
  0x1e   :  { %v199_v20 = vadd.f32 %v321_v2, %v128_v9  ;;  %v132_v21 = vmul.f32 %v316_v1, %v61_v5  ;;  %260 = vst [vmem:[%s835_s3 + $0x140] sm:$0xff] %v196_v11  ;;  %v200_v25 = vadd.f32 %v321_v2, %v129_v12  ;;  %v201_v26 = vadd.f32 %v321_v2, %v130_v13 }
  0x1f   :  { %v202_v27 = vadd.f32 %v321_v2, %v131_v14  ;;  %v133_v28 = vmul.f32 %v316_v1, %v62_v10  ;;  %261 = vst [vmem:[%s835_s3 + $0x148] sm:$0xff] %v197_v18  ;;  %262 = vst [vmem:[%s835_s3 + $0x150] sm:$0xff] %v198_v19  ;;  %v134_v31 = vmul.f32 %v316_v1, %v63_v15 }
  0x20   :  { %263 = vst [vmem:[%s835_s3 + $0x158] sm:$0xff] %v199_v20  ;;  %v203_v30 = vadd.f32 %v321_v2, %v132_v21  ;;  %v135_v32 = vmul.f32 %v316_v1, %v64_v16  ;;  %v136_v33 = vmul.f32 %v316_v1, %v65_v17  ;;  %264 = vst [vmem:[%s835_s3 + $0x160] sm:$0xff] %v200_v25 }
  0x21   :  { %265 = vst [vmem:[%s835_s3 + $0x168] sm:$0xff] %v201_v26  ;;  %266 = vst [vmem:[%s835_s3 + $0x170] sm:$0xff] %v202_v27  ;;  %v204_v35 = vadd.f32 %v321_v2, %v133_v28  ;;  %v137_v36 = vmul.f32 %v316_v1, %v66_v22  ;;  %v138_v37 = vmul.f32 %v316_v1, %v67_v23 }
  0x22   :  { %v139_v38 = vmul.f32 %v316_v1, %v68_v24  ;;  %267 = vst [vmem:[%s835_s3 + $0x178] sm:$0xff] %v203_v30  ;;  %v205_v42 = vadd.f32 %v321_v2, %v134_v31  ;;  %v206_v43 = vadd.f32 %v321_v2, %v135_v32  ;;  %v207_v44 = vadd.f32 %v321_v2, %v136_v33 }
  0x23   :  { %v140_v45 = vmul.f32 %v316_v1, %v69_v29  ;;  %268 = vst [vmem:[%s835_s3 + $0x180] sm:$0xff] %v204_v35  ;;  %v208_v49 = vadd.f32 %v321_v2, %v137_v36  ;;  %v209_v50 = vadd.f32 %v321_v2, %v138_v37  ;;  %v141_v52 = vmul.f32 %v316_v1, %v70_v34 }
  0x24   :  { %v210_v51 = vadd.f32 %v321_v2, %v139_v38  ;;  %269 = vst [vmem:[%s835_s3 + $0x188] sm:$0xff] %v205_v42  ;;  %270 = vst [vmem:[%s835_s3 + $0x190] sm:$0xff] %v206_v43  ;;  %v142_v55 = vmul.f32 %v316_v1, %v71_v39  ;;  %v143_v56 = vmul.f32 %v316_v1, %v72_v40 }
  0x25   :  { %271 = vst [vmem:[%s835_s3 + $0x198] sm:$0xff] %v207_v44  ;;  %v211_v54 = vadd.f32 %v321_v2, %v140_v45  ;;  %v144_v57 = vmul.f32 %v316_v1, %v73_v41  ;;  %272 = vst [vmem:[%s835_s3 + $0x1a0] sm:$0xff] %v208_v49  ;;  %v212_v58 = vadd.f32 %v321_v2, %v141_v52 }
  0x26   :  { %273 = vst [vmem:[%s835_s3 + $0x1a8] sm:$0xff] %v209_v50  ;;  %274 = vst [vmem:[%s835_s3 + $0x1b0] sm:$0xff] %v210_v51  ;;  %v145_v59 = vmul.f32 %v316_v1, %v74_v46  ;;  %v146_v60 = vmul.f32 %v316_v1, %v75_v47  ;;  %v147_v61 = vmul.f32 %v316_v1, %v76_v48 }
  0x27   :  { %275 = vst [vmem:[%s835_s3 + $0x1b8] sm:$0xff] %v211_v54  ;;  %v213_v62 = vadd.f32 %v321_v2, %v142_v55  ;;  %v214_v63 = vadd.f32 %v321_v2, %v143_v56  ;;  %v215_v0 = vadd.f32 %v321_v2, %v144_v57  ;;  %v148_v3 = vmul.f32 %v316_v1, %v77_v53 }
  0x28   :  { %276 = vst [vmem:[%s835_s3 + $0x1c0] sm:$0xff] %v212_v58  ;;  %v216_v4 = vadd.f32 %v321_v2, %v145_v59  ;;  %v217_v5 = vadd.f32 %v321_v2, %v146_v60  ;;  %v218_v6 = vadd.f32 %v321_v2, %v147_v61 }
  0x29   :  { %277 = vst [vmem:[%s835_s3 + $0x1c8] sm:$0xff] %v213_v62  ;;  %278 = vst [vmem:[%s835_s3 + $0x1d0] sm:$0xff] %v214_v63  ;;  %v219_v1 = vadd.f32 %v321_v2, %v148_v3 }
  0x2a   :  { %279 = vst [vmem:[%s835_s3 + $0x1d8] sm:$0xff] %v215_v0  ;;  %280 = vst [vmem:[%s835_s3 + $0x1e0] sm:$0xff] %v216_v4 }
  0x2b   :  { %281 = vst [vmem:[%s835_s3 + $0x1e8] sm:$0xff] %v217_v5  ;;  %282 = vst [vmem:[%s835_s3 + $0x1f0] sm:$0xff] %v218_v6 }
  0x2c   :  { %283 = vst [vmem:[%s835_s3 + $0x1f8] sm:$0xff] %v219_v1 }

// kernel: local_enhancer_forward.56
= control target key start
LH: loop header
LB: loop body
LE: loop exit
PB: predicated region body
PF: predicated region fallthrough
CT: control target
= control target key end

     0   :  { %s1652_s15 = smov 0   ;;  %s2262_s0 = inlined_call_operand.vmem [shape: bf16[2048,144], index: 0, kind: input, shape index: {}]   ;;  %s2263_s1 = inlined_call_operand.vmem [shape: bf16[144,128], index: 1, kind: input, shape index: {}]   ;;  %s2264_s2 = inlined_call_operand.vmem [shape: f32[2048,128], index: 2, kind: output, shape index: {0}]   ;;  %s2265_s3 = inlined_call_operand.vmem [shape: f32[1,128], index: 3, kind: output, shape index: {1}]   ;;  %s2266_s4 = inlined_call_operand.vmem [shape: f32[1,128], index: 4, kind: output, shape index: {2}]  }
   0x1 LB: > { %s1658_s16 = sadd.s32 4294967295, %s1623_s15   ;;  %p1368_p0 = scmp.ge.s32.totalorder %s1623_s15, 1  ;;  %s1623_s15 = sphi %s1652_s15, %s15_s15  }
   0x2   : > { %p159_p1 = scmp.lt.s32.totalorder %s1623_s15, 5 }
   0x4   : > { %p160_p2 = pnand %p1368_p0, %p159_p1 }
   0x6   : > { %163 = sbr.rel (%p160_p2) target bundleno = 530 (0x212), region = 28 }
   0xb   : > { %v1512_v0 = vld [vmem:[%s2263_s1 + $0x38] sm:$0xff]   ;;  %v1625_v1 = vmov 0   ;;  %s1369_s19 = sshll.u32 %s1658_s16, 6  ;;  %v1513_v2 = vld [vmem:[%s2263_s1 + $0x30] sm:$0xff]   ;;  %v1514_v3 = vld [vmem:[%s2263_s1 + $0x28] sm:$0xff]   ;;  %vm624_vm0 = vcmask 130048  }
   0xc   : > { %721 = vmatprep.subr.bf16.mxu0 %v1625_v1  ;;  %1484 = vmatprep.subr.bf16.mxu1 %v1625_v1  ;;  %p187_p3 = scmp.lt.s32.totalorder %s1369_s19, 255  ;;  %v1515_v4 = vld [vmem:[%s2263_s1 + $0x20] sm:$0xff]   ;;  %v1516_v7 = vld [vmem:[%s2263_s1 + $0x18] sm:$0xff]   ;;  %v1517_v8 = vld [vmem:[%s2263_s1 + $0x10] sm:$0xff]   ;;  %p1479_p4 = scmp.ne.s32.totalorder %s1658_s16, 0 }
   0xd   : > { %722 = vmatpush1.bf16.msra.mxu0 %v1512_v0  ;;  %1493 = vmatpush1.bf16.msra.mxu1 %v1512_v0  ;;  %v1518_v9 = vld [vmem:[%s2263_s1 + $0x8] sm:$0xff]   ;;  %v1519_v10 = vld [vmem:[%s2263_s1] sm:$0xff]  }
   0xe   : > { %723 = vmatprep.subr.bf16.mxu0 %v1625_v1  ;;  %1485 = vmatprep.subr.bf16.mxu1 %v1625_v1  ;;  %s2316_s19 = smov (!%p187_p3, %s1369_s19), 255  ;;  %v1520_v11 = vld [vmem:[%s2263_s1 + $0x40] sm:$0xff]  }
   0xf   : > { %s1483_s24 = sshll.u32 %s2316_s19, 3 }
  0x10   : > { %s1680_s27 = scalar_lea.vmem %s2262_s0, %s1483_s24  ;;  %s1801_s18 = scalar_lea.vmem %s2264_s2, %s1483_s24 }
  0x11   : > { %724 = vmatpush1.bf16.msra.mxu0 %v1513_v2  ;;  %1494 = vmatpush1.bf16.msra.mxu1 %v1513_v2  ;;  %v1523_v5 = vld [vmem:[%s1680_s27 + $0x4] ss:$8 sps:$4 sm:$0xff]   ;;  %v1521_v12 = vld [vmem:[%s1680_s27] ss:$8 sps:$4 sm:$0xff]   ;;  %v1527_v14 = vld [vmem:[%s1680_s27 + $0x14] ss:$8 sps:$4 sm:$0xff]  }
  0x12   : > { %725 = vmatprep.subr.bf16.mxu0 %v1625_v1  ;;  %1486 = vmatprep.subr.bf16.mxu1 %v1625_v1  ;;  %v1526_v6 = vld [vmem:[%s1680_s27 + $0x104] ss:$8 sps:$4 sm:$0xff]   ;;  %v1524_v13 = vld [vmem:[%s1680_s27 + $0x100] ss:$8 sps:$4 sm:$0xff]   ;;  %v1529_v15 = vld [vmem:[%s1680_s27 + $0x114] ss:$8 sps:$4 sm:$0xff]  }
  0x13   : > { %1447 = vmatprep.mubr.msk.bf16.mxu0 %vm624_vm0, %v1523_v5  ;;  %1463 = vmatprep.mubr.msk.bf16.mxu1 %vm624_vm0, %v1526_v6  ;;  %v1531_v16 = vld [vmem:[%s1680_s27 + $0x10] ss:$8 sps:$4 sm:$0xff]   ;;  %v1533_v18 = vld [vmem:[%s1680_s27 + $0x24] ss:$8 sps:$4 sm:$0xff]   ;;  %v1537_v20 = vld [vmem:[%s1680_s27 + $0x20] ss:$8 sps:$4 sm:$0xff]  }
  0x14   : > { %v1532_v17 = vld [vmem:[%s1680_s27 + $0x110] ss:$8 sps:$4 sm:$0xff]   ;;  %v1535_v19 = vld [vmem:[%s1680_s27 + $0x124] ss:$8 sps:$4 sm:$0xff]   ;;  %v1538_v21 = vld [vmem:[%s1680_s27 + $0x120] ss:$8 sps:$4 sm:$0xff]  }
  0x15   : > { %726 = vmatpush1.bf16.msra.mxu0 %v1514_v3  ;;  %1495 = vmatpush1.bf16.msra.mxu1 %v1514_v3  ;;  %v1539_v22 = vld [vmem:[%s1680_s27 + $0x34] ss:$8 sps:$4 sm:$0xff]   ;;  %v1543_v24 = vld [vmem:[%s1680_s27 + $0x30] ss:$8 sps:$4 sm:$0xff]   ;;  %v1545_v26 = vld [vmem:[%s1680_s27 + $0x44] ss:$8 sps:$4 sm:$0xff]  }
  0x16   : > { %727 = vmatprep.subr.bf16.mxu0 %v1625_v1  ;;  %1487 = vmatprep.subr.bf16.mxu1 %v1625_v1  ;;  %v1541_v23 = vld [vmem:[%s1680_s27 + $0x134] ss:$8 sps:$4 sm:$0xff]   ;;  %v1544_v25 = vld [vmem:[%s1680_s27 + $0x130] ss:$8 sps:$4 sm:$0xff]   ;;  %v1547_v27 = vld [vmem:[%s1680_s27 + $0x144] ss:$8 sps:$4 sm:$0xff]  }
  0x17   : > { %v1549_v28 = vld [vmem:[%s1680_s27 + $0x40] ss:$8 sps:$4 sm:$0xff]   ;;  %v1551_v30 = vld [vmem:[%s1680_s27 + $0x54] ss:$8 sps:$4 sm:$0xff]   ;;  %v1555_v32 = vld [vmem:[%s1680_s27 + $0x50] ss:$8 sps:$4 sm:$0xff]  }
  0x18   : > { %v1550_v29 = vld [vmem:[%s1680_s27 + $0x140] ss:$8 sps:$4 sm:$0xff]   ;;  %v1553_v31 = vld [vmem:[%s1680_s27 + $0x154] ss:$8 sps:$4 sm:$0xff]   ;;  %v1556_v33 = vld [vmem:[%s1680_s27 + $0x150] ss:$8 sps:$4 sm:$0xff]  }
  0x19   : > { %728 = vmatpush1.bf16.msra.mxu0 %v1515_v4  ;;  %1496 = vmatpush1.bf16.msra.mxu1 %v1515_v4  ;;  %v1557_v34 = vld [vmem:[%s1680_s27 + $0x64] ss:$8 sps:$4 sm:$0xff]   ;;  %v1561_v36 = vld [vmem:[%s1680_s27 + $0x60] ss:$8 sps:$4 sm:$0xff]   ;;  %v1563_v38 = vld [vmem:[%s1680_s27 + $0x74] ss:$8 sps:$4 sm:$0xff]  }
  0x1a   : > { %729 = vmatprep.subr.bf16.mxu0 %v1625_v1  ;;  %1488 = vmatprep.subr.bf16.mxu1 %v1625_v1  ;;  %v1559_v35 = vld [vmem:[%s1680_s27 + $0x164] ss:$8 sps:$4 sm:$0xff]   ;;  %v1562_v37 = vld [vmem:[%s1680_s27 + $0x160] ss:$8 sps:$4 sm:$0xff]   ;;  %v1565_v39 = vld [vmem:[%s1680_s27 + $0x174] ss:$8 sps:$4 sm:$0xff]  }
  0x1b   : > { %v1567_v40 = vld [vmem:[%s1680_s27 + $0x70] ss:$8 sps:$4 sm:$0xff]   ;;  %v1569_v42 = vld [vmem:[%s1680_s27 + $0x84] ss:$8 sps:$4 sm:$0xff]   ;;  %v1573_v44 = vld [vmem:[%s1680_s27 + $0x80] ss:$8 sps:$4 sm:$0xff]  }
  0x1c   : > { %v1568_v41 = vld [vmem:[%s1680_s27 + $0x170] ss:$8 sps:$4 sm:$0xff]   ;;  %v1571_v43 = vld [vmem:[%s1680_s27 + $0x184] ss:$8 sps:$4 sm:$0xff]   ;;  %v1574_v45 = vld [vmem:[%s1680_s27 + $0x180] ss:$8 sps:$4 sm:$0xff]  }
  0x1d   : > { %730 = vmatpush1.bf16.msra.mxu0 %v1516_v7  ;;  %1497 = vmatpush1.bf16.msra.mxu1 %v1516_v7  ;;  %v1575_v46 = vld [vmem:[%s1680_s27 + $0x94] ss:$8 sps:$4 sm:$0xff]   ;;  %v1579_v48 = vld [vmem:[%s1680_s27 + $0x90] ss:$8 sps:$4 sm:$0xff]   ;;  %v1581_v50 = vld [vmem:[%s1680_s27 + $0xa4] ss:$8 sps:$4 sm:$0xff]  }
  0x1e   : > { %731 = vmatprep.subr.bf16.mxu0 %v1625_v1  ;;  %1489 = vmatprep.subr.bf16.mxu1 %v1625_v1  ;;  %v1577_v47 = vld [vmem:[%s1680_s27 + $0x194] ss:$8 sps:$4 sm:$0xff]   ;;  %v1580_v49 = vld [vmem:[%s1680_s27 + $0x190] ss:$8 sps:$4 sm:$0xff]   ;;  %v1583_v51 = vld [vmem:[%s1680_s27 + $0x1a4] ss:$8 sps:$4 sm:$0xff]  }
  0x1f   : > { %v1585_v52 = vld [vmem:[%s1680_s27 + $0xa0] ss:$8 sps:$4 sm:$0xff]   ;;  %v1587_v54 = vld [vmem:[%s1680_s27 + $0xb4] ss:$8 sps:$4 sm:$0xff]   ;;  %v1591_v56 = vld [vmem:[%s1680_s27 + $0xb0] ss:$8 sps:$4 sm:$0xff]  }
  0x20   : > { %v1586_v53 = vld [vmem:[%s1680_s27 + $0x1a0] ss:$8 sps:$4 sm:$0xff]   ;;  %v1589_v55 = vld [vmem:[%s1680_s27 + $0x1b4] ss:$8 sps:$4 sm:$0xff]   ;;  %v1592_v57 = vld [vmem:[%s1680_s27 + $0x1b0] ss:$8 sps:$4 sm:$0xff]  }
  0x21   : > { %732 = vmatpush1.bf16.msra.mxu0 %v1517_v8  ;;  %1498 = vmatpush1.bf16.msra.mxu1 %v1517_v8  ;;  %v1593_v58 = vld [vmem:[%s1680_s27 + $0xc4] ss:$8 sps:$4 sm:$0xff]   ;;  %v1597_v60 = vld [vmem:[%s1680_s27 + $0xc0] ss:$8 sps:$4 sm:$0xff]   ;;  %v1599_v62 = vld [vmem:[%s1680_s27 + $0xd4] ss:$8 sps:$4 sm:$0xff]  }
  0x22   : > { %733 = vmatprep.subr.bf16.mxu0 %v1625_v1  ;;  %1490 = vmatprep.subr.bf16.mxu1 %v1625_v1  ;;  %v1595_v59 = vld [vmem:[%s1680_s27 + $0x1c4] ss:$8 sps:$4 sm:$0xff]   ;;  %v1598_v61 = vld [vmem:[%s1680_s27 + $0x1c0] ss:$8 sps:$4 sm:$0xff]   ;;  %v1601_v63 = vld [vmem:[%s1680_s27 + $0x1d4] ss:$8 sps:$4 sm:$0xff]  }
  0x23   : > { %v1603_v0 = vld [vmem:[%s1680_s27 + $0xd0] ss:$8 sps:$4 sm:$0xff]   ;;  %v1605_v2 = vld [vmem:[%s1680_s27 + $0xe4] ss:$8 sps:$4 sm:$0xff]   ;;  %v1609_v4 = vld [vmem:[%s1680_s27 + $0xe0] ss:$8 sps:$4 sm:$0xff]  }
  0x24   : > { %v1607_v3 = vld [vmem:[%s1680_s27 + $0x1e4] ss:$8 sps:$4 sm:$0xff]   ;;  %v1610_v5 = vld [vmem:[%s1680_s27 + $0x1e0] ss:$8 sps:$4 sm:$0xff]   ;;  %v1611_v6 = vld [vmem:[%s1680_s27 + $0xf4] ss:$8 sps:$4 sm:$0xff]  }
  0x25   : > { %734 = vmatpush1.bf16.msra.mxu0 %v1518_v9  ;;  %1499 = vmatpush1.bf16.msra.mxu1 %v1518_v9  ;;  %v1613_v7 = vld [vmem:[%s1680_s27 + $0x1f4] ss:$8 sps:$4 sm:$0xff]   ;;  %v1615_v8 = vld [vmem:[%s1680_s27 + $0xf0] ss:$8 sps:$4 sm:$0xff]  }
  0x26   : > { %735 = vmatprep.subr.bf16.mxu0 %v1625_v1  ;;  %1491 = vmatprep.subr.bf16.mxu1 %v1625_v1  ;;  %v1616_v9 = vld [vmem:[%s1680_s27 + $0x1f0] ss:$8 sps:$4 sm:$0xff]  }
  0x29   : > { %736 = vmatpush1.bf16.msra.mxu0 %v1519_v10  ;;  %1500 = vmatpush1.bf16.msra.mxu1 %v1519_v10 }
  0x2a   : > { %751 = vmatprep.subr.bf16.mxu0 %v1625_v1  ;;  %1492 = vmatprep.subr.bf16.mxu1 %v1625_v1  ;;  %v1604_v1 = vld [vmem:[%s1680_s27 + $0x1d0] ss:$8 sps:$4 sm:$0xff]  }
  0x2d   : > { %752 = vmatpush2.bf16.msra.mxu0 %v1520_v11  ;;  %1501 = vmatpush2.bf16.msra.mxu1 %v1520_v11 }
  0x30   : > { %754 = vmatmul.mubr.bf16.vlgmr.msra.gmra.mxu0 %v1521_v12  ;;  %882 = vmatmul.mubr.bf16.vlgmr.msra.gmra.mxu1 %v1524_v13 }
  0x31   : > { %1448 = vmatprep.mubr.msk.bf16.mxu0 %vm624_vm0, %v1527_v14  ;;  %1464 = vmatprep.mubr.msk.bf16.mxu1 %vm624_vm0, %v1529_v15 }
  0x38   : > { %762 = vmatmul.mubr.bf16.gmra.mxu0 %v1531_v16  ;;  %890 = vmatmul.mubr.bf16.gmra.mxu1 %v1532_v17 }
  0x39   : > { %1449 = vmatprep.mubr.msk.bf16.mxu0 %vm624_vm0, %v1533_v18  ;;  %1465 = vmatprep.mubr.msk.bf16.mxu1 %vm624_vm0, %v1535_v19 }
  0x40   : > { %770 = vmatmul.mubr.bf16.gmra.mxu0 %v1537_v20  ;;  %898 = vmatmul.mubr.bf16.gmra.mxu1 %v1538_v21 }
  0x41   : > { %1450 = vmatprep.mubr.msk.bf16.mxu0 %vm624_vm0, %v1539_v22  ;;  %1466 = vmatprep.mubr.msk.bf16.mxu1 %vm624_vm0, %v1541_v23 }
  0x48   : > { %778 = vmatmul.mubr.bf16.gmra.mxu0 %v1543_v24  ;;  %906 = vmatmul.mubr.bf16.gmra.mxu1 %v1544_v25 }
  0x49   : > { %1451 = vmatprep.mubr.msk.bf16.mxu0 %vm624_vm0, %v1545_v26  ;;  %1467 = vmatprep.mubr.msk.bf16.mxu1 %vm624_vm0, %v1547_v27 }
  0x50   : > { %786 = vmatmul.mubr.bf16.gmra.mxu0 %v1549_v28  ;;  %914 = vmatmul.mubr.bf16.gmra.mxu1 %v1550_v29 }
  0x51   : > { %1452 = vmatprep.mubr.msk.bf16.mxu0 %vm624_vm0, %v1551_v30  ;;  %1468 = vmatprep.mubr.msk.bf16.mxu1 %vm624_vm0, %v1553_v31 }
  0x58   : > { %794 = vmatmul.mubr.bf16.gmra.mxu0 %v1555_v32  ;;  %922 = vmatmul.mubr.bf16.gmra.mxu1 %v1556_v33 }
  0x59   : > { %1453 = vmatprep.mubr.msk.bf16.mxu0 %vm624_vm0, %v1557_v34  ;;  %1469 = vmatprep.mubr.msk.bf16.mxu1 %vm624_vm0, %v1559_v35 }
  0x60   : > { %802 = vmatmul.mubr.bf16.gmra.mxu0 %v1561_v36  ;;  %930 = vmatmul.mubr.bf16.gmra.mxu1 %v1562_v37 }
  0x61   : > { %1454 = vmatprep.mubr.msk.bf16.mxu0 %vm624_vm0, %v1563_v38  ;;  %1470 = vmatprep.mubr.msk.bf16.mxu1 %vm624_vm0, %v1565_v39 }
  0x68   : > { %810 = vmatmul.mubr.bf16.gmra.mxu0 %v1567_v40  ;;  %938 = vmatmul.mubr.bf16.gmra.mxu1 %v1568_v41 }
  0x69   : > { %1455 = vmatprep.mubr.msk.bf16.mxu0 %vm624_vm0, %v1569_v42  ;;  %1471 = vmatprep.mubr.msk.bf16.mxu1 %vm624_vm0, %v1571_v43 }
  0x70   : > { %818 = vmatmul.mubr.bf16.gmra.mxu0 %v1573_v44  ;;  %946 = vmatmul.mubr.bf16.gmra.mxu1 %v1574_v45 }
  0x71   : > { %1456 = vmatprep.mubr.msk.bf16.mxu0 %vm624_vm0, %v1575_v46  ;;  %1472 = vmatprep.mubr.msk.bf16.mxu1 %vm624_vm0, %v1577_v47 }
  0x78   : > { %826 = vmatmul.mubr.bf16.gmra.mxu0 %v1579_v48  ;;  %954 = vmatmul.mubr.bf16.gmra.mxu1 %v1580_v49 }
  0x79   : > { %1457 = vmatprep.mubr.msk.bf16.mxu0 %vm624_vm0, %v1581_v50  ;;  %1473 = vmatprep.mubr.msk.bf16.mxu1 %vm624_vm0, %v1583_v51 }
  0x80   : > { %834 = vmatmul.mubr.bf16.gmra.mxu0 %v1585_v52  ;;  %962 = vmatmul.mubr.bf16.gmra.mxu1 %v1586_v53 }
  0x81   : > { %1458 = vmatprep.mubr.msk.bf16.mxu0 %vm624_vm0, %v1587_v54  ;;  %1474 = vmatprep.mubr.msk.bf16.mxu1 %vm624_vm0, %v1589_v55 }
  0x88   : > { %842 = vmatmul.mubr.bf16.gmra.mxu0 %v1591_v56  ;;  %970 = vmatmul.mubr.bf16.gmra.mxu1 %v1592_v57 }
  0x89   : > { %1459 = vmatprep.mubr.msk.bf16.mxu0 %vm624_vm0, %v1593_v58  ;;  %1475 = vmatprep.mubr.msk.bf16.mxu1 %vm624_vm0, %v1595_v59 }
  0x90   : > { %850 = vmatmul.mubr.bf16.gmra.mxu0 %v1597_v60  ;;  %978 = vmatmul.mubr.bf16.gmra.mxu1 %v1598_v61 }
  0x91   : > { %1460 = vmatprep.mubr.msk.bf16.mxu0 %vm624_vm0, %v1599_v62  ;;  %1476 = vmatprep.mubr.msk.bf16.mxu1 %vm624_vm0, %v1601_v63 }
  0x98   : > { %858 = vmatmul.mubr.bf16.gmra.mxu0 %v1603_v0  ;;  %986 = vmatmul.mubr.bf16.gmra.mxu1 %v1604_v1 }
  0x99   : > { %1461 = vmatprep.mubr.msk.bf16.mxu0 %vm624_vm0, %v1605_v2  ;;  %1477 = vmatprep.mubr.msk.bf16.mxu1 %vm624_vm0, %v1607_v3 }
  0xa0   : > { %866 = vmatmul.mubr.bf16.gmra.mxu0 %v1609_v4  ;;  %994 = vmatmul.mubr.bf16.gmra.mxu1 %v1610_v5 }
  0xa1   : > { %1462 = vmatprep.mubr.msk.bf16.mxu0 %vm624_vm0, %v1611_v6  ;;  %1478 = vmatprep.mubr.msk.bf16.mxu1 %vm624_vm0, %v1613_v7 }
  0xa8   : > { %874 = vmatmul.mubr.bf16.gmra.mxu0 %v1615_v8  ;;  %1002 = vmatmul.mubr.bf16.gmra.mxu1 %v1616_v9 }
  0xf0   : > { %v1803_v10 = vpop.f32.mrf.mxu0  ;;  %v1805_v11 = vpop.f32.mrf.mxu1 }
  0xf1   : > { %1010 = vst [vmem:[%s1801_s18] sm:$0xff] %v1803_v10  ;;  %1042 = vst [vmem:[%s1801_s18 + $0x100] sm:$0xff] %v1805_v11 }
  0xf2   : > { %v757_v12 = vpop.f32.mrf.mxu0  ;;  %v885_v13 = vpop.f32.mrf.mxu1 }
  0xf4   : > { %v1811_v14 = vpop.f32.mrf.mxu0  ;;  %v1813_v15 = vpop.f32.mrf.mxu1 }
  0xf5   : > { %1011 = vst [vmem:[%s1801_s18 + $0x8] sm:$0xff] %v1811_v14  ;;  %1043 = vst [vmem:[%s1801_s18 + $0x108] sm:$0xff] %v1813_v15 }
  0xf6   : > { %v760_v16 = vpop.f32.mrf.mxu0  ;;  %v888_v17 = vpop.f32.mrf.mxu1 }
  0xf8   : > { %v1819_v18 = vpop.f32.mrf.mxu0  ;;  %v1821_v19 = vpop.f32.mrf.mxu1 }
  0xf9   : > { %1012 = vst [vmem:[%s1801_s18 + $0x10] sm:$0xff] %v1819_v18  ;;  %1044 = vst [vmem:[%s1801_s18 + $0x110] sm:$0xff] %v1821_v19 }
  0xfa   : > { %v765_v20 = vpop.f32.mrf.mxu0  ;;  %v893_v21 = vpop.f32.mrf.mxu1 }
  0xfc   : > { %v1827_v22 = vpop.f32.mrf.mxu0  ;;  %v1829_v23 = vpop.f32.mrf.mxu1 }
  0xfd   : > { %1013 = vst [vmem:[%s1801_s18 + $0x18] sm:$0xff] %v1827_v22  ;;  %1045 = vst [vmem:[%s1801_s18 + $0x118] sm:$0xff] %v1829_v23 }
  0xfe   : > { %v768_v24 = vpop.f32.mrf.mxu0  ;;  %v896_v25 = vpop.f32.mrf.mxu1 }
 0x100   : > { %v1835_v26 = vpop.f32.mrf.mxu0  ;;  %v1837_v27 = vpop.f32.mrf.mxu1 }
 0x101   : > { %1014 = vst [vmem:[%s1801_s18 + $0x20] sm:$0xff] %v1835_v26  ;;  %1046 = vst [vmem:[%s1801_s18 + $0x120] sm:$0xff] %v1837_v27 }
 0x102   : > { %v773_v28 = vpop.f32.mrf.mxu0  ;;  %v901_v29 = vpop.f32.mrf.mxu1 }
 0x104   : > { %v1843_v30 = vpop.f32.mrf.mxu0  ;;  %v1845_v31 = vpop.f32.mrf.mxu1 }
 0x105   : > { %1015 = vst [vmem:[%s1801_s18 + $0x28] sm:$0xff] %v1843_v30  ;;  %1047 = vst [vmem:[%s1801_s18 + $0x128] sm:$0xff] %v1845_v31 }
 0x106   : > { %v776_v32 = vpop.f32.mrf.mxu0  ;;  %v904_v33 = vpop.f32.mrf.mxu1 }
 0x108   : > { %v1851_v34 = vpop.f32.mrf.mxu0  ;;  %v1853_v35 = vpop.f32.mrf.mxu1 }
 0x109   : > { %1016 = vst [vmem:[%s1801_s18 + $0x30] sm:$0xff] %v1851_v34  ;;  %1048 = vst [vmem:[%s1801_s18 + $0x130] sm:$0xff] %v1853_v35 }
 0x10a   : > { %v781_v36 = vpop.f32.mrf.mxu0  ;;  %v909_v37 = vpop.f32.mrf.mxu1 }
 0x10c   : > { %v1859_v38 = vpop.f32.mrf.mxu0  ;;  %v1861_v39 = vpop.f32.mrf.mxu1 }
 0x10d   : > { %1017 = vst [vmem:[%s1801_s18 + $0x38] sm:$0xff] %v1859_v38  ;;  %1049 = vst [vmem:[%s1801_s18 + $0x138] sm:$0xff] %v1861_v39 }
 0x10e   : > { %v784_v40 = vpop.f32.mrf.mxu0  ;;  %v912_v41 = vpop.f32.mrf.mxu1 }
 0x110   : > { %v1867_v42 = vpop.f32.mrf.mxu0  ;;  %v1869_v43 = vpop.f32.mrf.mxu1 }
 0x111   : > { %1018 = vst [vmem:[%s1801_s18 + $0x40] sm:$0xff] %v1867_v42  ;;  %1050 = vst [vmem:[%s1801_s18 + $0x140] sm:$0xff] %v1869_v43 }
 0x112   : > { %v789_v44 = vpop.f32.mrf.mxu0  ;;  %v917_v45 = vpop.f32.mrf.mxu1 }
 0x114   : > { %v1875_v46 = vpop.f32.mrf.mxu0  ;;  %v1877_v47 = vpop.f32.mrf.mxu1 }
 0x115   : > { %1019 = vst [vmem:[%s1801_s18 + $0x48] sm:$0xff] %v1875_v46  ;;  %1051 = vst [vmem:[%s1801_s18 + $0x148] sm:$0xff] %v1877_v47 }
 0x116   : > { %v792_v48 = vpop.f32.mrf.mxu0  ;;  %v920_v49 = vpop.f32.mrf.mxu1 }
 0x118   : > { %v1883_v50 = vpop.f32.mrf.mxu0  ;;  %v1885_v51 = vpop.f32.mrf.mxu1 }
 0x119   : > { %1020 = vst [vmem:[%s1801_s18 + $0x50] sm:$0xff] %v1883_v50  ;;  %1052 = vst [vmem:[%s1801_s18 + $0x150] sm:$0xff] %v1885_v51 }
 0x11a   : > { %v797_v52 = vpop.f32.mrf.mxu0  ;;  %v925_v53 = vpop.f32.mrf.mxu1 }
 0x11c   : > { %v1891_v54 = vpop.f32.mrf.mxu0  ;;  %v1893_v55 = vpop.f32.mrf.mxu1 }
 0x11d   : > { %1021 = vst [vmem:[%s1801_s18 + $0x58] sm:$0xff] %v1891_v54  ;;  %1053 = vst [vmem:[%s1801_s18 + $0x158] sm:$0xff] %v1893_v55 }
 0x11e   : > { %v800_v56 = vpop.f32.mrf.mxu0  ;;  %v928_v57 = vpop.f32.mrf.mxu1 }
 0x120   : > { %v1899_v58 = vpop.f32.mrf.mxu0  ;;  %v1901_v59 = vpop.f32.mrf.mxu1 }
 0x121   : > { %1022 = vst [vmem:[%s1801_s18 + $0x60] sm:$0xff] %v1899_v58  ;;  %1054 = vst [vmem:[%s1801_s18 + $0x160] sm:$0xff] %v1901_v59 }
 0x122   : > { %v805_v60 = vpop.f32.mrf.mxu0  ;;  %v933_v61 = vpop.f32.mrf.mxu1 }
 0x124   : > { %v1907_v62 = vpop.f32.mrf.mxu0  ;;  %v1909_v63 = vpop.f32.mrf.mxu1 }
 0x125   : > { %1023 = vst [vmem:[%s1801_s18 + $0x68] sm:$0xff] %v1907_v62  ;;  %1055 = vst [vmem:[%s1801_s18 + $0x168] sm:$0xff] %v1909_v63 }
 0x126   : > { %v808_v0 = vpop.f32.mrf.mxu0  ;;  %v936_v1 = vpop.f32.mrf.mxu1 }
 0x128   : > { %v1915_v2 = vpop.f32.mrf.mxu0  ;;  %v1917_v3 = vpop.f32.mrf.mxu1 }
 0x129   : > { %1024 = vst [vmem:[%s1801_s18 + $0x70] sm:$0xff] %v1915_v2  ;;  %1056 = vst [vmem:[%s1801_s18 + $0x170] sm:$0xff] %v1917_v3 }
 0x12a   : > { %v813_v4 = vpop.f32.mrf.mxu0  ;;  %v941_v5 = vpop.f32.mrf.mxu1 }
 0x12c   : > { %v1923_v6 = vpop.f32.mrf.mxu0  ;;  %v1925_v7 = vpop.f32.mrf.mxu1 }
 0x12d   : > { %1025 = vst [vmem:[%s1801_s18 + $0x78] sm:$0xff] %v1923_v6  ;;  %1057 = vst [vmem:[%s1801_s18 + $0x178] sm:$0xff] %v1925_v7 }
 0x12e   : > { %v816_v8 = vpop.f32.mrf.mxu0  ;;  %v944_v9 = vpop.f32.mrf.mxu1 }
 0x130   : > { %v1931_v12 = vpop.f32.mrf.mxu0  ;;  %v1933_v13 = vpop.f32.mrf.mxu1 }
 0x131   : > { %1026 = vst [vmem:[%s1801_s18 + $0x80] sm:$0xff] %v1931_v12  ;;  %1058 = vst [vmem:[%s1801_s18 + $0x180] sm:$0xff] %v1933_v13 }
 0x132   : > { %v821_v16 = vpop.f32.mrf.mxu0  ;;  %v949_v17 = vpop.f32.mrf.mxu1 }
 0x134   : > { %v1939_v20 = vpop.f32.mrf.mxu0  ;;  %v1941_v21 = vpop.f32.mrf.mxu1 }
 0x135   : > { %1027 = vst [vmem:[%s1801_s18 + $0x88] sm:$0xff] %v1939_v20  ;;  %1059 = vst [vmem:[%s1801_s18 + $0x188] sm:$0xff] %v1941_v21 }
 0x136   : > { %v824_v24 = vpop.f32.mrf.mxu0  ;;  %v952_v25 = vpop.f32.mrf.mxu1 }
 0x138   : > { %v1947_v28 = vpop.f32.mrf.mxu0  ;;  %v1949_v29 = vpop.f32.mrf.mxu1 }
 0x139   : > { %1028 = vst [vmem:[%s1801_s18 + $0x90] sm:$0xff] %v1947_v28  ;;  %1060 = vst [vmem:[%s1801_s18 + $0x190] sm:$0xff] %v1949_v29 }
 0x13a   : > { %v829_v32 = vpop.f32.mrf.mxu0  ;;  %v957_v33 = vpop.f32.mrf.mxu1 }
 0x13c   : > { %v1955_v36 = vpop.f32.mrf.mxu0  ;;  %v1957_v37 = vpop.f32.mrf.mxu1 }
 0x13d   : > { %1029 = vst [vmem:[%s1801_s18 + $0x98] sm:$0xff] %v1955_v36  ;;  %1061 = vst [vmem:[%s1801_s18 + $0x198] sm:$0xff] %v1957_v37 }
 0x13e   : > { %v832_v40 = vpop.f32.mrf.mxu0  ;;  %v960_v41 = vpop.f32.mrf.mxu1 }
 0x140   : > { %v1963_v44 = vpop.f32.mrf.mxu0  ;;  %v1965_v45 = vpop.f32.mrf.mxu1 }
 0x141   : > { %2291 = vst [vmem:[#allocation4_spill] sm:$0xff] %v1965_v45  ;;  %1030 = vst [vmem:[%s1801_s18 + $0xa0] sm:$0xff] %v1963_v44 }
 0x142   : > { %1062 = vst [vmem:[%s1801_s18 + $0x1a0] sm:$0xff] %v1965_v45  ;;  %v837_v48 = vpop.f32.mrf.mxu0  ;;  %v965_v49 = vpop.f32.mrf.mxu1 }
 0x144   : > { %v1971_v52 = vpop.f32.mrf.mxu0  ;;  %v1973_v53 = vpop.f32.mrf.mxu1 }
 0x145   : > { %2292 = vst [vmem:[#allocation5_spill] sm:$0xff] %v1973_v53  ;;  %1031 = vst [vmem:[%s1801_s18 + $0xa8] sm:$0xff] %v1971_v52 }
 0x146   : > { %1063 = vst [vmem:[%s1801_s18 + $0x1a8] sm:$0xff] %v1973_v53  ;;  %v840_v56 = vpop.f32.mrf.mxu0  ;;  %v968_v57 = vpop.f32.mrf.mxu1 }
 0x148   : > { %v1979_v60 = vpop.f32.mrf.mxu0  ;;  %v1981_v61 = vpop.f32.mrf.mxu1 }
 0x149   : > { %2293 = vst [vmem:[#allocation6_spill] sm:$0xff] %v1981_v61  ;;  %1032 = vst [vmem:[%s1801_s18 + $0xb0] sm:$0xff] %v1979_v60 }
 0x14a   : > { %1064 = vst [vmem:[%s1801_s18 + $0x1b0] sm:$0xff] %v1981_v61  ;;  %v845_v0 = vpop.f32.mrf.mxu0  ;;  %v973_v1 = vpop.f32.mrf.mxu1 }
 0x14c   : > { %v1987_v4 = vpop.f32.mrf.mxu0  ;;  %v1989_v5 = vpop.f32.mrf.mxu1 }
 0x14d   : > { %2294 = vst [vmem:[#allocation7_spill] sm:$0xff] %v1989_v5  ;;  %1033 = vst [vmem:[%s1801_s18 + $0xb8] sm:$0xff] %v1987_v4 }
 0x14e   : > { %1065 = vst [vmem:[%s1801_s18 + $0x1b8] sm:$0xff] %v1989_v5  ;;  %v848_v8 = vpop.f32.mrf.mxu0  ;;  %v976_v9 = vpop.f32.mrf.mxu1 }
 0x150   : > { %v1995_v16 = vpop.f32.mrf.mxu0  ;;  %v1997_v17 = vpop.f32.mrf.mxu1 }
 0x151   : > { %2295 = vst [vmem:[#allocation8_spill] sm:$0xff] %v1997_v17  ;;  %1034 = vst [vmem:[%s1801_s18 + $0xc0] sm:$0xff] %v1995_v16 }
 0x152   : > { %1066 = vst [vmem:[%s1801_s18 + $0x1c0] sm:$0xff] %v1997_v17  ;;  %v853_v24 = vpop.f32.mrf.mxu0  ;;  %v981_v25 = vpop.f32.mrf.mxu1 }
 0x154   : > { %v2003_v32 = vpop.f32.mrf.mxu0  ;;  %v2005_v33 = vpop.f32.mrf.mxu1 }
 0x155   : > { %2296 = vst [vmem:[#allocation9_spill] sm:$0xff] %v2005_v33  ;;  %1035 = vst [vmem:[%s1801_s18 + $0xc8] sm:$0xff] %v2003_v32 }
 0x156   : > { %1067 = vst [vmem:[%s1801_s18 + $0x1c8] sm:$0xff] %v2005_v33  ;;  %v856_v40 = vpop.f32.mrf.mxu0  ;;  %v984_v41 = vpop.f32.mrf.mxu1 }
 0x158   : > { %v2011_v48 = vpop.f32.mrf.mxu0  ;;  %v2013_v49 = vpop.f32.mrf.mxu1 }
 0x159   : > { %2297 = vst [vmem:[#allocation10_spill] sm:$0xff] %v2013_v49  ;;  %1036 = vst [vmem:[%s1801_s18 + $0xd0] sm:$0xff] %v2011_v48 }
 0x15a   : > { %1068 = vst [vmem:[%s1801_s18 + $0x1d0] sm:$0xff] %v2013_v49  ;;  %v861_v56 = vpop.f32.mrf.mxu0  ;;  %v989_v57 = vpop.f32.mrf.mxu1 }
 0x15c   : > { %v2019_v0 = vpop.f32.mrf.mxu0  ;;  %v2021_v1 = vpop.f32.mrf.mxu1 }
 0x15d   : > { %2298 = vst [vmem:[#allocation11_spill] sm:$0xff] %v2021_v1  ;;  %1037 = vst [vmem:[%s1801_s18 + $0xd8] sm:$0xff] %v2019_v0 }
 0x15e   : > { %1069 = vst [vmem:[%s1801_s18 + $0x1d8] sm:$0xff] %v2021_v1  ;;  %v864_v8 = vpop.f32.mrf.mxu0  ;;  %v992_v9 = vpop.f32.mrf.mxu1 }
 0x160   : > { %v2027_v24 = vpop.f32.mrf.mxu0  ;;  %v2029_v25 = vpop.f32.mrf.mxu1 }
 0x161   : > { %2299 = vst [vmem:[#allocation12_spill] sm:$0xff] %v2029_v25  ;;  %1038 = vst [vmem:[%s1801_s18 + $0xe0] sm:$0xff] %v2027_v24 }
 0x162   : > { %1070 = vst [vmem:[%s1801_s18 + $0x1e0] sm:$0xff] %v2029_v25  ;;  %v869_v40 = vpop.f32.mrf.mxu0  ;;  %v997_v41 = vpop.f32.mrf.mxu1 }
 0x164   : > { %v2035_v56 = vpop.f32.mrf.mxu0  ;;  %v2037_v57 = vpop.f32.mrf.mxu1 }
 0x165   : > { %2300 = vst [vmem:[#allocation13_spill] sm:$0xff] %v2037_v57  ;;  %1039 = vst [vmem:[%s1801_s18 + $0xe8] sm:$0xff] %v2035_v56 }
 0x166   : > { %1071 = vst [vmem:[%s1801_s18 + $0x1e8] sm:$0xff] %v2037_v57  ;;  %v872_v8 = vpop.f32.mrf.mxu0  ;;  %v1000_v9 = vpop.f32.mrf.mxu1 }
 0x168   : > { %v2043_v1 = vpop.f32.mrf.mxu0  ;;  %v2045_v49 = vpop.f32.mrf.mxu1 }
 0x169   : > { %2301 = vst [vmem:[#allocation14_spill] sm:$0xff] %v2045_v49  ;;  %1040 = vst [vmem:[%s1801_s18 + $0xf0] sm:$0xff] %v2043_v1 }
 0x16a   : > { %1072 = vst [vmem:[%s1801_s18 + $0x1f0] sm:$0xff] %v2045_v49  ;;  %v877_v40 = vpop.f32.mrf.mxu0  ;;  %v1005_v41 = vpop.f32.mrf.mxu1  ;;  %1077 = sbr.rel (%p1479_p4) target bundleno = 369 (0x171), region = 32 }
 0x16c   : > { %v2051_v25 = vpop.f32.mrf.mxu0  ;;  %v2053_v33 = vpop.f32.mrf.mxu1 }
 0x16d   : > { %2302 = vst [vmem:[#allocation15_spill] sm:$0xff] %v2053_v33  ;;  %1041 = vst [vmem:[%s1801_s18 + $0xf8] sm:$0xff] %v2051_v25 }
 0x16e   : > { %1073 = vst [vmem:[%s1801_s18 + $0x1f8] sm:$0xff] %v2053_v33  ;;  %v880_v8 = vpop.f32.mrf.mxu0  ;;  %v1008_v9 = vpop.f32.mrf.mxu1 }
 0x16f   : > { %v1626_v57 = vmov 0.0  }
 0x170   : > { %1078 = vst [vmem:[#allocation2] sm:$0x1] %v1626_v57  ;;  %1079 = vst [vmem:[#allocation3] sm:$0x1] %v1626_v57 }
 0x171 PF: > { %v1081_v40 = vadd.f32 %v1811_v14, %v1803_v10  ;;  %v1153_v57 = vmul.f32 %v1803_v10, %v1803_v10  ;;  %v1154_v61 = vmul.f32 %v1811_v14, %v1811_v14  ;;  %v1158_v14 = vmul.f32 %v1843_v30, %v1843_v30  ;;  %p1480_p5 = scmp.ne.s32.totalorder %s1658_s16, 3 }
 0x173   : > { %v1082_v41 = vadd.f32 %v1081_v40, %v1819_v18 }
 0x175   : > { %v1083_v49 = vadd.f32 %v1082_v41, %v1827_v22  ;;  %v1155_v41 = vmul.f32 %v1819_v18, %v1819_v18 }
 0x177   : > { %v1084_v17 = vadd.f32 %v1083_v49, %v1835_v26 }
 0x179   : > { %v1085_v33 = vadd.f32 %v1084_v17, %v1843_v30  ;;  %v1156_v17 = vmul.f32 %v1827_v22, %v1827_v22 }
 0x17b   : > { %v1086_v8 = vadd.f32 %v1085_v33, %v1851_v34  ;;  %v1217_v33 = vadd.f32 %v1154_v61, %v1153_v57  ;;  %v1160_v61 = vmul.f32 %v1859_v38, %v1859_v38 }
 0x17d   : > { %v1087_v9 = vadd.f32 %v1086_v8, %v1859_v38  ;;  %v1218_v10 = vadd.f32 %v1217_v33, %v1155_v41  ;;  %v1161_v41 = vmul.f32 %v1867_v42, %v1867_v42  ;;  %v1163_v33 = vmul.f32 %v1883_v50, %v1883_v50 }
 0x17f   : > { %v1088_v5 = vadd.f32 %v1087_v9, %v1867_v42  ;;  %v1157_v9 = vmul.f32 %v1835_v26, %v1835_v26 }
 0x181   : > { %v1089_v40 = vadd.f32 %v1088_v5, %v1875_v46  ;;  %v1219_v5 = vadd.f32 %v1218_v10, %v1156_v17  ;;  %v1165_v10 = vmul.f32 %v1899_v58, %v1899_v58 }
 0x183   : > { %v1090_v49 = vadd.f32 %v1089_v40, %v1883_v50  ;;  %v1159_v40 = vmul.f32 %v1851_v34, %v1851_v34  ;;  %v1220_v45 = vadd.f32 %v1219_v5, %v1157_v9  ;;  %v1166_v5 = vmul.f32 %v1907_v62, %v1907_v62 }
 0x185   : > { %v1091_v8 = vadd.f32 %v1090_v49, %v1891_v54  ;;  %v1221_v57 = vadd.f32 %v1220_v45, %v1158_v14  ;;  %v1164_v45 = vmul.f32 %v1891_v54, %v1891_v54 }
 0x187   : > { %v1092_v53 = vadd.f32 %v1091_v8, %v1899_v58  ;;  %v1222_v49 = vadd.f32 %v1221_v57, %v1159_v40  ;;  %v1167_v40 = vmul.f32 %v1915_v2, %v1915_v2 }
 0x189   : > { %v1093_v18 = vadd.f32 %v1092_v53, %v1907_v62  ;;  %v1162_v53 = vmul.f32 %v1875_v46, %v1875_v46  ;;  %v1223_v17 = vadd.f32 %v1222_v49, %v1160_v61  ;;  %v1168_v61 = vmul.f32 %v1923_v6, %v1923_v6 }
 0x18a   : > { %v1170_v49 = vmul.f32 %v1939_v20, %v1939_v20 }
 0x18b   : > { %v1094_v22 = vadd.f32 %v1093_v18, %v1915_v2  ;;  %v1224_v8 = vadd.f32 %v1223_v17, %v1161_v41 }
 0x18d   : > { %v1095_v26 = vadd.f32 %v1094_v22, %v1923_v6  ;;  %v1225_v9 = vadd.f32 %v1224_v8, %v1162_v53  ;;  %v1171_v53 = vmul.f32 %v1947_v28, %v1947_v28  ;;  %v1173_v8 = vmul.f32 %v1963_v44, %v1963_v44 }
 0x18f   : > { %v1096_v30 = vadd.f32 %v1095_v26, %v1931_v12  ;;  %v1226_v14 = vadd.f32 %v1225_v9, %v1163_v33  ;;  %v1169_v26 = vmul.f32 %v1931_v12, %v1931_v12 }
 0x191   : > { %v1097_v34 = vadd.f32 %v1096_v30, %v1939_v20  ;;  %v1227_v18 = vadd.f32 %v1226_v14, %v1164_v45  ;;  %v1174_v45 = vmul.f32 %v1971_v52, %v1971_v52  ;;  %v1176_v14 = vmul.f32 %v1987_v4, %v1987_v4 }
 0x193   : > { %v1098_v38 = vadd.f32 %v1097_v34, %v1947_v28  ;;  %v1228_v22 = vadd.f32 %v1227_v18, %v1165_v10  ;;  %v1172_v34 = vmul.f32 %v1955_v36, %v1955_v36 }
 0x195   : > { %v1099_v42 = vadd.f32 %v1098_v38, %v1955_v36  ;;  %v1229_v57 = vadd.f32 %v1228_v22, %v1166_v5  ;;  %v1177_v5 = vmul.f32 %v1995_v16, %v1995_v16  ;;  %v1179_v22 = vmul.f32 %v2011_v48, %v2011_v48 }
 0x197   : > { %v1100_v46 = vadd.f32 %v1099_v42, %v1963_v44  ;;  %v1230_v41 = vadd.f32 %v1229_v57, %v1167_v40  ;;  %v1175_v42 = vmul.f32 %v1979_v60, %v1979_v60 }
 0x199   : > { %v1101_v50 = vadd.f32 %v1100_v46, %v1971_v52  ;;  %v1231_v30 = vadd.f32 %v1230_v41, %v1168_v61  ;;  %v1180_v61 = vmul.f32 %v2019_v0, %v2019_v0  ;;  %v1182_v41 = vmul.f32 %v2035_v56, %v2035_v56 }
 0x19b   : > { %v1102_v54 = vadd.f32 %v1101_v50, %v1979_v60  ;;  %v1232_v17 = vadd.f32 %v1231_v30, %v1169_v26  ;;  %v1178_v50 = vmul.f32 %v2003_v32, %v2003_v32 }
 0x19d   : > { %v1103_v58 = vadd.f32 %v1102_v54, %v1987_v4  ;;  %v1233_v33 = vadd.f32 %v1232_v17, %v1170_v49  ;;  %v1183_v49 = vmul.f32 %v2043_v1, %v2043_v1  ;;  %v1185_v17 = vmul.f32 %v1805_v11, %v1805_v11 }
 0x19f   : > { %v1104_v62 = vadd.f32 %v1103_v58, %v1995_v16  ;;  %v1234_v38 = vadd.f32 %v1233_v33, %v1171_v53  ;;  %v1181_v58 = vmul.f32 %v2027_v24, %v2027_v24 }
 0x1a1   : > { %v1105_v2 = vadd.f32 %v1104_v62, %v2003_v32  ;;  %v1235_v9 = vadd.f32 %v1234_v38, %v1172_v34  ;;  %v1186_v34 = vmul.f32 %v1813_v15, %v1813_v15  ;;  %v1188_v38 = vmul.f32 %v1829_v23, %v1829_v23 }
 0x1a3   : > { %v1106_v6 = vadd.f32 %v1105_v2, %v2011_v48  ;;  %v1236_v10 = vadd.f32 %v1235_v9, %v1173_v8  ;;  %v1184_v2 = vmul.f32 %v2051_v25, %v2051_v25 }
 0x1a5   : > { %v1107_v12 = vadd.f32 %v1106_v6, %v2019_v0  ;;  %v1237_v46 = vadd.f32 %v1236_v10, %v1174_v45  ;;  %v1189_v45 = vmul.f32 %v1837_v27, %v1837_v27  ;;  %v1191_v10 = vmul.f32 %v1853_v35, %v1853_v35 }
 0x1a7   : > { %v1108_v20 = vadd.f32 %v1107_v12, %v2027_v24  ;;  %v1238_v18 = vadd.f32 %v1237_v46, %v1175_v42  ;;  %v1187_v12 = vmul.f32 %v1821_v19, %v1821_v19 }
 0x1a9   : > { %v1109_v28 = vadd.f32 %v1108_v20, %v2035_v56  ;;  %v1239_v40 = vadd.f32 %v1238_v18, %v1176_v14  ;;  %v1192_v14 = vmul.f32 %v1861_v39, %v1861_v39  ;;  %v1194_v18 = vmul.f32 %v1877_v47, %v1877_v47 }
 0x1ab   : > { %v1110_v36 = vadd.f32 %v1109_v28, %v2043_v1  ;;  %v1240_v54 = vadd.f32 %v1239_v40, %v1177_v5  ;;  %v1190_v28 = vmul.f32 %v1845_v31, %v1845_v31 }
 0x1ad   : > { %v1111_v44 = vadd.f32 %v1110_v36, %v2051_v25  ;;  %v1241_v57 = vadd.f32 %v1240_v54, %v1178_v50  ;;  %v1195_v50 = vmul.f32 %v1885_v51, %v1885_v51  ;;  %v1197_v54 = vmul.f32 %v1901_v59, %v1901_v59 }
 0x1af   : > { %v1112_v52 = vadd.f32 %v1111_v44, %v1805_v11  ;;  %v1242_v26 = vadd.f32 %v1241_v57, %v1179_v22  ;;  %v1193_v44 = vmul.f32 %v1869_v43, %v1869_v43  ;;  %v1198_v57 = vmul.f32 %v1909_v63, %v1909_v63 }
 0x1b1   : > { %v1113_v60 = vadd.f32 %v1112_v52, %v1813_v15  ;;  %v1243_v62 = vadd.f32 %v1242_v26, %v1180_v61  ;;  %v1199_v26 = vmul.f32 %v1917_v3, %v1917_v3 }
 0x1b3   : > { %v1114_v4 = vadd.f32 %v1113_v60, %v1821_v19  ;;  %v1244_v30 = vadd.f32 %v1243_v62, %v1181_v58  ;;  %v1196_v60 = vmul.f32 %v1893_v55, %v1893_v55  ;;  %v1200_v62 = vmul.f32 %v1925_v7, %v1925_v7 }
 0x1b5   : > { %v1115_v16 = vadd.f32 %v1114_v4, %v1829_v23  ;;  %v1245_v53 = vadd.f32 %v1244_v30, %v1182_v41  ;;  %v1201_v30 = vmul.f32 %v1933_v13, %v1933_v13 }
 0x1b7   : > { %v1116_v32 = vadd.f32 %v1115_v16, %v1837_v27  ;;  %v1246_v6 = vadd.f32 %v1245_v53, %v1183_v49  ;;  %v1202_v53 = vmul.f32 %v1941_v21, %v1941_v21 }
 0x1b9   : > { %v1117_v48 = vadd.f32 %v1116_v32, %v1845_v31  ;;  %v1247_v33 = vadd.f32 %v1246_v6, %v1184_v2  ;;  %v1203_v6 = vmul.f32 %v1949_v29, %v1949_v29 }
 0x1bb   : > { %v1118_v0 = vadd.f32 %v1117_v48, %v1853_v35  ;;  %v1248_v8 = vadd.f32 %v1247_v33, %v1185_v17  ;;  %v1204_v33 = vmul.f32 %v1957_v37, %v1957_v37 }
 0x1bd   : > { %v1119_v24 = vadd.f32 %v1118_v0, %v1861_v39  ;;  %v1249_v20 = vadd.f32 %v1248_v8, %v1186_v34 }
 0x1bf   : > { %v1120_v56 = vadd.f32 %v1119_v24, %v1869_v43  ;;  %v1250_v9 = vadd.f32 %v1249_v20, %v1187_v12 }
 0x1c1   : > { %v1121_v1 = vadd.f32 %v1120_v56, %v1877_v47  ;;  %v1251_v42 = vadd.f32 %v1250_v9, %v1188_v38  ;;  %v2303_v47 = vld [vmem:[#allocation4_spill] sm:$0xff] }
 0x1c2   : > { %v1205_v8 = vmul.f32 %v2303_v47, %v2303_v47 }
 0x1c3   : > { %v1122_v25 = vadd.f32 %v1121_v1, %v1885_v51  ;;  %v1252_v36 = vadd.f32 %v1251_v42, %v1189_v45  ;;  %v2304_v51 = vld [vmem:[#allocation5_spill] sm:$0xff] }
 0x1c4   : > { %v1206_v20 = vmul.f32 %v2304_v51, %v2304_v51 }
 0x1c5   : > { %v1123_v11 = vadd.f32 %v1122_v25, %v1893_v55  ;;  %v1253_v46 = vadd.f32 %v1252_v36, %v1190_v28  ;;  %v2305_v55 = vld [vmem:[#allocation6_spill] sm:$0xff] }
 0x1c6   : > { %v1207_v9 = vmul.f32 %v2305_v55, %v2305_v55 }
 0x1c7   : > { %v1124_v15 = vadd.f32 %v1123_v11, %v1901_v59  ;;  %v1254_v5 = vadd.f32 %v1253_v46, %v1191_v10  ;;  %v2306_v59 = vld [vmem:[#allocation7_spill] sm:$0xff] }
 0x1c8   : > { %v1208_v42 = vmul.f32 %v2306_v59, %v2306_v59  ;;  %v2314_v10 = vld [vmem:[#allocation15_spill] sm:$0xff] }
 0x1c9   : > { %v1125_v19 = vadd.f32 %v1124_v15, %v1909_v63  ;;  %v1255_v52 = vadd.f32 %v1254_v5, %v1192_v14  ;;  %v2307_v63 = vld [vmem:[#allocation8_spill] sm:$0xff] }
 0x1cb   : > { %v1126_v23 = vadd.f32 %v1125_v19, %v1917_v3  ;;  %v1256_v40 = vadd.f32 %v1255_v52, %v1193_v44  ;;  %v2308_v3 = vld [vmem:[#allocation9_spill] sm:$0xff] }
 0x1cd   : > { %v1127_v27 = vadd.f32 %v1126_v23, %v1925_v7  ;;  %v1257_v22 = vadd.f32 %v1256_v40, %v1194_v18  ;;  %v2309_v7 = vld [vmem:[#allocation10_spill] sm:$0xff]  ;;  %v1209_v23 = vmul.f32 %v2307_v63, %v2307_v63 }
 0x1cf   : > { %v1128_v31 = vadd.f32 %v1127_v27, %v1933_v13  ;;  %v1258_v4 = vadd.f32 %v1257_v22, %v1195_v50  ;;  %v2310_v13 = vld [vmem:[#allocation11_spill] sm:$0xff]  ;;  %v1210_v27 = vmul.f32 %v2308_v3, %v2308_v3 }
 0x1d1   : > { %v1129_v35 = vadd.f32 %v1128_v31, %v1941_v21  ;;  %v1259_v16 = vadd.f32 %v1258_v4, %v1196_v60  ;;  %v2311_v21 = vld [vmem:[#allocation12_spill] sm:$0xff]  ;;  %v1211_v31 = vmul.f32 %v2309_v7, %v2309_v7  ;;  %v1080_v4 = vld [vmem:[#allocation2] sm:$0x1] }
 0x1d3   : > { %v1130_v39 = vadd.f32 %v1129_v35, %v1949_v29  ;;  %v1260_v32 = vadd.f32 %v1259_v16, %v1197_v54  ;;  %v2312_v29 = vld [vmem:[#allocation13_spill] sm:$0xff]  ;;  %v1212_v35 = vmul.f32 %v2310_v13, %v2310_v13 }
 0x1d5   : > { %v1131_v43 = vadd.f32 %v1130_v39, %v1957_v37  ;;  %v1261_v48 = vadd.f32 %v1260_v32, %v1198_v57  ;;  %v2313_v37 = vld [vmem:[#allocation14_spill] sm:$0xff]  ;;  %v1213_v39 = vmul.f32 %v2311_v21, %v2311_v21 }
 0x1d7   : > { %v1132_v61 = vadd.f32 %v1131_v43, %v2303_v47  ;;  %v1262_v0 = vadd.f32 %v1261_v48, %v1199_v26  ;;  %v1214_v43 = vmul.f32 %v2312_v29, %v2312_v29 }
 0x1d9   : > { %v1133_v58 = vadd.f32 %v1132_v61, %v2304_v51  ;;  %v1263_v24 = vadd.f32 %v1262_v0, %v1200_v62  ;;  %v1215_v61 = vmul.f32 %v2313_v37, %v2313_v37  ;;  %v1216_v51 = vmul.f32 %v2314_v10, %v2314_v10 }
 0x1db   : > { %v1134_v41 = vadd.f32 %v1133_v58, %v2305_v55  ;;  %v1264_v56 = vadd.f32 %v1263_v24, %v1201_v30 }
 0x1dd   : > { %v1135_v49 = vadd.f32 %v1134_v41, %v2306_v59  ;;  %v1265_v1 = vadd.f32 %v1264_v56, %v1202_v53 }
 0x1df   : > { %v1136_v2 = vadd.f32 %v1135_v49, %v2307_v63  ;;  %v1266_v25 = vadd.f32 %v1265_v1, %v1203_v6  ;;  %v1152_v49 = vld [vmem:[#allocation3] sm:$0x1] }
 0x1e1   : > { %v1137_v17 = vadd.f32 %v1136_v2, %v2308_v3  ;;  %v1267_v11 = vadd.f32 %v1266_v25, %v1204_v33 }
 0x1e3   : > { %v1138_v34 = vadd.f32 %v1137_v17, %v2309_v7  ;;  %v1268_v15 = vadd.f32 %v1267_v11, %v1205_v8 }
 0x1e5   : > { %v1139_v12 = vadd.f32 %v1138_v34, %v2310_v13  ;;  %v1269_v19 = vadd.f32 %v1268_v15, %v1206_v20 }
 0x1e7   : > { %v1140_v38 = vadd.f32 %v1139_v12, %v2311_v21  ;;  %v1270_v14 = vadd.f32 %v1269_v19, %v1207_v9 }
 0x1e9   : > { %v1141_v45 = vadd.f32 %v1140_v38, %v2312_v29  ;;  %v1271_v44 = vadd.f32 %v1270_v14, %v1208_v42 }
 0x1eb   : > { %v1142_v28 = vadd.f32 %v1141_v45, %v2313_v37  ;;  %v1272_v18 = vadd.f32 %v1271_v44, %v1209_v23 }
 0x1ed   : > { %v1143_v36 = vadd.f32 %v1142_v28, %v2314_v10  ;;  %v1273_v50 = vadd.f32 %v1272_v18, %v1210_v27 }
 0x1ef   : > { %v1144_v46 = vrot.slane %v1143_v36, 4  ;;  %v1274_v60 = vadd.f32 %v1273_v50, %v1211_v31 }
 0x1f1   : > { %v1145_v5 = vadd.f32 %v1144_v46, %v1143_v36  ;;  %v1275_v54 = vadd.f32 %v1274_v60, %v1212_v35 }
 0x1f3   : > { %v1146_v52 = vrot.slane %v1145_v5, 2  ;;  %v1276_v57 = vadd.f32 %v1275_v54, %v1213_v39 }
 0x1f5   : > { %v1147_v40 = vadd.f32 %v1146_v52, %v1145_v5  ;;  %v1277_v58 = vadd.f32 %v1276_v57, %v1214_v43 }
 0x1f7   : > { %v1148_v22 = vrot.slane %v1147_v40, 1  ;;  %v1278_v26 = vadd.f32 %v1277_v58, %v1215_v61 }
 0x1f9   : > { %v1149_v47 = vadd.f32 %v1148_v22, %v1147_v40  ;;  %v1279_v32 = vadd.f32 %v1278_v26, %v1216_v51 }
 0x1fb   : > { %v1150_v16 = vadd.f32 %v1149_v47, %v1080_v4  ;;  %v1280_v55 = vrot.slane %v1279_v32, 4 }
 0x1fd   : > { %1151 = vst [vmem:[#allocation2] sm:$0x1] %v1150_v16  ;;  %v1281_v41 = vadd.f32 %v1280_v55, %v1279_v32 }
 0x1ff   : > { %v1282_v62 = vrot.slane %v1281_v41, 2 }
 0x201   : > { %v1283_v48 = vadd.f32 %v1282_v62, %v1281_v41 }
 0x203   : > { %v1284_v59 = vrot.slane %v1283_v48, 1 }
 0x205   : > { %v1285_v30 = vadd.f32 %v1284_v59, %v1283_v48  ;;  %1291 = sbr.rel (%p1480_p5) target bundleno = 530 (0x212), region = 36 }
 0x207   : > { %v1286_v0 = vadd.f32 %v1285_v30, %v1152_v49 }
 0x209   : > { %1287 = vst [vmem:[#allocation3] sm:$0x1] %v1286_v0 }
 0x20a   : > { %v1292_v63 = vld [vmem:[#allocation2] sm:$0x1] }
 0x20b   : > { %1293 = vst [vmem:[%s2265_s3] sm:$0x1] %v1292_v63 }
 0x210   : > { %v1294_v2 = vld [vmem:[#allocation3] sm:$0x1] }
 0x211   : > { %1295 = vst [vmem:[%s2266_s4] sm:$0x1] %v1294_v2 }
 0x212 PF: > { %s15_s15 = sadd.s32 1, %s1623_s15  }
 0x213   : > { %p12_p6 = scmp.ge.s32.totalorder %s15_s15, 6  }
 0x215   :  { %14 = sbr.rel (!%p12_p6) target bundleno = 1 (0x1), region = 82 }

// kernel: local_enhancer_forward.58
= control target key start
LH: loop header
LB: loop body
LE: loop exit
PB: predicated region body
PF: predicated region fallthrough
CT: control target
= control target key end

     0   :  { %10 = vsyncpa [#allocation5], 0  ;;  %s3500_s0 = inlined_call_operand.vmem [shape: bf16[2048,392], index: 0, kind: input, shape index: {}]   ;;  %s3501_s1 = inlined_call_operand.vmem [shape: bf16[392,128], index: 1, kind: input, shape index: {}]   ;;  %s3502_s2 = inlined_call_operand.vmem [shape: f32[2048,128], index: 2, kind: output, shape index: {0}]   ;;  %s3503_s3 = inlined_call_operand.hbm [shape: f32[1,128], index: 3, kind: output, shape index: {1}]   ;;  %s3504_s4 = inlined_call_operand.hbm [shape: f32[1,128], index: 4, kind: output, shape index: {2}]  }
   0x1   :  { %11 = vsyncpa [#allocation7], 0  ;;  %s2739_s15 = smov 0  }
   0x2 LB: > { %s2745_s16 = sadd.s32 4294967295, %s2708_s15   ;;  %p2205_p0 = scmp.ge.s32.totalorder %s2708_s15, 1  ;;  %s2708_s15 = sphi %s2739_s15, %s17_s15  }
   0x3   : > { %p161_p1 = scmp.lt.s32.totalorder %s2708_s15, 5 }
   0x5   : > { %p162_p2 = pnand %p2205_p0, %p161_p1 }
   0x7   : > { %165 = sbr.rel (%p162_p2) target bundleno = 716 (0x2cc), region = 28 }
   0xc   : > { %v2429_v0 = vld [vmem:[%s3501_s1 + $0x38] sm:$0xff]   ;;  %v2710_v1 = vmov 0   ;;  %v2430_v2 = vld [vmem:[%s3501_s1 + $0x30] sm:$0xff]   ;;  %v2431_v3 = vld [vmem:[%s3501_s1 + $0x28] sm:$0xff]   ;;  %s2206_s25 = sshll.u32 %s2745_s16, 6  ;;  %vm1134_vm0 = vcmask 64512  }
   0xd   : > { %1235 = vmatprep.subr.bf16.mxu0 %v2710_v1  ;;  %1524 = vmatprep.subr.bf16.mxu1 %v2710_v1  ;;  %v2435_v4 = vld [vmem:[%s3501_s1 + $0xb8] sm:$0xff]   ;;  %v2437_v5 = vld [vmem:[%s3501_s1 + $0xb0] sm:$0xff]   ;;  %v2432_v6 = vld [vmem:[%s3501_s1 + $0x20] sm:$0xff]   ;;  %p189_p3 = scmp.lt.s32.totalorder %s2206_s25, 255  ;;  %vm1231_vm1 = vcmask 1043456   ;;  %p2396_p4 = scmp.ne.s32.totalorder %s2745_s16, 0 }
   0xe   : > { %1236 = vmatpush1.bf16.msra.mxu0 %v2429_v0  ;;  %1525 = vmatpush1.bf16.msra.mxu1 %v2435_v4  ;;  %v2439_v7 = vld [vmem:[%s3501_s1 + $0xa8] sm:$0xff]   ;;  %v2433_v8 = vld [vmem:[%s3501_s1 + $0x18] sm:$0xff]   ;;  %v2441_v9 = vld [vmem:[%s3501_s1 + $0xa0] sm:$0xff]  }
   0xf   : > { %1237 = vmatprep.subr.bf16.mxu0 %v2710_v1  ;;  %1526 = vmatprep.subr.bf16.mxu1 %v2710_v1  ;;  %s3554_s25 = smov (!%p189_p3, %s2206_s25), 255  ;;  %v2434_v10 = vld [vmem:[%s3501_s1 + $0x10] sm:$0xff]   ;;  %v2443_v11 = vld [vmem:[%s3501_s1 + $0x98] sm:$0xff]   ;;  %v2436_v12 = vld [vmem:[%s3501_s1 + $0x8] sm:$0xff]  }
  0x10   : > { %s2404_s12 = sshll.u32 %s3554_s25, 4  ;;  %v2445_v13 = vld [vmem:[%s3501_s1 + $0x90] sm:$0xff]   ;;  %v2438_v15 = vld [vmem:[%s3501_s1] sm:$0xff]   ;;  %v2447_v17 = vld [vmem:[%s3501_s1 + $0x88] sm:$0xff]   ;;  %s2210_s27 = sshll.u32 %s3554_s25, 3 }
  0x11   : > { %s2800_s19 = scalar_lea.vmem %s3500_s0, %s2404_s12  ;;  %v2440_v18 = vld [vmem:[%s3501_s1 + $0x78] sm:$0xff]   ;;  %v2449_v19 = vld [vmem:[%s3501_s1 + $0x80] sm:$0xff]   ;;  %v2442_v21 = vld [vmem:[%s3501_s1 + $0x70] sm:$0xff]   ;;  %s2998_s30 = scalar_lea.vmem %s3502_s2, %s2210_s27 }
  0x12   : > { %1238 = vmatpush1.bf16.msra.mxu0 %v2430_v2  ;;  %1527 = vmatpush1.bf16.msra.mxu1 %v2437_v5  ;;  %v2455_v14 = vld [vmem:[%s2800_s19 + $0xc] ss:$16 sps:$4 sm:$0xff]   ;;  %v2459_v16 = vld [vmem:[%s2800_s19 + $0x4] ss:$16 sps:$4 sm:$0xff]   ;;  %v2451_v20 = vld [vmem:[%s3501_s1 + $0xc0] ss:$0 sps:$4 sm:$0xff]  }
  0x13   : > { %1239 = vmatprep.subr.bf16.mxu0 %v2710_v1  ;;  %1528 = vmatprep.subr.bf16.mxu1 %v2710_v1  ;;  %v1233_v22 = vsel %vm1231_vm1, %v2451_v20, 0  ;;  %v2444_v23 = vld [vmem:[%s3501_s1 + $0x68] sm:$0xff]   ;;  %v2446_v26 = vld [vmem:[%s3501_s1 + $0x60] sm:$0xff]   ;;  %v2448_v27 = vld [vmem:[%s3501_s1 + $0x58] sm:$0xff]  }
  0x14   : > { %2364 = vmatprep.mubr.msk.bf16.mxu1 %vm1134_vm0, %v2455_v14  ;;  %1267 = vmatprep.mubr.bf16.mxu0 %v2459_v16  ;;  %v2453_v24 = vld [vmem:[%s2800_s19 + $0x8] ss:$16 sps:$4 sm:$0xff]   ;;  %v2460_v25 = vld [vmem:[%s2800_s19 + $0x2c] ss:$16 sps:$4 sm:$0xff]   ;;  %v2450_v30 = vld [vmem:[%s3501_s1 + $0x50] sm:$0xff]  }
  0x15   : > { %v2462_v28 = vld [vmem:[%s2800_s19 + $0x28] ss:$16 sps:$4 sm:$0xff]   ;;  %v2466_v29 = vld [vmem:[%s2800_s19 + $0x4c] ss:$16 sps:$4 sm:$0xff]   ;;  %v2456_v34 = vld [vmem:[%s3501_s1 + $0x40] sm:$0xff]  }
  0x16   : > { %1240 = vmatpush1.bf16.msra.mxu0 %v2431_v3  ;;  %1529 = vmatpush1.bf16.msra.mxu1 %v2439_v7  ;;  %v2452_v31 = vld [vmem:[%s3501_s1 + $0x48] sm:$0xff]   ;;  %v2457_v35 = vld [vmem:[%s2800_s19] ss:$16 sps:$4 sm:$0xff]   ;;  %v2463_v36 = vld [vmem:[%s2800_s19 + $0x24] ss:$16 sps:$4 sm:$0xff]  }
  0x17   : > { %1241 = vmatprep.subr.bf16.mxu0 %v2710_v1  ;;  %1530 = vmatprep.subr.bf16.mxu1 %v2710_v1  ;;  %v2468_v32 = vld [vmem:[%s2800_s19 + $0x48] ss:$16 sps:$4 sm:$0xff]   ;;  %v2472_v33 = vld [vmem:[%s2800_s19 + $0x6c] ss:$16 sps:$4 sm:$0xff]   ;;  %v2465_v39 = vld [vmem:[%s2800_s19 + $0x20] ss:$16 sps:$4 sm:$0xff]  }
  0x18   : > { %v2474_v37 = vld [vmem:[%s2800_s19 + $0x68] ss:$16 sps:$4 sm:$0xff]   ;;  %v2478_v38 = vld [vmem:[%s2800_s19 + $0x8c] ss:$16 sps:$4 sm:$0xff]   ;;  %v2469_v40 = vld [vmem:[%s2800_s19 + $0x44] ss:$16 sps:$4 sm:$0xff]  }
  0x19   : > { %v2480_v41 = vld [vmem:[%s2800_s19 + $0x88] ss:$16 sps:$4 sm:$0xff]   ;;  %v2484_v42 = vld [vmem:[%s2800_s19 + $0xac] ss:$16 sps:$4 sm:$0xff]   ;;  %v2471_v43 = vld [vmem:[%s2800_s19 + $0x40] ss:$16 sps:$4 sm:$0xff]  }
  0x1a   : > { %1242 = vmatpush1.bf16.msra.mxu0 %v2432_v6  ;;  %1531 = vmatpush1.bf16.msra.mxu1 %v2441_v9  ;;  %v2475_v44 = vld [vmem:[%s2800_s19 + $0x64] ss:$16 sps:$4 sm:$0xff]   ;;  %v2486_v45 = vld [vmem:[%s2800_s19 + $0xa8] ss:$16 sps:$4 sm:$0xff]   ;;  %v2490_v46 = vld [vmem:[%s2800_s19 + $0xcc] ss:$16 sps:$4 sm:$0xff]  }
  0x1b   : > { %1243 = vmatprep.subr.bf16.mxu0 %v2710_v1  ;;  %1532 = vmatprep.subr.bf16.mxu1 %v2710_v1  ;;  %v2477_v47 = vld [vmem:[%s2800_s19 + $0x60] ss:$16 sps:$4 sm:$0xff]   ;;  %v2481_v48 = vld [vmem:[%s2800_s19 + $0x84] ss:$16 sps:$4 sm:$0xff]   ;;  %v2492_v49 = vld [vmem:[%s2800_s19 + $0xc8] ss:$16 sps:$4 sm:$0xff]  }
  0x1c   : > { %v2496_v50 = vld [vmem:[%s2800_s19 + $0xec] ss:$16 sps:$4 sm:$0xff]   ;;  %v2483_v51 = vld [vmem:[%s2800_s19 + $0x80] ss:$16 sps:$4 sm:$0xff]   ;;  %v2487_v52 = vld [vmem:[%s2800_s19 + $0xa4] ss:$16 sps:$4 sm:$0xff]  }
  0x1d   : > { %v2498_v53 = vld [vmem:[%s2800_s19 + $0xe8] ss:$16 sps:$4 sm:$0xff]   ;;  %v2502_v54 = vld [vmem:[%s2800_s19 + $0x10c] ss:$16 sps:$4 sm:$0xff]   ;;  %v2489_v55 = vld [vmem:[%s2800_s19 + $0xa0] ss:$16 sps:$4 sm:$0xff]  }
  0x1e   : > { %1244 = vmatpush1.bf16.msra.mxu0 %v2433_v8  ;;  %1533 = vmatpush1.bf16.msra.mxu1 %v2443_v11  ;;  %v2493_v56 = vld [vmem:[%s2800_s19 + $0xc4] ss:$16 sps:$4 sm:$0xff]   ;;  %v2504_v57 = vld [vmem:[%s2800_s19 + $0x108] ss:$16 sps:$4 sm:$0xff]   ;;  %v2508_v58 = vld [vmem:[%s2800_s19 + $0x12c] ss:$16 sps:$4 sm:$0xff]  }
  0x1f   : > { %1245 = vmatprep.subr.bf16.mxu0 %v2710_v1  ;;  %1534 = vmatprep.subr.bf16.mxu1 %v2710_v1  ;;  %v2495_v59 = vld [vmem:[%s2800_s19 + $0xc0] ss:$16 sps:$4 sm:$0xff]   ;;  %v2499_v60 = vld [vmem:[%s2800_s19 + $0xe4] ss:$16 sps:$4 sm:$0xff]   ;;  %v2510_v61 = vld [vmem:[%s2800_s19 + $0x128] ss:$16 sps:$4 sm:$0xff]  }
  0x20   : > { %v2514_v62 = vld [vmem:[%s2800_s19 + $0x14c] ss:$16 sps:$4 sm:$0xff]   ;;  %v2501_v63 = vld [vmem:[%s2800_s19 + $0xe0] ss:$16 sps:$4 sm:$0xff]   ;;  %v2505_v0 = vld [vmem:[%s2800_s19 + $0x104] ss:$16 sps:$4 sm:$0xff]  }
  0x21   : > { %v2520_v2 = vld [vmem:[%s2800_s19 + $0x16c] ss:$16 sps:$4 sm:$0xff]   ;;  %v2507_v3 = vld [vmem:[%s2800_s19 + $0x100] ss:$16 sps:$4 sm:$0xff]   ;;  %v2511_v4 = vld [vmem:[%s2800_s19 + $0x124] ss:$16 sps:$4 sm:$0xff]  }
  0x22   : > { %1246 = vmatpush1.bf16.msra.mxu0 %v2434_v10  ;;  %1535 = vmatpush1.bf16.msra.mxu1 %v2445_v13  ;;  %v2522_v5 = vld [vmem:[%s2800_s19 + $0x168] ss:$16 sps:$4 sm:$0xff]   ;;  %v2526_v6 = vld [vmem:[%s2800_s19 + $0x18c] ss:$16 sps:$4 sm:$0xff]   ;;  %v2513_v7 = vld [vmem:[%s2800_s19 + $0x120] ss:$16 sps:$4 sm:$0xff]  }
  0x23   : > { %1247 = vmatprep.subr.bf16.mxu0 %v2710_v1  ;;  %1536 = vmatprep.subr.bf16.mxu1 %v2710_v1  ;;  %v2517_v8 = vld [vmem:[%s2800_s19 + $0x144] ss:$16 sps:$4 sm:$0xff]   ;;  %v2528_v9 = vld [vmem:[%s2800_s19 + $0x188] ss:$16 sps:$4 sm:$0xff]   ;;  %v2532_v10 = vld [vmem:[%s2800_s19 + $0x1ac] ss:$16 sps:$4 sm:$0xff]  }
  0x24   : > { %v2519_v11 = vld [vmem:[%s2800_s19 + $0x140] ss:$16 sps:$4 sm:$0xff]   ;;  %v2534_v13 = vld [vmem:[%s2800_s19 + $0x1a8] ss:$16 sps:$4 sm:$0xff]   ;;  %v2538_v14 = vld [vmem:[%s2800_s19 + $0x1cc] ss:$16 sps:$4 sm:$0xff]  }
  0x25   : > { %v2529_v16 = vld [vmem:[%s2800_s19 + $0x184] ss:$16 sps:$4 sm:$0xff]  }
  0x26   : > { %1248 = vmatpush1.bf16.msra.mxu0 %v2436_v12  ;;  %1537 = vmatpush1.bf16.msra.mxu1 %v2447_v17  ;;  %v2523_v12 = vld [vmem:[%s2800_s19 + $0x164] ss:$16 sps:$4 sm:$0xff]   ;;  %v2540_v17 = vld [vmem:[%s2800_s19 + $0x1c8] ss:$16 sps:$4 sm:$0xff]  }
  0x27   : > { %1249 = vmatprep.subr.bf16.mxu0 %v2710_v1  ;;  %1538 = vmatprep.subr.bf16.mxu1 %v2710_v1  ;;  %v2535_v20 = vld [vmem:[%s2800_s19 + $0x1a4] ss:$16 sps:$4 sm:$0xff]  }
  0x2a   : > { %1250 = vmatpush1.bf16.msra.mxu0 %v2438_v15  ;;  %1539 = vmatpush1.bf16.msra.mxu1 %v2449_v19  ;;  %v2525_v15 = vld [vmem:[%s2800_s19 + $0x160] ss:$16 sps:$4 sm:$0xff]  }
  0x2b   : > { %1251 = vmatprep.subr.bf16.mxu0 %v2710_v1  ;;  %1554 = vmatprep.subr.bf16.mxu1 %v2710_v1  ;;  %v2531_v19 = vld [vmem:[%s2800_s19 + $0x180] ss:$16 sps:$4 sm:$0xff]  }
  0x2e   : > { %1252 = vmatpush2.bf16.msra.mxu0 %v2440_v18  ;;  %1555 = vmatpush2.bf16.msra.mxu1 %v1233_v22  ;;  %v2544_v18 = vld [vmem:[%s2800_s19 + $0x1ec] ss:$16 sps:$4 sm:$0xff]  }
  0x2f   : > { %1253 = vmatprep.subr.bf16.mxu0 %v2710_v1  ;;  %v2550_v22 = vld [vmem:[%s2800_s19 + $0x20c] ss:$16 sps:$4 sm:$0xff]  }
  0x31   : > { %1557 = vmatmul.mubr.bf16.vlgmr.msra.gmra.mxu1 %v2453_v24  ;;  %v2541_v24 = vld [vmem:[%s2800_s19 + $0x1c4] ss:$16 sps:$4 sm:$0xff]  }
  0x32   : > { %1254 = vmatpush2.bf16.msra.mxu0 %v2442_v21  ;;  %2365 = vmatprep.mubr.msk.bf16.mxu1 %vm1134_vm0, %v2460_v25  ;;  %v2546_v21 = vld [vmem:[%s2800_s19 + $0x1e8] ss:$16 sps:$4 sm:$0xff]  }
  0x33   : > { %1255 = vmatprep.subr.bf16.mxu0 %v2710_v1  ;;  %v2552_v25 = vld [vmem:[%s2800_s19 + $0x208] ss:$16 sps:$4 sm:$0xff]  }
  0x36   : > { %1256 = vmatpush2.bf16.msra.mxu0 %v2444_v23  ;;  %v2537_v23 = vld [vmem:[%s2800_s19 + $0x1a0] ss:$16 sps:$4 sm:$0xff]  }
  0x37   : > { %1257 = vmatprep.subr.bf16.mxu0 %v2710_v1 }
  0x39   : > { %1565 = vmatmul.mubr.bf16.gmra.mxu1 %v2462_v28  ;;  %v2547_v28 = vld [vmem:[%s2800_s19 + $0x1e4] ss:$16 sps:$4 sm:$0xff]  }
  0x3a   : > { %1258 = vmatpush2.bf16.msra.mxu0 %v2446_v26  ;;  %2366 = vmatprep.mubr.msk.bf16.mxu1 %vm1134_vm0, %v2466_v29  ;;  %v2556_v26 = vld [vmem:[%s2800_s19 + $0x22c] ss:$16 sps:$4 sm:$0xff]   ;;  %v2558_v29 = vld [vmem:[%s2800_s19 + $0x228] ss:$16 sps:$4 sm:$0xff]  }
  0x3b   : > { %1259 = vmatprep.subr.bf16.mxu0 %v2710_v1 }
  0x3e   : > { %1260 = vmatpush2.bf16.msra.mxu0 %v2448_v27  ;;  %v2543_v27 = vld [vmem:[%s2800_s19 + $0x1c0] ss:$16 sps:$4 sm:$0xff]  }
  0x3f   : > { %1261 = vmatprep.subr.bf16.mxu0 %v2710_v1 }
  0x41   : > { %1573 = vmatmul.mubr.bf16.gmra.mxu1 %v2468_v32  ;;  %v2553_v32 = vld [vmem:[%s2800_s19 + $0x204] ss:$16 sps:$4 sm:$0xff]  }
  0x42   : > { %1262 = vmatpush2.bf16.msra.mxu0 %v2450_v30  ;;  %2367 = vmatprep.mubr.msk.bf16.mxu1 %vm1134_vm0, %v2472_v33  ;;  %v2562_v30 = vld [vmem:[%s2800_s19 + $0x24c] ss:$16 sps:$4 sm:$0xff]   ;;  %v2564_v33 = vld [vmem:[%s2800_s19 + $0x248] ss:$16 sps:$4 sm:$0xff]  }
  0x43   : > { %1263 = vmatprep.subr.bf16.mxu0 %v2710_v1 }
  0x46   : > { %1264 = vmatpush2.bf16.msra.mxu0 %v2452_v31  ;;  %v2549_v31 = vld [vmem:[%s2800_s19 + $0x1e0] ss:$16 sps:$4 sm:$0xff]  }
  0x47   : > { %1265 = vmatprep.subr.bf16.mxu0 %v2710_v1  ;;  %v2516_v1 = vld [vmem:[%s2800_s19 + $0x148] ss:$16 sps:$4 sm:$0xff]  }
  0x49   : > { %1581 = vmatmul.mubr.bf16.gmra.mxu1 %v2474_v37  ;;  %v2570_v37 = vld [vmem:[%s2800_s19 + $0x268] ss:$16 sps:$4 sm:$0xff]  }
  0x4a   : > { %1266 = vmatpush2.bf16.msra.mxu0 %v2456_v34  ;;  %2368 = vmatprep.mubr.msk.bf16.mxu1 %vm1134_vm0, %v2478_v38  ;;  %v2568_v34 = vld [vmem:[%s2800_s19 + $0x26c] ss:$16 sps:$4 sm:$0xff]  }
  0x4b   : > { %v2574_v38 = vld [vmem:[%s2800_s19 + $0x28c] ss:$16 sps:$4 sm:$0xff]  }
  0x4d   : > { %1268 = vmatmul.mubr.bf16.vlgmr.msra.gmra.mxu0 %v2457_v35  ;;  %v2555_v35 = vld [vmem:[%s2800_s19 + $0x200] ss:$16 sps:$4 sm:$0xff]  }
  0x4e   : > { %1275 = vmatprep.mubr.bf16.mxu0 %v2463_v36  ;;  %v2559_v36 = vld [vmem:[%s2800_s19 + $0x224] ss:$16 sps:$4 sm:$0xff]  }
  0x51   : > { %1589 = vmatmul.mubr.bf16.gmra.mxu1 %v2480_v41  ;;  %v2576_v41 = vld [vmem:[%s2800_s19 + $0x288] ss:$16 sps:$4 sm:$0xff]  }
  0x52   : > { %2369 = vmatprep.mubr.msk.bf16.mxu1 %vm1134_vm0, %v2484_v42  ;;  %v2580_v42 = vld [vmem:[%s2800_s19 + $0x2ac] ss:$16 sps:$4 sm:$0xff]  }
  0x55   : > { %1276 = vmatmul.mubr.bf16.gmra.mxu0 %v2465_v39  ;;  %v2561_v39 = vld [vmem:[%s2800_s19 + $0x220] ss:$16 sps:$4 sm:$0xff]  }
  0x56   : > { %1283 = vmatprep.mubr.bf16.mxu0 %v2469_v40  ;;  %v2565_v40 = vld [vmem:[%s2800_s19 + $0x244] ss:$16 sps:$4 sm:$0xff]  }
  0x59   : > { %1597 = vmatmul.mubr.bf16.gmra.mxu1 %v2486_v45  ;;  %v2582_v45 = vld [vmem:[%s2800_s19 + $0x2a8] ss:$16 sps:$4 sm:$0xff]  }
  0x5a   : > { %2370 = vmatprep.mubr.msk.bf16.mxu1 %vm1134_vm0, %v2490_v46  ;;  %v2586_v46 = vld [vmem:[%s2800_s19 + $0x2cc] ss:$16 sps:$4 sm:$0xff]  }
  0x5d   : > { %1284 = vmatmul.mubr.bf16.gmra.mxu0 %v2471_v43  ;;  %v2567_v43 = vld [vmem:[%s2800_s19 + $0x240] ss:$16 sps:$4 sm:$0xff]  }
  0x5e   : > { %1291 = vmatprep.mubr.bf16.mxu0 %v2475_v44  ;;  %v2571_v44 = vld [vmem:[%s2800_s19 + $0x264] ss:$16 sps:$4 sm:$0xff]  }
  0x61   : > { %1605 = vmatmul.mubr.bf16.gmra.mxu1 %v2492_v49  ;;  %v2588_v49 = vld [vmem:[%s2800_s19 + $0x2c8] ss:$16 sps:$4 sm:$0xff]  }
  0x62   : > { %2371 = vmatprep.mubr.msk.bf16.mxu1 %vm1134_vm0, %v2496_v50  ;;  %v2592_v50 = vld [vmem:[%s2800_s19 + $0x2ec] ss:$16 sps:$4 sm:$0xff]  }
  0x65   : > { %1292 = vmatmul.mubr.bf16.gmra.mxu0 %v2477_v47  ;;  %v2573_v47 = vld [vmem:[%s2800_s19 + $0x260] ss:$16 sps:$4 sm:$0xff]  }
  0x66   : > { %1299 = vmatprep.mubr.bf16.mxu0 %v2481_v48  ;;  %v2577_v48 = vld [vmem:[%s2800_s19 + $0x284] ss:$16 sps:$4 sm:$0xff]  }
  0x69   : > { %1613 = vmatmul.mubr.bf16.gmra.mxu1 %v2498_v53  ;;  %v2594_v53 = vld [vmem:[%s2800_s19 + $0x2e8] ss:$16 sps:$4 sm:$0xff]  }
  0x6a   : > { %2372 = vmatprep.mubr.msk.bf16.mxu1 %vm1134_vm0, %v2502_v54  ;;  %v2598_v54 = vld [vmem:[%s2800_s19 + $0x30c] ss:$16 sps:$4 sm:$0xff]  }
  0x6d   : > { %1300 = vmatmul.mubr.bf16.gmra.mxu0 %v2483_v51  ;;  %v2579_v51 = vld [vmem:[%s2800_s19 + $0x280] ss:$16 sps:$4 sm:$0xff]  }
  0x6e   : > { %1307 = vmatprep.mubr.bf16.mxu0 %v2487_v52  ;;  %v2583_v52 = vld [vmem:[%s2800_s19 + $0x2a4] ss:$16 sps:$4 sm:$0xff]  }
  0x71   : > { %1621 = vmatmul.mubr.bf16.gmra.mxu1 %v2504_v57  ;;  %v2600_v57 = vld [vmem:[%s2800_s19 + $0x308] ss:$16 sps:$4 sm:$0xff]  }
  0x72   : > { %2373 = vmatprep.mubr.msk.bf16.mxu1 %vm1134_vm0, %v2508_v58  ;;  %v2604_v58 = vld [vmem:[%s2800_s19 + $0x32c] ss:$16 sps:$4 sm:$0xff]  }
  0x75   : > { %1308 = vmatmul.mubr.bf16.gmra.mxu0 %v2489_v55  ;;  %v2585_v55 = vld [vmem:[%s2800_s19 + $0x2a0] ss:$16 sps:$4 sm:$0xff]  }
  0x76   : > { %1315 = vmatprep.mubr.bf16.mxu0 %v2493_v56  ;;  %v2589_v56 = vld [vmem:[%s2800_s19 + $0x2c4] ss:$16 sps:$4 sm:$0xff]  }
  0x79   : > { %1629 = vmatmul.mubr.bf16.gmra.mxu1 %v2510_v61 }
  0x7a   : > { %2374 = vmatprep.mubr.msk.bf16.mxu1 %vm1134_vm0, %v2514_v62  ;;  %v2595_v62 = vld [vmem:[%s2800_s19 + $0x2e4] ss:$16 sps:$4 sm:$0xff]  }
  0x7d   : > { %1316 = vmatmul.mubr.bf16.gmra.mxu0 %v2495_v59 }
  0x7e   : > { %1323 = vmatprep.mubr.bf16.mxu0 %v2499_v60  ;;  %v2591_v60 = vld [vmem:[%s2800_s19 + $0x2c0] ss:$16 sps:$4 sm:$0xff]  }
  0x81   : > { %1637 = vmatmul.mubr.bf16.gmra.mxu1 %v2516_v1  ;;  %v2610_v1 = vld [vmem:[%s2800_s19 + $0x34c] ss:$16 sps:$4 sm:$0xff]  }
  0x82   : > { %2375 = vmatprep.mubr.msk.bf16.mxu1 %vm1134_vm0, %v2520_v2 }
  0x85   : > { %1324 = vmatmul.mubr.bf16.gmra.mxu0 %v2501_v63 }
  0x86   : > { %1331 = vmatprep.mubr.bf16.mxu0 %v2505_v0  ;;  %v2606_v0 = vld [vmem:[%s2800_s19 + $0x328] ss:$16 sps:$4 sm:$0xff]  }
  0x89   : > { %1645 = vmatmul.mubr.bf16.gmra.mxu1 %v2522_v5 }
  0x8a   : > { %2376 = vmatprep.mubr.msk.bf16.mxu1 %vm1134_vm0, %v2526_v6  ;;  %v2601_v6 = vld [vmem:[%s2800_s19 + $0x304] ss:$16 sps:$4 sm:$0xff]  }
  0x8d   : > { %1332 = vmatmul.mubr.bf16.gmra.mxu0 %v2507_v3 }
  0x8e   : > { %1339 = vmatprep.mubr.bf16.mxu0 %v2511_v4  ;;  %v2597_v4 = vld [vmem:[%s2800_s19 + $0x2e0] ss:$16 sps:$4 sm:$0xff]  }
  0x91   : > { %1653 = vmatmul.mubr.bf16.gmra.mxu1 %v2528_v9  ;;  %v2616_v9 = vld [vmem:[%s2800_s19 + $0x36c] ss:$16 sps:$4 sm:$0xff]  }
  0x92   : > { %2377 = vmatprep.mubr.msk.bf16.mxu1 %vm1134_vm0, %v2532_v10 }
  0x95   : > { %1340 = vmatmul.mubr.bf16.gmra.mxu0 %v2513_v7 }
  0x96   : > { %1347 = vmatprep.mubr.bf16.mxu0 %v2517_v8  ;;  %v2612_v8 = vld [vmem:[%s2800_s19 + $0x348] ss:$16 sps:$4 sm:$0xff]  }
  0x99   : > { %1661 = vmatmul.mubr.bf16.gmra.mxu1 %v2534_v13 }
  0x9a   : > { %2378 = vmatprep.mubr.msk.bf16.mxu1 %vm1134_vm0, %v2538_v14  ;;  %v2607_v14 = vld [vmem:[%s2800_s19 + $0x324] ss:$16 sps:$4 sm:$0xff]  }
  0x9d   : > { %1348 = vmatmul.mubr.bf16.gmra.mxu0 %v2519_v11 }
  0x9e   : > { %1355 = vmatprep.mubr.bf16.mxu0 %v2523_v12  ;;  %v2603_v12 = vld [vmem:[%s2800_s19 + $0x300] ss:$16 sps:$4 sm:$0xff]  }
  0xa1   : > { %1669 = vmatmul.mubr.bf16.gmra.mxu1 %v2540_v17  ;;  %v2622_v17 = vld [vmem:[%s2800_s19 + $0x38c] ss:$16 sps:$4 sm:$0xff]  }
  0xa2   : > { %2379 = vmatprep.mubr.msk.bf16.mxu1 %vm1134_vm0, %v2544_v18 }
  0xa5   : > { %1356 = vmatmul.mubr.bf16.gmra.mxu0 %v2525_v15 }
  0xa6   : > { %1363 = vmatprep.mubr.bf16.mxu0 %v2529_v16  ;;  %v2618_v16 = vld [vmem:[%s2800_s19 + $0x368] ss:$16 sps:$4 sm:$0xff]  }
  0xa9   : > { %1677 = vmatmul.mubr.bf16.gmra.mxu1 %v2546_v21 }
  0xaa   : > { %2380 = vmatprep.mubr.msk.bf16.mxu1 %vm1134_vm0, %v2550_v22 }
  0xad   : > { %1364 = vmatmul.mubr.bf16.gmra.mxu0 %v2531_v19 }
  0xae   : > { %1371 = vmatprep.mubr.bf16.mxu0 %v2535_v20 }
  0xb1   : > { %1685 = vmatmul.mubr.bf16.gmra.mxu1 %v2552_v25 }
  0xb2   : > { %2381 = vmatprep.mubr.msk.bf16.mxu1 %vm1134_vm0, %v2556_v26 }
  0xb5   : > { %1372 = vmatmul.mubr.bf16.gmra.mxu0 %v2537_v23 }
  0xb6   : > { %1379 = vmatprep.mubr.bf16.mxu0 %v2541_v24  ;;  %v2609_v24 = vld [vmem:[%s2800_s19 + $0x320] ss:$16 sps:$4 sm:$0xff]  }
  0xb9   : > { %1693 = vmatmul.mubr.bf16.gmra.mxu1 %v2558_v29 }
  0xba   : > { %2382 = vmatprep.mubr.msk.bf16.mxu1 %vm1134_vm0, %v2562_v30  ;;  %v2624_v30 = vld [vmem:[%s2800_s19 + $0x388] ss:$16 sps:$4 sm:$0xff]  }
  0xbd   : > { %1380 = vmatmul.mubr.bf16.gmra.mxu0 %v2543_v27  ;;  %v2613_v27 = vld [vmem:[%s2800_s19 + $0x344] ss:$16 sps:$4 sm:$0xff]  }
  0xbe   : > { %1387 = vmatprep.mubr.bf16.mxu0 %v2547_v28 }
  0xc1   : > { %1701 = vmatmul.mubr.bf16.gmra.mxu1 %v2564_v33 }
  0xc2   : > { %2383 = vmatprep.mubr.msk.bf16.mxu1 %vm1134_vm0, %v2568_v34 }
  0xc5   : > { %1388 = vmatmul.mubr.bf16.gmra.mxu0 %v2549_v31  ;;  %v2628_v31 = vld [vmem:[%s2800_s19 + $0x3ac] ss:$16 sps:$4 sm:$0xff]  }
  0xc6   : > { %1395 = vmatprep.mubr.bf16.mxu0 %v2553_v32 }
  0xc9   : > { %1709 = vmatmul.mubr.bf16.gmra.mxu1 %v2570_v37 }
  0xca   : > { %2384 = vmatprep.mubr.msk.bf16.mxu1 %vm1134_vm0, %v2574_v38  ;;  %v2615_v38 = vld [vmem:[%s2800_s19 + $0x340] ss:$16 sps:$4 sm:$0xff]  }
  0xcd   : > { %1396 = vmatmul.mubr.bf16.gmra.mxu0 %v2555_v35 }
  0xce   : > { %1403 = vmatprep.mubr.bf16.mxu0 %v2559_v36 }
  0xd1   : > { %1717 = vmatmul.mubr.bf16.gmra.mxu1 %v2576_v41  ;;  %v2619_v41 = vld [vmem:[%s2800_s19 + $0x364] ss:$16 sps:$4 sm:$0xff]  }
  0xd2   : > { %2385 = vmatprep.mubr.msk.bf16.mxu1 %vm1134_vm0, %v2580_v42 }
  0xd5   : > { %1404 = vmatmul.mubr.bf16.gmra.mxu0 %v2561_v39 }
  0xd6   : > { %1411 = vmatprep.mubr.bf16.mxu0 %v2565_v40 }
  0xd9   : > { %1725 = vmatmul.mubr.bf16.gmra.mxu1 %v2582_v45  ;;  %v2634_v45 = vld [vmem:[%s2800_s19 + $0x3cc] ss:$16 sps:$4 sm:$0xff]  }
  0xda   : > { %2386 = vmatprep.mubr.msk.bf16.mxu1 %vm1134_vm0, %v2586_v46 }
  0xdd   : > { %1412 = vmatmul.mubr.bf16.gmra.mxu0 %v2567_v43 }
  0xde   : > { %1419 = vmatprep.mubr.bf16.mxu0 %v2571_v44  ;;  %v2630_v44 = vld [vmem:[%s2800_s19 + $0x3a8] ss:$16 sps:$4 sm:$0xff]  }
  0xe1   : > { %1733 = vmatmul.mubr.bf16.gmra.mxu1 %v2588_v49 }
  0xe2   : > { %2387 = vmatprep.mubr.msk.bf16.mxu1 %vm1134_vm0, %v2592_v50 }
  0xe5   : > { %1420 = vmatmul.mubr.bf16.gmra.mxu0 %v2573_v47 }
  0xe6   : > { %1427 = vmatprep.mubr.bf16.mxu0 %v2577_v48 }
  0xe9   : > { %1741 = vmatmul.mubr.bf16.gmra.mxu1 %v2594_v53 }
  0xea   : > { %2388 = vmatprep.mubr.msk.bf16.mxu1 %vm1134_vm0, %v2598_v54 }
  0xed   : > { %1428 = vmatmul.mubr.bf16.gmra.mxu0 %v2579_v51 }
  0xee   : > { %1435 = vmatprep.mubr.bf16.mxu0 %v2583_v52  ;;  %v2621_v52 = vld [vmem:[%s2800_s19 + $0x360] ss:$16 sps:$4 sm:$0xff]  }
  0xf1   : > { %v1558_v59 = vpop.f32.mrf.mxu1  ;;  %1749 = vmatmul.mubr.bf16.gmra.mxu1 %v2600_v57 }
  0xf2   : > { %2389 = vmatprep.mubr.msk.bf16.mxu1 %vm1134_vm0, %v2604_v58  ;;  %v2636_v58 = vld [vmem:[%s2800_s19 + $0x3c8] ss:$16 sps:$4 sm:$0xff]  }
  0xf3   : > { %v1560_v61 = vpop.f32.mrf.mxu1 }
  0xf5   : > { %1436 = vmatmul.mubr.bf16.gmra.mxu0 %v2585_v55  ;;  %v1561_v63 = vpop.f32.mrf.mxu1  ;;  %v2627_v55 = vld [vmem:[%s2800_s19 + $0x384] ss:$16 sps:$4 sm:$0xff]  }
  0xf6   : > { %1443 = vmatprep.mubr.bf16.mxu0 %v2589_v56 }
  0xf7   : > { %v1563_v2 = vpop.f32.mrf.mxu1 }
  0xf8   : > { %v2625_v2 = vld [vmem:[%s2800_s19 + $0x380] ss:$16 sps:$4 sm:$0xff]  }
  0xf9   : > { %v1566_v3 = vpop.f32.mrf.mxu1  ;;  %1757 = vmatmul.mubr.bf16.gmra.mxu1 %v2606_v0 }
  0xfa   : > { %2390 = vmatprep.mubr.msk.bf16.mxu1 %vm1134_vm0, %v2610_v1 }
  0xfb   : > { %v1568_v5 = vpop.f32.mrf.mxu1 }
  0xfc   : > { %v2633_v5 = vld [vmem:[%s2800_s19 + $0x3a4] ss:$16 sps:$4 sm:$0xff]  }
  0xfd   : > { %1444 = vmatmul.mubr.bf16.gmra.mxu0 %v2591_v60  ;;  %v1569_v7 = vpop.f32.mrf.mxu1 }
  0xfe   : > { %1451 = vmatprep.mubr.bf16.mxu0 %v2595_v62 }
  0xff   : > { %v1571_v10 = vpop.f32.mrf.mxu1 }
 0x101   : > { %v1574_v11 = vpop.f32.mrf.mxu1  ;;  %1765 = vmatmul.mubr.bf16.gmra.mxu1 %v2612_v8  ;;  %v2642_v8 = vld [vmem:[%s2800_s19 + $0x3e8] ss:$16 sps:$4 sm:$0xff]  }
 0x102   : > { %2391 = vmatprep.mubr.msk.bf16.mxu1 %vm1134_vm0, %v2616_v9 }
 0x103   : > { %v1576_v13 = vpop.f32.mrf.mxu1 }
 0x105   : > { %1452 = vmatmul.mubr.bf16.gmra.mxu0 %v2597_v4  ;;  %v1577_v15 = vpop.f32.mrf.mxu1 }
 0x106   : > { %1459 = vmatprep.mubr.bf16.mxu0 %v2601_v6 }
 0x107   : > { %v1579_v19 = vpop.f32.mrf.mxu1 }
 0x109   : > { %v1582_v22 = vpop.f32.mrf.mxu1  ;;  %1773 = vmatmul.mubr.bf16.gmra.mxu1 %v2618_v16 }
 0x10a   : > { %2392 = vmatprep.mubr.msk.bf16.mxu1 %vm1134_vm0, %v2622_v17 }
 0x10b   : > { %v1584_v25 = vpop.f32.mrf.mxu1 }
 0x10d   : > { %v1269_v18 = vpop.f32.mrf.mxu0  ;;  %1460 = vmatmul.mubr.bf16.gmra.mxu0 %v2603_v12  ;;  %v1585_v29 = vpop.f32.mrf.mxu1 }
 0x10e   : > { %v3000_v20 = vadd.f32 %v1558_v59, %v1269_v18  ;;  %1467 = vmatprep.mubr.bf16.mxu0 %v2607_v14  ;;  %v2640_v59 = vld [vmem:[%s2800_s19 + $0x3ec] ss:$16 sps:$4 sm:$0xff]   ;;  %v2639_v18 = vld [vmem:[%s2800_s19 + $0x3c4] ss:$16 sps:$4 sm:$0xff]  }
 0x10f   : > { %v1271_v21 = vpop.f32.mrf.mxu0  ;;  %v1587_v33 = vpop.f32.mrf.mxu1 }
 0x110   : > { %1813 = vst [vmem:[%s2998_s30] sm:$0xff] %v3000_v20 }
 0x111   : > { %v1272_v23 = vpop.f32.mrf.mxu0  ;;  %v1590_v36 = vpop.f32.mrf.mxu1  ;;  %1781 = vmatmul.mubr.bf16.gmra.mxu1 %v2624_v30 }
 0x112   : > { %v3006_v26 = vadd.f32 %v1561_v63, %v1272_v23  ;;  %2393 = vmatprep.mubr.msk.bf16.mxu1 %vm1134_vm0, %v2628_v31 }
 0x113   : > { %v1274_v28 = vpop.f32.mrf.mxu0  ;;  %v1592_v39 = vpop.f32.mrf.mxu1 }
 0x114   : > { %1814 = vst [vmem:[%s2998_s30 + $0x8] sm:$0xff] %v3006_v26 }
 0x115   : > { %v1277_v32 = vpop.f32.mrf.mxu0  ;;  %1468 = vmatmul.mubr.bf16.gmra.mxu0 %v2609_v24  ;;  %v1593_v43 = vpop.f32.mrf.mxu1 }
 0x116   : > { %v3013_v34 = vadd.f32 %v1566_v3, %v1277_v32  ;;  %1475 = vmatprep.mubr.bf16.mxu0 %v2613_v27  ;;  %v2645_v32 = vld [vmem:[%s2800_s19 + $0x3e4] ss:$16 sps:$4 sm:$0xff]  }
 0x117   : > { %v1279_v35 = vpop.f32.mrf.mxu0  ;;  %v1595_v47 = vpop.f32.mrf.mxu1 }
 0x118   : > { %1815 = vst [vmem:[%s2998_s30 + $0x10] sm:$0xff] %v3013_v34 }
 0x119   : > { %v1280_v37 = vpop.f32.mrf.mxu0  ;;  %v1598_v50 = vpop.f32.mrf.mxu1  ;;  %1789 = vmatmul.mubr.bf16.gmra.mxu1 %v2630_v44 }
 0x11a   : > { %v3019_v40 = vadd.f32 %v1569_v7, %v1280_v37  ;;  %2394 = vmatprep.mubr.msk.bf16.mxu1 %vm1134_vm0, %v2634_v45 }
 0x11b   : > { %v1282_v42 = vpop.f32.mrf.mxu0  ;;  %v1600_v53 = vpop.f32.mrf.mxu1 }
 0x11c   : > { %1816 = vst [vmem:[%s2998_s30 + $0x18] sm:$0xff] %v3019_v40 }
 0x11d   : > { %v1285_v46 = vpop.f32.mrf.mxu0  ;;  %1476 = vmatmul.mubr.bf16.gmra.mxu0 %v2615_v38  ;;  %v1601_v57 = vpop.f32.mrf.mxu1 }
 0x11e   : > { %v3026_v48 = vadd.f32 %v1574_v11, %v1285_v46  ;;  %1483 = vmatprep.mubr.bf16.mxu0 %v2619_v41 }
 0x11f   : > { %v1287_v49 = vpop.f32.mrf.mxu0  ;;  %v1603_v61 = vpop.f32.mrf.mxu1 }
 0x120   : > { %1817 = vst [vmem:[%s2998_s30 + $0x20] sm:$0xff] %v3026_v48 }
 0x121   : > { %v1288_v51 = vpop.f32.mrf.mxu0  ;;  %v1606_v0 = vpop.f32.mrf.mxu1  ;;  %1797 = vmatmul.mubr.bf16.gmra.mxu1 %v2636_v58 }
 0x122   : > { %v3032_v54 = vadd.f32 %v1577_v15, %v1288_v51  ;;  %2395 = vmatprep.mubr.msk.bf16.mxu1 %vm1134_vm0, %v2640_v59  ;;  %v2631_v15 = vld [vmem:[%s2800_s19 + $0x3a0] ss:$16 sps:$4 sm:$0xff]  }
 0x123   : > { %v1290_v56 = vpop.f32.mrf.mxu0  ;;  %v1608_v3 = vpop.f32.mrf.mxu1 }
 0x124   : > { %1818 = vst [vmem:[%s2998_s30 + $0x28] sm:$0xff] %v3032_v54 }
 0x125   : > { %v1293_v60 = vpop.f32.mrf.mxu0  ;;  %1484 = vmatmul.mubr.bf16.gmra.mxu0 %v2621_v52  ;;  %v1609_v7 = vpop.f32.mrf.mxu1 }
 0x126   : > { %v3039_v62 = vadd.f32 %v1582_v22, %v1293_v60  ;;  %1491 = vmatprep.mubr.bf16.mxu0 %v2627_v55 }
 0x127   : > { %v1295_v63 = vpop.f32.mrf.mxu0  ;;  %v1611_v10 = vpop.f32.mrf.mxu1 }
 0x128   : > { %1819 = vst [vmem:[%s2998_s30 + $0x30] sm:$0xff] %v3039_v62 }
 0x129   : > { %v1296_v1 = vpop.f32.mrf.mxu0  ;;  %v1614_v13 = vpop.f32.mrf.mxu1  ;;  %1805 = vmatmul.mubr.bf16.gmra.mxu1 %v2642_v8 }
 0x12a   : > { %v3045_v4 = vadd.f32 %v1585_v29, %v1296_v1  ;;  %v2637_v29 = vld [vmem:[%s2800_s19 + $0x3c0] ss:$16 sps:$4 sm:$0xff]  }
 0x12b   : > { %v1298_v6 = vpop.f32.mrf.mxu0  ;;  %v1616_v16 = vpop.f32.mrf.mxu1 }
 0x12c   : > { %1820 = vst [vmem:[%s2998_s30 + $0x38] sm:$0xff] %v3045_v4 }
 0x12d   : > { %v1301_v9 = vpop.f32.mrf.mxu0  ;;  %1492 = vmatmul.mubr.bf16.gmra.mxu0 %v2625_v2  ;;  %v1617_v21 = vpop.f32.mrf.mxu1 }
 0x12e   : > { %v3051_v11 = vadd.f32 %v1590_v36, %v1301_v9  ;;  %1499 = vmatprep.mubr.bf16.mxu0 %v2633_v5 }
 0x12f   : > { %v1303_v12 = vpop.f32.mrf.mxu0  ;;  %v1619_v23 = vpop.f32.mrf.mxu1 }
 0x130   : > { %1821 = vst [vmem:[%s2998_s30 + $0x40] sm:$0xff] %v3051_v11 }
 0x131   : > { %v1304_v14 = vpop.f32.mrf.mxu0  ;;  %v1622_v27 = vpop.f32.mrf.mxu1 }
 0x132   : > { %v3056_v17 = vadd.f32 %v1593_v43, %v1304_v14  ;;  %v2643_v43 = vld [vmem:[%s2800_s19 + $0x3e0] ss:$16 sps:$4 sm:$0xff]  }
 0x133   : > { %v1306_v19 = vpop.f32.mrf.mxu0  ;;  %v1624_v30 = vpop.f32.mrf.mxu1 }
 0x134   : > { %1822 = vst [vmem:[%s2998_s30 + $0x48] sm:$0xff] %v3056_v17 }
 0x135   : > { %v1309_v22 = vpop.f32.mrf.mxu0  ;;  %1500 = vmatmul.mubr.bf16.gmra.mxu0 %v2631_v15  ;;  %v1625_v35 = vpop.f32.mrf.mxu1 }
 0x136   : > { %v3061_v24 = vadd.f32 %v1598_v50, %v1309_v22  ;;  %1507 = vmatprep.mubr.bf16.mxu0 %v2639_v18 }
 0x137   : > { %v1311_v25 = vpop.f32.mrf.mxu0  ;;  %v1627_v37 = vpop.f32.mrf.mxu1 }
 0x138   : > { %1823 = vst [vmem:[%s2998_s30 + $0x50] sm:$0xff] %v3061_v24 }
 0x139   : > { %v1312_v28 = vpop.f32.mrf.mxu0  ;;  %v1630_v41 = vpop.f32.mrf.mxu1 }
 0x13a   : > { %v3066_v31 = vadd.f32 %v1601_v57, %v1312_v28 }
 0x13b   : > { %v1314_v33 = vpop.f32.mrf.mxu0  ;;  %v1632_v44 = vpop.f32.mrf.mxu1 }
 0x13c   : > { %1824 = vst [vmem:[%s2998_s30 + $0x58] sm:$0xff] %v3066_v31 }
 0x13d   : > { %v1317_v36 = vpop.f32.mrf.mxu0  ;;  %1508 = vmatmul.mubr.bf16.gmra.mxu0 %v2637_v29  ;;  %v1633_v47 = vpop.f32.mrf.mxu1 }
 0x13e   : > { %v3071_v38 = vadd.f32 %v1606_v0, %v1317_v36  ;;  %1515 = vmatprep.mubr.bf16.mxu0 %v2645_v32 }
 0x13f   : > { %v1319_v39 = vpop.f32.mrf.mxu0  ;;  %v1635_v50 = vpop.f32.mrf.mxu1 }
 0x140   : > { %1825 = vst [vmem:[%s2998_s30 + $0x60] sm:$0xff] %v3071_v38 }
 0x141   : > { %v1320_v42 = vpop.f32.mrf.mxu0  ;;  %v1638_v53 = vpop.f32.mrf.mxu1 }
 0x142   : > { %v3076_v45 = vadd.f32 %v1609_v7, %v1320_v42 }
 0x143   : > { %v1322_v46 = vpop.f32.mrf.mxu0  ;;  %v1640_v56 = vpop.f32.mrf.mxu1 }
 0x144   : > { %1826 = vst [vmem:[%s2998_s30 + $0x68] sm:$0xff] %v3076_v45 }
 0x145   : > { %v1325_v49 = vpop.f32.mrf.mxu0  ;;  %1516 = vmatmul.mubr.bf16.gmra.mxu0 %v2643_v43  ;;  %v1641_v59 = vpop.f32.mrf.mxu1 }
 0x146   : > { %v3080_v51 = vadd.f32 %v1614_v13, %v1325_v49 }
 0x147   : > { %v1327_v52 = vpop.f32.mrf.mxu0  ;;  %v1643_v61 = vpop.f32.mrf.mxu1 }
 0x148   : > { %1827 = vst [vmem:[%s2998_s30 + $0x70] sm:$0xff] %v3080_v51 }
 0x149   : > { %v1328_v55 = vpop.f32.mrf.mxu0  ;;  %v1646_v1 = vpop.f32.mrf.mxu1 }
 0x14a   : > { %v3084_v57 = vadd.f32 %v1617_v21, %v1328_v55 }
 0x14b   : > { %v1330_v58 = vpop.f32.mrf.mxu0  ;;  %v1648_v3 = vpop.f32.mrf.mxu1 }
 0x14c   : > { %1828 = vst [vmem:[%s2998_s30 + $0x78] sm:$0xff] %v3084_v57 }
 0x14d   : > { %v1333_v60 = vpop.f32.mrf.mxu0  ;;  %v1649_v7 = vpop.f32.mrf.mxu1 }
 0x14e   : > { %v3088_v63 = vadd.f32 %v1622_v27, %v1333_v60 }
 0x14f   : > { %v1335_v0 = vpop.f32.mrf.mxu0  ;;  %v1651_v9 = vpop.f32.mrf.mxu1 }
 0x150   : > { %1829 = vst [vmem:[%s2998_s30 + $0x80] sm:$0xff] %v3088_v63 }
 0x151   : > { %v1336_v2 = vpop.f32.mrf.mxu0  ;;  %v1654_v13 = vpop.f32.mrf.mxu1 }
 0x152   : > { %v3092_v5 = vadd.f32 %v1625_v35, %v1336_v2 }
 0x153   : > { %v1338_v6 = vpop.f32.mrf.mxu0  ;;  %v1656_v15 = vpop.f32.mrf.mxu1 }
 0x154   : > { %1830 = vst [vmem:[%s2998_s30 + $0x88] sm:$0xff] %v3092_v5 }
 0x155   : > { %v1341_v8 = vpop.f32.mrf.mxu0  ;;  %v1657_v19 = vpop.f32.mrf.mxu1 }
 0x156   : > { %v3096_v10 = vadd.f32 %v1630_v41, %v1341_v8 }
 0x157   : > { %v1343_v12 = vpop.f32.mrf.mxu0  ;;  %v1659_v22 = vpop.f32.mrf.mxu1 }
 0x158   : > { %1831 = vst [vmem:[%s2998_s30 + $0x90] sm:$0xff] %v3096_v10 }
 0x159   : > { %v1344_v14 = vpop.f32.mrf.mxu0  ;;  %v1662_v27 = vpop.f32.mrf.mxu1 }
 0x15a   : > { %v3100_v16 = vadd.f32 %v1633_v47, %v1344_v14 }
 0x15b   : > { %v1346_v18 = vpop.f32.mrf.mxu0  ;;  %v1664_v29 = vpop.f32.mrf.mxu1 }
 0x15c   : > { %1832 = vst [vmem:[%s2998_s30 + $0x98] sm:$0xff] %v3100_v16 }
 0x15d   : > { %v1349_v21 = vpop.f32.mrf.mxu0  ;;  %v1665_v33 = vpop.f32.mrf.mxu1 }
 0x15e   : > { %v3104_v23 = vadd.f32 %v1638_v53, %v1349_v21 }
 0x15f   : > { %v1351_v25 = vpop.f32.mrf.mxu0  ;;  %v1667_v36 = vpop.f32.mrf.mxu1 }
 0x160   : > { %1833 = vst [vmem:[%s2998_s30 + $0xa0] sm:$0xff] %v3104_v23 }
 0x161   : > { %v1352_v28 = vpop.f32.mrf.mxu0  ;;  %v1670_v41 = vpop.f32.mrf.mxu1 }
 0x162   : > { %v3108_v30 = vadd.f32 %v1641_v59, %v1352_v28 }
 0x163   : > { %v1354_v32 = vpop.f32.mrf.mxu0  ;;  %v1672_v43 = vpop.f32.mrf.mxu1 }
 0x164   : > { %1834 = vst [vmem:[%s2998_s30 + $0xa8] sm:$0xff] %v3108_v30 }
 0x165   : > { %v1357_v35 = vpop.f32.mrf.mxu0  ;;  %v1673_v47 = vpop.f32.mrf.mxu1 }
 0x166   : > { %v3112_v37 = vadd.f32 %v1646_v1, %v1357_v35 }
 0x167   : > { %v1359_v39 = vpop.f32.mrf.mxu0  ;;  %v1675_v50 = vpop.f32.mrf.mxu1 }
 0x168   : > { %1835 = vst [vmem:[%s2998_s30 + $0xb0] sm:$0xff] %v3112_v37 }
 0x169   : > { %v1360_v42 = vpop.f32.mrf.mxu0  ;;  %v1678_v55 = vpop.f32.mrf.mxu1 }
 0x16a   : > { %v3116_v44 = vadd.f32 %v1649_v7, %v1360_v42 }
 0x16b   : > { %v1362_v46 = vpop.f32.mrf.mxu0  ;;  %v1680_v58 = vpop.f32.mrf.mxu1 }
 0x16c   : > { %1836 = vst [vmem:[%s2998_s30 + $0xb8] sm:$0xff] %v3116_v44 }
 0x16d   : > { %v1365_v49 = vpop.f32.mrf.mxu0  ;;  %v1681_v61 = vpop.f32.mrf.mxu1 }
 0x16e   : > { %v3120_v52 = vadd.f32 %v1654_v13, %v1365_v49 }
 0x16f   : > { %v1367_v53 = vpop.f32.mrf.mxu0  ;;  %v1683_v1 = vpop.f32.mrf.mxu1 }
 0x170   : > { %1837 = vst [vmem:[%s2998_s30 + $0xc0] sm:$0xff] %v3120_v52 }
 0x171   : > { %v1368_v56 = vpop.f32.mrf.mxu0  ;;  %v1686_v6 = vpop.f32.mrf.mxu1 }
 0x172   : > { %v3124_v59 = vadd.f32 %v1657_v19, %v1368_v56 }
 0x173   : > { %v1370_v60 = vpop.f32.mrf.mxu0  ;;  %v1688_v8 = vpop.f32.mrf.mxu1 }
 0x174   : > { %1838 = vst [vmem:[%s2998_s30 + $0xc8] sm:$0xff] %v3124_v59 }
 0x175   : > { %v1373_v0 = vpop.f32.mrf.mxu0  ;;  %v1689_v13 = vpop.f32.mrf.mxu1 }
 0x176   : > { %v3128_v2 = vadd.f32 %v1662_v27, %v1373_v0 }
 0x177   : > { %v1375_v3 = vpop.f32.mrf.mxu0  ;;  %v1691_v15 = vpop.f32.mrf.mxu1 }
 0x178   : > { %1839 = vst [vmem:[%s2998_s30 + $0xd0] sm:$0xff] %v3128_v2 }
 0x179   : > { %v1376_v7 = vpop.f32.mrf.mxu0  ;;  %v1694_v21 = vpop.f32.mrf.mxu1 }
 0x17a   : > { %v3132_v9 = vadd.f32 %v1665_v33, %v1376_v7 }
 0x17b   : > { %v1378_v12 = vpop.f32.mrf.mxu0  ;;  %v1696_v25 = vpop.f32.mrf.mxu1 }
 0x17c   : > { %1840 = vst [vmem:[%s2998_s30 + $0xd8] sm:$0xff] %v3132_v9 }
 0x17d   : > { %v1381_v14 = vpop.f32.mrf.mxu0  ;;  %v1697_v29 = vpop.f32.mrf.mxu1 }
 0x17e   : > { %v3136_v18 = vadd.f32 %v1670_v41, %v1381_v14 }
 0x17f   : > { %v1383_v19 = vpop.f32.mrf.mxu0  ;;  %v1699_v33 = vpop.f32.mrf.mxu1 }
 0x180   : > { %1841 = vst [vmem:[%s2998_s30 + $0xe0] sm:$0xff] %v3136_v18 }
 0x181   : > { %v1384_v22 = vpop.f32.mrf.mxu0  ;;  %v1702_v39 = vpop.f32.mrf.mxu1 }
 0x182   : > { %v3140_v27 = vadd.f32 %v1673_v47, %v1384_v22 }
 0x183   : > { %v1386_v28 = vpop.f32.mrf.mxu0  ;;  %v1704_v42 = vpop.f32.mrf.mxu1 }
 0x184   : > { %1842 = vst [vmem:[%s2998_s30 + $0xe8] sm:$0xff] %v3140_v27 }
 0x185   : > { %v1389_v32 = vpop.f32.mrf.mxu0  ;;  %v1705_v47 = vpop.f32.mrf.mxu1 }
 0x186   : > { %v3144_v35 = vadd.f32 %v1678_v55, %v1389_v32 }
 0x187   : > { %v1391_v36 = vpop.f32.mrf.mxu0  ;;  %v1707_v50 = vpop.f32.mrf.mxu1 }
 0x188   : > { %1843 = vst [vmem:[%s2998_s30 + $0xf0] sm:$0xff] %v3144_v35 }
 0x189   : > { %v1392_v41 = vpop.f32.mrf.mxu0  ;;  %v1710_v56 = vpop.f32.mrf.mxu1 }
 0x18a   : > { %v3148_v43 = vadd.f32 %v1681_v61, %v1392_v41 }
 0x18b   : > { %v1394_v46 = vpop.f32.mrf.mxu0  ;;  %v1712_v60 = vpop.f32.mrf.mxu1 }
 0x18c   : > { %1844 = vst [vmem:[%s2998_s30 + $0xf8] sm:$0xff] %v3148_v43 }
 0x18d   : > { %v1397_v49 = vpop.f32.mrf.mxu0  ;;  %v1713_v1 = vpop.f32.mrf.mxu1 }
 0x18e   : > { %v3152_v53 = vadd.f32 %v1686_v6, %v1397_v49 }
 0x18f   : > { %v1399_v55 = vpop.f32.mrf.mxu0  ;;  %v1715_v7 = vpop.f32.mrf.mxu1 }
 0x190   : > { %1845 = vst [vmem:[%s2998_s30 + $0x100] sm:$0xff] %v3152_v53 }
 0x191   : > { %v1400_v58 = vpop.f32.mrf.mxu0  ;;  %v1718_v12 = vpop.f32.mrf.mxu1 }
 0x192   : > { %v3156_v0 = vadd.f32 %v1689_v13, %v1400_v58 }
 0x193   : > { %v1402_v61 = vpop.f32.mrf.mxu0  ;;  %v1720_v15 = vpop.f32.mrf.mxu1 }
 0x194   : > { %1846 = vst [vmem:[%s2998_s30 + $0x108] sm:$0xff] %v3156_v0 }
 0x195   : > { %v1405_v3 = vpop.f32.mrf.mxu0  ;;  %v1721_v22 = vpop.f32.mrf.mxu1 }
 0x196   : > { %v3160_v8 = vadd.f32 %v1694_v21, %v1405_v3 }
 0x197   : > { %v1407_v6 = vpop.f32.mrf.mxu0  ;;  %v1723_v28 = vpop.f32.mrf.mxu1 }
 0x198   : > { %1847 = vst [vmem:[%s2998_s30 + $0x110] sm:$0xff] %v3160_v8 }
 0x199   : > { %v1408_v14 = vpop.f32.mrf.mxu0  ;;  %v1726_v33 = vpop.f32.mrf.mxu1 }
 0x19a   : > { %v3164_v19 = vadd.f32 %v1697_v29, %v1408_v14 }
 0x19b   : > { %v1410_v13 = vpop.f32.mrf.mxu0  ;;  %v1728_v41 = vpop.f32.mrf.mxu1 }
 0x19c   : > { %1848 = vst [vmem:[%s2998_s30 + $0x118] sm:$0xff] %v3164_v19 }
 0x19d   : > { %v1413_v25 = vpop.f32.mrf.mxu0  ;;  %v1729_v46 = vpop.f32.mrf.mxu1 }
 0x19e   : > { %v3168_v32 = vadd.f32 %v1702_v39, %v1413_v25 }
 0x19f   : > { %v1415_v21 = vpop.f32.mrf.mxu0  ;;  %v1731_v50 = vpop.f32.mrf.mxu1 }
 0x1a0   : > { %1849 = vst [vmem:[%s2998_s30 + $0x120] sm:$0xff] %v3168_v32 }
 0x1a1   : > { %v1416_v36 = vpop.f32.mrf.mxu0  ;;  %v1734_v58 = vpop.f32.mrf.mxu1 }
 0x1a2   : > { %v3172_v42 = vadd.f32 %v1705_v47, %v1416_v36 }
 0x1a3   : > { %v1418_v29 = vpop.f32.mrf.mxu0  ;;  %v1736_v61 = vpop.f32.mrf.mxu1 }
 0x1a4   : > { %1850 = vst [vmem:[%s2998_s30 + $0x128] sm:$0xff] %v3172_v42 }
 0x1a5   : > { %v1421_v49 = vpop.f32.mrf.mxu0  ;;  %v1737_v7 = vpop.f32.mrf.mxu1 }
 0x1a6   : > { %v3176_v55 = vadd.f32 %v1710_v56, %v1421_v49 }
 0x1a7   : > { %v1423_v39 = vpop.f32.mrf.mxu0  ;;  %v1739_v14 = vpop.f32.mrf.mxu1 }
 0x1a8   : > { %1851 = vst [vmem:[%s2998_s30 + $0x130] sm:$0xff] %v3176_v55 }
 0x1a9   : > { %v1424_v60 = vpop.f32.mrf.mxu0  ;;  %v1742_v13 = vpop.f32.mrf.mxu1 }
 0x1aa   : > { %v3180_v3 = vadd.f32 %v1713_v1, %v1424_v60 }
 0x1ab   : > { %v1426_v47 = vpop.f32.mrf.mxu0  ;;  %v1744_v28 = vpop.f32.mrf.mxu1 }
 0x1ac   : > { %1852 = vst [vmem:[%s2998_s30 + $0x138] sm:$0xff] %v3180_v3 }
 0x1ad   : > { %v1429_v6 = vpop.f32.mrf.mxu0  ;;  %v1745_v36 = vpop.f32.mrf.mxu1 }
 0x1ae   : > { %v3184_v15 = vadd.f32 %v1718_v12, %v1429_v6 }
 0x1af   : > { %v1431_v56 = vpop.f32.mrf.mxu0  ;;  %v1747_v29 = vpop.f32.mrf.mxu1 }
 0x1b0   : > { %1853 = vst [vmem:[%s2998_s30 + $0x140] sm:$0xff] %v3184_v15 }
 0x1b1   : > { %v1432_v25 = vpop.f32.mrf.mxu0  ;;  %v1750_v50 = vpop.f32.mrf.mxu1 }
 0x1b2   : > { %v3188_v21 = vadd.f32 %v1721_v22, %v1432_v25 }
 0x1b3   : > { %v1434_v1 = vpop.f32.mrf.mxu0  ;;  %v1752_v60 = vpop.f32.mrf.mxu1 }
 0x1b4   : > { %1854 = vst [vmem:[%s2998_s30 + $0x148] sm:$0xff] %v3188_v21 }
 0x1b5   : > { %v1437_v41 = vpop.f32.mrf.mxu0  ;;  %v1753_v47 = vpop.f32.mrf.mxu1 }
 0x1b6   : > { %v3192_v49 = vadd.f32 %v1726_v33, %v1437_v41 }
 0x1b7   : > { %v1439_v12 = vpop.f32.mrf.mxu0  ;;  %v1755_v14 = vpop.f32.mrf.mxu1 }
 0x1b8   : > { %1855 = vst [vmem:[%s2998_s30 + $0x150] sm:$0xff] %v3192_v49 }
 0x1b9   : > { %v1440_v39 = vpop.f32.mrf.mxu0  ;;  %v1758_v25 = vpop.f32.mrf.mxu1 }
 0x1ba   : > { %v3196_v61 = vadd.f32 %v1729_v46, %v1440_v39 }
 0x1bb   : > { %v1442_v22 = vpop.f32.mrf.mxu0  ;;  %v1760_v1 = vpop.f32.mrf.mxu1 }
 0x1bc   : > { %1856 = vst [vmem:[%s2998_s30 + $0x158] sm:$0xff] %v3196_v61 }
 0x1bd   : > { %v1445_v6 = vpop.f32.mrf.mxu0  ;;  %v1761_v29 = vpop.f32.mrf.mxu1 }
 0x1be   : > { %v3200_v56 = vadd.f32 %v1734_v58, %v1445_v6 }
 0x1bf   : > { %v1447_v33 = vpop.f32.mrf.mxu0  ;;  %v1763_v39 = vpop.f32.mrf.mxu1 }
 0x1c0   : > { %1857 = vst [vmem:[%s2998_s30 + $0x160] sm:$0xff] %v3200_v56 }
 0x1c1   : > { %v1448_v28 = vpop.f32.mrf.mxu0  ;;  %v1766_v22 = vpop.f32.mrf.mxu1 }
 0x1c2   : > { %v3204_v41 = vadd.f32 %v1737_v7, %v1448_v28 }
 0x1c3   : > { %v1450_v46 = vpop.f32.mrf.mxu0  ;;  %v1768_v14 = vpop.f32.mrf.mxu1 }
 0x1c4   : > { %1858 = vst [vmem:[%s2998_s30 + $0x168] sm:$0xff] %v3204_v41 }
 0x1c5   : > { %v1453_v12 = vpop.f32.mrf.mxu0  ;;  %v1769_v28 = vpop.f32.mrf.mxu1 }
 0x1c6   : > { %v3208_v60 = vadd.f32 %v1742_v13, %v1453_v12 }
 0x1c7   : > { %v1455_v58 = vpop.f32.mrf.mxu0  ;;  %v1771_v46 = vpop.f32.mrf.mxu1 }
 0x1c8   : > { %3529 = vst [vmem:[#allocation10_spill] sm:$0xff] %v3208_v60  ;;  %1859 = vst [vmem:[%s2998_s30 + $0x170] sm:$0xff] %v3208_v60 }
 0x1c9   : > { %v1456_v6 = vpop.f32.mrf.mxu0  ;;  %v1774_v12 = vpop.f32.mrf.mxu1 }
 0x1ca   : > { %v3212_v33 = vadd.f32 %v1745_v36, %v1456_v6 }
 0x1cb   : > { %v1458_v7 = vpop.f32.mrf.mxu0  ;;  %v1776_v60 = vpop.f32.mrf.mxu1 }
 0x1cc   : > { %3530 = vst [vmem:[#allocation11_spill] sm:$0xff] %v3212_v33  ;;  %1860 = vst [vmem:[%s2998_s30 + $0x178] sm:$0xff] %v3212_v33 }
 0x1cd   : > { %v1461_v1 = vpop.f32.mrf.mxu0  ;;  %v1777_v6 = vpop.f32.mrf.mxu1 }
 0x1ce   : > { %v3216_v39 = vadd.f32 %v1750_v50, %v1461_v1 }
 0x1cf   : > { %v1463_v13 = vpop.f32.mrf.mxu0  ;;  %v1779_v33 = vpop.f32.mrf.mxu1 }
 0x1d0   : > { %3531 = vst [vmem:[#allocation12_spill] sm:$0xff] %v3216_v39  ;;  %1861 = vst [vmem:[%s2998_s30 + $0x180] sm:$0xff] %v3216_v39 }
 0x1d1   : > { %v1464_v58 = vpop.f32.mrf.mxu0  ;;  %v1782_v1 = vpop.f32.mrf.mxu1 }
 0x1d2   : > { %v3220_v14 = vadd.f32 %v1753_v47, %v1464_v58 }
 0x1d3   : > { %v1466_v36 = vpop.f32.mrf.mxu0  ;;  %v1784_v39 = vpop.f32.mrf.mxu1 }
 0x1d4   : > { %3532 = vst [vmem:[#allocation13_spill] sm:$0xff] %v3220_v14  ;;  %1862 = vst [vmem:[%s2998_s30 + $0x188] sm:$0xff] %v3220_v14 }
 0x1d5   : > { %v1469_v7 = vpop.f32.mrf.mxu0  ;;  %v1785_v58 = vpop.f32.mrf.mxu1 }
 0x1d6   : > { %v3224_v46 = vadd.f32 %v1758_v25, %v1469_v7 }
 0x1d7   : > { %v1471_v50 = vpop.f32.mrf.mxu0  ;;  %v1787_v14 = vpop.f32.mrf.mxu1 }
 0x1d8   : > { %3533 = vst [vmem:[#allocation14_spill] sm:$0xff] %v3224_v46  ;;  %1863 = vst [vmem:[%s2998_s30 + $0x190] sm:$0xff] %v3224_v46 }
 0x1d9   : > { %v1472_v13 = vpop.f32.mrf.mxu0  ;;  %v1790_v7 = vpop.f32.mrf.mxu1 }
 0x1da   : > { %v3228_v60 = vadd.f32 %v1761_v29, %v1472_v13 }
 0x1db   : > { %v1474_v47 = vpop.f32.mrf.mxu0  ;;  %v1792_v46 = vpop.f32.mrf.mxu1 }
 0x1dc   : > { %3534 = vst [vmem:[#allocation15_spill] sm:$0xff] %v3228_v60  ;;  %1864 = vst [vmem:[%s2998_s30 + $0x198] sm:$0xff] %v3228_v60 }
 0x1dd   : > { %v1477_v36 = vpop.f32.mrf.mxu0  ;;  %v1793_v13 = vpop.f32.mrf.mxu1 }
 0x1de   : > { %v3232_v33 = vadd.f32 %v1766_v22, %v1477_v36 }
 0x1df   : > { %v1479_v25 = vpop.f32.mrf.mxu0  ;;  %v1795_v60 = vpop.f32.mrf.mxu1 }
 0x1e0   : > { %3535 = vst [vmem:[#allocation16_spill] sm:$0xff] %v3232_v33  ;;  %1865 = vst [vmem:[%s2998_s30 + $0x1a0] sm:$0xff] %v3232_v33 }
 0x1e1   : > { %v1480_v50 = vpop.f32.mrf.mxu0  ;;  %v1798_v36 = vpop.f32.mrf.mxu1 }
 0x1e2   : > { %v3236_v39 = vadd.f32 %v1769_v28, %v1480_v50 }
 0x1e3   : > { %v1482_v29 = vpop.f32.mrf.mxu0  ;;  %v1800_v33 = vpop.f32.mrf.mxu1 }
 0x1e4   : > { %3536 = vst [vmem:[#allocation17_spill] sm:$0xff] %v3236_v39  ;;  %1866 = vst [vmem:[%s2998_s30 + $0x1a8] sm:$0xff] %v3236_v39 }
 0x1e5   : > { %v1485_v47 = vpop.f32.mrf.mxu0  ;;  %v1801_v50 = vpop.f32.mrf.mxu1 }
 0x1e6   : > { %v3240_v14 = vadd.f32 %v1774_v12, %v1485_v47 }
 0x1e7   : > { %v1487_v22 = vpop.f32.mrf.mxu0  ;;  %v1803_v39 = vpop.f32.mrf.mxu1 }
 0x1e8   : > { %3537 = vst [vmem:[#allocation18_spill] sm:$0xff] %v3240_v14  ;;  %1867 = vst [vmem:[%s2998_s30 + $0x1b0] sm:$0xff] %v3240_v14 }
 0x1e9   : > { %v1488_v25 = vpop.f32.mrf.mxu0  ;;  %v1806_v47 = vpop.f32.mrf.mxu1 }
 0x1ea   : > { %v3244_v46 = vadd.f32 %v1777_v6, %v1488_v25 }
 0x1eb   : > { %v1490_v28 = vpop.f32.mrf.mxu0  ;;  %v1808_v14 = vpop.f32.mrf.mxu1 }
 0x1ec   : > { %3538 = vst [vmem:[#allocation19_spill] sm:$0xff] %v3244_v46  ;;  %1868 = vst [vmem:[%s2998_s30 + $0x1b8] sm:$0xff] %v3244_v46 }
 0x1ed   : > { %v1493_v29 = vpop.f32.mrf.mxu0  ;;  %v1809_v25 = vpop.f32.mrf.mxu1 }
 0x1ee   : > { %v3248_v60 = vadd.f32 %v1782_v1, %v1493_v29 }
 0x1ef   : > { %v1495_v12 = vpop.f32.mrf.mxu0  ;;  %v1811_v46 = vpop.f32.mrf.mxu1 }
 0x1f0   : > { %1869 = vst [vmem:[%s2998_s30 + $0x1c0] sm:$0xff] %v3248_v60 }
 0x1f1   : > { %v1496_v22 = vpop.f32.mrf.mxu0 }
 0x1f2   : > { %v3252_v33 = vadd.f32 %v1785_v58, %v1496_v22 }
 0x1f3   : > { %v1498_v6 = vpop.f32.mrf.mxu0 }
 0x1f4   : > { %1870 = vst [vmem:[%s2998_s30 + $0x1c8] sm:$0xff] %v3252_v33 }
 0x1f5   : > { %v1501_v28 = vpop.f32.mrf.mxu0 }
 0x1f6   : > { %v3256_v39 = vadd.f32 %v1790_v7, %v1501_v28 }
 0x1f7   : > { %v1503_v1 = vpop.f32.mrf.mxu0 }
 0x1f8   : > { %3539 = vst [vmem:[#allocation20_spill] sm:$0xff] %v3256_v39  ;;  %1871 = vst [vmem:[%s2998_s30 + $0x1d0] sm:$0xff] %v3256_v39 }
 0x1f9   : > { %v1504_v29 = vpop.f32.mrf.mxu0 }
 0x1fa   : > { %v3260_v12 = vadd.f32 %v1793_v13, %v1504_v29 }
 0x1fb   : > { %v1506_v14 = vpop.f32.mrf.mxu0 }
 0x1fc   : > { %1872 = vst [vmem:[%s2998_s30 + $0x1d8] sm:$0xff] %v3260_v12 }
 0x1fd   : > { %v1509_v58 = vpop.f32.mrf.mxu0 }
 0x1fe   : > { %v3264_v22 = vadd.f32 %v1798_v36, %v1509_v58 }
 0x1ff   : > { %v1511_v6 = vpop.f32.mrf.mxu0 }
 0x200   : > { %1873 = vst [vmem:[%s2998_s30 + $0x1e0] sm:$0xff] %v3264_v22 }
 0x201   : > { %v1512_v46 = vpop.f32.mrf.mxu0 }
 0x202   : > { %v3268_v7 = vadd.f32 %v1801_v50, %v1512_v46 }
 0x203   : > { %v1514_v28 = vpop.f32.mrf.mxu0 }
 0x204   : > { %1874 = vst [vmem:[%s2998_s30 + $0x1e8] sm:$0xff] %v3268_v7 }
 0x205   : > { %v1517_v1 = vpop.f32.mrf.mxu0 }
 0x206   : > { %v3272_v39 = vadd.f32 %v1806_v47, %v1517_v1 }
 0x207   : > { %v1519_v13 = vpop.f32.mrf.mxu0 }
 0x208   : > { %1875 = vst [vmem:[%s2998_s30 + $0x1f0] sm:$0xff] %v3272_v39  ;;  %1880 = sbr.rel (%p2396_p4) target bundleno = 527 (0x20f), region = 32 }
 0x209   : > { %v1520_v29 = vpop.f32.mrf.mxu0 }
 0x20a   : > { %v3276_v14 = vadd.f32 %v1809_v25, %v1520_v29 }
 0x20b   : > { %v1522_v36 = vpop.f32.mrf.mxu0 }
 0x20c   : > { %3540 = vst [vmem:[#allocation21_spill] sm:$0xff] %v3276_v14  ;;  %1876 = vst [vmem:[%s2998_s30 + $0x1f8] sm:$0xff] %v3276_v14 }
 0x20d   : > { %v2711_v50 = vmov 0.0  }
 0x20e   : > { %1881 = vst [vmem:[#allocation2] sm:$0x1] %v2711_v50  ;;  %1882 = vst [vmem:[#allocation3] sm:$0x1] %v2711_v50 }
 0x20f PF: > { %v1884_v47 = vadd.f32 %v3006_v26, %v3000_v20  ;;  %v1956_v29 = vmul.f32 %v3000_v20, %v3000_v20  ;;  %v1957_v36 = vmul.f32 %v3006_v26, %v3006_v26  ;;  %v1961_v26 = vmul.f32 %v3032_v54, %v3032_v54  ;;  %p2397_p5 = scmp.ne.s32.totalorder %s2745_s16, 3 }
 0x211   : > { %v1885_v58 = vadd.f32 %v1884_v47, %v3013_v34  ;;  %v1958_v47 = vmul.f32 %v3013_v34, %v3013_v34 }
 0x213   : > { %v1886_v6 = vadd.f32 %v1885_v58, %v3019_v40 }
 0x215   : > { %v1887_v25 = vadd.f32 %v1886_v6, %v3026_v48  ;;  %v1959_v6 = vmul.f32 %v3019_v40, %v3019_v40 }
 0x217   : > { %v1888_v46 = vadd.f32 %v1887_v25, %v3032_v54  ;;  %v2020_v25 = vadd.f32 %v1957_v36, %v1956_v29  ;;  %v1963_v29 = vmul.f32 %v3045_v4, %v3045_v4 }
 0x219   : > { %v1889_v28 = vadd.f32 %v1888_v46, %v3039_v62  ;;  %v2021_v20 = vadd.f32 %v2020_v25, %v1958_v47  ;;  %v1964_v47 = vmul.f32 %v3051_v11, %v3051_v11 }
 0x21b   : > { %v1890_v1 = vadd.f32 %v1889_v28, %v3045_v4  ;;  %v1960_v28 = vmul.f32 %v3026_v48, %v3026_v48 }
 0x21d   : > { %v1891_v13 = vadd.f32 %v1890_v1, %v3051_v11 }
 0x21f   : > { %v1892_v50 = vadd.f32 %v1891_v13, %v3056_v17  ;;  %v2022_v13 = vadd.f32 %v2021_v20, %v1959_v6  ;;  %v1965_v6 = vmul.f32 %v3056_v17, %v3056_v17 }
 0x221   : > { %v1893_v58 = vadd.f32 %v1892_v50, %v3061_v24  ;;  %v1962_v50 = vmul.f32 %v3039_v62, %v3039_v62  ;;  %v2023_v14 = vadd.f32 %v2022_v13, %v1960_v28  ;;  %v1969_v13 = vmul.f32 %v3076_v45, %v3076_v45 }
 0x223   : > { %v1894_v46 = vadd.f32 %v1893_v58, %v3066_v31  ;;  %v2024_v36 = vadd.f32 %v2023_v14, %v1961_v26  ;;  %v1967_v14 = vmul.f32 %v3066_v31, %v3066_v31 }
 0x225   : > { %v1895_v1 = vadd.f32 %v1894_v46, %v3071_v38  ;;  %v2025_v58 = vadd.f32 %v2024_v36, %v1962_v50  ;;  %v1966_v46 = vmul.f32 %v3061_v24, %v3061_v24  ;;  %v1970_v50 = vmul.f32 %v3080_v51, %v3080_v51 }
 0x227   : > { %v1896_v34 = vadd.f32 %v1895_v1, %v3076_v45  ;;  %v2026_v25 = vadd.f32 %v2025_v58, %v1963_v29  ;;  %v1968_v1 = vmul.f32 %v3071_v38, %v3071_v38  ;;  %v1971_v29 = vmul.f32 %v3084_v57, %v3084_v57 }
 0x228   : > { %v1973_v58 = vmul.f32 %v3092_v5, %v3092_v5 }
 0x229   : > { %v1897_v40 = vadd.f32 %v1896_v34, %v3080_v51  ;;  %v2027_v28 = vadd.f32 %v2026_v25, %v1964_v47 }
 0x22b   : > { %v1898_v48 = vadd.f32 %v1897_v40, %v3084_v57  ;;  %v2028_v20 = vadd.f32 %v2027_v28, %v1965_v6  ;;  %v1974_v6 = vmul.f32 %v3096_v10, %v3096_v10  ;;  %v1976_v28 = vmul.f32 %v3104_v23, %v3104_v23 }
 0x22d   : > { %v1899_v54 = vadd.f32 %v1898_v48, %v3088_v63  ;;  %v2029_v26 = vadd.f32 %v2028_v20, %v1966_v46  ;;  %v1972_v48 = vmul.f32 %v3088_v63, %v3088_v63 }
 0x22f   : > { %v1900_v62 = vadd.f32 %v1899_v54, %v3092_v5  ;;  %v2030_v34 = vadd.f32 %v2029_v26, %v1967_v14  ;;  %v1977_v14 = vmul.f32 %v3108_v30, %v3108_v30  ;;  %v1979_v26 = vmul.f32 %v3116_v44, %v3116_v44 }
 0x231   : > { %v1901_v4 = vadd.f32 %v1900_v62, %v3096_v10  ;;  %v2031_v40 = vadd.f32 %v2030_v34, %v1968_v1  ;;  %v1975_v62 = vmul.f32 %v3100_v16, %v3100_v16 }
 0x233   : > { %v1902_v11 = vadd.f32 %v1901_v4, %v3100_v16  ;;  %v2032_v36 = vadd.f32 %v2031_v40, %v1969_v13  ;;  %v1980_v13 = vmul.f32 %v3120_v52, %v3120_v52  ;;  %v1982_v40 = vmul.f32 %v3128_v2, %v3128_v2 }
 0x235   : > { %v1903_v17 = vadd.f32 %v1902_v11, %v3104_v23  ;;  %v2033_v47 = vadd.f32 %v2032_v36, %v1970_v50  ;;  %v1978_v11 = vmul.f32 %v3112_v37, %v3112_v37 }
 0x237   : > { %v1904_v24 = vadd.f32 %v1903_v17, %v3108_v30  ;;  %v2034_v54 = vadd.f32 %v2033_v47, %v1971_v29  ;;  %v1983_v29 = vmul.f32 %v3132_v9, %v3132_v9  ;;  %v1985_v47 = vmul.f32 %v3140_v27, %v3140_v27 }
 0x239   : > { %v1905_v31 = vadd.f32 %v1904_v24, %v3112_v37  ;;  %v2035_v25 = vadd.f32 %v2034_v54, %v1972_v48  ;;  %v1981_v24 = vmul.f32 %v3124_v59, %v3124_v59 }
 0x23b   : > { %v1906_v38 = vadd.f32 %v1905_v31, %v3116_v44  ;;  %v2036_v46 = vadd.f32 %v2035_v25, %v1973_v58  ;;  %v1986_v58 = vmul.f32 %v3144_v35, %v3144_v35  ;;  %v1988_v25 = vmul.f32 %v3152_v53, %v3152_v53 }
 0x23d   : > { %v1907_v45 = vadd.f32 %v1906_v38, %v3120_v52  ;;  %v2037_v4 = vadd.f32 %v2036_v46, %v1974_v6  ;;  %v1984_v38 = vmul.f32 %v3136_v18, %v3136_v18 }
 0x23f   : > { %v1908_v51 = vadd.f32 %v1907_v45, %v3124_v59  ;;  %v2038_v20 = vadd.f32 %v2037_v4, %v1975_v62  ;;  %v1989_v62 = vmul.f32 %v3156_v0, %v3156_v0  ;;  %v1991_v4 = vmul.f32 %v3164_v19, %v3164_v19 }
 0x241   : > { %v1909_v57 = vadd.f32 %v1908_v51, %v3128_v2  ;;  %v2039_v1 = vadd.f32 %v2038_v20, %v1976_v28  ;;  %v1987_v51 = vmul.f32 %v3148_v43, %v3148_v43 }
 0x243   : > { %v1910_v63 = vadd.f32 %v1909_v57, %v3132_v9  ;;  %v2040_v17 = vadd.f32 %v2039_v1, %v1977_v14  ;;  %v1992_v14 = vmul.f32 %v3168_v32, %v3168_v32  ;;  %v1994_v1 = vmul.f32 %v3176_v55, %v3176_v55 }
 0x245   : > { %v1911_v5 = vadd.f32 %v1910_v63, %v3136_v18  ;;  %v2041_v34 = vadd.f32 %v2040_v17, %v1978_v11  ;;  %v1990_v63 = vmul.f32 %v3160_v8, %v3160_v8  ;;  %v1995_v17 = vmul.f32 %v3180_v3, %v3180_v3 }
 0x247   : > { %v1912_v10 = vadd.f32 %v1911_v5, %v3140_v27  ;;  %v2042_v50 = vadd.f32 %v2041_v34, %v1979_v26  ;;  %v1996_v34 = vmul.f32 %v3184_v15, %v3184_v15 }
 0x249   : > { %v1913_v16 = vadd.f32 %v1912_v10, %v3144_v35  ;;  %v2043_v31 = vadd.f32 %v2042_v50, %v1980_v13  ;;  %v1993_v10 = vmul.f32 %v3172_v42, %v3172_v42  ;;  %v1997_v50 = vmul.f32 %v3188_v21, %v3188_v21 }
 0x24b   : > { %v1914_v23 = vadd.f32 %v1913_v16, %v3148_v43  ;;  %v2044_v36 = vadd.f32 %v2043_v31, %v1981_v24  ;;  %v1998_v31 = vmul.f32 %v3192_v49, %v3192_v49 }
 0x24d   : > { %v1915_v30 = vadd.f32 %v1914_v23, %v3152_v53  ;;  %v2045_v48 = vadd.f32 %v2044_v36, %v1982_v40  ;;  %v1999_v36 = vmul.f32 %v3196_v61, %v3196_v61 }
 0x24f   : > { %v1916_v37 = vadd.f32 %v1915_v30, %v3156_v0  ;;  %v2046_v45 = vadd.f32 %v2045_v48, %v1983_v29  ;;  %v2000_v48 = vmul.f32 %v3200_v56, %v3200_v56 }
 0x251   : > { %v1917_v44 = vadd.f32 %v1916_v37, %v3160_v8  ;;  %v2047_v54 = vadd.f32 %v2046_v45, %v1984_v38  ;;  %v2001_v45 = vmul.f32 %v3204_v41, %v3204_v41 }
 0x253   : > { %v1918_v52 = vadd.f32 %v1917_v44, %v3164_v19  ;;  %v2048_v6 = vadd.f32 %v2047_v54, %v1985_v47  ;;  %v3541_v19 = vld [vmem:[#allocation10_spill] sm:$0xff] }
 0x254   : > { %v2002_v54 = vmul.f32 %v3541_v19, %v3541_v19 }
 0x255   : > { %v1919_v59 = vadd.f32 %v1918_v52, %v3168_v32  ;;  %v2049_v57 = vadd.f32 %v2048_v6, %v1986_v58  ;;  %v3542_v32 = vld [vmem:[#allocation11_spill] sm:$0xff] }
 0x256   : > { %v2003_v6 = vmul.f32 %v3542_v32, %v3542_v32 }
 0x257   : > { %v1920_v2 = vadd.f32 %v1919_v59, %v3172_v42  ;;  %v2050_v46 = vadd.f32 %v2049_v57, %v1987_v51  ;;  %v3543_v42 = vld [vmem:[#allocation12_spill] sm:$0xff] }
 0x258   : > { %v2004_v57 = vmul.f32 %v3543_v42, %v3543_v42 }
 0x259   : > { %v1921_v9 = vadd.f32 %v1920_v2, %v3176_v55  ;;  %v2051_v28 = vadd.f32 %v2050_v46, %v1988_v25  ;;  %v3544_v55 = vld [vmem:[#allocation13_spill] sm:$0xff] }
 0x25b   : > { %v1922_v18 = vadd.f32 %v1921_v9, %v3180_v3  ;;  %v2052_v5 = vadd.f32 %v2051_v28, %v1989_v62  ;;  %v3545_v3 = vld [vmem:[#allocation14_spill] sm:$0xff]  ;;  %v2005_v62 = vmul.f32 %v3544_v55, %v3544_v55 }
 0x25d   : > { %v1923_v27 = vadd.f32 %v1922_v18, %v3184_v15  ;;  %v2053_v20 = vadd.f32 %v2052_v5, %v1990_v63  ;;  %v3546_v15 = vld [vmem:[#allocation15_spill] sm:$0xff]  ;;  %v2006_v63 = vmul.f32 %v3545_v3, %v3545_v3 }
 0x25e   : > { %v2007_v5 = vmul.f32 %v3546_v15, %v3546_v15 }
 0x25f   : > { %v1924_v35 = vadd.f32 %v1923_v27, %v3188_v21  ;;  %v2054_v11 = vadd.f32 %v2053_v20, %v1991_v4  ;;  %v3547_v21 = vld [vmem:[#allocation16_spill] sm:$0xff] }
 0x260   : > { %v2008_v20 = vmul.f32 %v3547_v21, %v3547_v21 }
 0x261   : > { %v1925_v43 = vadd.f32 %v1924_v35, %v3192_v49  ;;  %v2055_v16 = vadd.f32 %v2054_v11, %v1992_v14  ;;  %v3548_v49 = vld [vmem:[#allocation17_spill] sm:$0xff] }
 0x262   : > { %v2009_v11 = vmul.f32 %v3548_v49, %v3548_v49 }
 0x263   : > { %v1926_v53 = vadd.f32 %v1925_v43, %v3196_v61  ;;  %v2056_v23 = vadd.f32 %v2055_v16, %v1993_v10  ;;  %v3549_v61 = vld [vmem:[#allocation18_spill] sm:$0xff]  ;;  %v3551_v43 = vld [vmem:[#allocation20_spill] sm:$0xff] }
 0x264   : > { %v2010_v16 = vmul.f32 %v3549_v61, %v3549_v61 }
 0x265   : > { %v1927_v0 = vadd.f32 %v1926_v53, %v3200_v56  ;;  %v2057_v30 = vadd.f32 %v2056_v23, %v1994_v1  ;;  %v3550_v56 = vld [vmem:[#allocation19_spill] sm:$0xff] }
 0x267   : > { %v1928_v8 = vadd.f32 %v1927_v0, %v3204_v41  ;;  %v2058_v37 = vadd.f32 %v2057_v30, %v1995_v17  ;;  %v2011_v17 = vmul.f32 %v3550_v56, %v3550_v56 }
 0x269   : > { %v1929_v26 = vadd.f32 %v1928_v8, %v3541_v19  ;;  %v2059_v44 = vadd.f32 %v2058_v37, %v1996_v34  ;;  %v2012_v34 = vmul.f32 %v3248_v60, %v3248_v60 }
 0x26b   : > { %v1930_v13 = vadd.f32 %v1929_v26, %v3542_v32  ;;  %v2060_v52 = vadd.f32 %v2059_v44, %v1997_v50  ;;  %v3552_v32 = vld [vmem:[#allocation21_spill] sm:$0xff]  ;;  %v2015_v44 = vmul.f32 %v3260_v12, %v3260_v12 }
 0x26d   : > { %v1931_v24 = vadd.f32 %v1930_v13, %v3543_v42  ;;  %v2061_v59 = vadd.f32 %v2060_v52, %v1998_v31 }
 0x26f   : > { %v1932_v40 = vadd.f32 %v1931_v24, %v3544_v55  ;;  %v2062_v2 = vadd.f32 %v2061_v59, %v1999_v36  ;;  %v2013_v24 = vmul.f32 %v3252_v33, %v3252_v33  ;;  %v2014_v55 = vmul.f32 %v3551_v43, %v3551_v43 }
 0x270   : > { %v2018_v59 = vmul.f32 %v3272_v39, %v3272_v39 }
 0x271   : > { %v1933_v29 = vadd.f32 %v1932_v40, %v3545_v3  ;;  %v2063_v9 = vadd.f32 %v2062_v2, %v2000_v48 }
 0x273   : > { %v1934_v38 = vadd.f32 %v1933_v29, %v3546_v15  ;;  %v2064_v18 = vadd.f32 %v2063_v9, %v2001_v45 }
 0x275   : > { %v1935_v47 = vadd.f32 %v1934_v38, %v3547_v21  ;;  %v2065_v27 = vadd.f32 %v2064_v18, %v2002_v54  ;;  %v1883_v38 = vld [vmem:[#allocation2] sm:$0x1] }
 0x277   : > { %v1936_v58 = vadd.f32 %v1935_v47, %v3548_v49  ;;  %v2066_v46 = vadd.f32 %v2065_v27, %v2003_v6 }
 0x279   : > { %v1937_v51 = vadd.f32 %v1936_v58, %v3549_v61  ;;  %v2067_v28 = vadd.f32 %v2066_v46, %v2004_v57  ;;  %v1955_v61 = vld [vmem:[#allocation3] sm:$0x1] }
 0x27b   : > { %v1938_v25 = vadd.f32 %v1937_v51, %v3550_v56  ;;  %v2068_v53 = vadd.f32 %v2067_v28, %v2005_v62 }
 0x27d   : > { %v1939_v41 = vadd.f32 %v1938_v25, %v3248_v60  ;;  %v2069_v0 = vadd.f32 %v2068_v53, %v2006_v63  ;;  %v2016_v60 = vmul.f32 %v3264_v22, %v3264_v22 }
 0x27f   : > { %v1940_v35 = vadd.f32 %v1939_v41, %v3252_v33  ;;  %v2070_v8 = vadd.f32 %v2069_v0, %v2007_v5  ;;  %v2017_v33 = vmul.f32 %v3268_v7, %v3268_v7 }
 0x281   : > { %v1941_v4 = vadd.f32 %v1940_v35, %v3551_v43  ;;  %v2071_v19 = vadd.f32 %v2070_v8, %v2008_v20 }
 0x283   : > { %v1942_v14 = vadd.f32 %v1941_v4, %v3260_v12  ;;  %v2072_v23 = vadd.f32 %v2071_v19, %v2009_v11  ;;  %v2019_v12 = vmul.f32 %v3552_v32, %v3552_v32 }
 0x285   : > { %v1943_v10 = vadd.f32 %v1942_v14, %v3264_v22  ;;  %v2073_v30 = vadd.f32 %v2072_v23, %v2010_v16 }
 0x287   : > { %v1944_v1 = vadd.f32 %v1943_v10, %v3268_v7  ;;  %v2074_v50 = vadd.f32 %v2073_v30, %v2011_v17 }
 0x289   : > { %v1945_v26 = vadd.f32 %v1944_v1, %v3272_v39  ;;  %v2075_v40 = vadd.f32 %v2074_v50, %v2012_v34 }
 0x28b   : > { %v1946_v13 = vadd.f32 %v1945_v26, %v3552_v32  ;;  %v2076_v3 = vadd.f32 %v2075_v40, %v2013_v24 }
 0x28d   : > { %v1947_v42 = vrot.slane %v1946_v13, 4  ;;  %v2077_v36 = vadd.f32 %v2076_v3, %v2014_v55 }
 0x28f   : > { %v1948_v37 = vadd.f32 %v1947_v42, %v1946_v13  ;;  %v2078_v15 = vadd.f32 %v2077_v36, %v2015_v44 }
 0x291   : > { %v1949_v31 = vrot.slane %v1948_v37, 2  ;;  %v2079_v21 = vadd.f32 %v2078_v15, %v2016_v60 }
 0x293   : > { %v1950_v29 = vadd.f32 %v1949_v31, %v1948_v37  ;;  %v2080_v45 = vadd.f32 %v2079_v21, %v2017_v33 }
 0x295   : > { %v1951_v52 = vrot.slane %v1950_v29, 1  ;;  %v2081_v2 = vadd.f32 %v2080_v45, %v2018_v59 }
 0x297   : > { %v1952_v48 = vadd.f32 %v1951_v52, %v1950_v29  ;;  %v2082_v22 = vadd.f32 %v2081_v2, %v2019_v12 }
 0x299   : > { %v1953_v47 = vadd.f32 %v1952_v48, %v1883_v38  ;;  %v2083_v49 = vrot.slane %v2082_v22, 4 }
 0x29b   : > { %1954 = vst [vmem:[#allocation2] sm:$0x1] %v1953_v47  ;;  %v2084_v58 = vadd.f32 %v2083_v49, %v2082_v22 }
 0x29d   : > { %v2085_v54 = vrot.slane %v2084_v58, 2 }
 0x29f   : > { %v2086_v9 = vadd.f32 %v2085_v54, %v2084_v58 }
 0x2a1   : > { %v2087_v7 = vrot.slane %v2086_v9, 1 }
 0x2a3   : > { %v2088_v51 = vadd.f32 %v2087_v7, %v2086_v9  ;;  %2094 = sbr.rel (%p2397_p5) target bundleno = 688 (0x2b0), region = 36 }
 0x2a5   : > { %v2089_v6 = vadd.f32 %v2088_v51, %v1955_v61 }
 0x2a7   : > { %2090 = vst [vmem:[#allocation3] sm:$0x1] %v2089_v6 }
 0x2a8   : > { %v2095_v39 = vld [vmem:[#allocation2] sm:$0x1] }
 0x2a9   : > { %2096 = vst [vmem:[#allocation4] sm:$0x1] %v2095_v39 }
 0x2ae   : > { %v2097_v18 = vld [vmem:[#allocation3] sm:$0x1] }
 0x2af   : > { %2098 = vst [vmem:[#allocation6] sm:$0x1] %v2097_v18 }
 0x2b0 PF: > { %p2413_p6 = scmp.eq.s32.totalorder %s2745_s16, 3  ;;  %s2712_s25 = smov [#allocation4]  }
 0x2b1   : > { %s2115_s19 = sshll.u32 %s2712_s25, 4  ;;  %s2713_s5 = smov [#allocation6]   ;;  %s2116_s19 = int_to_ptr.vmem [resolvable:$true] %s2115_s19 }
 0x2b2   : > { %s2126_s6 = sshll.u32 %s2713_s5, 4  ;;  %s2646_s7 = scalar_lea.vmem %s2116_s19, 16  ;;  %s2127_s6 = int_to_ptr.vmem [resolvable:$true] %s2126_s6 }
 0x2b3   : > { %p2647_p7 = scmp.ne.s32.totalorder %s2116_s19, %s2646_s7  ;;  %s2652_s8 = scalar_lea.vmem %s2116_s19, 32 }
 0x2b4   : > { %p2653_p10 = scmp.lt.s32.totalorder %s2116_s19, %s2116_s19  ;;  %p2654_p11 = scmp.lt.s32.totalorder %s2652_s8, %s2646_s7 }
 0x2b5   : > { %p2648_p8 = pnand %p2647_p7, %p2413_p6 }
 0x2b6   : > { %p2655_p12 = por %p2654_p11, %p2653_p10 }
 0x2b7   : > { %p2649_p9 = pneg %p2648_p8 }
 0x2b9   : > { %p2656_p13 = pnand %p2655_p12, %p2649_p9 }
 0x2bb   : > { %2659 = shalt.err (!%p2656_p13)
}
 0x2bc   : > { %2406 = dma.vmem_to_hbm [thread:$0]  (%p2413_p6), %s2116_s19, 16, %s3503_s3, [#allocation5]  }
 0x2bd   : > { %s2670_s11 = scalar_lea.vmem %s2127_s6, 16  ;;  %s2676_s12 = scalar_lea.vmem %s2127_s6, 32 }
 0x2be   : > { %p2671_p0 = scmp.ne.s32.totalorder %s2127_s6, %s2670_s11  ;;  %p2677_p3 = scmp.lt.s32.totalorder %s2127_s6, %s2127_s6 }
 0x2bf   : > { %p2678_p4 = scmp.lt.s32.totalorder %s2676_s12, %s2670_s11 }
 0x2c0   : > { %p2672_p1 = pnand %p2671_p0, %p2413_p6 }
 0x2c1   : > { %p2679_p5 = por %p2678_p4, %p2677_p3 }
 0x2c2   : > { %p2673_p2 = pneg %p2672_p1 }
 0x2c4   : > { %p2680_p7 = pnand %p2679_p5, %p2673_p2 }
 0x2c6   : > { %2683 = shalt.err (!%p2680_p7)
}
 0x2c7   : > { %2408 = dma.vmem_to_hbm [thread:$0]  (%p2413_p6), %s2127_s6, 16, %s3504_s4, [#allocation7]  }
 0x2c8   : > { %2699 = dma.done.wait (%p2413_p6), [#allocation5], 16  }
 0x2c9   : > { %2701 = vsyncadd (%p2413_p6), [#allocation5], 4294967280 }
 0x2ca   : > { %2703 = dma.done.wait (%p2413_p6), [#allocation7], 16  }
 0x2cb   : > { %2705 = vsyncadd (%p2413_p6), [#allocation7], 4294967280 }
 0x2cc PF: > { %s17_s15 = sadd.s32 1, %s2708_s15  }
 0x2cd   : > { %p14_p8 = scmp.ge.s32.totalorder %s17_s15, 6  }
 0x2cf   :  { %16 = sbr.rel (!%p14_p8) target bundleno = 2 (0x2), region = 83 }
 0x2d4   :  { %2151 = vsyncpa [#allocation5], 1 }
 0x2d5   :  { %2153 = vsyncpa [#allocation5 + $0x1], 1 }
 0x2d6   :  { %2154 = vsyncpa [#allocation7], 1 }

// kernel: local_enhancer_forward.59
= control target key start
LH: loop header
LB: loop body
LE: loop exit
PB: predicated region body
PF: predicated region fallthrough
CT: control target
= control target key end

     0   :  { %s741_s12 = smov 0   ;;  %s1035_s0 = inlined_call_operand.vmem [shape: f32[2048,128], index: 0, kind: input, shape index: {}]   ;;  %s1036_s1 = inlined_call_operand.vmem [shape: f32[1,128], index: 1, kind: input, shape index: {}]   ;;  %s1037_s2 = inlined_call_operand.vmem [shape: f32[1,128], index: 2, kind: input, shape index: {}]   ;;  %s1038_s3 = inlined_call_operand.vmem [shape: f32[2048,128], index: 3, kind: output, shape index: {}]  }
   0x1 LB: > { %s564_s13 = sadd.s32 4294967295, %s719_s12   ;;  %p568_p0 = scmp.ge.s32.totalorder %s719_s12, 1  ;;  %s719_s12 = sphi %s741_s12, %s13_s12  }
   0x2   : > { %p138_p1 = scmp.lt.s32.totalorder %s719_s12, 5 }
   0x4   : > { %p139_p2 = pnand %p568_p0, %p138_p1 }
   0x5   : > { %s569_s14 = sshll.u32 (!%p139_p2), %s564_s13, 6 }
   0x6   : > { %142 = sbr.rel (%p139_p2) target bundleno = 97 (0x61), region = 32  ;;  %p163_p3 = scmp.lt.s32.totalorder (!%p139_p2), %s569_s14, 255 }
   0xb   : > { %s1040_s14 = smov (!%p163_p3, %s569_s14), 255  ;;  %v755_v0 = vld [vmem:[%s1036_s1] ss:$0 sm:$0xff] }
   0xc   : > { %s570_s15 = sshll.u32 %s1040_s14, 3  ;;  %v767_v1 = vld [vmem:[%s1037_s2] ss:$0 sm:$0xff] }
   0xd   : > { %s762_s20 = scalar_lea.vmem %s1035_s0, %s570_s15  ;;  %s830_s25 = scalar_lea.vmem %s1038_s3, %s570_s15 }
   0xe   : > { %v174_v2 = vld [vmem:[%s762_s20] sm:$0xff]  ;;  %v175_v3 = vld [vmem:[%s762_s20 + $0x8] sm:$0xff]  ;;  %v176_v4 = vld [vmem:[%s762_s20 + $0x10] sm:$0xff] }
   0xf   : > { %v245_v5 = vmul.f32 %v755_v0, %v174_v2  ;;  %v246_v6 = vmul.f32 %v755_v0, %v175_v3  ;;  %v247_v7 = vmul.f32 %v755_v0, %v176_v4  ;;  %v177_v8 = vld [vmem:[%s762_s20 + $0x18] sm:$0xff]  ;;  %v178_v9 = vld [vmem:[%s762_s20 + $0x20] sm:$0xff]  ;;  %v179_v10 = vld [vmem:[%s762_s20 + $0x28] sm:$0xff] }
  0x10   : > { %v248_v11 = vmul.f32 %v755_v0, %v177_v8  ;;  %v249_v12 = vmul.f32 %v755_v0, %v178_v9  ;;  %v250_v13 = vmul.f32 %v755_v0, %v179_v10  ;;  %v180_v14 = vld [vmem:[%s762_s20 + $0x30] sm:$0xff]  ;;  %v181_v15 = vld [vmem:[%s762_s20 + $0x38] sm:$0xff]  ;;  %v182_v16 = vld [vmem:[%s762_s20 + $0x40] sm:$0xff] }
  0x11   : > { %v316_v17 = vadd.f32 %v767_v1, %v245_v5  ;;  %v317_v18 = vadd.f32 %v767_v1, %v246_v6  ;;  %v318_v19 = vadd.f32 %v767_v1, %v247_v7  ;;  %v251_v20 = vmul.f32 %v755_v0, %v180_v14  ;;  %v183_v21 = vld [vmem:[%s762_s20 + $0x48] sm:$0xff]  ;;  %v184_v24 = vld [vmem:[%s762_s20 + $0x50] sm:$0xff]  ;;  %v185_v27 = vld [vmem:[%s762_s20 + $0x58] sm:$0xff] }
  0x12   : > { %v319_v22 = vadd.f32 %v767_v1, %v248_v11  ;;  %v252_v23 = vmul.f32 %v755_v0, %v181_v15  ;;  %v320_v25 = vadd.f32 %v767_v1, %v249_v12  ;;  %v253_v26 = vmul.f32 %v755_v0, %v182_v16  ;;  %v186_v30 = vld [vmem:[%s762_s20 + $0x60] sm:$0xff]  ;;  %v187_v33 = vld [vmem:[%s762_s20 + $0x68] sm:$0xff]  ;;  %v188_v36 = vld [vmem:[%s762_s20 + $0x70] sm:$0xff] }
  0x13   : > { %585 = vtanh.f32 %v316_v17  ;;  %v321_v28 = vadd.f32 %v767_v1, %v250_v13  ;;  %v254_v29 = vmul.f32 %v755_v0, %v183_v21  ;;  %v322_v31 = vadd.f32 %v767_v1, %v251_v20  ;;  %v189_v39 = vld [vmem:[%s762_s20 + $0x78] sm:$0xff]  ;;  %v190_v42 = vld [vmem:[%s762_s20 + $0x80] sm:$0xff]  ;;  %v191_v45 = vld [vmem:[%s762_s20 + $0x88] sm:$0xff] }
  0x14   : > { %587 = vtanh.f32 %v317_v18  ;;  %v255_v32 = vmul.f32 %v755_v0, %v184_v24  ;;  %v323_v34 = vadd.f32 %v767_v1, %v252_v23  ;;  %v256_v35 = vmul.f32 %v755_v0, %v185_v27  ;;  %v192_v48 = vld [vmem:[%s762_s20 + $0x90] sm:$0xff]  ;;  %v193_v51 = vld [vmem:[%s762_s20 + $0x98] sm:$0xff]  ;;  %v194_v54 = vld [vmem:[%s762_s20 + $0xa0] sm:$0xff] }
  0x15   : > { %589 = vtanh.f32 %v318_v19  ;;  %v324_v37 = vadd.f32 %v767_v1, %v253_v26  ;;  %v257_v38 = vmul.f32 %v755_v0, %v186_v30  ;;  %v325_v40 = vadd.f32 %v767_v1, %v254_v29  ;;  %v195_v57 = vld [vmem:[%s762_s20 + $0xa8] sm:$0xff]  ;;  %v196_v60 = vld [vmem:[%s762_s20 + $0xb0] sm:$0xff]  ;;  %v197_v63 = vld [vmem:[%s762_s20 + $0xb8] sm:$0xff] }
  0x16   : > { %591 = vtanh.f32 %v319_v22  ;;  %v258_v41 = vmul.f32 %v755_v0, %v187_v33  ;;  %v326_v43 = vadd.f32 %v767_v1, %v255_v32  ;;  %v259_v44 = vmul.f32 %v755_v0, %v188_v36  ;;  %v198_v5 = vld [vmem:[%s762_s20 + $0xc0] sm:$0xff]  ;;  %v199_v9 = vld [vmem:[%s762_s20 + $0xc8] sm:$0xff]  ;;  %v200_v13 = vld [vmem:[%s762_s20 + $0xd0] sm:$0xff] }
  0x17   : > { %593 = vtanh.f32 %v320_v25  ;;  %v327_v46 = vadd.f32 %v767_v1, %v256_v35  ;;  %v260_v47 = vmul.f32 %v755_v0, %v189_v39  ;;  %v328_v49 = vadd.f32 %v767_v1, %v257_v38  ;;  %v201_v17 = vld [vmem:[%s762_s20 + $0xd8] sm:$0xff]  ;;  %v202_v21 = vld [vmem:[%s762_s20 + $0xe0] sm:$0xff]  ;;  %v203_v25 = vld [vmem:[%s762_s20 + $0xe8] sm:$0xff] }
  0x18   : > { %595 = vtanh.f32 %v321_v28  ;;  %v261_v50 = vmul.f32 %v755_v0, %v190_v42  ;;  %v329_v52 = vadd.f32 %v767_v1, %v258_v41  ;;  %v262_v53 = vmul.f32 %v755_v0, %v191_v45  ;;  %v204_v29 = vld [vmem:[%s762_s20 + $0xf0] sm:$0xff]  ;;  %v205_v33 = vld [vmem:[%s762_s20 + $0xf8] sm:$0xff]  ;;  %v207_v41 = vld [vmem:[%s762_s20 + $0x108] sm:$0xff] }
  0x19   : > { %597 = vtanh.f32 %v322_v31  ;;  %v330_v55 = vadd.f32 %v767_v1, %v259_v44  ;;  %v263_v56 = vmul.f32 %v755_v0, %v192_v48  ;;  %v331_v58 = vadd.f32 %v767_v1, %v260_v47  ;;  %v208_v45 = vld [vmem:[%s762_s20 + $0x110] sm:$0xff] }
  0x1a   : > { %599 = vtanh.f32 %v323_v34  ;;  %v264_v59 = vmul.f32 %v755_v0, %v193_v51  ;;  %v332_v61 = vadd.f32 %v767_v1, %v261_v50  ;;  %v265_v62 = vmul.f32 %v755_v0, %v194_v54 }
  0x1b   : > { %601 = vtanh.f32 %v324_v37  ;;  %v333_v3 = vadd.f32 %v767_v1, %v262_v53  ;;  %v266_v4 = vmul.f32 %v755_v0, %v195_v57  ;;  %v334_v7 = vadd.f32 %v767_v1, %v263_v56  ;;  %v206_v37 = vld [vmem:[%s762_s20 + $0x100] sm:$0xff]  ;;  %v211_v57 = vld [vmem:[%s762_s20 + $0x128] sm:$0xff] }
  0x1c   : > { %603 = vtanh.f32 %v325_v40  ;;  %v267_v8 = vmul.f32 %v755_v0, %v196_v60  ;;  %v335_v11 = vadd.f32 %v767_v1, %v264_v59  ;;  %v268_v12 = vmul.f32 %v755_v0, %v197_v63  ;;  %v210_v53 = vld [vmem:[%s762_s20 + $0x120] sm:$0xff] }
  0x1d   : > { %605 = vtanh.f32 %v326_v43  ;;  %v336_v15 = vadd.f32 %v767_v1, %v265_v62  ;;  %v269_v16 = vmul.f32 %v755_v0, %v198_v5  ;;  %v337_v19 = vadd.f32 %v767_v1, %v266_v4 }
  0x1e   : > { %607 = vtanh.f32 %v327_v46  ;;  %v270_v20 = vmul.f32 %v755_v0, %v199_v9  ;;  %v338_v23 = vadd.f32 %v767_v1, %v267_v8  ;;  %v271_v24 = vmul.f32 %v755_v0, %v200_v13 }
  0x1f   : > { %609 = vtanh.f32 %v328_v49  ;;  %v339_v27 = vadd.f32 %v767_v1, %v268_v12  ;;  %v272_v28 = vmul.f32 %v755_v0, %v201_v17  ;;  %v340_v31 = vadd.f32 %v767_v1, %v269_v16  ;;  %v209_v49 = vld [vmem:[%s762_s20 + $0x118] sm:$0xff] }
  0x20   : > { %v586_v2 = vpop.eup %585  ;;  %611 = vtanh.f32 %v329_v52  ;;  %v273_v32 = vmul.f32 %v755_v0, %v202_v21  ;;  %v341_v35 = vadd.f32 %v767_v1, %v270_v20  ;;  %v274_v36 = vmul.f32 %v755_v0, %v203_v25 }
  0x21   : > { %v588_v6 = vpop.eup %587  ;;  %444 = vst [vmem:[%s830_s25] sm:$0xff] %v586_v2  ;;  %613 = vtanh.f32 %v330_v55  ;;  %v342_v39 = vadd.f32 %v767_v1, %v271_v24  ;;  %v275_v40 = vmul.f32 %v755_v0, %v204_v29  ;;  %v343_v43 = vadd.f32 %v767_v1, %v272_v28 }
  0x22   : > { %v590_v10 = vpop.eup %589  ;;  %445 = vst [vmem:[%s830_s25 + $0x8] sm:$0xff] %v588_v6  ;;  %615 = vtanh.f32 %v331_v58  ;;  %v276_v44 = vmul.f32 %v755_v0, %v205_v33  ;;  %v344_v47 = vadd.f32 %v767_v1, %v273_v32  ;;  %v277_v48 = vmul.f32 %v755_v0, %v206_v37 }
  0x23   : > { %v592_v14 = vpop.eup %591  ;;  %446 = vst [vmem:[%s830_s25 + $0x10] sm:$0xff] %v590_v10  ;;  %617 = vtanh.f32 %v332_v61  ;;  %v345_v51 = vadd.f32 %v767_v1, %v274_v36  ;;  %v278_v52 = vmul.f32 %v755_v0, %v207_v41  ;;  %v346_v55 = vadd.f32 %v767_v1, %v275_v40  ;;  %v212_v61 = vld [vmem:[%s762_s20 + $0x130] sm:$0xff] }
  0x24   : > { %v594_v18 = vpop.eup %593  ;;  %447 = vst [vmem:[%s830_s25 + $0x18] sm:$0xff] %v592_v14  ;;  %619 = vtanh.f32 %v333_v3  ;;  %v279_v56 = vmul.f32 %v755_v0, %v208_v45  ;;  %v347_v59 = vadd.f32 %v767_v1, %v276_v44  ;;  %v280_v60 = vmul.f32 %v755_v0, %v209_v49  ;;  %v213_v3 = vld [vmem:[%s762_s20 + $0x138] sm:$0xff] }
  0x25   : > { %v596_v22 = vpop.eup %595  ;;  %448 = vst [vmem:[%s830_s25 + $0x20] sm:$0xff] %v594_v18  ;;  %621 = vtanh.f32 %v334_v7  ;;  %v348_v63 = vadd.f32 %v767_v1, %v277_v48  ;;  %v281_v2 = vmul.f32 %v755_v0, %v210_v53  ;;  %v349_v5 = vadd.f32 %v767_v1, %v278_v52  ;;  %v214_v7 = vld [vmem:[%s762_s20 + $0x140] sm:$0xff] }
  0x26   : > { %v598_v26 = vpop.eup %597  ;;  %449 = vst [vmem:[%s830_s25 + $0x28] sm:$0xff] %v596_v22  ;;  %623 = vtanh.f32 %v335_v11  ;;  %v282_v6 = vmul.f32 %v755_v0, %v211_v57  ;;  %v350_v9 = vadd.f32 %v767_v1, %v279_v56  ;;  %v283_v10 = vmul.f32 %v755_v0, %v212_v61  ;;  %v215_v11 = vld [vmem:[%s762_s20 + $0x148] sm:$0xff] }
  0x27   : > { %v600_v30 = vpop.eup %599  ;;  %450 = vst [vmem:[%s830_s25 + $0x30] sm:$0xff] %v598_v26  ;;  %625 = vtanh.f32 %v336_v15  ;;  %v351_v13 = vadd.f32 %v767_v1, %v280_v60  ;;  %v284_v14 = vmul.f32 %v755_v0, %v213_v3  ;;  %v216_v15 = vld [vmem:[%s762_s20 + $0x150] sm:$0xff]  ;;  %v352_v17 = vadd.f32 %v767_v1, %v281_v2 }
  0x28   : > { %v602_v34 = vpop.eup %601  ;;  %451 = vst [vmem:[%s830_s25 + $0x38] sm:$0xff] %v600_v30  ;;  %627 = vtanh.f32 %v337_v19  ;;  %v285_v18 = vmul.f32 %v755_v0, %v214_v7  ;;  %v217_v19 = vld [vmem:[%s762_s20 + $0x158] sm:$0xff]  ;;  %v353_v21 = vadd.f32 %v767_v1, %v282_v6  ;;  %v286_v22 = vmul.f32 %v755_v0, %v215_v11 }
  0x29   : > { %v604_v38 = vpop.eup %603  ;;  %452 = vst [vmem:[%s830_s25 + $0x40] sm:$0xff] %v602_v34  ;;  %629 = vtanh.f32 %v338_v23  ;;  %v218_v23 = vld [vmem:[%s762_s20 + $0x160] sm:$0xff]  ;;  %v354_v25 = vadd.f32 %v767_v1, %v283_v10  ;;  %v287_v26 = vmul.f32 %v755_v0, %v216_v15  ;;  %v355_v29 = vadd.f32 %v767_v1, %v284_v14 }
  0x2a   : > { %v606_v42 = vpop.eup %605  ;;  %453 = vst [vmem:[%s830_s25 + $0x48] sm:$0xff] %v604_v38  ;;  %631 = vtanh.f32 %v339_v27  ;;  %v219_v27 = vld [vmem:[%s762_s20 + $0x168] sm:$0xff]  ;;  %v288_v30 = vmul.f32 %v755_v0, %v217_v19  ;;  %v356_v33 = vadd.f32 %v767_v1, %v285_v18  ;;  %v289_v34 = vmul.f32 %v755_v0, %v218_v23 }
  0x2b   : > { %v608_v46 = vpop.eup %607  ;;  %454 = vst [vmem:[%s830_s25 + $0x50] sm:$0xff] %v606_v42  ;;  %633 = vtanh.f32 %v340_v31  ;;  %v220_v31 = vld [vmem:[%s762_s20 + $0x170] sm:$0xff]  ;;  %v357_v37 = vadd.f32 %v767_v1, %v286_v22  ;;  %v290_v38 = vmul.f32 %v755_v0, %v219_v27  ;;  %v358_v41 = vadd.f32 %v767_v1, %v287_v26 }
  0x2c   : > { %v610_v50 = vpop.eup %609  ;;  %455 = vst [vmem:[%s830_s25 + $0x58] sm:$0xff] %v608_v46  ;;  %635 = vtanh.f32 %v341_v35  ;;  %v221_v35 = vld [vmem:[%s762_s20 + $0x178] sm:$0xff]  ;;  %v291_v42 = vmul.f32 %v755_v0, %v220_v31  ;;  %v359_v45 = vadd.f32 %v767_v1, %v288_v30  ;;  %v360_v49 = vadd.f32 %v767_v1, %v289_v34 }
  0x2d   : > { %v612_v54 = vpop.eup %611  ;;  %456 = vst [vmem:[%s830_s25 + $0x60] sm:$0xff] %v610_v50  ;;  %637 = vtanh.f32 %v342_v39  ;;  %v222_v39 = vld [vmem:[%s762_s20 + $0x180] sm:$0xff]  ;;  %v292_v46 = vmul.f32 %v755_v0, %v221_v35  ;;  %v361_v53 = vadd.f32 %v767_v1, %v290_v38 }
  0x2e   : > { %v614_v58 = vpop.eup %613  ;;  %457 = vst [vmem:[%s830_s25 + $0x68] sm:$0xff] %v612_v54  ;;  %639 = vtanh.f32 %v343_v43  ;;  %v223_v43 = vld [vmem:[%s762_s20 + $0x188] sm:$0xff]  ;;  %v293_v50 = vmul.f32 %v755_v0, %v222_v39  ;;  %v362_v57 = vadd.f32 %v767_v1, %v291_v42 }
  0x2f   : > { %v616_v62 = vpop.eup %615  ;;  %458 = vst [vmem:[%s830_s25 + $0x70] sm:$0xff] %v614_v58  ;;  %641 = vtanh.f32 %v344_v47  ;;  %v224_v47 = vld [vmem:[%s762_s20 + $0x190] sm:$0xff]  ;;  %v294_v54 = vmul.f32 %v755_v0, %v223_v43  ;;  %v363_v61 = vadd.f32 %v767_v1, %v292_v46 }
  0x30   : > { %v618_v4 = vpop.eup %617  ;;  %459 = vst [vmem:[%s830_s25 + $0x78] sm:$0xff] %v616_v62  ;;  %643 = vtanh.f32 %v345_v51  ;;  %v225_v51 = vld [vmem:[%s762_s20 + $0x198] sm:$0xff]  ;;  %v295_v58 = vmul.f32 %v755_v0, %v224_v47  ;;  %v364_v3 = vadd.f32 %v767_v1, %v293_v50 }
  0x31   : > { %v620_v8 = vpop.eup %619  ;;  %460 = vst [vmem:[%s830_s25 + $0x80] sm:$0xff] %v618_v4  ;;  %645 = vtanh.f32 %v346_v55  ;;  %v226_v55 = vld [vmem:[%s762_s20 + $0x1a0] sm:$0xff]  ;;  %v296_v62 = vmul.f32 %v755_v0, %v225_v51  ;;  %v365_v7 = vadd.f32 %v767_v1, %v294_v54 }
  0x32   : > { %v622_v12 = vpop.eup %621  ;;  %461 = vst [vmem:[%s830_s25 + $0x88] sm:$0xff] %v620_v8  ;;  %647 = vtanh.f32 %v347_v59  ;;  %v227_v59 = vld [vmem:[%s762_s20 + $0x1a8] sm:$0xff]  ;;  %v297_v4 = vmul.f32 %v755_v0, %v226_v55  ;;  %v366_v11 = vadd.f32 %v767_v1, %v295_v58 }
  0x33   : > { %v624_v16 = vpop.eup %623  ;;  %462 = vst [vmem:[%s830_s25 + $0x90] sm:$0xff] %v622_v12  ;;  %649 = vtanh.f32 %v348_v63  ;;  %v228_v63 = vld [vmem:[%s762_s20 + $0x1b0] sm:$0xff]  ;;  %v298_v8 = vmul.f32 %v755_v0, %v227_v59  ;;  %v367_v15 = vadd.f32 %v767_v1, %v296_v62 }
  0x34   : > { %v626_v20 = vpop.eup %625  ;;  %463 = vst [vmem:[%s830_s25 + $0x98] sm:$0xff] %v624_v16  ;;  %651 = vtanh.f32 %v349_v5  ;;  %v229_v5 = vld [vmem:[%s762_s20 + $0x1b8] sm:$0xff]  ;;  %v299_v12 = vmul.f32 %v755_v0, %v228_v63  ;;  %v368_v19 = vadd.f32 %v767_v1, %v297_v4 }
  0x35   : > { %v628_v24 = vpop.eup %627  ;;  %464 = vst [vmem:[%s830_s25 + $0xa0] sm:$0xff] %v626_v20  ;;  %653 = vtanh.f32 %v350_v9  ;;  %v230_v9 = vld [vmem:[%s762_s20 + $0x1c0] sm:$0xff]  ;;  %v300_v16 = vmul.f32 %v755_v0, %v229_v5  ;;  %v369_v23 = vadd.f32 %v767_v1, %v298_v8 }
  0x36   : > { %v630_v28 = vpop.eup %629  ;;  %465 = vst [vmem:[%s830_s25 + $0xa8] sm:$0xff] %v628_v24  ;;  %655 = vtanh.f32 %v351_v13  ;;  %v231_v13 = vld [vmem:[%s762_s20 + $0x1c8] sm:$0xff]  ;;  %v301_v20 = vmul.f32 %v755_v0, %v230_v9  ;;  %v370_v27 = vadd.f32 %v767_v1, %v299_v12 }
  0x37   : > { %v632_v32 = vpop.eup %631  ;;  %466 = vst [vmem:[%s830_s25 + $0xb0] sm:$0xff] %v630_v28  ;;  %657 = vtanh.f32 %v352_v17  ;;  %v232_v17 = vld [vmem:[%s762_s20 + $0x1d0] sm:$0xff]  ;;  %v302_v24 = vmul.f32 %v755_v0, %v231_v13  ;;  %v371_v31 = vadd.f32 %v767_v1, %v300_v16 }
  0x38   : > { %v634_v36 = vpop.eup %633  ;;  %467 = vst [vmem:[%s830_s25 + $0xb8] sm:$0xff] %v632_v32  ;;  %659 = vtanh.f32 %v353_v21  ;;  %v233_v21 = vld [vmem:[%s762_s20 + $0x1d8] sm:$0xff]  ;;  %v303_v28 = vmul.f32 %v755_v0, %v232_v17  ;;  %v372_v35 = vadd.f32 %v767_v1, %v301_v20 }
  0x39   : > { %v636_v40 = vpop.eup %635  ;;  %468 = vst [vmem:[%s830_s25 + $0xc0] sm:$0xff] %v634_v36  ;;  %661 = vtanh.f32 %v354_v25  ;;  %v234_v25 = vld [vmem:[%s762_s20 + $0x1e0] sm:$0xff]  ;;  %v304_v32 = vmul.f32 %v755_v0, %v233_v21  ;;  %v373_v39 = vadd.f32 %v767_v1, %v302_v24 }
  0x3a   : > { %v638_v44 = vpop.eup %637  ;;  %469 = vst [vmem:[%s830_s25 + $0xc8] sm:$0xff] %v636_v40  ;;  %663 = vtanh.f32 %v355_v29  ;;  %v235_v29 = vld [vmem:[%s762_s20 + $0x1e8] sm:$0xff]  ;;  %v305_v36 = vmul.f32 %v755_v0, %v234_v25  ;;  %v374_v42 = vadd.f32 %v767_v1, %v303_v28 }
  0x3b   : > { %v640_v48 = vpop.eup %639  ;;  %470 = vst [vmem:[%s830_s25 + $0xd0] sm:$0xff] %v638_v44  ;;  %665 = vtanh.f32 %v356_v33  ;;  %v236_v33 = vld [vmem:[%s762_s20 + $0x1f0] sm:$0xff]  ;;  %v306_v40 = vmul.f32 %v755_v0, %v235_v29 }
  0x3c   : > { %v642_v52 = vpop.eup %641  ;;  %471 = vst [vmem:[%s830_s25 + $0xd8] sm:$0xff] %v640_v48  ;;  %667 = vtanh.f32 %v357_v37  ;;  %v237_v37 = vld [vmem:[%s762_s20 + $0x1f8] sm:$0xff]  ;;  %v307_v43 = vmul.f32 %v755_v0, %v236_v33  ;;  %v376_v48 = vadd.f32 %v767_v1, %v305_v36 }
  0x3d   : > { %v644_v56 = vpop.eup %643  ;;  %472 = vst [vmem:[%s830_s25 + $0xe0] sm:$0xff] %v642_v52  ;;  %669 = vtanh.f32 %v358_v41  ;;  %v308_v46 = vmul.f32 %v755_v0, %v237_v37  ;;  %v377_v50 = vadd.f32 %v767_v1, %v306_v40 }
  0x3e   : > { %v646_v60 = vpop.eup %645  ;;  %473 = vst [vmem:[%s830_s25 + $0xe8] sm:$0xff] %v644_v56  ;;  %671 = vtanh.f32 %v359_v45  ;;  %v375_v45 = vadd.f32 %v767_v1, %v304_v32  ;;  %v378_v52 = vadd.f32 %v767_v1, %v307_v43 }
  0x3f   : > { %v648_v2 = vpop.eup %647  ;;  %474 = vst [vmem:[%s830_s25 + $0xf0] sm:$0xff] %v646_v60  ;;  %673 = vtanh.f32 %v360_v49 }
  0x40   : > { %v650_v6 = vpop.eup %649  ;;  %475 = vst [vmem:[%s830_s25 + $0xf8] sm:$0xff] %v648_v2  ;;  %675 = vtanh.f32 %v361_v53  ;;  %v379_v53 = vadd.f32 %v767_v1, %v308_v46 }
  0x41   : > { %v652_v10 = vpop.eup %651  ;;  %476 = vst [vmem:[%s830_s25 + $0x100] sm:$0xff] %v650_v6  ;;  %677 = vtanh.f32 %v362_v57 }
  0x42   : > { %v654_v14 = vpop.eup %653  ;;  %477 = vst [vmem:[%s830_s25 + $0x108] sm:$0xff] %v652_v10  ;;  %679 = vtanh.f32 %v363_v61 }
  0x43   : > { %v656_v18 = vpop.eup %655  ;;  %478 = vst [vmem:[%s830_s25 + $0x110] sm:$0xff] %v654_v14  ;;  %681 = vtanh.f32 %v364_v3 }
  0x44   : > { %v658_v22 = vpop.eup %657  ;;  %479 = vst [vmem:[%s830_s25 + $0x118] sm:$0xff] %v656_v18  ;;  %683 = vtanh.f32 %v365_v7 }
  0x45   : > { %v660_v26 = vpop.eup %659  ;;  %480 = vst [vmem:[%s830_s25 + $0x120] sm:$0xff] %v658_v22  ;;  %685 = vtanh.f32 %v366_v11 }
  0x46   : > { %v662_v30 = vpop.eup %661  ;;  %481 = vst [vmem:[%s830_s25 + $0x128] sm:$0xff] %v660_v26  ;;  %687 = vtanh.f32 %v367_v15 }
  0x47   : > { %v664_v34 = vpop.eup %663  ;;  %482 = vst [vmem:[%s830_s25 + $0x130] sm:$0xff] %v662_v30  ;;  %689 = vtanh.f32 %v368_v19 }
  0x48   : > { %v666_v38 = vpop.eup %665  ;;  %483 = vst [vmem:[%s830_s25 + $0x138] sm:$0xff] %v664_v34  ;;  %691 = vtanh.f32 %v369_v23 }
  0x49   : > { %v668_v41 = vpop.eup %667  ;;  %484 = vst [vmem:[%s830_s25 + $0x140] sm:$0xff] %v666_v38  ;;  %693 = vtanh.f32 %v370_v27 }
  0x4a   : > { %v670_v44 = vpop.eup %669  ;;  %485 = vst [vmem:[%s830_s25 + $0x148] sm:$0xff] %v668_v41  ;;  %695 = vtanh.f32 %v371_v31 }
  0x4b   : > { %v672_v47 = vpop.eup %671  ;;  %486 = vst [vmem:[%s830_s25 + $0x150] sm:$0xff] %v670_v44  ;;  %697 = vtanh.f32 %v372_v35 }
  0x4c   : > { %v674_v49 = vpop.eup %673  ;;  %487 = vst [vmem:[%s830_s25 + $0x158] sm:$0xff] %v672_v47  ;;  %699 = vtanh.f32 %v373_v39 }
  0x4d   : > { %v676_v51 = vpop.eup %675  ;;  %488 = vst [vmem:[%s830_s25 + $0x160] sm:$0xff] %v674_v49  ;;  %701 = vtanh.f32 %v374_v42 }
  0x4e   : > { %v678_v0 = vpop.eup %677  ;;  %489 = vst [vmem:[%s830_s25 + $0x168] sm:$0xff] %v676_v51  ;;  %703 = vtanh.f32 %v375_v45 }
  0x4f   : > { %v680_v54 = vpop.eup %679  ;;  %490 = vst [vmem:[%s830_s25 + $0x170] sm:$0xff] %v678_v0  ;;  %705 = vtanh.f32 %v376_v48 }
  0x50   : > { %v682_v55 = vpop.eup %681  ;;  %491 = vst [vmem:[%s830_s25 + $0x178] sm:$0xff] %v680_v54  ;;  %707 = vtanh.f32 %v377_v50 }
  0x51   : > { %v684_v56 = vpop.eup %683  ;;  %492 = vst [vmem:[%s830_s25 + $0x180] sm:$0xff] %v682_v55  ;;  %709 = vtanh.f32 %v378_v52 }
  0x52   : > { %v686_v57 = vpop.eup %685  ;;  %493 = vst [vmem:[%s830_s25 + $0x188] sm:$0xff] %v684_v56  ;;  %711 = vtanh.f32 %v379_v53 }
  0x53   : > { %v688_v1 = vpop.eup %687  ;;  %494 = vst [vmem:[%s830_s25 + $0x190] sm:$0xff] %v686_v57 }
  0x54   : > { %v690_v58 = vpop.eup %689  ;;  %495 = vst [vmem:[%s830_s25 + $0x198] sm:$0xff] %v688_v1 }
  0x55   : > { %v692_v59 = vpop.eup %691  ;;  %496 = vst [vmem:[%s830_s25 + $0x1a0] sm:$0xff] %v690_v58 }
  0x56   : > { %v694_v60 = vpop.eup %693  ;;  %497 = vst [vmem:[%s830_s25 + $0x1a8] sm:$0xff] %v692_v59 }
  0x57   : > { %v696_v61 = vpop.eup %695  ;;  %498 = vst [vmem:[%s830_s25 + $0x1b0] sm:$0xff] %v694_v60 }
  0x58   : > { %v698_v62 = vpop.eup %697  ;;  %499 = vst [vmem:[%s830_s25 + $0x1b8] sm:$0xff] %v696_v61 }
  0x59   : > { %v700_v63 = vpop.eup %699  ;;  %500 = vst [vmem:[%s830_s25 + $0x1c0] sm:$0xff] %v698_v62 }
  0x5a   : > { %v702_v2 = vpop.eup %701  ;;  %501 = vst [vmem:[%s830_s25 + $0x1c8] sm:$0xff] %v700_v63 }
  0x5b   : > { %v704_v3 = vpop.eup %703  ;;  %502 = vst [vmem:[%s830_s25 + $0x1d0] sm:$0xff] %v702_v2 }
  0x5c   : > { %v706_v4 = vpop.eup %705  ;;  %503 = vst [vmem:[%s830_s25 + $0x1d8] sm:$0xff] %v704_v3 }
  0x5d   : > { %v708_v5 = vpop.eup %707  ;;  %504 = vst [vmem:[%s830_s25 + $0x1e0] sm:$0xff] %v706_v4 }
  0x5e   : > { %v710_v6 = vpop.eup %709  ;;  %505 = vst [vmem:[%s830_s25 + $0x1e8] sm:$0xff] %v708_v5 }
  0x5f   : > { %v712_v7 = vpop.eup %711  ;;  %506 = vst [vmem:[%s830_s25 + $0x1f0] sm:$0xff] %v710_v6 }
  0x60   : > { %507 = vst [vmem:[%s830_s25 + $0x1f8] sm:$0xff] %v712_v7 }
  0x61 PF: > { %s13_s12 = sadd.s32 1, %s719_s12  }
  0x62   : > { %p10_p4 = scmp.ge.s32.totalorder %s13_s12, 6  }
  0x64   :  { %12 = sbr.rel (!%p10_p4) target bundleno = 1 (0x1), region = 62 }

</bundles_post_ra>
